<compile_context>
chip_gen: v5e
topology: v5e:2x2
jax: 0.10.0
libtpu: 0.0.40
codegen_flags: <defaults>
</compile_context>

<pallas_src>
import math

import jax
import jax.numpy as jnp
from jax import lax
from jax.experimental import pallas as pl
from jax.experimental.pallas import tpu as pltpu

HIDDEN = 256        # hidden_dim hardcoded in GPTran.__init__
NHEAD = 4           # transformer config is external to GPTran; 4 heads -> dh=64
DH = HIDDEN // NHEAD
FFN = 512
NLAYERS = 2
NUM_QUERIES = 3     # CTRL-C uses 3 VP queries (indices 0..2), lines are 3:
EPS_LN = 1e-5


def _round_up(x, m):
    return ((x + m - 1) // m) * m


def _layernorm(x, w, b):
    mu = jnp.mean(x, axis=-1, keepdims=True)
    xc = x - mu
    var = jnp.mean(xc * xc, axis=-1, keepdims=True)
    return xc * lax.rsqrt(var + EPS_LN) * w + b


# ---------------------------------------------------------------------------
# Fused kernel factory: line_proj -> 2 encoder layers -> output heads
# ---------------------------------------------------------------------------
def _make_fused_kernel(bt, SP, emit_attn):
    D, dh = HIDDEN, DH
    M = bt * SP
    bf16 = jnp.bfloat16
    f32 = jnp.float32

    def mm(x_bf, w_bf):                     # bf16 operands, f32 accumulation
        return jnp.dot(x_bf, w_bf, preferred_element_type=f32)

    def kernel(st_ref, mask_ref, pos_ref, srcb_ref, projw_ref,
               wq_ref, bq_ref, wk_ref, bk_ref, wv_ref, bv_ref,
               wo_ref, bo_ref, ln1w_ref, ln1b_ref,
               w1_ref, b1_ref, w2_ref, b2_ref, ln2w_ref, ln2b_ref,
               wh_ref, bh_ref, *out_and_scratch):
        n_attn = NLAYERS if emit_attn else 0
        heads_ref = out_and_scratch[0]
        attn_refs = out_and_scratch[1:1 + n_attn]
        ctx_scr = out_and_scratch[1 + n_attn]          # [M, D] bf16 VMEM scratch

        # ---- hoisted once per grid step
        pos_flat = jnp.tile(pos_ref[...], (bt, 1))             # [M, D] f32
        srcb_flat = jnp.tile(srcb_ref[...], (bt, 1))           # [M, D] f32
        mask_b = jnp.broadcast_to(mask_ref[...], (bt, SP, SP))  # one broadcast/step

        # ---- input_line_proj on the structure-tensor sequence; query / pad rows
        #      have zero features and zero bias -> stay exactly 0 (DETR-style src).
        hs = mm(st_ref[...].reshape(M, 6).astype(bf16), projw_ref[...]) + srcb_flat

        # ---- encoder layers (post-norm, pos added to q/k only)
        for l in range(NLAYERS):
            qk_bf = (hs + pos_flat).astype(bf16)   # cast once, reused for Wq & Wk
            hs_bf = hs.astype(bf16)                # cast once, reused for Wv

            attn_acc = jnp.zeros((bt, SP, SP), f32) if emit_attn else None
            for h in range(NHEAD):
                # head-major weights: no activation lane-slicing, scale folded in
                qh = (mm(qk_bf, wq_ref[l, h]) + bq_ref[l, h]).astype(bf16)  # [M,dh]
                kh = (mm(qk_bf, wk_ref[l, h]) + bk_ref[l, h]).astype(bf16)
                vh = (mm(hs_bf, wv_ref[l, h]) + bv_ref[l, h]).astype(bf16)

                # scores[b, s, t] = qh[b, s] . kh[b, t]
                s = lax.dot_general(qh.reshape(bt, SP, dh), kh.reshape(bt, SP, dh),
                                    (((2,), (2,)), ((0,), (0,))),
                                    preferred_element_type=f32)     # [bt,SP,SP]
                s = s + mask_b
                s = s - jnp.max(s, axis=-1, keepdims=True)
                e = jnp.exp(s)
                pw = e * pl.reciprocal(jnp.sum(e, axis=-1, keepdims=True))
                if emit_attn:
                    attn_acc = attn_acc + pw
                ctx = lax.dot_general(pw.astype(bf16), vh.reshape(bt, SP, dh),
                                      (((2,), (1,)), ((0,), (0,))),
                                      preferred_element_type=f32)   # [bt,SP,dh]
                # stage head context at its lane offset -> one K=256 W_o matmul
                ctx_scr[:, h * dh:(h + 1) * dh] = ctx.reshape(M, dh).astype(bf16)

            ao = mm(ctx_scr[...], wo_ref[l]) + bo_ref[l]            # [M, D] f32
            x1 = _layernorm(hs + ao, ln1w_ref[l], ln1b_ref[l])
            ff = jnp.maximum(mm(x1.astype(bf16), w1_ref[l]) + b1_ref[l], 0.0)
            ff = mm(ff.astype(bf16), w2_ref[l]) + b2_ref[l]
            hs = _layernorm(x1 + ff, ln2w_ref[l], ln2b_ref[l])      # [M, D] f32

            if emit_attn:
                attn_refs[l][...] = (attn_acc * (1.0 / NHEAD)).astype(
                    attn_refs[l].dtype)

        # ---- heads: [vp1 | vp2 | vp3 | cls] in one [D,12] matmul, per-group
        #      L2 normalization via 3-lane slice sums (no block-diag matmul).
        y = mm(hs.astype(bf16), wh_ref[...]) + bh_ref[...]          # [M, 12] f32

        def l2n(g):
            ss = jnp.sum(g * g, axis=-1, keepdims=True)
            return g * lax.rsqrt(jnp.maximum(ss, 1e-24))            # F.normalize(p=2)

        out12 = jnp.concatenate([l2n(y[:, 0:3]), l2n(y[:, 3:6]),
                                 l2n(y[:, 6:9]), y[:, 9:12]], axis=-1)
        heads_ref[...] = out12.reshape(bt, SP, 12).astype(heads_ref.dtype)

    return kernel


# ---------------------------------------------------------------------------
# Wrapper
# ---------------------------------------------------------------------------
def gptran_forward(lines, line_mask, params, *, block_b=None, return_attn=True):
    B, N, _ = lines.shape
    Q = NUM_QUERIES
    S = Q + N
    SP = _round_up(S, 16)         # 16-align so bf16 [bt,SP,D]<->[M,D] reshapes are free
    D, L = HIDDEN, NLAYERS
    f32, bf16 = jnp.float32, jnp.bfloat16

    # ---- batch tile: target ~1024 MXU rows per step; keep >=2 grid steps when
    #      B allows so ("parallel",) can shard across v7x's 2 TensorCores.
    #      (On v5e/v6e a single TC just runs the steps back-to-back.)
    if block_b is None:
        bt = max(1, min(B, max(1, 1024 // SP)))
        if B >= 2 and -(-B // bt) < 2:
            bt = -(-B // 2)
    else:
        bt = max(1, min(block_b, B))
    B_pad = _round_up(B, bt)
    nb = B_pad // bt
    pad_b = B_pad - B

    # ---- XLA-side prep: structure tensor, padding, masks, pos / bias rows
    lines_p = jnp.pad(lines.astype(f32), ((0, pad_b), (0, 0), (0, 0)))
    lmask_p = jnp.pad(line_mask.astype(f32), ((0, pad_b), (0, 0), (0, 0)),
                      constant_values=1.0)

    a = lines_p[..., 0]
    b_ = lines_p[..., 1]
    c = lines_p[..., 2]
    st = jnp.stack([a * a, a * b_, b_ * b_, b_ * c, c * c, c * a], axis=-1)
    st_seq = jnp.zeros((B_pad, SP, 6), f32).at[:, Q:Q + N, :].set(st)

    key_valid = jnp.concatenate(
        [jnp.ones((B_pad, Q), bool),               # query tokens never padded
         lmask_p[..., 0] > 0.5,                    # lines: 1 = valid
         jnp.zeros((B_pad, SP - S), bool)], axis=1)
    add_mask = jnp.where(key_valid, 0.0, -1e9).astype(f32)[:, None, :]  # [B_pad,1,SP]

    pos = jnp.zeros((SP, D), f32).at[:Q, :].set(params['query_embed'])
    src_bias = jnp.zeros((SP, D), f32).at[Q:Q + N, :].set(
        jnp.broadcast_to(params['proj_b'], (N, D)))

    # ---- stack per-layer weights; Q/K/V head-major, 1/sqrt(dh) folded into Wq/bq
    scale = 1.0 / (DH ** 0.5)

    def stk(name):
        return jnp.stack([lp[name] for lp in params['layers']], 0)

    def head_w(w):   # [L, D, D] -> [L, NHEAD, D, DH]
        return w.reshape(L, D, NHEAD, DH).transpose(0, 2, 1, 3)

    def head_b(b):   # [L, 1, D] -> [L, NHEAD, 1, DH]
        return b.reshape(L, NHEAD, DH)[:, :, None, :]

    wq = head_w(stk('wq') * scale).astype(bf16)
    bq = head_b(stk('bq') * scale).astype(f32)
    wk = head_w(stk('wk')).astype(bf16)
    bk = head_b(stk('bk')).astype(f32)
    wv = head_w(stk('wv')).astype(bf16)
    bv = head_b(stk('bv')).astype(f32)
    wo = stk('wo').astype(bf16)
    bo = stk('bo').astype(f32)
    w1, b1 = stk('w1').astype(bf16), stk('b1').astype(f32)
    w2, b2 = stk('w2').astype(bf16), stk('b2').astype(f32)
    ln1w, ln1b = stk('ln1w').astype(f32), stk('ln1b').astype(f32)
    ln2w, ln2b = stk('ln2w').astype(f32), stk('ln2b').astype(f32)

    proj_w = params['proj_w'].astype(bf16)                              # [6, D]
    wh = jnp.concatenate([params['vp_w'][0], params['vp_w'][1],
                          params['vp_w'][2], params['cls_w']], axis=1).astype(bf16)  # [D,12]
    bh = jnp.concatenate([params['vp_b'].reshape(-1),
                          params['cls_b'].reshape(-1)])[None, :].astype(f32)         # [1,12]

    def rep(shape):
        nd = len(shape)
        return pl.BlockSpec(shape, lambda i, _n=nd: (0,) * _n)

    in_specs = [
        pl.BlockSpec((bt, SP, 6), lambda i: (i, 0, 0)),     # st_seq
        pl.BlockSpec((bt, 1, SP), lambda i: (i, 0, 0)),     # add_mask
        rep((SP, D)), rep((SP, D)), rep((6, D)),            # pos, src_bias, proj_w
        rep((L, NHEAD, D, DH)), rep((L, NHEAD, 1, DH)),     # wq, bq (head-major)
        rep((L, NHEAD, D, DH)), rep((L, NHEAD, 1, DH)),     # wk, bk
        rep((L, NHEAD, D, DH)), rep((L, NHEAD, 1, DH)),     # wv, bv
        rep((L, D, D)), rep((L, 1, D)),                     # wo, bo
        rep((L, 1, D)), rep((L, 1, D)),                     # ln1w, ln1b
        rep((L, D, FFN)), rep((L, 1, FFN)),                 # w1, b1
        rep((L, FFN, D)), rep((L, 1, D)),                   # w2, b2
        rep((L, 1, D)), rep((L, 1, D)),                     # ln2w, ln2b
        rep((D, 12)), rep((1, 12)),                         # wh, bh
    ]
    out_specs = [pl.BlockSpec((bt, SP, 12), lambda i: (i, 0, 0))]
    out_shape = [jax.ShapeDtypeStruct((B_pad, SP, 12), f32)]
    if return_attn:
        out_specs += [pl.BlockSpec((bt, SP, SP), lambda i: (i, 0, 0))
                      for _ in range(L)]
        out_shape += [jax.ShapeDtypeStruct((B_pad, SP, SP), f32) for _ in range(L)]
    out_specs, out_shape = tuple(out_specs), tuple(out_shape)

    args = (st_seq, add_mask, pos, src_bias, proj_w,
            wq, bq, wk, bk, wv, bv, wo, bo, ln1w, ln1b,
            w1, b1, w2, b2, ln2w, ln2b, wh, bh)

    flops = (2 * B_pad * SP * (6 * D + 12 * D)
             + NLAYERS * (8 * B_pad * SP * D * D
                          + 4 * B_pad * SP * SP * D
                          + 4 * B_pad * SP * D * FFN))
    transcendentals = NLAYERS * NHEAD * B_pad * SP * SP
    bytes_accessed = (sum(int(x.size) * x.dtype.itemsize for x in args)
                      + sum(math.prod(s.shape) * 4 for s in out_shape))

    results = pl.pallas_call(
        _make_fused_kernel(bt, SP, return_attn),
        grid=(nb,),
        in_specs=in_specs,
        out_specs=out_specs,
        out_shape=out_shape,
        scratch_shapes=[pltpu.VMEM((bt * SP, D), bf16)],    # per-head ctx staging
        compiler_params=pltpu.CompilerParams(
            dimension_semantics=("parallel",),
            # Footprint (weights + tiles + temporaries) stays well under 32 MiB
            # at M<=1024 on every generation, including v7x's 64 MiB/TC.
            vmem_limit_bytes=32 * 1024 * 1024),
        cost_estimate=pl.CostEstimate(flops=flops,
                                      transcendentals=transcendentals,
                                      bytes_accessed=bytes_accessed),
    )(*args)

    heads_out = results[0][:B]                      # [B, SP, 12]
    out = {
        'pred_vp1': heads_out[:, 0, 0:3],           # [B, 3], unit L2 norm
        'pred_vp2': heads_out[:, 1, 3:6],
        'pred_vp3': heads_out[:, 2, 6:9],
        'pred_vp1_logits': heads_out[:, Q:Q + N, 9:10],   # [B, N, 1]
        'pred_vp2_logits': heads_out[:, Q:Q + N, 10:11],
        'pred_vp3_logits': heads_out[:, Q:Q + N, 11:12],
    }
    extra_info = {}
    if return_attn:
        enc_attns = jnp.stack(results[1:], axis=0)[:, :B, :S, :S]   # [L, B, S, S]
        extra_info['enc_attns'] = enc_attns
    # TODO(synk): aux_loss branch and the torch.svd helper (_evaluate_whls_zvp)
    # are not on the default forward path and are omitted.
    return out, extra_info


# ---------------------------------------------------------------------------
# Deterministic parameter init (synthetic; shapes follow GPTran.__init__)
# ---------------------------------------------------------------------------
def init_params(key):
    D, F, Q = HIDDEN, FFN, NUM_QUERIES

    def dense(k, fan_in, fan_out):
        kw, kb = jax.random.split(k)
        lim = 1.0 / (fan_in ** 0.5)
        w = jax.random.uniform(kw, (fan_in, fan_out), jnp.float32, -lim, lim)
        b = jax.random.uniform(kb, (1, fan_out), jnp.float32, -lim, lim)
        return w, b

    keys = jax.random.split(key, 6 + NLAYERS)
    params = {}
    params['proj_w'], params['proj_b'] = dense(keys[0], 6, D)       # input_line_proj
    params['query_embed'] = jax.random.normal(keys[1], (Q, D), jnp.float32)

    vp_ws, vp_bs = [], []
    for i in range(3):                                              # vp{1,2,3}_embed
        w, b = dense(jax.random.fold_in(keys[2], i), D, 3)
        vp_ws.append(w)
        vp_bs.append(b[0])
    params['vp_w'] = jnp.stack(vp_ws, axis=0)                       # [3, D, 3]
    params['vp_b'] = jnp.stack(vp_bs, axis=0)                       # [3, 3]

    cls_ws, cls_bs = [], []
    for i in range(3):                                              # vp{1,2,3}_class_embed
        w, b = dense(jax.random.fold_in(keys[3], i), D, 1)
        cls_ws.append(w)
        cls_bs.append(b[0])
    params['cls_w'] = jnp.concatenate(cls_ws, axis=1)               # [D, 3]
    params['cls_b'] = jnp.concatenate(cls_bs, axis=0)[None, :]      # [1, 3]

    layers = []
    for l in range(NLAYERS):
        k = keys[6 + l]
        ks = jax.random.split(k, 8)
        lp = {}
        lp['wq'], lp['bq'] = dense(ks[0], D, D)
        lp['wk'], lp['bk'] = dense(ks[1], D, D)
        lp['wv'], lp['bv'] = dense(ks[2], D, D)
        lp['wo'], lp['bo'] = dense(ks[3], D, D)
        lp['w1'], lp['b1'] = dense(ks[4], D, F)
        lp['w2'], lp['b2'] = dense(ks[5], F, D)
        lp['ln1w'] = jnp.ones((1, D), jnp.float32)
        lp['ln1b'] = jnp.zeros((1, D), jnp.float32)
        lp['ln2w'] = jnp.ones((1, D), jnp.float32)
        lp['ln2b'] = jnp.zeros((1, D), jnp.float32)
        layers.append(lp)
    params['layers'] = layers
    return params


if __name__ == "__main__":
    key = jax.random.PRNGKey(0)
    kp, kl = jax.random.split(key)
    params = init_params(kp)

    B, N = 2, 8
    lines = jax.random.normal(kl, (B, N, 3), jnp.float32)
    # line_mask: 1 = valid line, 0 = padded (last two lines padded)
    line_mask = jnp.ones((B, N, 1), jnp.float32).at[:, N - 2:, :].set(0.0)

    out, extra = gptran_forward(lines, line_mask, params)
    jax.tree_util.tree_map(jax.block_until_ready, (out, extra))

    assert out['pred_vp1'].shape == (B, 3)
    assert out['pred_vp2'].shape == (B, 3)
    assert out['pred_vp3'].shape == (B, 3)
    assert out['pred_vp1_logits'].shape == (B, N, 1)
    assert extra['enc_attns'].shape == (NLAYERS, B, NUM_QUERIES + N, NUM_QUERIES + N)
    finite = all(bool(jnp.all(jnp.isfinite(v))) for v in out.values())
    finite = finite and bool(jnp.all(jnp.isfinite(extra['enc_attns'])))
    assert finite
    print("KERNEL_OK")
</pallas_src>

<mosaic_0001>
module attributes {stable_mosaic.version = 11 : i64} {
  func.func @kernel(%arg0: i32, %arg1: memref<1x16x6xf32, #tpu.memory_space<vmem>>, %arg2: memref<1x1x16xf32, #tpu.memory_space<vmem>>, %arg3: memref<16x256xf32, #tpu.memory_space<vmem>>, %arg4: memref<16x256xf32, #tpu.memory_space<vmem>>, %arg5: memref<6x256xbf16, #tpu.memory_space<vmem>>, %arg6: memref<2x4x256x64xbf16, #tpu.memory_space<vmem>>, %arg7: memref<2x4x1x64xf32, #tpu.memory_space<vmem>>, %arg8: memref<2x4x256x64xbf16, #tpu.memory_space<vmem>>, %arg9: memref<2x4x1x64xf32, #tpu.memory_space<vmem>>, %arg10: memref<2x4x256x64xbf16, #tpu.memory_space<vmem>>, %arg11: memref<2x4x1x64xf32, #tpu.memory_space<vmem>>, %arg12: memref<2x256x256xbf16, #tpu.memory_space<vmem>>, %arg13: memref<2x1x256xf32, #tpu.memory_space<vmem>>, %arg14: memref<2x1x256xf32, #tpu.memory_space<vmem>>, %arg15: memref<2x1x256xf32, #tpu.memory_space<vmem>>, %arg16: memref<2x256x512xbf16, #tpu.memory_space<vmem>>, %arg17: memref<2x1x512xf32, #tpu.memory_space<vmem>>, %arg18: memref<2x512x256xbf16, #tpu.memory_space<vmem>>, %arg19: memref<2x1x256xf32, #tpu.memory_space<vmem>>, %arg20: memref<2x1x256xf32, #tpu.memory_space<vmem>>, %arg21: memref<2x1x256xf32, #tpu.memory_space<vmem>>, %arg22: memref<256x12xbf16, #tpu.memory_space<vmem>>, %arg23: memref<1x12xf32, #tpu.memory_space<vmem>>, %arg24: memref<1x16x12xf32, #tpu.memory_space<vmem>>, %arg25: memref<1x16x16xf32, #tpu.memory_space<vmem>>, %arg26: memref<1x16x16xf32, #tpu.memory_space<vmem>>, %arg27: memref<16x256xbf16, #tpu.memory_space<vmem>>) attributes {dimension_semantics = [#tpu.dimension_semantics<parallel>], iteration_bounds = array<i64: 2>, scalar_prefetch = 0 : i64, scratch_operands = 1 : i64, tpu.core_type = #tpu.core_type<tc>, window_params = [{transform_indices = @transform_0, window_bounds = array<i64: 1, 16, 6>}, {transform_indices = @transform_1, window_bounds = array<i64: 1, 1, 16>}, {pipeline_mode = #tpu.pipeline_mode<synchronous>, transform_indices = @transform_2, window_bounds = array<i64: 16, 256>}, {pipeline_mode = #tpu.pipeline_mode<synchronous>, transform_indices = @transform_3, window_bounds = array<i64: 16, 256>}, {pipeline_mode = #tpu.pipeline_mode<synchronous>, transform_indices = @transform_4, window_bounds = array<i64: 6, 256>}, {pipeline_mode = #tpu.pipeline_mode<synchronous>, transform_indices = @transform_5, window_bounds = array<i64: 2, 4, 256, 64>}, {pipeline_mode = #tpu.pipeline_mode<synchronous>, transform_indices = @transform_6, window_bounds = array<i64: 2, 4, 1, 64>}, {pipeline_mode = #tpu.pipeline_mode<synchronous>, transform_indices = @transform_7, window_bounds = array<i64: 2, 4, 256, 64>}, {pipeline_mode = #tpu.pipeline_mode<synchronous>, transform_indices = @transform_8, window_bounds = array<i64: 2, 4, 1, 64>}, {pipeline_mode = #tpu.pipeline_mode<synchronous>, transform_indices = @transform_9, window_bounds = array<i64: 2, 4, 256, 64>}, {pipeline_mode = #tpu.pipeline_mode<synchronous>, transform_indices = @transform_10, window_bounds = array<i64: 2, 4, 1, 64>}, {pipeline_mode = #tpu.pipeline_mode<synchronous>, transform_indices = @transform_11, window_bounds = array<i64: 2, 256, 256>}, {pipeline_mode = #tpu.pipeline_mode<synchronous>, transform_indices = @transform_12, window_bounds = array<i64: 2, 1, 256>}, {pipeline_mode = #tpu.pipeline_mode<synchronous>, transform_indices = @transform_13, window_bounds = array<i64: 2, 1, 256>}, {pipeline_mode = #tpu.pipeline_mode<synchronous>, transform_indices = @transform_14, window_bounds = array<i64: 2, 1, 256>}, {pipeline_mode = #tpu.pipeline_mode<synchronous>, transform_indices = @transform_15, window_bounds = array<i64: 2, 256, 512>}, {pipeline_mode = #tpu.pipeline_mode<synchronous>, transform_indices = @transform_16, window_bounds = array<i64: 2, 1, 512>}, {pipeline_mode = #tpu.pipeline_mode<synchronous>, transform_indices = @transform_17, window_bounds = array<i64: 2, 512, 256>}, {pipeline_mode = #tpu.pipeline_mode<synchronous>, transform_indices = @transform_18, window_bounds = array<i64: 2, 1, 256>}, {pipeline_mode = #tpu.pipeline_mode<synchronous>, transform_indices = @transform_19, window_bounds = array<i64: 2, 1, 256>}, {pipeline_mode = #tpu.pipeline_mode<synchronous>, transform_indices = @transform_20, window_bounds = array<i64: 2, 1, 256>}, {pipeline_mode = #tpu.pipeline_mode<synchronous>, transform_indices = @transform_21, window_bounds = array<i64: 256, 12>}, {pipeline_mode = #tpu.pipeline_mode<synchronous>, transform_indices = @transform_22, window_bounds = array<i64: 1, 12>}, {transform_indices = @transform_23, window_bounds = array<i64: 1, 16, 12>}, {transform_indices = @transform_24, window_bounds = array<i64: 1, 16, 16>}, {transform_indices = @transform_25, window_bounds = array<i64: 1, 16, 16>}]} {
    %c0 = arith.constant 0 : index
    %c0_0 = arith.constant 0 : index
    %0 = vector.load %arg3[%c0, %c0_0] : memref<16x256xf32, #tpu.memory_space<vmem>>, vector<16x256xf32>
    %c0_1 = arith.constant 0 : index
    %c0_2 = arith.constant 0 : index
    %1 = vector.load %arg4[%c0_1, %c0_2] : memref<16x256xf32, #tpu.memory_space<vmem>>, vector<16x256xf32>
    %c0_3 = arith.constant 0 : index
    %c0_4 = arith.constant 0 : index
    %c0_5 = arith.constant 0 : index
    %2 = vector.load %arg2[%c0_3, %c0_4, %c0_5] : memref<1x1x16xf32, #tpu.memory_space<vmem>>, vector<1x1x16xf32>
    %3 = vector.shape_cast %2 : vector<1x1x16xf32> to vector<1x1x16xf32>
    %4 = vector.broadcast %3 : vector<1x1x16xf32> to vector<1x16x16xf32>
    %c0_6 = arith.constant 0 : index
    %c0_7 = arith.constant 0 : index
    %c0_8 = arith.constant 0 : index
    %5 = vector.load %arg1[%c0_6, %c0_7, %c0_8] : memref<1x16x6xf32, #tpu.memory_space<vmem>>, vector<1x16x6xf32>
    %6 = vector.shape_cast %5 : vector<1x16x6xf32> to vector<16x6xf32>
    %7 = arith.truncf %6 : vector<16x6xf32> to vector<16x6xbf16>
    %c0_9 = arith.constant 0 : index
    %c0_10 = arith.constant 0 : index
    %8 = vector.load %arg5[%c0_9, %c0_10] : memref<6x256xbf16, #tpu.memory_space<vmem>>, vector<6x256xbf16>
    %cst = arith.constant dense<0.000000e+00> : vector<16x256xf32>
    %9 = tpu.matmul %7, %8, %cst {dimension_numbers = #tpu.dot_dimension_numbers<[1], [0], [0], [1], [0, 0, 1, 1], [], []>} : vector<16x6xbf16>, vector<6x256xbf16>, vector<16x256xf32> -> vector<16x256xf32>
    %10 = arith.addf %9, %1 : vector<16x256xf32>
    %11 = arith.addf %10, %0 : vector<16x256xf32>
    %12 = arith.truncf %11 : vector<16x256xf32> to vector<16x256xbf16>
    %13 = arith.truncf %10 : vector<16x256xf32> to vector<16x256xbf16>
    %cst_11 = arith.constant 0.000000e+00 : f32
    %14 = vector.broadcast %cst_11 : f32 to vector<1x16x16xf32>
    %c0_12 = arith.constant 0 : index
    %c0_13 = arith.constant 0 : index
    %c0_14 = arith.constant 0 : index
    %c0_15 = arith.constant 0 : index
    %15 = vector.load %arg6[%c0_12, %c0_13, %c0_14, %c0_15] : memref<2x4x256x64xbf16, #tpu.memory_space<vmem>>, vector<1x1x256x64xbf16>
    %16 = vector.shape_cast %15 : vector<1x1x256x64xbf16> to vector<256x64xbf16>
    %cst_16 = arith.constant dense<0.000000e+00> : vector<16x64xf32>
    %17 = tpu.matmul %12, %16, %cst_16 {dimension_numbers = #tpu.dot_dimension_numbers<[1], [0], [0], [1], [0, 0, 1, 1], [], []>} : vector<16x256xbf16>, vector<256x64xbf16>, vector<16x64xf32> -> vector<16x64xf32>
    %c0_17 = arith.constant 0 : index
    %c0_18 = arith.constant 0 : index
    %c0_19 = arith.constant 0 : index
    %c0_20 = arith.constant 0 : index
    %18 = vector.load %arg7[%c0_17, %c0_18, %c0_19, %c0_20] : memref<2x4x1x64xf32, #tpu.memory_space<vmem>>, vector<1x1x1x64xf32>
    %19 = vector.shape_cast %18 : vector<1x1x1x64xf32> to vector<1x64xf32>
    %20 = vector.broadcast %19 : vector<1x64xf32> to vector<16x64xf32>
    %21 = arith.addf %17, %20 : vector<16x64xf32>
    %22 = arith.truncf %21 : vector<16x64xf32> to vector<16x64xbf16>
    %c0_21 = arith.constant 0 : index
    %c0_22 = arith.constant 0 : index
    %c0_23 = arith.constant 0 : index
    %c0_24 = arith.constant 0 : index
    %23 = vector.load %arg8[%c0_21, %c0_22, %c0_23, %c0_24] : memref<2x4x256x64xbf16, #tpu.memory_space<vmem>>, vector<1x1x256x64xbf16>
    %24 = vector.shape_cast %23 : vector<1x1x256x64xbf16> to vector<256x64xbf16>
    %cst_25 = arith.constant dense<0.000000e+00> : vector<16x64xf32>
    %25 = tpu.matmul %12, %24, %cst_25 {dimension_numbers = #tpu.dot_dimension_numbers<[1], [0], [0], [1], [0, 0, 1, 1], [], []>} : vector<16x256xbf16>, vector<256x64xbf16>, vector<16x64xf32> -> vector<16x64xf32>
    %c0_26 = arith.constant 0 : index
    %c0_27 = arith.constant 0 : index
    %c0_28 = arith.constant 0 : index
    %c0_29 = arith.constant 0 : index
    %26 = vector.load %arg9[%c0_26, %c0_27, %c0_28, %c0_29] : memref<2x4x1x64xf32, #tpu.memory_space<vmem>>, vector<1x1x1x64xf32>
    %27 = vector.shape_cast %26 : vector<1x1x1x64xf32> to vector<1x64xf32>
    %28 = vector.broadcast %27 : vector<1x64xf32> to vector<16x64xf32>
    %29 = arith.addf %25, %28 : vector<16x64xf32>
    %30 = arith.truncf %29 : vector<16x64xf32> to vector<16x64xbf16>
    %c0_30 = arith.constant 0 : index
    %c0_31 = arith.constant 0 : index
    %c0_32 = arith.constant 0 : index
    %c0_33 = arith.constant 0 : index
    %31 = vector.load %arg10[%c0_30, %c0_31, %c0_32, %c0_33] : memref<2x4x256x64xbf16, #tpu.memory_space<vmem>>, vector<1x1x256x64xbf16>
    %32 = vector.shape_cast %31 : vector<1x1x256x64xbf16> to vector<256x64xbf16>
    %cst_34 = arith.constant dense<0.000000e+00> : vector<16x64xf32>
    %33 = tpu.matmul %13, %32, %cst_34 {dimension_numbers = #tpu.dot_dimension_numbers<[1], [0], [0], [1], [0, 0, 1, 1], [], []>} : vector<16x256xbf16>, vector<256x64xbf16>, vector<16x64xf32> -> vector<16x64xf32>
    %c0_35 = arith.constant 0 : index
    %c0_36 = arith.constant 0 : index
    %c0_37 = arith.constant 0 : index
    %c0_38 = arith.constant 0 : index
    %34 = vector.load %arg11[%c0_35, %c0_36, %c0_37, %c0_38] : memref<2x4x1x64xf32, #tpu.memory_space<vmem>>, vector<1x1x1x64xf32>
    %35 = vector.shape_cast %34 : vector<1x1x1x64xf32> to vector<1x64xf32>
    %36 = vector.broadcast %35 : vector<1x64xf32> to vector<16x64xf32>
    %37 = arith.addf %33, %36 : vector<16x64xf32>
    %38 = arith.truncf %37 : vector<16x64xf32> to vector<16x64xbf16>
    %39 = vector.shape_cast %22 : vector<16x64xbf16> to vector<1x16x64xbf16>
    %40 = vector.shape_cast %30 : vector<16x64xbf16> to vector<1x16x64xbf16>
    %cst_39 = arith.constant dense<0.000000e+00> : vector<1x16x16xf32>
    %41 = tpu.matmul %39, %40, %cst_39 {dimension_numbers = #tpu.dot_dimension_numbers<[2], [2], [1], [1], [0, 0, 0, 1, 1, 1], [0], [0]>} : vector<1x16x64xbf16>, vector<1x16x64xbf16>, vector<1x16x16xf32> -> vector<1x16x16xf32>
    %42 = arith.addf %41, %4 : vector<1x16x16xf32>
    %cst_40 = arith.constant dense<0xFF800000> : vector<1x16xf32>
    %43 = vector.multi_reduction <maximumf>, %42, %cst_40 [2] : vector<1x16x16xf32> to vector<1x16xf32>
    %44 = vector.shape_cast %43 : vector<1x16xf32> to vector<1x16x1xf32>
    %45 = vector.broadcast %44 : vector<1x16x1xf32> to vector<1x16x16xf32>
    %46 = arith.subf %42, %45 : vector<1x16x16xf32>
    %47 = math.exp %46 : vector<1x16x16xf32>
    %cst_41 = arith.constant dense<0.000000e+00> : vector<1x16xf32>
    %48 = vector.multi_reduction <add>, %47, %cst_41 [2] : vector<1x16x16xf32> to vector<1x16xf32>
    %49 = vector.shape_cast %48 : vector<1x16xf32> to vector<1x16x1xf32>
    %50 = tpu.reciprocal %49 : vector<1x16x1xf32> -> vector<1x16x1xf32>
    %51 = vector.broadcast %50 : vector<1x16x1xf32> to vector<1x16x16xf32>
    %52 = arith.mulf %47, %51 : vector<1x16x16xf32>
    %53 = arith.addf %14, %52 : vector<1x16x16xf32>
    %54 = arith.truncf %52 : vector<1x16x16xf32> to vector<1x16x16xbf16>
    %55 = vector.shape_cast %38 : vector<16x64xbf16> to vector<1x16x64xbf16>
    %cst_42 = arith.constant dense<0.000000e+00> : vector<1x16x64xf32>
    %56 = tpu.matmul %54, %55, %cst_42 {dimension_numbers = #tpu.dot_dimension_numbers<[2], [1], [1], [2], [0, 0, 0, 1, 1, 2], [0], [0]>} : vector<1x16x16xbf16>, vector<1x16x64xbf16>, vector<1x16x64xf32> -> vector<1x16x64xf32>
    %57 = vector.shape_cast %56 : vector<1x16x64xf32> to vector<16x64xf32>
    %58 = arith.truncf %57 : vector<16x64xf32> to vector<16x64xbf16>
    %c0_43 = arith.constant 0 : index
    %c0_44 = arith.constant 0 : index
    %59 = vector.load %arg27[%c0_43, %c0_44] : memref<16x256xbf16, #tpu.memory_space<vmem>>, vector<16x64xbf16>
    tpu.vector_store %arg27[%c0_43, %c0_44], %58 {strides = array<i32>} : memref<16x256xbf16, #tpu.memory_space<vmem>>, vector<16x64xbf16>,
    %c0_45 = arith.constant 0 : index
    %c1 = arith.constant 1 : index
    %c0_46 = arith.constant 0 : index
    %c0_47 = arith.constant 0 : index
    %60 = vector.load %arg6[%c0_45, %c1, %c0_46, %c0_47] : memref<2x4x256x64xbf16, #tpu.memory_space<vmem>>, vector<1x1x256x64xbf16>
    %61 = vector.shape_cast %60 : vector<1x1x256x64xbf16> to vector<256x64xbf16>
    %cst_48 = arith.constant dense<0.000000e+00> : vector<16x64xf32>
    %62 = tpu.matmul %12, %61, %cst_48 {dimension_numbers = #tpu.dot_dimension_numbers<[1], [0], [0], [1], [0, 0, 1, 1], [], []>} : vector<16x256xbf16>, vector<256x64xbf16>, vector<16x64xf32> -> vector<16x64xf32>
    %c0_49 = arith.constant 0 : index
    %c1_50 = arith.constant 1 : index
    %c0_51 = arith.constant 0 : index
    %c0_52 = arith.constant 0 : index
    %63 = vector.load %arg7[%c0_49, %c1_50, %c0_51, %c0_52] : memref<2x4x1x64xf32, #tpu.memory_space<vmem>>, vector<1x1x1x64xf32>
    %64 = vector.shape_cast %63 : vector<1x1x1x64xf32> to vector<1x64xf32>
    %65 = vector.broadcast %64 : vector<1x64xf32> to vector<16x64xf32>
    %66 = arith.addf %62, %65 : vector<16x64xf32>
    %67 = arith.truncf %66 : vector<16x64xf32> to vector<16x64xbf16>
    %c0_53 = arith.constant 0 : index
    %c1_54 = arith.constant 1 : index
    %c0_55 = arith.constant 0 : index
    %c0_56 = arith.constant 0 : index
    %68 = vector.load %arg8[%c0_53, %c1_54, %c0_55, %c0_56] : memref<2x4x256x64xbf16, #tpu.memory_space<vmem>>, vector<1x1x256x64xbf16>
    %69 = vector.shape_cast %68 : vector<1x1x256x64xbf16> to vector<256x64xbf16>
    %cst_57 = arith.constant dense<0.000000e+00> : vector<16x64xf32>
    %70 = tpu.matmul %12, %69, %cst_57 {dimension_numbers = #tpu.dot_dimension_numbers<[1], [0], [0], [1], [0, 0, 1, 1], [], []>} : vector<16x256xbf16>, vector<256x64xbf16>, vector<16x64xf32> -> vector<16x64xf32>
    %c0_58 = arith.constant 0 : index
    %c1_59 = arith.constant 1 : index
    %c0_60 = arith.constant 0 : index
    %c0_61 = arith.constant 0 : index
    %71 = vector.load %arg9[%c0_58, %c1_59, %c0_60, %c0_61] : memref<2x4x1x64xf32, #tpu.memory_space<vmem>>, vector<1x1x1x64xf32>
    %72 = vector.shape_cast %71 : vector<1x1x1x64xf32> to vector<1x64xf32>
    %73 = vector.broadcast %72 : vector<1x64xf32> to vector<16x64xf32>
    %74 = arith.addf %70, %73 : vector<16x64xf32>
    %75 = arith.truncf %74 : vector<16x64xf32> to vector<16x64xbf16>
    %c0_62 = arith.constant 0 : index
    %c1_63 = arith.constant 1 : index
    %c0_64 = arith.constant 0 : index
    %c0_65 = arith.constant 0 : index
    %76 = vector.load %arg10[%c0_62, %c1_63, %c0_64, %c0_65] : memref<2x4x256x64xbf16, #tpu.memory_space<vmem>>, vector<1x1x256x64xbf16>
    %77 = vector.shape_cast %76 : vector<1x1x256x64xbf16> to vector<256x64xbf16>
    %cst_66 = arith.constant dense<0.000000e+00> : vector<16x64xf32>
    %78 = tpu.matmul %13, %77, %cst_66 {dimension_numbers = #tpu.dot_dimension_numbers<[1], [0], [0], [1], [0, 0, 1, 1], [], []>} : vector<16x256xbf16>, vector<256x64xbf16>, vector<16x64xf32> -> vector<16x64xf32>
    %c0_67 = arith.constant 0 : index
    %c1_68 = arith.constant 1 : index
    %c0_69 = arith.constant 0 : index
    %c0_70 = arith.constant 0 : index
    %79 = vector.load %arg11[%c0_67, %c1_68, %c0_69, %c0_70] : memref<2x4x1x64xf32, #tpu.memory_space<vmem>>, vector<1x1x1x64xf32>
    %80 = vector.shape_cast %79 : vector<1x1x1x64xf32> to vector<1x64xf32>
    %81 = vector.broadcast %80 : vector<1x64xf32> to vector<16x64xf32>
    %82 = arith.addf %78, %81 : vector<16x64xf32>
    %83 = arith.truncf %82 : vector<16x64xf32> to vector<16x64xbf16>
    %84 = vector.shape_cast %67 : vector<16x64xbf16> to vector<1x16x64xbf16>
    %85 = vector.shape_cast %75 : vector<16x64xbf16> to vector<1x16x64xbf16>
    %cst_71 = arith.constant dense<0.000000e+00> : vector<1x16x16xf32>
    %86 = tpu.matmul %84, %85, %cst_71 {dimension_numbers = #tpu.dot_dimension_numbers<[2], [2], [1], [1], [0, 0, 0, 1, 1, 1], [0], [0]>} : vector<1x16x64xbf16>, vector<1x16x64xbf16>, vector<1x16x16xf32> -> vector<1x16x16xf32>
    %87 = arith.addf %86, %4 : vector<1x16x16xf32>
    %cst_72 = arith.constant dense<0xFF800000> : vector<1x16xf32>
    %88 = vector.multi_reduction <maximumf>, %87, %cst_72 [2] : vector<1x16x16xf32> to vector<1x16xf32>
    %89 = vector.shape_cast %88 : vector<1x16xf32> to vector<1x16x1xf32>
    %90 = vector.broadcast %89 : vector<1x16x1xf32> to vector<1x16x16xf32>
    %91 = arith.subf %87, %90 : vector<1x16x16xf32>
    %92 = math.exp %91 : vector<1x16x16xf32>
    %cst_73 = arith.constant dense<0.000000e+00> : vector<1x16xf32>
    %93 = vector.multi_reduction <add>, %92, %cst_73 [2] : vector<1x16x16xf32> to vector<1x16xf32>
    %94 = vector.shape_cast %93 : vector<1x16xf32> to vector<1x16x1xf32>
    %95 = tpu.reciprocal %94 : vector<1x16x1xf32> -> vector<1x16x1xf32>
    %96 = vector.broadcast %95 : vector<1x16x1xf32> to vector<1x16x16xf32>
    %97 = arith.mulf %92, %96 : vector<1x16x16xf32>
    %98 = arith.addf %53, %97 : vector<1x16x16xf32>
    %99 = arith.truncf %97 : vector<1x16x16xf32> to vector<1x16x16xbf16>
    %100 = vector.shape_cast %83 : vector<16x64xbf16> to vector<1x16x64xbf16>
    %cst_74 = arith.constant dense<0.000000e+00> : vector<1x16x64xf32>
    %101 = tpu.matmul %99, %100, %cst_74 {dimension_numbers = #tpu.dot_dimension_numbers<[2], [1], [1], [2], [0, 0, 0, 1, 1, 2], [0], [0]>} : vector<1x16x16xbf16>, vector<1x16x64xbf16>, vector<1x16x64xf32> -> vector<1x16x64xf32>
    %102 = vector.shape_cast %101 : vector<1x16x64xf32> to vector<16x64xf32>
    %103 = arith.truncf %102 : vector<16x64xf32> to vector<16x64xbf16>
    %c0_75 = arith.constant 0 : index
    %c64 = arith.constant 64 : index
    %104 = vector.load %arg27[%c0_75, %c64] : memref<16x256xbf16, #tpu.memory_space<vmem>>, vector<16x64xbf16>
    tpu.vector_store %arg27[%c0_75, %c64], %103 {strides = array<i32>} : memref<16x256xbf16, #tpu.memory_space<vmem>>, vector<16x64xbf16>,
    %c0_76 = arith.constant 0 : index
    %c2 = arith.constant 2 : index
    %c0_77 = arith.constant 0 : index
    %c0_78 = arith.constant 0 : index
    %105 = vector.load %arg6[%c0_76, %c2, %c0_77, %c0_78] : memref<2x4x256x64xbf16, #tpu.memory_space<vmem>>, vector<1x1x256x64xbf16>
    %106 = vector.shape_cast %105 : vector<1x1x256x64xbf16> to vector<256x64xbf16>
    %cst_79 = arith.constant dense<0.000000e+00> : vector<16x64xf32>
    %107 = tpu.matmul %12, %106, %cst_79 {dimension_numbers = #tpu.dot_dimension_numbers<[1], [0], [0], [1], [0, 0, 1, 1], [], []>} : vector<16x256xbf16>, vector<256x64xbf16>, vector<16x64xf32> -> vector<16x64xf32>
    %c0_80 = arith.constant 0 : index
    %c2_81 = arith.constant 2 : index
    %c0_82 = arith.constant 0 : index
    %c0_83 = arith.constant 0 : index
    %108 = vector.load %arg7[%c0_80, %c2_81, %c0_82, %c0_83] : memref<2x4x1x64xf32, #tpu.memory_space<vmem>>, vector<1x1x1x64xf32>
    %109 = vector.shape_cast %108 : vector<1x1x1x64xf32> to vector<1x64xf32>
    %110 = vector.broadcast %109 : vector<1x64xf32> to vector<16x64xf32>
    %111 = arith.addf %107, %110 : vector<16x64xf32>
    %112 = arith.truncf %111 : vector<16x64xf32> to vector<16x64xbf16>
    %c0_84 = arith.constant 0 : index
    %c2_85 = arith.constant 2 : index
    %c0_86 = arith.constant 0 : index
    %c0_87 = arith.constant 0 : index
    %113 = vector.load %arg8[%c0_84, %c2_85, %c0_86, %c0_87] : memref<2x4x256x64xbf16, #tpu.memory_space<vmem>>, vector<1x1x256x64xbf16>
    %114 = vector.shape_cast %113 : vector<1x1x256x64xbf16> to vector<256x64xbf16>
    %cst_88 = arith.constant dense<0.000000e+00> : vector<16x64xf32>
    %115 = tpu.matmul %12, %114, %cst_88 {dimension_numbers = #tpu.dot_dimension_numbers<[1], [0], [0], [1], [0, 0, 1, 1], [], []>} : vector<16x256xbf16>, vector<256x64xbf16>, vector<16x64xf32> -> vector<16x64xf32>
    %c0_89 = arith.constant 0 : index
    %c2_90 = arith.constant 2 : index
    %c0_91 = arith.constant 0 : index
    %c0_92 = arith.constant 0 : index
    %116 = vector.load %arg9[%c0_89, %c2_90, %c0_91, %c0_92] : memref<2x4x1x64xf32, #tpu.memory_space<vmem>>, vector<1x1x1x64xf32>
    %117 = vector.shape_cast %116 : vector<1x1x1x64xf32> to vector<1x64xf32>
    %118 = vector.broadcast %117 : vector<1x64xf32> to vector<16x64xf32>
    %119 = arith.addf %115, %118 : vector<16x64xf32>
    %120 = arith.truncf %119 : vector<16x64xf32> to vector<16x64xbf16>
    %c0_93 = arith.constant 0 : index
    %c2_94 = arith.constant 2 : index
    %c0_95 = arith.constant 0 : index
    %c0_96 = arith.constant 0 : index
    %121 = vector.load %arg10[%c0_93, %c2_94, %c0_95, %c0_96] : memref<2x4x256x64xbf16, #tpu.memory_space<vmem>>, vector<1x1x256x64xbf16>
    %122 = vector.shape_cast %121 : vector<1x1x256x64xbf16> to vector<256x64xbf16>
    %cst_97 = arith.constant dense<0.000000e+00> : vector<16x64xf32>
    %123 = tpu.matmul %13, %122, %cst_97 {dimension_numbers = #tpu.dot_dimension_numbers<[1], [0], [0], [1], [0, 0, 1, 1], [], []>} : vector<16x256xbf16>, vector<256x64xbf16>, vector<16x64xf32> -> vector<16x64xf32>
    %c0_98 = arith.constant 0 : index
    %c2_99 = arith.constant 2 : index
    %c0_100 = arith.constant 0 : index
    %c0_101 = arith.constant 0 : index
    %124 = vector.load %arg11[%c0_98, %c2_99, %c0_100, %c0_101] : memref<2x4x1x64xf32, #tpu.memory_space<vmem>>, vector<1x1x1x64xf32>
    %125 = vector.shape_cast %124 : vector<1x1x1x64xf32> to vector<1x64xf32>
    %126 = vector.broadcast %125 : vector<1x64xf32> to vector<16x64xf32>
    %127 = arith.addf %123, %126 : vector<16x64xf32>
    %128 = arith.truncf %127 : vector<16x64xf32> to vector<16x64xbf16>
    %129 = vector.shape_cast %112 : vector<16x64xbf16> to vector<1x16x64xbf16>
    %130 = vector.shape_cast %120 : vector<16x64xbf16> to vector<1x16x64xbf16>
    %cst_102 = arith.constant dense<0.000000e+00> : vector<1x16x16xf32>
    %131 = tpu.matmul %129, %130, %cst_102 {dimension_numbers = #tpu.dot_dimension_numbers<[2], [2], [1], [1], [0, 0, 0, 1, 1, 1], [0], [0]>} : vector<1x16x64xbf16>, vector<1x16x64xbf16>, vector<1x16x16xf32> -> vector<1x16x16xf32>
    %132 = arith.addf %131, %4 : vector<1x16x16xf32>
    %cst_103 = arith.constant dense<0xFF800000> : vector<1x16xf32>
    %133 = vector.multi_reduction <maximumf>, %132, %cst_103 [2] : vector<1x16x16xf32> to vector<1x16xf32>
    %134 = vector.shape_cast %133 : vector<1x16xf32> to vector<1x16x1xf32>
    %135 = vector.broadcast %134 : vector<1x16x1xf32> to vector<1x16x16xf32>
    %136 = arith.subf %132, %135 : vector<1x16x16xf32>
    %137 = math.exp %136 : vector<1x16x16xf32>
    %cst_104 = arith.constant dense<0.000000e+00> : vector<1x16xf32>
    %138 = vector.multi_reduction <add>, %137, %cst_104 [2] : vector<1x16x16xf32> to vector<1x16xf32>
    %139 = vector.shape_cast %138 : vector<1x16xf32> to vector<1x16x1xf32>
    %140 = tpu.reciprocal %139 : vector<1x16x1xf32> -> vector<1x16x1xf32>
    %141 = vector.broadcast %140 : vector<1x16x1xf32> to vector<1x16x16xf32>
    %142 = arith.mulf %137, %141 : vector<1x16x16xf32>
    %143 = arith.addf %98, %142 : vector<1x16x16xf32>
    %144 = arith.truncf %142 : vector<1x16x16xf32> to vector<1x16x16xbf16>
    %145 = vector.shape_cast %128 : vector<16x64xbf16> to vector<1x16x64xbf16>
    %cst_105 = arith.constant dense<0.000000e+00> : vector<1x16x64xf32>
    %146 = tpu.matmul %144, %145, %cst_105 {dimension_numbers = #tpu.dot_dimension_numbers<[2], [1], [1], [2], [0, 0, 0, 1, 1, 2], [0], [0]>} : vector<1x16x16xbf16>, vector<1x16x64xbf16>, vector<1x16x64xf32> -> vector<1x16x64xf32>
    %147 = vector.shape_cast %146 : vector<1x16x64xf32> to vector<16x64xf32>
    %148 = arith.truncf %147 : vector<16x64xf32> to vector<16x64xbf16>
    %c0_106 = arith.constant 0 : index
    %c128 = arith.constant 128 : index
    %149 = vector.load %arg27[%c0_106, %c128] : memref<16x256xbf16, #tpu.memory_space<vmem>>, vector<16x64xbf16>
    tpu.vector_store %arg27[%c0_106, %c128], %148 {strides = array<i32>} : memref<16x256xbf16, #tpu.memory_space<vmem>>, vector<16x64xbf16>,
    %c0_107 = arith.constant 0 : index
    %c3 = arith.constant 3 : index
    %c0_108 = arith.constant 0 : index
    %c0_109 = arith.constant 0 : index
    %150 = vector.load %arg6[%c0_107, %c3, %c0_108, %c0_109] : memref<2x4x256x64xbf16, #tpu.memory_space<vmem>>, vector<1x1x256x64xbf16>
    %151 = vector.shape_cast %150 : vector<1x1x256x64xbf16> to vector<256x64xbf16>
    %cst_110 = arith.constant dense<0.000000e+00> : vector<16x64xf32>
    %152 = tpu.matmul %12, %151, %cst_110 {dimension_numbers = #tpu.dot_dimension_numbers<[1], [0], [0], [1], [0, 0, 1, 1], [], []>} : vector<16x256xbf16>, vector<256x64xbf16>, vector<16x64xf32> -> vector<16x64xf32>
    %c0_111 = arith.constant 0 : index
    %c3_112 = arith.constant 3 : index
    %c0_113 = arith.constant 0 : index
    %c0_114 = arith.constant 0 : index
    %153 = vector.load %arg7[%c0_111, %c3_112, %c0_113, %c0_114] : memref<2x4x1x64xf32, #tpu.memory_space<vmem>>, vector<1x1x1x64xf32>
    %154 = vector.shape_cast %153 : vector<1x1x1x64xf32> to vector<1x64xf32>
    %155 = vector.broadcast %154 : vector<1x64xf32> to vector<16x64xf32>
    %156 = arith.addf %152, %155 : vector<16x64xf32>
    %157 = arith.truncf %156 : vector<16x64xf32> to vector<16x64xbf16>
    %c0_115 = arith.constant 0 : index
    %c3_116 = arith.constant 3 : index
    %c0_117 = arith.constant 0 : index
    %c0_118 = arith.constant 0 : index
    %158 = vector.load %arg8[%c0_115, %c3_116, %c0_117, %c0_118] : memref<2x4x256x64xbf16, #tpu.memory_space<vmem>>, vector<1x1x256x64xbf16>
    %159 = vector.shape_cast %158 : vector<1x1x256x64xbf16> to vector<256x64xbf16>
    %cst_119 = arith.constant dense<0.000000e+00> : vector<16x64xf32>
    %160 = tpu.matmul %12, %159, %cst_119 {dimension_numbers = #tpu.dot_dimension_numbers<[1], [0], [0], [1], [0, 0, 1, 1], [], []>} : vector<16x256xbf16>, vector<256x64xbf16>, vector<16x64xf32> -> vector<16x64xf32>
    %c0_120 = arith.constant 0 : index
    %c3_121 = arith.constant 3 : index
    %c0_122 = arith.constant 0 : index
    %c0_123 = arith.constant 0 : index
    %161 = vector.load %arg9[%c0_120, %c3_121, %c0_122, %c0_123] : memref<2x4x1x64xf32, #tpu.memory_space<vmem>>, vector<1x1x1x64xf32>
    %162 = vector.shape_cast %161 : vector<1x1x1x64xf32> to vector<1x64xf32>
    %163 = vector.broadcast %162 : vector<1x64xf32> to vector<16x64xf32>
    %164 = arith.addf %160, %163 : vector<16x64xf32>
    %165 = arith.truncf %164 : vector<16x64xf32> to vector<16x64xbf16>
    %c0_124 = arith.constant 0 : index
    %c3_125 = arith.constant 3 : index
    %c0_126 = arith.constant 0 : index
    %c0_127 = arith.constant 0 : index
    %166 = vector.load %arg10[%c0_124, %c3_125, %c0_126, %c0_127] : memref<2x4x256x64xbf16, #tpu.memory_space<vmem>>, vector<1x1x256x64xbf16>
    %167 = vector.shape_cast %166 : vector<1x1x256x64xbf16> to vector<256x64xbf16>
    %cst_128 = arith.constant dense<0.000000e+00> : vector<16x64xf32>
    %168 = tpu.matmul %13, %167, %cst_128 {dimension_numbers = #tpu.dot_dimension_numbers<[1], [0], [0], [1], [0, 0, 1, 1], [], []>} : vector<16x256xbf16>, vector<256x64xbf16>, vector<16x64xf32> -> vector<16x64xf32>
    %c0_129 = arith.constant 0 : index
    %c3_130 = arith.constant 3 : index
    %c0_131 = arith.constant 0 : index
    %c0_132 = arith.constant 0 : index
    %169 = vector.load %arg11[%c0_129, %c3_130, %c0_131, %c0_132] : memref<2x4x1x64xf32, #tpu.memory_space<vmem>>, vector<1x1x1x64xf32>
    %170 = vector.shape_cast %169 : vector<1x1x1x64xf32> to vector<1x64xf32>
    %171 = vector.broadcast %170 : vector<1x64xf32> to vector<16x64xf32>
    %172 = arith.addf %168, %171 : vector<16x64xf32>
    %173 = arith.truncf %172 : vector<16x64xf32> to vector<16x64xbf16>
    %174 = vector.shape_cast %157 : vector<16x64xbf16> to vector<1x16x64xbf16>
    %175 = vector.shape_cast %165 : vector<16x64xbf16> to vector<1x16x64xbf16>
    %cst_133 = arith.constant dense<0.000000e+00> : vector<1x16x16xf32>
    %176 = tpu.matmul %174, %175, %cst_133 {dimension_numbers = #tpu.dot_dimension_numbers<[2], [2], [1], [1], [0, 0, 0, 1, 1, 1], [0], [0]>} : vector<1x16x64xbf16>, vector<1x16x64xbf16>, vector<1x16x16xf32> -> vector<1x16x16xf32>
    %177 = arith.addf %176, %4 : vector<1x16x16xf32>
    %cst_134 = arith.constant dense<0xFF800000> : vector<1x16xf32>
    %178 = vector.multi_reduction <maximumf>, %177, %cst_134 [2] : vector<1x16x16xf32> to vector<1x16xf32>
    %179 = vector.shape_cast %178 : vector<1x16xf32> to vector<1x16x1xf32>
    %180 = vector.broadcast %179 : vector<1x16x1xf32> to vector<1x16x16xf32>
    %181 = arith.subf %177, %180 : vector<1x16x16xf32>
    %182 = math.exp %181 : vector<1x16x16xf32>
    %cst_135 = arith.constant dense<0.000000e+00> : vector<1x16xf32>
    %183 = vector.multi_reduction <add>, %182, %cst_135 [2] : vector<1x16x16xf32> to vector<1x16xf32>
    %184 = vector.shape_cast %183 : vector<1x16xf32> to vector<1x16x1xf32>
    %185 = tpu.reciprocal %184 : vector<1x16x1xf32> -> vector<1x16x1xf32>
    %186 = vector.broadcast %185 : vector<1x16x1xf32> to vector<1x16x16xf32>
    %187 = arith.mulf %182, %186 : vector<1x16x16xf32>
    %188 = arith.addf %143, %187 : vector<1x16x16xf32>
    %189 = arith.truncf %187 : vector<1x16x16xf32> to vector<1x16x16xbf16>
    %190 = vector.shape_cast %173 : vector<16x64xbf16> to vector<1x16x64xbf16>
    %cst_136 = arith.constant dense<0.000000e+00> : vector<1x16x64xf32>
    %191 = tpu.matmul %189, %190, %cst_136 {dimension_numbers = #tpu.dot_dimension_numbers<[2], [1], [1], [2], [0, 0, 0, 1, 1, 2], [0], [0]>} : vector<1x16x16xbf16>, vector<1x16x64xbf16>, vector<1x16x64xf32> -> vector<1x16x64xf32>
    %192 = vector.shape_cast %191 : vector<1x16x64xf32> to vector<16x64xf32>
    %193 = arith.truncf %192 : vector<16x64xf32> to vector<16x64xbf16>
    %c0_137 = arith.constant 0 : index
    %c192 = arith.constant 192 : index
    %194 = vector.load %arg27[%c0_137, %c192] : memref<16x256xbf16, #tpu.memory_space<vmem>>, vector<16x64xbf16>
    tpu.vector_store %arg27[%c0_137, %c192], %193 {strides = array<i32>} : memref<16x256xbf16, #tpu.memory_space<vmem>>, vector<16x64xbf16>,
    %c0_138 = arith.constant 0 : index
    %c0_139 = arith.constant 0 : index
    %195 = vector.load %arg27[%c0_138, %c0_139] : memref<16x256xbf16, #tpu.memory_space<vmem>>, vector<16x256xbf16>
    %c0_140 = arith.constant 0 : index
    %c0_141 = arith.constant 0 : index
    %c0_142 = arith.constant 0 : index
    %196 = vector.load %arg12[%c0_140, %c0_141, %c0_142] : memref<2x256x256xbf16, #tpu.memory_space<vmem>>, vector<1x256x256xbf16>
    %197 = vector.shape_cast %196 : vector<1x256x256xbf16> to vector<256x256xbf16>
    %cst_143 = arith.constant dense<0.000000e+00> : vector<16x256xf32>
    %198 = tpu.matmul %195, %197, %cst_143 {dimension_numbers = #tpu.dot_dimension_numbers<[1], [0], [0], [1], [0, 0, 1, 1], [], []>} : vector<16x256xbf16>, vector<256x256xbf16>, vector<16x256xf32> -> vector<16x256xf32>
    %c0_144 = arith.constant 0 : index
    %c0_145 = arith.constant 0 : index
    %c0_146 = arith.constant 0 : index
    %199 = vector.load %arg13[%c0_144, %c0_145, %c0_146] : memref<2x1x256xf32, #tpu.memory_space<vmem>>, vector<1x1x256xf32>
    %200 = vector.shape_cast %199 : vector<1x1x256xf32> to vector<1x256xf32>
    %201 = vector.broadcast %200 : vector<1x256xf32> to vector<16x256xf32>
    %202 = arith.addf %198, %201 : vector<16x256xf32>
    %203 = arith.addf %10, %202 : vector<16x256xf32>
    %c0_147 = arith.constant 0 : index
    %c0_148 = arith.constant 0 : index
    %c0_149 = arith.constant 0 : index
    %204 = vector.load %arg14[%c0_147, %c0_148, %c0_149] : memref<2x1x256xf32, #tpu.memory_space<vmem>>, vector<1x1x256xf32>
    %205 = vector.shape_cast %204 : vector<1x1x256xf32> to vector<1x256xf32>
    %c0_150 = arith.constant 0 : index
    %c0_151 = arith.constant 0 : index
    %c0_152 = arith.constant 0 : index
    %206 = vector.load %arg15[%c0_150, %c0_151, %c0_152] : memref<2x1x256xf32, #tpu.memory_space<vmem>>, vector<1x1x256xf32>
    %207 = vector.shape_cast %206 : vector<1x1x256xf32> to vector<1x256xf32>
    %cst_153 = arith.constant dense<0.000000e+00> : vector<16xf32>
    %208 = vector.multi_reduction <add>, %203, %cst_153 [1] : vector<16x256xf32> to vector<16xf32>
    %209 = vector.shape_cast %208 : vector<16xf32> to vector<16x1xf32>
    %cst_154 = arith.constant 2.560000e+02 : f32
    %210 = vector.broadcast %cst_154 : f32 to vector<16x1xf32>
    %211 = arith.divf %209, %210 : vector<16x1xf32>
    %212 = vector.broadcast %211 : vector<16x1xf32> to vector<16x256xf32>
    %213 = arith.subf %203, %212 : vector<16x256xf32>
    %214 = arith.mulf %213, %213 : vector<16x256xf32>
    %cst_155 = arith.constant dense<0.000000e+00> : vector<16xf32>
    %215 = vector.multi_reduction <add>, %214, %cst_155 [1] : vector<16x256xf32> to vector<16xf32>
    %216 = vector.shape_cast %215 : vector<16xf32> to vector<16x1xf32>
    %cst_156 = arith.constant 2.560000e+02 : f32
    %217 = vector.broadcast %cst_156 : f32 to vector<16x1xf32>
    %218 = arith.divf %216, %217 : vector<16x1xf32>
    %cst_157 = arith.constant 9.99999974E-6 : f32
    %219 = vector.broadcast %cst_157 : f32 to vector<16x1xf32>
    %220 = arith.addf %218, %219 : vector<16x1xf32>
    %221 = math.rsqrt %220 : vector<16x1xf32>
    %222 = vector.broadcast %221 : vector<16x1xf32> to vector<16x256xf32>
    %223 = arith.mulf %213, %222 : vector<16x256xf32>
    %224 = vector.broadcast %205 : vector<1x256xf32> to vector<16x256xf32>
    %225 = arith.mulf %223, %224 : vector<16x256xf32>
    %226 = vector.broadcast %207 : vector<1x256xf32> to vector<16x256xf32>
    %227 = arith.addf %225, %226 : vector<16x256xf32>
    %228 = arith.truncf %227 : vector<16x256xf32> to vector<16x256xbf16>
    %c0_158 = arith.constant 0 : index
    %c0_159 = arith.constant 0 : index
    %c0_160 = arith.constant 0 : index
    %229 = vector.load %arg16[%c0_158, %c0_159, %c0_160] : memref<2x256x512xbf16, #tpu.memory_space<vmem>>, vector<1x256x512xbf16>
    %230 = vector.shape_cast %229 : vector<1x256x512xbf16> to vector<256x512xbf16>
    %cst_161 = arith.constant dense<0.000000e+00> : vector<16x512xf32>
    %231 = tpu.matmul %228, %230, %cst_161 {dimension_numbers = #tpu.dot_dimension_numbers<[1], [0], [0], [1], [0, 0, 1, 1], [], []>} : vector<16x256xbf16>, vector<256x512xbf16>, vector<16x512xf32> -> vector<16x512xf32>
    %c0_162 = arith.constant 0 : index
    %c0_163 = arith.constant 0 : index
    %c0_164 = arith.constant 0 : index
    %232 = vector.load %arg17[%c0_162, %c0_163, %c0_164] : memref<2x1x512xf32, #tpu.memory_space<vmem>>, vector<1x1x512xf32>
    %233 = vector.shape_cast %232 : vector<1x1x512xf32> to vector<1x512xf32>
    %234 = vector.broadcast %233 : vector<1x512xf32> to vector<16x512xf32>
    %235 = arith.addf %231, %234 : vector<16x512xf32>
    %cst_165 = arith.constant 0.000000e+00 : f32
    %236 = vector.broadcast %cst_165 : f32 to vector<16x512xf32>
    %237 = arith.maximumf %235, %236 : vector<16x512xf32>
    %238 = arith.truncf %237 : vector<16x512xf32> to vector<16x512xbf16>
    %c0_166 = arith.constant 0 : index
    %c0_167 = arith.constant 0 : index
    %c0_168 = arith.constant 0 : index
    %239 = vector.load %arg18[%c0_166, %c0_167, %c0_168] : memref<2x512x256xbf16, #tpu.memory_space<vmem>>, vector<1x512x256xbf16>
    %240 = vector.shape_cast %239 : vector<1x512x256xbf16> to vector<512x256xbf16>
    %cst_169 = arith.constant dense<0.000000e+00> : vector<16x256xf32>
    %241 = tpu.matmul %238, %240, %cst_169 {dimension_numbers = #tpu.dot_dimension_numbers<[1], [0], [0], [1], [0, 0, 1, 1], [], []>} : vector<16x512xbf16>, vector<512x256xbf16>, vector<16x256xf32> -> vector<16x256xf32>
    %c0_170 = arith.constant 0 : index
    %c0_171 = arith.constant 0 : index
    %c0_172 = arith.constant 0 : index
    %242 = vector.load %arg19[%c0_170, %c0_171, %c0_172] : memref<2x1x256xf32, #tpu.memory_space<vmem>>, vector<1x1x256xf32>
    %243 = vector.shape_cast %242 : vector<1x1x256xf32> to vector<1x256xf32>
    %244 = vector.broadcast %243 : vector<1x256xf32> to vector<16x256xf32>
    %245 = arith.addf %241, %244 : vector<16x256xf32>
    %246 = arith.addf %227, %245 : vector<16x256xf32>
    %c0_173 = arith.constant 0 : index
    %c0_174 = arith.constant 0 : index
    %c0_175 = arith.constant 0 : index
    %247 = vector.load %arg20[%c0_173, %c0_174, %c0_175] : memref<2x1x256xf32, #tpu.memory_space<vmem>>, vector<1x1x256xf32>
    %248 = vector.shape_cast %247 : vector<1x1x256xf32> to vector<1x256xf32>
    %c0_176 = arith.constant 0 : index
    %c0_177 = arith.constant 0 : index
    %c0_178 = arith.constant 0 : index
    %249 = vector.load %arg21[%c0_176, %c0_177, %c0_178] : memref<2x1x256xf32, #tpu.memory_space<vmem>>, vector<1x1x256xf32>
    %250 = vector.shape_cast %249 : vector<1x1x256xf32> to vector<1x256xf32>
    %cst_179 = arith.constant dense<0.000000e+00> : vector<16xf32>
    %251 = vector.multi_reduction <add>, %246, %cst_179 [1] : vector<16x256xf32> to vector<16xf32>
    %252 = vector.shape_cast %251 : vector<16xf32> to vector<16x1xf32>
    %cst_180 = arith.constant 2.560000e+02 : f32
    %253 = vector.broadcast %cst_180 : f32 to vector<16x1xf32>
    %254 = arith.divf %252, %253 : vector<16x1xf32>
    %255 = vector.broadcast %254 : vector<16x1xf32> to vector<16x256xf32>
    %256 = arith.subf %246, %255 : vector<16x256xf32>
    %257 = arith.mulf %256, %256 : vector<16x256xf32>
    %cst_181 = arith.constant dense<0.000000e+00> : vector<16xf32>
    %258 = vector.multi_reduction <add>, %257, %cst_181 [1] : vector<16x256xf32> to vector<16xf32>
    %259 = vector.shape_cast %258 : vector<16xf32> to vector<16x1xf32>
    %cst_182 = arith.constant 2.560000e+02 : f32
    %260 = vector.broadcast %cst_182 : f32 to vector<16x1xf32>
    %261 = arith.divf %259, %260 : vector<16x1xf32>
    %cst_183 = arith.constant 9.99999974E-6 : f32
    %262 = vector.broadcast %cst_183 : f32 to vector<16x1xf32>
    %263 = arith.addf %261, %262 : vector<16x1xf32>
    %264 = math.rsqrt %263 : vector<16x1xf32>
    %265 = vector.broadcast %264 : vector<16x1xf32> to vector<16x256xf32>
    %266 = arith.mulf %256, %265 : vector<16x256xf32>
    %267 = vector.broadcast %248 : vector<1x256xf32> to vector<16x256xf32>
    %268 = arith.mulf %266, %267 : vector<16x256xf32>
    %269 = vector.broadcast %250 : vector<1x256xf32> to vector<16x256xf32>
    %270 = arith.addf %268, %269 : vector<16x256xf32>
    %cst_184 = arith.constant 2.500000e-01 : f32
    %271 = vector.broadcast %cst_184 : f32 to vector<1x16x16xf32>
    %272 = arith.mulf %188, %271 : vector<1x16x16xf32>
    %c0_185 = arith.constant 0 : index
    %c0_186 = arith.constant 0 : index
    %c0_187 = arith.constant 0 : index
    %273 = vector.load %arg25[%c0_185, %c0_186, %c0_187] : memref<1x16x16xf32, #tpu.memory_space<vmem>>, vector<1x16x16xf32>
    tpu.vector_store %arg25[%c0_185, %c0_186, %c0_187], %272 {strides = array<i32>} : memref<1x16x16xf32, #tpu.memory_space<vmem>>, vector<1x16x16xf32>,
    %274 = arith.addf %270, %0 : vector<16x256xf32>
    %275 = arith.truncf %274 : vector<16x256xf32> to vector<16x256xbf16>
    %276 = arith.truncf %270 : vector<16x256xf32> to vector<16x256xbf16>
    %cst_188 = arith.constant 0.000000e+00 : f32
    %277 = vector.broadcast %cst_188 : f32 to vector<1x16x16xf32>
    %c1_189 = arith.constant 1 : index
    %c0_190 = arith.constant 0 : index
    %c0_191 = arith.constant 0 : index
    %c0_192 = arith.constant 0 : index
    %278 = vector.load %arg6[%c1_189, %c0_190, %c0_191, %c0_192] : memref<2x4x256x64xbf16, #tpu.memory_space<vmem>>, vector<1x1x256x64xbf16>
    %279 = vector.shape_cast %278 : vector<1x1x256x64xbf16> to vector<256x64xbf16>
    %cst_193 = arith.constant dense<0.000000e+00> : vector<16x64xf32>
    %280 = tpu.matmul %275, %279, %cst_193 {dimension_numbers = #tpu.dot_dimension_numbers<[1], [0], [0], [1], [0, 0, 1, 1], [], []>} : vector<16x256xbf16>, vector<256x64xbf16>, vector<16x64xf32> -> vector<16x64xf32>
    %c1_194 = arith.constant 1 : index
    %c0_195 = arith.constant 0 : index
    %c0_196 = arith.constant 0 : index
    %c0_197 = arith.constant 0 : index
    %281 = vector.load %arg7[%c1_194, %c0_195, %c0_196, %c0_197] : memref<2x4x1x64xf32, #tpu.memory_space<vmem>>, vector<1x1x1x64xf32>
    %282 = vector.shape_cast %281 : vector<1x1x1x64xf32> to vector<1x64xf32>
    %283 = vector.broadcast %282 : vector<1x64xf32> to vector<16x64xf32>
    %284 = arith.addf %280, %283 : vector<16x64xf32>
    %285 = arith.truncf %284 : vector<16x64xf32> to vector<16x64xbf16>
    %c1_198 = arith.constant 1 : index
    %c0_199 = arith.constant 0 : index
    %c0_200 = arith.constant 0 : index
    %c0_201 = arith.constant 0 : index
    %286 = vector.load %arg8[%c1_198, %c0_199, %c0_200, %c0_201] : memref<2x4x256x64xbf16, #tpu.memory_space<vmem>>, vector<1x1x256x64xbf16>
    %287 = vector.shape_cast %286 : vector<1x1x256x64xbf16> to vector<256x64xbf16>
    %cst_202 = arith.constant dense<0.000000e+00> : vector<16x64xf32>
    %288 = tpu.matmul %275, %287, %cst_202 {dimension_numbers = #tpu.dot_dimension_numbers<[1], [0], [0], [1], [0, 0, 1, 1], [], []>} : vector<16x256xbf16>, vector<256x64xbf16>, vector<16x64xf32> -> vector<16x64xf32>
    %c1_203 = arith.constant 1 : index
    %c0_204 = arith.constant 0 : index
    %c0_205 = arith.constant 0 : index
    %c0_206 = arith.constant 0 : index
    %289 = vector.load %arg9[%c1_203, %c0_204, %c0_205, %c0_206] : memref<2x4x1x64xf32, #tpu.memory_space<vmem>>, vector<1x1x1x64xf32>
    %290 = vector.shape_cast %289 : vector<1x1x1x64xf32> to vector<1x64xf32>
    %291 = vector.broadcast %290 : vector<1x64xf32> to vector<16x64xf32>
    %292 = arith.addf %288, %291 : vector<16x64xf32>
    %293 = arith.truncf %292 : vector<16x64xf32> to vector<16x64xbf16>
    %c1_207 = arith.constant 1 : index
    %c0_208 = arith.constant 0 : index
    %c0_209 = arith.constant 0 : index
    %c0_210 = arith.constant 0 : index
    %294 = vector.load %arg10[%c1_207, %c0_208, %c0_209, %c0_210] : memref<2x4x256x64xbf16, #tpu.memory_space<vmem>>, vector<1x1x256x64xbf16>
    %295 = vector.shape_cast %294 : vector<1x1x256x64xbf16> to vector<256x64xbf16>
    %cst_211 = arith.constant dense<0.000000e+00> : vector<16x64xf32>
    %296 = tpu.matmul %276, %295, %cst_211 {dimension_numbers = #tpu.dot_dimension_numbers<[1], [0], [0], [1], [0, 0, 1, 1], [], []>} : vector<16x256xbf16>, vector<256x64xbf16>, vector<16x64xf32> -> vector<16x64xf32>
    %c1_212 = arith.constant 1 : index
    %c0_213 = arith.constant 0 : index
    %c0_214 = arith.constant 0 : index
    %c0_215 = arith.constant 0 : index
    %297 = vector.load %arg11[%c1_212, %c0_213, %c0_214, %c0_215] : memref<2x4x1x64xf32, #tpu.memory_space<vmem>>, vector<1x1x1x64xf32>
    %298 = vector.shape_cast %297 : vector<1x1x1x64xf32> to vector<1x64xf32>
    %299 = vector.broadcast %298 : vector<1x64xf32> to vector<16x64xf32>
    %300 = arith.addf %296, %299 : vector<16x64xf32>
    %301 = arith.truncf %300 : vector<16x64xf32> to vector<16x64xbf16>
    %302 = vector.shape_cast %285 : vector<16x64xbf16> to vector<1x16x64xbf16>
    %303 = vector.shape_cast %293 : vector<16x64xbf16> to vector<1x16x64xbf16>
    %cst_216 = arith.constant dense<0.000000e+00> : vector<1x16x16xf32>
    %304 = tpu.matmul %302, %303, %cst_216 {dimension_numbers = #tpu.dot_dimension_numbers<[2], [2], [1], [1], [0, 0, 0, 1, 1, 1], [0], [0]>} : vector<1x16x64xbf16>, vector<1x16x64xbf16>, vector<1x16x16xf32> -> vector<1x16x16xf32>
    %305 = arith.addf %304, %4 : vector<1x16x16xf32>
    %cst_217 = arith.constant dense<0xFF800000> : vector<1x16xf32>
    %306 = vector.multi_reduction <maximumf>, %305, %cst_217 [2] : vector<1x16x16xf32> to vector<1x16xf32>
    %307 = vector.shape_cast %306 : vector<1x16xf32> to vector<1x16x1xf32>
    %308 = vector.broadcast %307 : vector<1x16x1xf32> to vector<1x16x16xf32>
    %309 = arith.subf %305, %308 : vector<1x16x16xf32>
    %310 = math.exp %309 : vector<1x16x16xf32>
    %cst_218 = arith.constant dense<0.000000e+00> : vector<1x16xf32>
    %311 = vector.multi_reduction <add>, %310, %cst_218 [2] : vector<1x16x16xf32> to vector<1x16xf32>
    %312 = vector.shape_cast %311 : vector<1x16xf32> to vector<1x16x1xf32>
    %313 = tpu.reciprocal %312 : vector<1x16x1xf32> -> vector<1x16x1xf32>
    %314 = vector.broadcast %313 : vector<1x16x1xf32> to vector<1x16x16xf32>
    %315 = arith.mulf %310, %314 : vector<1x16x16xf32>
    %316 = arith.addf %277, %315 : vector<1x16x16xf32>
    %317 = arith.truncf %315 : vector<1x16x16xf32> to vector<1x16x16xbf16>
    %318 = vector.shape_cast %301 : vector<16x64xbf16> to vector<1x16x64xbf16>
    %cst_219 = arith.constant dense<0.000000e+00> : vector<1x16x64xf32>
    %319 = tpu.matmul %317, %318, %cst_219 {dimension_numbers = #tpu.dot_dimension_numbers<[2], [1], [1], [2], [0, 0, 0, 1, 1, 2], [0], [0]>} : vector<1x16x16xbf16>, vector<1x16x64xbf16>, vector<1x16x64xf32> -> vector<1x16x64xf32>
    %320 = vector.shape_cast %319 : vector<1x16x64xf32> to vector<16x64xf32>
    %321 = arith.truncf %320 : vector<16x64xf32> to vector<16x64xbf16>
    %c0_220 = arith.constant 0 : index
    %c0_221 = arith.constant 0 : index
    %322 = vector.load %arg27[%c0_220, %c0_221] : memref<16x256xbf16, #tpu.memory_space<vmem>>, vector<16x64xbf16>
    tpu.vector_store %arg27[%c0_220, %c0_221], %321 {strides = array<i32>} : memref<16x256xbf16, #tpu.memory_space<vmem>>, vector<16x64xbf16>,
    %c1_222 = arith.constant 1 : index
    %c1_223 = arith.constant 1 : index
    %c0_224 = arith.constant 0 : index
    %c0_225 = arith.constant 0 : index
    %323 = vector.load %arg6[%c1_222, %c1_223, %c0_224, %c0_225] : memref<2x4x256x64xbf16, #tpu.memory_space<vmem>>, vector<1x1x256x64xbf16>
    %324 = vector.shape_cast %323 : vector<1x1x256x64xbf16> to vector<256x64xbf16>
    %cst_226 = arith.constant dense<0.000000e+00> : vector<16x64xf32>
    %325 = tpu.matmul %275, %324, %cst_226 {dimension_numbers = #tpu.dot_dimension_numbers<[1], [0], [0], [1], [0, 0, 1, 1], [], []>} : vector<16x256xbf16>, vector<256x64xbf16>, vector<16x64xf32> -> vector<16x64xf32>
    %c1_227 = arith.constant 1 : index
    %c1_228 = arith.constant 1 : index
    %c0_229 = arith.constant 0 : index
    %c0_230 = arith.constant 0 : index
    %326 = vector.load %arg7[%c1_227, %c1_228, %c0_229, %c0_230] : memref<2x4x1x64xf32, #tpu.memory_space<vmem>>, vector<1x1x1x64xf32>
    %327 = vector.shape_cast %326 : vector<1x1x1x64xf32> to vector<1x64xf32>
    %328 = vector.broadcast %327 : vector<1x64xf32> to vector<16x64xf32>
    %329 = arith.addf %325, %328 : vector<16x64xf32>
    %330 = arith.truncf %329 : vector<16x64xf32> to vector<16x64xbf16>
    %c1_231 = arith.constant 1 : index
    %c1_232 = arith.constant 1 : index
    %c0_233 = arith.constant 0 : index
    %c0_234 = arith.constant 0 : index
    %331 = vector.load %arg8[%c1_231, %c1_232, %c0_233, %c0_234] : memref<2x4x256x64xbf16, #tpu.memory_space<vmem>>, vector<1x1x256x64xbf16>
    %332 = vector.shape_cast %331 : vector<1x1x256x64xbf16> to vector<256x64xbf16>
    %cst_235 = arith.constant dense<0.000000e+00> : vector<16x64xf32>
    %333 = tpu.matmul %275, %332, %cst_235 {dimension_numbers = #tpu.dot_dimension_numbers<[1], [0], [0], [1], [0, 0, 1, 1], [], []>} : vector<16x256xbf16>, vector<256x64xbf16>, vector<16x64xf32> -> vector<16x64xf32>
    %c1_236 = arith.constant 1 : index
    %c1_237 = arith.constant 1 : index
    %c0_238 = arith.constant 0 : index
    %c0_239 = arith.constant 0 : index
    %334 = vector.load %arg9[%c1_236, %c1_237, %c0_238, %c0_239] : memref<2x4x1x64xf32, #tpu.memory_space<vmem>>, vector<1x1x1x64xf32>
    %335 = vector.shape_cast %334 : vector<1x1x1x64xf32> to vector<1x64xf32>
    %336 = vector.broadcast %335 : vector<1x64xf32> to vector<16x64xf32>
    %337 = arith.addf %333, %336 : vector<16x64xf32>
    %338 = arith.truncf %337 : vector<16x64xf32> to vector<16x64xbf16>
    %c1_240 = arith.constant 1 : index
    %c1_241 = arith.constant 1 : index
    %c0_242 = arith.constant 0 : index
    %c0_243 = arith.constant 0 : index
    %339 = vector.load %arg10[%c1_240, %c1_241, %c0_242, %c0_243] : memref<2x4x256x64xbf16, #tpu.memory_space<vmem>>, vector<1x1x256x64xbf16>
    %340 = vector.shape_cast %339 : vector<1x1x256x64xbf16> to vector<256x64xbf16>
    %cst_244 = arith.constant dense<0.000000e+00> : vector<16x64xf32>
    %341 = tpu.matmul %276, %340, %cst_244 {dimension_numbers = #tpu.dot_dimension_numbers<[1], [0], [0], [1], [0, 0, 1, 1], [], []>} : vector<16x256xbf16>, vector<256x64xbf16>, vector<16x64xf32> -> vector<16x64xf32>
    %c1_245 = arith.constant 1 : index
    %c1_246 = arith.constant 1 : index
    %c0_247 = arith.constant 0 : index
    %c0_248 = arith.constant 0 : index
    %342 = vector.load %arg11[%c1_245, %c1_246, %c0_247, %c0_248] : memref<2x4x1x64xf32, #tpu.memory_space<vmem>>, vector<1x1x1x64xf32>
    %343 = vector.shape_cast %342 : vector<1x1x1x64xf32> to vector<1x64xf32>
    %344 = vector.broadcast %343 : vector<1x64xf32> to vector<16x64xf32>
    %345 = arith.addf %341, %344 : vector<16x64xf32>
    %346 = arith.truncf %345 : vector<16x64xf32> to vector<16x64xbf16>
    %347 = vector.shape_cast %330 : vector<16x64xbf16> to vector<1x16x64xbf16>
    %348 = vector.shape_cast %338 : vector<16x64xbf16> to vector<1x16x64xbf16>
    %cst_249 = arith.constant dense<0.000000e+00> : vector<1x16x16xf32>
    %349 = tpu.matmul %347, %348, %cst_249 {dimension_numbers = #tpu.dot_dimension_numbers<[2], [2], [1], [1], [0, 0, 0, 1, 1, 1], [0], [0]>} : vector<1x16x64xbf16>, vector<1x16x64xbf16>, vector<1x16x16xf32> -> vector<1x16x16xf32>
    %350 = arith.addf %349, %4 : vector<1x16x16xf32>
    %cst_250 = arith.constant dense<0xFF800000> : vector<1x16xf32>
    %351 = vector.multi_reduction <maximumf>, %350, %cst_250 [2] : vector<1x16x16xf32> to vector<1x16xf32>
    %352 = vector.shape_cast %351 : vector<1x16xf32> to vector<1x16x1xf32>
    %353 = vector.broadcast %352 : vector<1x16x1xf32> to vector<1x16x16xf32>
    %354 = arith.subf %350, %353 : vector<1x16x16xf32>
    %355 = math.exp %354 : vector<1x16x16xf32>
    %cst_251 = arith.constant dense<0.000000e+00> : vector<1x16xf32>
    %356 = vector.multi_reduction <add>, %355, %cst_251 [2] : vector<1x16x16xf32> to vector<1x16xf32>
    %357 = vector.shape_cast %356 : vector<1x16xf32> to vector<1x16x1xf32>
    %358 = tpu.reciprocal %357 : vector<1x16x1xf32> -> vector<1x16x1xf32>
    %359 = vector.broadcast %358 : vector<1x16x1xf32> to vector<1x16x16xf32>
    %360 = arith.mulf %355, %359 : vector<1x16x16xf32>
    %361 = arith.addf %316, %360 : vector<1x16x16xf32>
    %362 = arith.truncf %360 : vector<1x16x16xf32> to vector<1x16x16xbf16>
    %363 = vector.shape_cast %346 : vector<16x64xbf16> to vector<1x16x64xbf16>
    %cst_252 = arith.constant dense<0.000000e+00> : vector<1x16x64xf32>
    %364 = tpu.matmul %362, %363, %cst_252 {dimension_numbers = #tpu.dot_dimension_numbers<[2], [1], [1], [2], [0, 0, 0, 1, 1, 2], [0], [0]>} : vector<1x16x16xbf16>, vector<1x16x64xbf16>, vector<1x16x64xf32> -> vector<1x16x64xf32>
    %365 = vector.shape_cast %364 : vector<1x16x64xf32> to vector<16x64xf32>
    %366 = arith.truncf %365 : vector<16x64xf32> to vector<16x64xbf16>
    %c0_253 = arith.constant 0 : index
    %c64_254 = arith.constant 64 : index
    %367 = vector.load %arg27[%c0_253, %c64_254] : memref<16x256xbf16, #tpu.memory_space<vmem>>, vector<16x64xbf16>
    tpu.vector_store %arg27[%c0_253, %c64_254], %366 {strides = array<i32>} : memref<16x256xbf16, #tpu.memory_space<vmem>>, vector<16x64xbf16>,
    %c1_255 = arith.constant 1 : index
    %c2_256 = arith.constant 2 : index
    %c0_257 = arith.constant 0 : index
    %c0_258 = arith.constant 0 : index
    %368 = vector.load %arg6[%c1_255, %c2_256, %c0_257, %c0_258] : memref<2x4x256x64xbf16, #tpu.memory_space<vmem>>, vector<1x1x256x64xbf16>
    %369 = vector.shape_cast %368 : vector<1x1x256x64xbf16> to vector<256x64xbf16>
    %cst_259 = arith.constant dense<0.000000e+00> : vector<16x64xf32>
    %370 = tpu.matmul %275, %369, %cst_259 {dimension_numbers = #tpu.dot_dimension_numbers<[1], [0], [0], [1], [0, 0, 1, 1], [], []>} : vector<16x256xbf16>, vector<256x64xbf16>, vector<16x64xf32> -> vector<16x64xf32>
    %c1_260 = arith.constant 1 : index
    %c2_261 = arith.constant 2 : index
    %c0_262 = arith.constant 0 : index
    %c0_263 = arith.constant 0 : index
    %371 = vector.load %arg7[%c1_260, %c2_261, %c0_262, %c0_263] : memref<2x4x1x64xf32, #tpu.memory_space<vmem>>, vector<1x1x1x64xf32>
    %372 = vector.shape_cast %371 : vector<1x1x1x64xf32> to vector<1x64xf32>
    %373 = vector.broadcast %372 : vector<1x64xf32> to vector<16x64xf32>
    %374 = arith.addf %370, %373 : vector<16x64xf32>
    %375 = arith.truncf %374 : vector<16x64xf32> to vector<16x64xbf16>
    %c1_264 = arith.constant 1 : index
    %c2_265 = arith.constant 2 : index
    %c0_266 = arith.constant 0 : index
    %c0_267 = arith.constant 0 : index
    %376 = vector.load %arg8[%c1_264, %c2_265, %c0_266, %c0_267] : memref<2x4x256x64xbf16, #tpu.memory_space<vmem>>, vector<1x1x256x64xbf16>
    %377 = vector.shape_cast %376 : vector<1x1x256x64xbf16> to vector<256x64xbf16>
    %cst_268 = arith.constant dense<0.000000e+00> : vector<16x64xf32>
    %378 = tpu.matmul %275, %377, %cst_268 {dimension_numbers = #tpu.dot_dimension_numbers<[1], [0], [0], [1], [0, 0, 1, 1], [], []>} : vector<16x256xbf16>, vector<256x64xbf16>, vector<16x64xf32> -> vector<16x64xf32>
    %c1_269 = arith.constant 1 : index
    %c2_270 = arith.constant 2 : index
    %c0_271 = arith.constant 0 : index
    %c0_272 = arith.constant 0 : index
    %379 = vector.load %arg9[%c1_269, %c2_270, %c0_271, %c0_272] : memref<2x4x1x64xf32, #tpu.memory_space<vmem>>, vector<1x1x1x64xf32>
    %380 = vector.shape_cast %379 : vector<1x1x1x64xf32> to vector<1x64xf32>
    %381 = vector.broadcast %380 : vector<1x64xf32> to vector<16x64xf32>
    %382 = arith.addf %378, %381 : vector<16x64xf32>
    %383 = arith.truncf %382 : vector<16x64xf32> to vector<16x64xbf16>
    %c1_273 = arith.constant 1 : index
    %c2_274 = arith.constant 2 : index
    %c0_275 = arith.constant 0 : index
    %c0_276 = arith.constant 0 : index
    %384 = vector.load %arg10[%c1_273, %c2_274, %c0_275, %c0_276] : memref<2x4x256x64xbf16, #tpu.memory_space<vmem>>, vector<1x1x256x64xbf16>
    %385 = vector.shape_cast %384 : vector<1x1x256x64xbf16> to vector<256x64xbf16>
    %cst_277 = arith.constant dense<0.000000e+00> : vector<16x64xf32>
    %386 = tpu.matmul %276, %385, %cst_277 {dimension_numbers = #tpu.dot_dimension_numbers<[1], [0], [0], [1], [0, 0, 1, 1], [], []>} : vector<16x256xbf16>, vector<256x64xbf16>, vector<16x64xf32> -> vector<16x64xf32>
    %c1_278 = arith.constant 1 : index
    %c2_279 = arith.constant 2 : index
    %c0_280 = arith.constant 0 : index
    %c0_281 = arith.constant 0 : index
    %387 = vector.load %arg11[%c1_278, %c2_279, %c0_280, %c0_281] : memref<2x4x1x64xf32, #tpu.memory_space<vmem>>, vector<1x1x1x64xf32>
    %388 = vector.shape_cast %387 : vector<1x1x1x64xf32> to vector<1x64xf32>
    %389 = vector.broadcast %388 : vector<1x64xf32> to vector<16x64xf32>
    %390 = arith.addf %386, %389 : vector<16x64xf32>
    %391 = arith.truncf %390 : vector<16x64xf32> to vector<16x64xbf16>
    %392 = vector.shape_cast %375 : vector<16x64xbf16> to vector<1x16x64xbf16>
    %393 = vector.shape_cast %383 : vector<16x64xbf16> to vector<1x16x64xbf16>
    %cst_282 = arith.constant dense<0.000000e+00> : vector<1x16x16xf32>
    %394 = tpu.matmul %392, %393, %cst_282 {dimension_numbers = #tpu.dot_dimension_numbers<[2], [2], [1], [1], [0, 0, 0, 1, 1, 1], [0], [0]>} : vector<1x16x64xbf16>, vector<1x16x64xbf16>, vector<1x16x16xf32> -> vector<1x16x16xf32>
    %395 = arith.addf %394, %4 : vector<1x16x16xf32>
    %cst_283 = arith.constant dense<0xFF800000> : vector<1x16xf32>
    %396 = vector.multi_reduction <maximumf>, %395, %cst_283 [2] : vector<1x16x16xf32> to vector<1x16xf32>
    %397 = vector.shape_cast %396 : vector<1x16xf32> to vector<1x16x1xf32>
    %398 = vector.broadcast %397 : vector<1x16x1xf32> to vector<1x16x16xf32>
    %399 = arith.subf %395, %398 : vector<1x16x16xf32>
    %400 = math.exp %399 : vector<1x16x16xf32>
    %cst_284 = arith.constant dense<0.000000e+00> : vector<1x16xf32>
    %401 = vector.multi_reduction <add>, %400, %cst_284 [2] : vector<1x16x16xf32> to vector<1x16xf32>
    %402 = vector.shape_cast %401 : vector<1x16xf32> to vector<1x16x1xf32>
    %403 = tpu.reciprocal %402 : vector<1x16x1xf32> -> vector<1x16x1xf32>
    %404 = vector.broadcast %403 : vector<1x16x1xf32> to vector<1x16x16xf32>
    %405 = arith.mulf %400, %404 : vector<1x16x16xf32>
    %406 = arith.addf %361, %405 : vector<1x16x16xf32>
    %407 = arith.truncf %405 : vector<1x16x16xf32> to vector<1x16x16xbf16>
    %408 = vector.shape_cast %391 : vector<16x64xbf16> to vector<1x16x64xbf16>
    %cst_285 = arith.constant dense<0.000000e+00> : vector<1x16x64xf32>
    %409 = tpu.matmul %407, %408, %cst_285 {dimension_numbers = #tpu.dot_dimension_numbers<[2], [1], [1], [2], [0, 0, 0, 1, 1, 2], [0], [0]>} : vector<1x16x16xbf16>, vector<1x16x64xbf16>, vector<1x16x64xf32> -> vector<1x16x64xf32>
    %410 = vector.shape_cast %409 : vector<1x16x64xf32> to vector<16x64xf32>
    %411 = arith.truncf %410 : vector<16x64xf32> to vector<16x64xbf16>
    %c0_286 = arith.constant 0 : index
    %c128_287 = arith.constant 128 : index
    %412 = vector.load %arg27[%c0_286, %c128_287] : memref<16x256xbf16, #tpu.memory_space<vmem>>, vector<16x64xbf16>
    tpu.vector_store %arg27[%c0_286, %c128_287], %411 {strides = array<i32>} : memref<16x256xbf16, #tpu.memory_space<vmem>>, vector<16x64xbf16>,
    %c1_288 = arith.constant 1 : index
    %c3_289 = arith.constant 3 : index
    %c0_290 = arith.constant 0 : index
    %c0_291 = arith.constant 0 : index
    %413 = vector.load %arg6[%c1_288, %c3_289, %c0_290, %c0_291] : memref<2x4x256x64xbf16, #tpu.memory_space<vmem>>, vector<1x1x256x64xbf16>
    %414 = vector.shape_cast %413 : vector<1x1x256x64xbf16> to vector<256x64xbf16>
    %cst_292 = arith.constant dense<0.000000e+00> : vector<16x64xf32>
    %415 = tpu.matmul %275, %414, %cst_292 {dimension_numbers = #tpu.dot_dimension_numbers<[1], [0], [0], [1], [0, 0, 1, 1], [], []>} : vector<16x256xbf16>, vector<256x64xbf16>, vector<16x64xf32> -> vector<16x64xf32>
    %c1_293 = arith.constant 1 : index
    %c3_294 = arith.constant 3 : index
    %c0_295 = arith.constant 0 : index
    %c0_296 = arith.constant 0 : index
    %416 = vector.load %arg7[%c1_293, %c3_294, %c0_295, %c0_296] : memref<2x4x1x64xf32, #tpu.memory_space<vmem>>, vector<1x1x1x64xf32>
    %417 = vector.shape_cast %416 : vector<1x1x1x64xf32> to vector<1x64xf32>
    %418 = vector.broadcast %417 : vector<1x64xf32> to vector<16x64xf32>
    %419 = arith.addf %415, %418 : vector<16x64xf32>
    %420 = arith.truncf %419 : vector<16x64xf32> to vector<16x64xbf16>
    %c1_297 = arith.constant 1 : index
    %c3_298 = arith.constant 3 : index
    %c0_299 = arith.constant 0 : index
    %c0_300 = arith.constant 0 : index
    %421 = vector.load %arg8[%c1_297, %c3_298, %c0_299, %c0_300] : memref<2x4x256x64xbf16, #tpu.memory_space<vmem>>, vector<1x1x256x64xbf16>
    %422 = vector.shape_cast %421 : vector<1x1x256x64xbf16> to vector<256x64xbf16>
    %cst_301 = arith.constant dense<0.000000e+00> : vector<16x64xf32>
    %423 = tpu.matmul %275, %422, %cst_301 {dimension_numbers = #tpu.dot_dimension_numbers<[1], [0], [0], [1], [0, 0, 1, 1], [], []>} : vector<16x256xbf16>, vector<256x64xbf16>, vector<16x64xf32> -> vector<16x64xf32>
    %c1_302 = arith.constant 1 : index
    %c3_303 = arith.constant 3 : index
    %c0_304 = arith.constant 0 : index
    %c0_305 = arith.constant 0 : index
    %424 = vector.load %arg9[%c1_302, %c3_303, %c0_304, %c0_305] : memref<2x4x1x64xf32, #tpu.memory_space<vmem>>, vector<1x1x1x64xf32>
    %425 = vector.shape_cast %424 : vector<1x1x1x64xf32> to vector<1x64xf32>
    %426 = vector.broadcast %425 : vector<1x64xf32> to vector<16x64xf32>
    %427 = arith.addf %423, %426 : vector<16x64xf32>
    %428 = arith.truncf %427 : vector<16x64xf32> to vector<16x64xbf16>
    %c1_306 = arith.constant 1 : index
    %c3_307 = arith.constant 3 : index
    %c0_308 = arith.constant 0 : index
    %c0_309 = arith.constant 0 : index
    %429 = vector.load %arg10[%c1_306, %c3_307, %c0_308, %c0_309] : memref<2x4x256x64xbf16, #tpu.memory_space<vmem>>, vector<1x1x256x64xbf16>
    %430 = vector.shape_cast %429 : vector<1x1x256x64xbf16> to vector<256x64xbf16>
    %cst_310 = arith.constant dense<0.000000e+00> : vector<16x64xf32>
    %431 = tpu.matmul %276, %430, %cst_310 {dimension_numbers = #tpu.dot_dimension_numbers<[1], [0], [0], [1], [0, 0, 1, 1], [], []>} : vector<16x256xbf16>, vector<256x64xbf16>, vector<16x64xf32> -> vector<16x64xf32>
    %c1_311 = arith.constant 1 : index
    %c3_312 = arith.constant 3 : index
    %c0_313 = arith.constant 0 : index
    %c0_314 = arith.constant 0 : index
    %432 = vector.load %arg11[%c1_311, %c3_312, %c0_313, %c0_314] : memref<2x4x1x64xf32, #tpu.memory_space<vmem>>, vector<1x1x1x64xf32>
    %433 = vector.shape_cast %432 : vector<1x1x1x64xf32> to vector<1x64xf32>
    %434 = vector.broadcast %433 : vector<1x64xf32> to vector<16x64xf32>
    %435 = arith.addf %431, %434 : vector<16x64xf32>
    %436 = arith.truncf %435 : vector<16x64xf32> to vector<16x64xbf16>
    %437 = vector.shape_cast %420 : vector<16x64xbf16> to vector<1x16x64xbf16>
    %438 = vector.shape_cast %428 : vector<16x64xbf16> to vector<1x16x64xbf16>
    %cst_315 = arith.constant dense<0.000000e+00> : vector<1x16x16xf32>
    %439 = tpu.matmul %437, %438, %cst_315 {dimension_numbers = #tpu.dot_dimension_numbers<[2], [2], [1], [1], [0, 0, 0, 1, 1, 1], [0], [0]>} : vector<1x16x64xbf16>, vector<1x16x64xbf16>, vector<1x16x16xf32> -> vector<1x16x16xf32>
    %440 = arith.addf %439, %4 : vector<1x16x16xf32>
    %cst_316 = arith.constant dense<0xFF800000> : vector<1x16xf32>
    %441 = vector.multi_reduction <maximumf>, %440, %cst_316 [2] : vector<1x16x16xf32> to vector<1x16xf32>
    %442 = vector.shape_cast %441 : vector<1x16xf32> to vector<1x16x1xf32>
    %443 = vector.broadcast %442 : vector<1x16x1xf32> to vector<1x16x16xf32>
    %444 = arith.subf %440, %443 : vector<1x16x16xf32>
    %445 = math.exp %444 : vector<1x16x16xf32>
    %cst_317 = arith.constant dense<0.000000e+00> : vector<1x16xf32>
    %446 = vector.multi_reduction <add>, %445, %cst_317 [2] : vector<1x16x16xf32> to vector<1x16xf32>
    %447 = vector.shape_cast %446 : vector<1x16xf32> to vector<1x16x1xf32>
    %448 = tpu.reciprocal %447 : vector<1x16x1xf32> -> vector<1x16x1xf32>
    %449 = vector.broadcast %448 : vector<1x16x1xf32> to vector<1x16x16xf32>
    %450 = arith.mulf %445, %449 : vector<1x16x16xf32>
    %451 = arith.addf %406, %450 : vector<1x16x16xf32>
    %452 = arith.truncf %450 : vector<1x16x16xf32> to vector<1x16x16xbf16>
    %453 = vector.shape_cast %436 : vector<16x64xbf16> to vector<1x16x64xbf16>
    %cst_318 = arith.constant dense<0.000000e+00> : vector<1x16x64xf32>
    %454 = tpu.matmul %452, %453, %cst_318 {dimension_numbers = #tpu.dot_dimension_numbers<[2], [1], [1], [2], [0, 0, 0, 1, 1, 2], [0], [0]>} : vector<1x16x16xbf16>, vector<1x16x64xbf16>, vector<1x16x64xf32> -> vector<1x16x64xf32>
    %455 = vector.shape_cast %454 : vector<1x16x64xf32> to vector<16x64xf32>
    %456 = arith.truncf %455 : vector<16x64xf32> to vector<16x64xbf16>
    %c0_319 = arith.constant 0 : index
    %c192_320 = arith.constant 192 : index
    %457 = vector.load %arg27[%c0_319, %c192_320] : memref<16x256xbf16, #tpu.memory_space<vmem>>, vector<16x64xbf16>
    tpu.vector_store %arg27[%c0_319, %c192_320], %456 {strides = array<i32>} : memref<16x256xbf16, #tpu.memory_space<vmem>>, vector<16x64xbf16>,
    %c0_321 = arith.constant 0 : index
    %c0_322 = arith.constant 0 : index
    %458 = vector.load %arg27[%c0_321, %c0_322] : memref<16x256xbf16, #tpu.memory_space<vmem>>, vector<16x256xbf16>
    %c1_323 = arith.constant 1 : index
    %c0_324 = arith.constant 0 : index
    %c0_325 = arith.constant 0 : index
    %459 = vector.load %arg12[%c1_323, %c0_324, %c0_325] : memref<2x256x256xbf16, #tpu.memory_space<vmem>>, vector<1x256x256xbf16>
    %460 = vector.shape_cast %459 : vector<1x256x256xbf16> to vector<256x256xbf16>
    %cst_326 = arith.constant dense<0.000000e+00> : vector<16x256xf32>
    %461 = tpu.matmul %458, %460, %cst_326 {dimension_numbers = #tpu.dot_dimension_numbers<[1], [0], [0], [1], [0, 0, 1, 1], [], []>} : vector<16x256xbf16>, vector<256x256xbf16>, vector<16x256xf32> -> vector<16x256xf32>
    %c1_327 = arith.constant 1 : index
    %c0_328 = arith.constant 0 : index
    %c0_329 = arith.constant 0 : index
    %462 = vector.load %arg13[%c1_327, %c0_328, %c0_329] : memref<2x1x256xf32, #tpu.memory_space<vmem>>, vector<1x1x256xf32>
    %463 = vector.shape_cast %462 : vector<1x1x256xf32> to vector<1x256xf32>
    %464 = vector.broadcast %463 : vector<1x256xf32> to vector<16x256xf32>
    %465 = arith.addf %461, %464 : vector<16x256xf32>
    %466 = arith.addf %270, %465 : vector<16x256xf32>
    %c1_330 = arith.constant 1 : index
    %c0_331 = arith.constant 0 : index
    %c0_332 = arith.constant 0 : index
    %467 = vector.load %arg14[%c1_330, %c0_331, %c0_332] : memref<2x1x256xf32, #tpu.memory_space<vmem>>, vector<1x1x256xf32>
    %468 = vector.shape_cast %467 : vector<1x1x256xf32> to vector<1x256xf32>
    %c1_333 = arith.constant 1 : index
    %c0_334 = arith.constant 0 : index
    %c0_335 = arith.constant 0 : index
    %469 = vector.load %arg15[%c1_333, %c0_334, %c0_335] : memref<2x1x256xf32, #tpu.memory_space<vmem>>, vector<1x1x256xf32>
    %470 = vector.shape_cast %469 : vector<1x1x256xf32> to vector<1x256xf32>
    %cst_336 = arith.constant dense<0.000000e+00> : vector<16xf32>
    %471 = vector.multi_reduction <add>, %466, %cst_336 [1] : vector<16x256xf32> to vector<16xf32>
    %472 = vector.shape_cast %471 : vector<16xf32> to vector<16x1xf32>
    %cst_337 = arith.constant 2.560000e+02 : f32
    %473 = vector.broadcast %cst_337 : f32 to vector<16x1xf32>
    %474 = arith.divf %472, %473 : vector<16x1xf32>
    %475 = vector.broadcast %474 : vector<16x1xf32> to vector<16x256xf32>
    %476 = arith.subf %466, %475 : vector<16x256xf32>
    %477 = arith.mulf %476, %476 : vector<16x256xf32>
    %cst_338 = arith.constant dense<0.000000e+00> : vector<16xf32>
    %478 = vector.multi_reduction <add>, %477, %cst_338 [1] : vector<16x256xf32> to vector<16xf32>
    %479 = vector.shape_cast %478 : vector<16xf32> to vector<16x1xf32>
    %cst_339 = arith.constant 2.560000e+02 : f32
    %480 = vector.broadcast %cst_339 : f32 to vector<16x1xf32>
    %481 = arith.divf %479, %480 : vector<16x1xf32>
    %cst_340 = arith.constant 9.99999974E-6 : f32
    %482 = vector.broadcast %cst_340 : f32 to vector<16x1xf32>
    %483 = arith.addf %481, %482 : vector<16x1xf32>
    %484 = math.rsqrt %483 : vector<16x1xf32>
    %485 = vector.broadcast %484 : vector<16x1xf32> to vector<16x256xf32>
    %486 = arith.mulf %476, %485 : vector<16x256xf32>
    %487 = vector.broadcast %468 : vector<1x256xf32> to vector<16x256xf32>
    %488 = arith.mulf %486, %487 : vector<16x256xf32>
    %489 = vector.broadcast %470 : vector<1x256xf32> to vector<16x256xf32>
    %490 = arith.addf %488, %489 : vector<16x256xf32>
    %491 = arith.truncf %490 : vector<16x256xf32> to vector<16x256xbf16>
    %c1_341 = arith.constant 1 : index
    %c0_342 = arith.constant 0 : index
    %c0_343 = arith.constant 0 : index
    %492 = vector.load %arg16[%c1_341, %c0_342, %c0_343] : memref<2x256x512xbf16, #tpu.memory_space<vmem>>, vector<1x256x512xbf16>
    %493 = vector.shape_cast %492 : vector<1x256x512xbf16> to vector<256x512xbf16>
    %cst_344 = arith.constant dense<0.000000e+00> : vector<16x512xf32>
    %494 = tpu.matmul %491, %493, %cst_344 {dimension_numbers = #tpu.dot_dimension_numbers<[1], [0], [0], [1], [0, 0, 1, 1], [], []>} : vector<16x256xbf16>, vector<256x512xbf16>, vector<16x512xf32> -> vector<16x512xf32>
    %c1_345 = arith.constant 1 : index
    %c0_346 = arith.constant 0 : index
    %c0_347 = arith.constant 0 : index
    %495 = vector.load %arg17[%c1_345, %c0_346, %c0_347] : memref<2x1x512xf32, #tpu.memory_space<vmem>>, vector<1x1x512xf32>
    %496 = vector.shape_cast %495 : vector<1x1x512xf32> to vector<1x512xf32>
    %497 = vector.broadcast %496 : vector<1x512xf32> to vector<16x512xf32>
    %498 = arith.addf %494, %497 : vector<16x512xf32>
    %cst_348 = arith.constant 0.000000e+00 : f32
    %499 = vector.broadcast %cst_348 : f32 to vector<16x512xf32>
    %500 = arith.maximumf %498, %499 : vector<16x512xf32>
    %501 = arith.truncf %500 : vector<16x512xf32> to vector<16x512xbf16>
    %c1_349 = arith.constant 1 : index
    %c0_350 = arith.constant 0 : index
    %c0_351 = arith.constant 0 : index
    %502 = vector.load %arg18[%c1_349, %c0_350, %c0_351] : memref<2x512x256xbf16, #tpu.memory_space<vmem>>, vector<1x512x256xbf16>
    %503 = vector.shape_cast %502 : vector<1x512x256xbf16> to vector<512x256xbf16>
    %cst_352 = arith.constant dense<0.000000e+00> : vector<16x256xf32>
    %504 = tpu.matmul %501, %503, %cst_352 {dimension_numbers = #tpu.dot_dimension_numbers<[1], [0], [0], [1], [0, 0, 1, 1], [], []>} : vector<16x512xbf16>, vector<512x256xbf16>, vector<16x256xf32> -> vector<16x256xf32>
    %c1_353 = arith.constant 1 : index
    %c0_354 = arith.constant 0 : index
    %c0_355 = arith.constant 0 : index
    %505 = vector.load %arg19[%c1_353, %c0_354, %c0_355] : memref<2x1x256xf32, #tpu.memory_space<vmem>>, vector<1x1x256xf32>
    %506 = vector.shape_cast %505 : vector<1x1x256xf32> to vector<1x256xf32>
    %507 = vector.broadcast %506 : vector<1x256xf32> to vector<16x256xf32>
    %508 = arith.addf %504, %507 : vector<16x256xf32>
    %509 = arith.addf %490, %508 : vector<16x256xf32>
    %c1_356 = arith.constant 1 : index
    %c0_357 = arith.constant 0 : index
    %c0_358 = arith.constant 0 : index
    %510 = vector.load %arg20[%c1_356, %c0_357, %c0_358] : memref<2x1x256xf32, #tpu.memory_space<vmem>>, vector<1x1x256xf32>
    %511 = vector.shape_cast %510 : vector<1x1x256xf32> to vector<1x256xf32>
    %c1_359 = arith.constant 1 : index
    %c0_360 = arith.constant 0 : index
    %c0_361 = arith.constant 0 : index
    %512 = vector.load %arg21[%c1_359, %c0_360, %c0_361] : memref<2x1x256xf32, #tpu.memory_space<vmem>>, vector<1x1x256xf32>
    %513 = vector.shape_cast %512 : vector<1x1x256xf32> to vector<1x256xf32>
    %cst_362 = arith.constant dense<0.000000e+00> : vector<16xf32>
    %514 = vector.multi_reduction <add>, %509, %cst_362 [1] : vector<16x256xf32> to vector<16xf32>
    %515 = vector.shape_cast %514 : vector<16xf32> to vector<16x1xf32>
    %cst_363 = arith.constant 2.560000e+02 : f32
    %516 = vector.broadcast %cst_363 : f32 to vector<16x1xf32>
    %517 = arith.divf %515, %516 : vector<16x1xf32>
    %518 = vector.broadcast %517 : vector<16x1xf32> to vector<16x256xf32>
    %519 = arith.subf %509, %518 : vector<16x256xf32>
    %520 = arith.mulf %519, %519 : vector<16x256xf32>
    %cst_364 = arith.constant dense<0.000000e+00> : vector<16xf32>
    %521 = vector.multi_reduction <add>, %520, %cst_364 [1] : vector<16x256xf32> to vector<16xf32>
    %522 = vector.shape_cast %521 : vector<16xf32> to vector<16x1xf32>
    %cst_365 = arith.constant 2.560000e+02 : f32
    %523 = vector.broadcast %cst_365 : f32 to vector<16x1xf32>
    %524 = arith.divf %522, %523 : vector<16x1xf32>
    %cst_366 = arith.constant 9.99999974E-6 : f32
    %525 = vector.broadcast %cst_366 : f32 to vector<16x1xf32>
    %526 = arith.addf %524, %525 : vector<16x1xf32>
    %527 = math.rsqrt %526 : vector<16x1xf32>
    %528 = vector.broadcast %527 : vector<16x1xf32> to vector<16x256xf32>
    %529 = arith.mulf %519, %528 : vector<16x256xf32>
    %530 = vector.broadcast %511 : vector<1x256xf32> to vector<16x256xf32>
    %531 = arith.mulf %529, %530 : vector<16x256xf32>
    %532 = vector.broadcast %513 : vector<1x256xf32> to vector<16x256xf32>
    %533 = arith.addf %531, %532 : vector<16x256xf32>
    %cst_367 = arith.constant 2.500000e-01 : f32
    %534 = vector.broadcast %cst_367 : f32 to vector<1x16x16xf32>
    %535 = arith.mulf %451, %534 : vector<1x16x16xf32>
    %c0_368 = arith.constant 0 : index
    %c0_369 = arith.constant 0 : index
    %c0_370 = arith.constant 0 : index
    %536 = vector.load %arg26[%c0_368, %c0_369, %c0_370] : memref<1x16x16xf32, #tpu.memory_space<vmem>>, vector<1x16x16xf32>
    tpu.vector_store %arg26[%c0_368, %c0_369, %c0_370], %535 {strides = array<i32>} : memref<1x16x16xf32, #tpu.memory_space<vmem>>, vector<1x16x16xf32>,
    %537 = arith.truncf %533 : vector<16x256xf32> to vector<16x256xbf16>
    %c0_371 = arith.constant 0 : index
    %c0_372 = arith.constant 0 : index
    %538 = vector.load %arg22[%c0_371, %c0_372] : memref<256x12xbf16, #tpu.memory_space<vmem>>, vector<256x12xbf16>
    %cst_373 = arith.constant dense<0.000000e+00> : vector<16x12xf32>
    %539 = tpu.matmul %537, %538, %cst_373 {dimension_numbers = #tpu.dot_dimension_numbers<[1], [0], [0], [1], [0, 0, 1, 1], [], []>} : vector<16x256xbf16>, vector<256x12xbf16>, vector<16x12xf32> -> vector<16x12xf32>
    %c0_374 = arith.constant 0 : index
    %c0_375 = arith.constant 0 : index
    %540 = vector.load %arg23[%c0_374, %c0_375] : memref<1x12xf32, #tpu.memory_space<vmem>>, vector<1x12xf32>
    %541 = vector.broadcast %540 : vector<1x12xf32> to vector<16x12xf32>
    %542 = arith.addf %539, %541 : vector<16x12xf32>
    %543 = vector.extract_strided_slice %542 {offsets = [0, 0], sizes = [16, 3], strides = [1, 1]} : vector<16x12xf32> to vector<16x3xf32>
    %544 = arith.mulf %543, %543 : vector<16x3xf32>
    %cst_376 = arith.constant dense<0.000000e+00> : vector<16xf32>
    %545 = vector.multi_reduction <add>, %544, %cst_376 [1] : vector<16x3xf32> to vector<16xf32>
    %546 = vector.shape_cast %545 : vector<16xf32> to vector<16x1xf32>
    %cst_377 = arith.constant 1.000000e-24 : f32
    %547 = vector.broadcast %cst_377 : f32 to vector<16x1xf32>
    %548 = arith.maximumf %546, %547 : vector<16x1xf32>
    %549 = math.rsqrt %548 : vector<16x1xf32>
    %550 = vector.broadcast %549 : vector<16x1xf32> to vector<16x3xf32>
    %551 = arith.mulf %543, %550 : vector<16x3xf32>
    %552 = vector.extract_strided_slice %542 {offsets = [0, 3], sizes = [16, 3], strides = [1, 1]} : vector<16x12xf32> to vector<16x3xf32>
    %553 = arith.mulf %552, %552 : vector<16x3xf32>
    %cst_378 = arith.constant dense<0.000000e+00> : vector<16xf32>
    %554 = vector.multi_reduction <add>, %553, %cst_378 [1] : vector<16x3xf32> to vector<16xf32>
    %555 = vector.shape_cast %554 : vector<16xf32> to vector<16x1xf32>
    %cst_379 = arith.constant 1.000000e-24 : f32
    %556 = vector.broadcast %cst_379 : f32 to vector<16x1xf32>
    %557 = arith.maximumf %555, %556 : vector<16x1xf32>
    %558 = math.rsqrt %557 : vector<16x1xf32>
    %559 = vector.broadcast %558 : vector<16x1xf32> to vector<16x3xf32>
    %560 = arith.mulf %552, %559 : vector<16x3xf32>
    %561 = vector.extract_strided_slice %542 {offsets = [0, 6], sizes = [16, 3], strides = [1, 1]} : vector<16x12xf32> to vector<16x3xf32>
    %562 = arith.mulf %561, %561 : vector<16x3xf32>
    %cst_380 = arith.constant dense<0.000000e+00> : vector<16xf32>
    %563 = vector.multi_reduction <add>, %562, %cst_380 [1] : vector<16x3xf32> to vector<16xf32>
    %564 = vector.shape_cast %563 : vector<16xf32> to vector<16x1xf32>
    %cst_381 = arith.constant 1.000000e-24 : f32
    %565 = vector.broadcast %cst_381 : f32 to vector<16x1xf32>
    %566 = arith.maximumf %564, %565 : vector<16x1xf32>
    %567 = math.rsqrt %566 : vector<16x1xf32>
    %568 = vector.broadcast %567 : vector<16x1xf32> to vector<16x3xf32>
    %569 = arith.mulf %561, %568 : vector<16x3xf32>
    %570 = vector.extract_strided_slice %542 {offsets = [0, 9], sizes = [16, 3], strides = [1, 1]} : vector<16x12xf32> to vector<16x3xf32>
    %571 = tpu.concatenate %551, %560, %569, %570 in 1 : vector<16x3xf32>, vector<16x3xf32>, vector<16x3xf32>, vector<16x3xf32> -> vector<16x12xf32>
    %572 = vector.shape_cast %571 : vector<16x12xf32> to vector<1x16x12xf32>
    %c0_382 = arith.constant 0 : index
    %c0_383 = arith.constant 0 : index
    %c0_384 = arith.constant 0 : index
    %573 = vector.load %arg24[%c0_382, %c0_383, %c0_384] : memref<1x16x12xf32, #tpu.memory_space<vmem>>, vector<1x16x12xf32>
    tpu.vector_store %arg24[%c0_382, %c0_383, %c0_384], %572 {strides = array<i32>} : memref<1x16x12xf32, #tpu.memory_space<vmem>>, vector<1x16x12xf32>,
    return
  }
  func.func @transform_0(%arg0: i32) -> (i32, i32, i32) {
    %c0_i32 = arith.constant 0 : i32
    %c0_i32_0 = arith.constant 0 : i32
    %c0_i32_1 = arith.constant 0 : i32
    return %arg0, %c0_i32, %c0_i32_0 : i32, i32, i32
  }
  func.func @transform_1(%arg0: i32) -> (i32, i32, i32) {
    %c0_i32 = arith.constant 0 : i32
    %c0_i32_0 = arith.constant 0 : i32
    %c0_i32_1 = arith.constant 0 : i32
    return %arg0, %c0_i32, %c0_i32_0 : i32, i32, i32
  }
  func.func @transform_2(%arg0: i32) -> (i32, i32) {
    %c0_i32 = arith.constant 0 : i32
    %c0_i32_0 = arith.constant 0 : i32
    %c0_i32_1 = arith.constant 0 : i32
    return %c0_i32, %c0_i32_0 : i32, i32
  }
  func.func @transform_3(%arg0: i32) -> (i32, i32) {
    %c0_i32 = arith.constant 0 : i32
    %c0_i32_0 = arith.constant 0 : i32
    %c0_i32_1 = arith.constant 0 : i32
    return %c0_i32, %c0_i32_0 : i32, i32
  }
  func.func @transform_4(%arg0: i32) -> (i32, i32) {
    %c0_i32 = arith.constant 0 : i32
    %c0_i32_0 = arith.constant 0 : i32
    %c0_i32_1 = arith.constant 0 : i32
    return %c0_i32, %c0_i32_0 : i32, i32
  }
  func.func @transform_5(%arg0: i32) -> (i32, i32, i32, i32) {
    %c0_i32 = arith.constant 0 : i32
    %c0_i32_0 = arith.constant 0 : i32
    %c0_i32_1 = arith.constant 0 : i32
    %c0_i32_2 = arith.constant 0 : i32
    %c0_i32_3 = arith.constant 0 : i32
    return %c0_i32, %c0_i32_0, %c0_i32_1, %c0_i32_2 : i32, i32, i32, i32
  }
  func.func @transform_6(%arg0: i32) -> (i32, i32, i32, i32) {
    %c0_i32 = arith.constant 0 : i32
    %c0_i32_0 = arith.constant 0 : i32
    %c0_i32_1 = arith.constant 0 : i32
    %c0_i32_2 = arith.constant 0 : i32
    %c0_i32_3 = arith.constant 0 : i32
    return %c0_i32, %c0_i32_0, %c0_i32_1, %c0_i32_2 : i32, i32, i32, i32
  }
  func.func @transform_7(%arg0: i32) -> (i32, i32, i32, i32) {
    %c0_i32 = arith.constant 0 : i32
    %c0_i32_0 = arith.constant 0 : i32
    %c0_i32_1 = arith.constant 0 : i32
    %c0_i32_2 = arith.constant 0 : i32
    %c0_i32_3 = arith.constant 0 : i32
    return %c0_i32, %c0_i32_0, %c0_i32_1, %c0_i32_2 : i32, i32, i32, i32
  }
  func.func @transform_8(%arg0: i32) -> (i32, i32, i32, i32) {
    %c0_i32 = arith.constant 0 : i32
    %c0_i32_0 = arith.constant 0 : i32
    %c0_i32_1 = arith.constant 0 : i32
    %c0_i32_2 = arith.constant 0 : i32
    %c0_i32_3 = arith.constant 0 : i32
    return %c0_i32, %c0_i32_0, %c0_i32_1, %c0_i32_2 : i32, i32, i32, i32
  }
  func.func @transform_9(%arg0: i32) -> (i32, i32, i32, i32) {
    %c0_i32 = arith.constant 0 : i32
    %c0_i32_0 = arith.constant 0 : i32
    %c0_i32_1 = arith.constant 0 : i32
    %c0_i32_2 = arith.constant 0 : i32
    %c0_i32_3 = arith.constant 0 : i32
    return %c0_i32, %c0_i32_0, %c0_i32_1, %c0_i32_2 : i32, i32, i32, i32
  }
  func.func @transform_10(%arg0: i32) -> (i32, i32, i32, i32) {
    %c0_i32 = arith.constant 0 : i32
    %c0_i32_0 = arith.constant 0 : i32
    %c0_i32_1 = arith.constant 0 : i32
    %c0_i32_2 = arith.constant 0 : i32
    %c0_i32_3 = arith.constant 0 : i32
    return %c0_i32, %c0_i32_0, %c0_i32_1, %c0_i32_2 : i32, i32, i32, i32
  }
  func.func @transform_11(%arg0: i32) -> (i32, i32, i32) {
    %c0_i32 = arith.constant 0 : i32
    %c0_i32_0 = arith.constant 0 : i32
    %c0_i32_1 = arith.constant 0 : i32
    %c0_i32_2 = arith.constant 0 : i32
    return %c0_i32, %c0_i32_0, %c0_i32_1 : i32, i32, i32
  }
  func.func @transform_12(%arg0: i32) -> (i32, i32, i32) {
    %c0_i32 = arith.constant 0 : i32
    %c0_i32_0 = arith.constant 0 : i32
    %c0_i32_1 = arith.constant 0 : i32
    %c0_i32_2 = arith.constant 0 : i32
    return %c0_i32, %c0_i32_0, %c0_i32_1 : i32, i32, i32
  }
  func.func @transform_13(%arg0: i32) -> (i32, i32, i32) {
    %c0_i32 = arith.constant 0 : i32
    %c0_i32_0 = arith.constant 0 : i32
    %c0_i32_1 = arith.constant 0 : i32
    %c0_i32_2 = arith.constant 0 : i32
    return %c0_i32, %c0_i32_0, %c0_i32_1 : i32, i32, i32
  }
  func.func @transform_14(%arg0: i32) -> (i32, i32, i32) {
    %c0_i32 = arith.constant 0 : i32
    %c0_i32_0 = arith.constant 0 : i32
    %c0_i32_1 = arith.constant 0 : i32
    %c0_i32_2 = arith.constant 0 : i32
    return %c0_i32, %c0_i32_0, %c0_i32_1 : i32, i32, i32
  }
  func.func @transform_15(%arg0: i32) -> (i32, i32, i32) {
    %c0_i32 = arith.constant 0 : i32
    %c0_i32_0 = arith.constant 0 : i32
    %c0_i32_1 = arith.constant 0 : i32
    %c0_i32_2 = arith.constant 0 : i32
    return %c0_i32, %c0_i32_0, %c0_i32_1 : i32, i32, i32
  }
  func.func @transform_16(%arg0: i32) -> (i32, i32, i32) {
    %c0_i32 = arith.constant 0 : i32
    %c0_i32_0 = arith.constant 0 : i32
    %c0_i32_1 = arith.constant 0 : i32
    %c0_i32_2 = arith.constant 0 : i32
    return %c0_i32, %c0_i32_0, %c0_i32_1 : i32, i32, i32
  }
  func.func @transform_17(%arg0: i32) -> (i32, i32, i32) {
    %c0_i32 = arith.constant 0 : i32
    %c0_i32_0 = arith.constant 0 : i32
    %c0_i32_1 = arith.constant 0 : i32
    %c0_i32_2 = arith.constant 0 : i32
    return %c0_i32, %c0_i32_0, %c0_i32_1 : i32, i32, i32
  }
  func.func @transform_18(%arg0: i32) -> (i32, i32, i32) {
    %c0_i32 = arith.constant 0 : i32
    %c0_i32_0 = arith.constant 0 : i32
    %c0_i32_1 = arith.constant 0 : i32
    %c0_i32_2 = arith.constant 0 : i32
    return %c0_i32, %c0_i32_0, %c0_i32_1 : i32, i32, i32
  }
  func.func @transform_19(%arg0: i32) -> (i32, i32, i32) {
    %c0_i32 = arith.constant 0 : i32
    %c0_i32_0 = arith.constant 0 : i32
    %c0_i32_1 = arith.constant 0 : i32
    %c0_i32_2 = arith.constant 0 : i32
    return %c0_i32, %c0_i32_0, %c0_i32_1 : i32, i32, i32
  }
  func.func @transform_20(%arg0: i32) -> (i32, i32, i32) {
    %c0_i32 = arith.constant 0 : i32
    %c0_i32_0 = arith.constant 0 : i32
    %c0_i32_1 = arith.constant 0 : i32
    %c0_i32_2 = arith.constant 0 : i32
    return %c0_i32, %c0_i32_0, %c0_i32_1 : i32, i32, i32
  }
  func.func @transform_21(%arg0: i32) -> (i32, i32) {
    %c0_i32 = arith.constant 0 : i32
    %c0_i32_0 = arith.constant 0 : i32
    %c0_i32_1 = arith.constant 0 : i32
    return %c0_i32, %c0_i32_0 : i32, i32
  }
  func.func @transform_22(%arg0: i32) -> (i32, i32) {
    %c0_i32 = arith.constant 0 : i32
    %c0_i32_0 = arith.constant 0 : i32
    %c0_i32_1 = arith.constant 0 : i32
    return %c0_i32, %c0_i32_0 : i32, i32
  }
  func.func @transform_23(%arg0: i32) -> (i32, i32, i32) {
    %c0_i32 = arith.constant 0 : i32
    %c0_i32_0 = arith.constant 0 : i32
    %c0_i32_1 = arith.constant 0 : i32
    return %arg0, %c0_i32, %c0_i32_0 : i32, i32, i32
  }
  func.func @transform_24(%arg0: i32) -> (i32, i32, i32) {
    %c0_i32 = arith.constant 0 : i32
    %c0_i32_0 = arith.constant 0 : i32
    %c0_i32_1 = arith.constant 0 : i32
    return %arg0, %c0_i32, %c0_i32_0 : i32, i32, i32
  }
  func.func @transform_25(%arg0: i32) -> (i32, i32, i32) {
    %c0_i32 = arith.constant 0 : i32
    %c0_i32_0 = arith.constant 0 : i32
    %c0_i32_1 = arith.constant 0 : i32
    return %arg0, %c0_i32, %c0_i32_0 : i32, i32, i32
  }
}

</mosaic_0001>

<bundles_post_ra>
// kernel: tpu_custom_call.1
= control target key start
LH: loop header
LB: loop body
LE: loop exit
PB: predicated region body
PF: predicated region fallthrough
CT: control target
= control target key end

     0   :  { %s17972_s0 = inlined_call_operand.vmem [shape: f32[2,16,6], index: 0, kind: input, shape index: {}]   ;;  %s17973_s1 = inlined_call_operand.vmem [shape: f32[2,1,16], index: 1, kind: input, shape index: {}]   ;;  %s17974_s2 = inlined_call_operand.vmem [shape: f32[16,256], index: 2, kind: input, shape index: {}]   ;;  %s17975_s3 = inlined_call_operand.vmem [shape: f32[16,256], index: 3, kind: input, shape index: {}]   ;;  %s17976_s4 = inlined_call_operand.vmem [shape: bf16[6,256], index: 4, kind: input, shape index: {}]   ;;  %s17977_s5 = inlined_call_operand.vmem [shape: bf16[2,4,256,64], index: 5, kind: input, shape index: {}]   ;;  %s17978_s6 = inlined_call_operand.vmem [shape: f32[2,4,1,64], index: 6, kind: input, shape index: {}]   ;;  %s17979_s7 = inlined_call_operand.vmem [shape: bf16[2,4,256,64], index: 7, kind: input, shape index: {}]   ;;  %s17980_s8 = inlined_call_operand.vmem [shape: f32[2,4,1,64], index: 8, kind: input, shape index: {}]   ;;  %s17981_s9 = inlined_call_operand.vmem [shape: bf16[2,4,256,64], index: 9, kind: input, shape index: {}]   ;;  %s17982_s10 = inlined_call_operand.vmem [shape: f32[2,4,1,64], index: 10, kind: input, shape index: {}]   ;;  %s17983_s11 = inlined_call_operand.vmem [shape: bf16[2,256,256], index: 11, kind: input, shape index: {}]   ;;  %s17984_s12 = inlined_call_operand.vmem [shape: f32[2,1,256], index: 12, kind: input, shape index: {}]   ;;  %s17985_s13 = inlined_call_operand.vmem [shape: f32[2,1,256], index: 13, kind: input, shape index: {}]   ;;  %s17986_s14 = inlined_call_operand.vmem [shape: f32[2,1,256], index: 14, kind: input, shape index: {}]   ;;  %s17987_s15 = inlined_call_operand.vmem [shape: bf16[2,256,512], index: 15, kind: input, shape index: {}]   ;;  %s17988_s16 = inlined_call_operand.vmem [shape: f32[2,1,512], index: 16, kind: input, shape index: {}]   ;;  %s17989_s17 = inlined_call_operand.vmem [shape: bf16[2,512,256], index: 17, kind: input, shape index: {}]   ;;  %s17990_s18 = inlined_call_operand.vmem [shape: f32[2,1,256], index: 18, kind: input, shape index: {}]   ;;  %s17991_s19 = inlined_call_operand.vmem [shape: f32[2,1,256], index: 19, kind: input, shape index: {}]   ;;  %s17992_s20 = inlined_call_operand.vmem [shape: f32[2,1,256], index: 20, kind: input, shape index: {}]   ;;  %s17993_s21 = inlined_call_operand.vmem [shape: bf16[256,12], index: 21, kind: input, shape index: {}]   ;;  %s17994_s22 = inlined_call_operand.vmem [shape: f32[1,12], index: 22, kind: input, shape index: {}]   ;;  %s17995_s23 = inlined_call_operand.vmem [shape: f32[2,16,12], index: 23, kind: output, shape index: {0}]   ;;  %s17996_s24 = inlined_call_operand.hbm [shape: f32[2,16,16], index: 24, kind: output, shape index: {1}]   ;;  %s17997_s25 = inlined_call_operand.hbm [shape: f32[2,16,16], index: 25, kind: output, shape index: {2}]  }
   0x1   :  { %18027 = sst [smem:[#allocation20_spill]] %s17972_s0 }
   0x2   :  { %18028 = sst [smem:[#allocation21_spill]] %s17973_s1 }
   0x3   :  { %18029 = sst [smem:[#allocation22_spill]] %s17974_s2 }
   0x4   :  { %18030 = sst [smem:[#allocation23_spill]] %s17975_s3 }
   0x5   :  { %18031 = sst [smem:[#allocation24_spill]] %s17976_s4 }
   0x6   :  { %18032 = sst [smem:[#allocation25_spill]] %s17977_s5 }
   0x7   :  { %18033 = sst [smem:[#allocation26_spill]] %s17978_s6 }
   0x8   :  { %18034 = sst [smem:[#allocation27_spill]] %s17979_s7 }
   0x9   :  { %18035 = sst [smem:[#allocation28_spill]] %s17980_s8 }
   0xa   :  { %18036 = sst [smem:[#allocation29_spill]] %s17981_s9 }
   0xb   :  { %18037 = sst [smem:[#allocation30_spill]] %s17982_s10 }
   0xc   :  { %18038 = sst [smem:[#allocation31_spill]] %s17983_s11 }
   0xd   :  { %18039 = sst [smem:[#allocation32_spill]] %s17984_s12 }
   0xe   :  { %18040 = sst [smem:[#allocation33_spill]] %s17985_s13 }
   0xf   :  { %18041 = sst [smem:[#allocation34_spill]] %s17986_s14 }
  0x10   :  { %18042 = sst [smem:[#allocation35_spill]] %s17987_s15 }
  0x11   :  { %18043 = sst [smem:[#allocation36_spill]] %s17993_s21 }
  0x12   :  { %18044 = sst [smem:[#allocation37_spill]] %s17994_s22 }
  0x13   :  { %18045 = sst [smem:[#allocation38_spill]] %s17995_s23 }
  0x14   :  { %18046 = sst [smem:[#allocation39_spill]] %s17996_s24 }
  0x15   :  { %18047 = sst [smem:[#allocation40_spill]] %s17997_s25 }
  0x16   :  { %31 = vsyncpa [#allocation4], 0 }
  0x17   :  { %33 = vsyncpa [#allocation4 + $0x1], 0 }
  0x18   :  { %34 = vsyncpa [#allocation6], 0 }
  0x19   :  { %36 = vsyncpa [#allocation6 + $0x1], 0  ;;  %s14034_s29 = smov 0   ;;  %s14036_s2 = smov 0  }
  0x1a   :  { %s14038_s6 = smov 0   ;;  %s14040_s30 = smov 0  }
  0x1b LB: > { %18048 = sst [smem:[#allocation9_spill]] %s13884_s29  ;;  %s14055_s7 = sadd.s32 4294967295, %s13896_s30   ;;  %s13896_s30 = sphi %s14040_s30, %s18094_s30   ;;  %s13892_s6 = sphi %s14038_s6, %s18097_s6   ;;  %s13888_s2 = sphi %s14036_s2, %s18096_s2   ;;  %s13884_s29 = sphi %s14034_s29, %s18095_s29  }
  0x1c   : > { %18049 = sst [smem:[#allocation10_spill]] %s13888_s2  ;;  %s9106_s3 = sadd.s32 4294967294, %s13896_s30  }
  0x1d   : > { %18050 = sst [smem:[#allocation11_spill]] %s13892_s6  ;;  %s14059_s26 = sadd.s32 1, %s13896_s30  }
  0x1e   : > { %18051 = sst [smem:[#allocation12_spill]] %s13896_s30  ;;  %s568_s1 = sadd.s32 1, %s13892_s6 }
  0x1f   : > { %18052 = sst [smem:[#allocation13_spill]] %s14055_s7  ;;  %s565_s8 = ssub.s32 %s13896_s30, %s14059_s26 }
  0x20   : > { %18053 = sst [smem:[#allocation14_spill]] %s14059_s26  ;;  %p578_p0 = scmp.ne.s32.totalorder %s13892_s6, %s13888_s2 }
  0x21   : > { %p566_p1 = scmp.eq.s32.totalorder %s565_s8, 0  ;;  %p579_p2 = scmp.eq.s32.totalorder %s14055_s7, 1 }
  0x22   : > { %p584_p3 = scmp.ne.s32.totalorder %s13888_s2, %s13884_s29  ;;  %p585_p4 = scmp.eq.s32.totalorder %s9106_s3, 1 }
  0x23   : > { %s14070_s27 = scalar_select %p566_p1, %s13892_s6, %s568_s1  }
  0x24   : > { %p14072_p5 = por %p579_p2, %p578_p0  ;;  %p14076_p6 = por %p585_p4, %p584_p3 }
  0x25   : > { %18054 = sst [smem:[#allocation15_spill]] %s14070_s27  ;;  %p9109_p7 = scmp.ge.s32.totalorder %s13896_s30, 1 }
  0x26   : > { %s18055_s4 = scalar_select %p14072_p5, 1, 0 }
  0x27   : > { %s18057_s28 = scalar_select %p14076_p6, 1, 0 }
  0x28   : > { %18056 = sst [smem:[#allocation16_spill]] %s18055_s4  ;;  %p706_p8 = scmp.lt.s32.totalorder %s13896_s30, 3 }
  0x29   : > { %18058 = sst [smem:[#allocation17_spill]] %s18057_s28 }
  0x2a   : > { %p707_p9 = pnand %p9109_p7, %p706_p8 }
  0x2c   : > { %710 = sbr.rel (%p707_p9) target bundleno = 7687 (0x1e07), region = 112 }
  0x31   : > { %s18059_s0 = sld [smem:[#allocation24_spill]]  ;;  %p787_p10 = scmp.lt.s32.totalorder %s14055_s7, 1  ;;  %vm826_vm0 = vcmask 1042432   ;;  %vm822_vm1 = vcmask 48128   ;;  %vm1365_vm2 = vcmask 523264   ;;  %vm1386_vm3 = vcmask 130048  }
  0x32   : > { %s18060_s8 = sld [smem:[#allocation25_spill]]  ;;  %vm1469_vm12 = vcmask 519168   ;;  %s13900_s1 = smov 122  }
  0x33   : > { %s14093_s26 = scalar_select %p787_p10, %s14055_s7, 1 }
  0x34   : > { %s18062_s28 = sld [smem:[#allocation21_spill]]  ;;  %s13901_s7 = smov 125  }
  0x35   : > { %18061 = sst [smem:[#allocation18_spill]] %s14093_s26  ;;  %s18013_s6 = sshll.u32 %s14093_s26, 4 }
  0x36   : > { %s18063_s25 = sld [smem:[#allocation20_spill]] }
  0x37   : > { %v816_v0 = vld [vmem:[%s18059_s0] sm:$0x77]  ;;  %s18064_s23 = sld [smem:[#allocation27_spill]]  ;;  %s14996_s0 = sand.u32 1, %s13888_s2  }
  0x38   : > { %v12907_v1 = vld [vmem:[%s18060_s8 + $0x38] sm:$0xff]  ;;  %v818_v2 = vunpack.c.l.b16 %v816_v0  ;;  %v819_v3 = vunpack.c.h.b16 %v816_v0  ;;  %v12906_v7 = vld [vmem:[%s18060_s8 + $0x30] sm:$0xff]  ;;  %v12905_v13 = vld [vmem:[%s18060_s8 + $0x28] sm:$0xff]  ;;  %s18066_s5 = sld [smem:[#allocation23_spill]]  ;;  %s18021_s3 = sshll.u32 %s14996_s0, 4 }
  0x39   : > { %v12915_v4 = vld [vmem:[%s18060_s8 + $0x78] sm:$0xff]  ;;  %1001 = vmatpush.bf16.msra.mxu2 %v12907_v1  ;;  %v12914_v8 = vld [vmem:[%s18060_s8 + $0x70] sm:$0xff]  ;;  %v12913_v15 = vld [vmem:[%s18060_s8 + $0x68] sm:$0xff]  ;;  %s18067_s4 = sld [smem:[#allocation22_spill]]  ;;  %s15003_s27 = scalar_lea.vmem [#allocation3], %s18021_s3 }
  0x3a   : > { %v820_v5 = vpack.c.b16 %v818_v2, %v818_v2  ;;  %v821_v6 = vpack.c.b16 %v819_v3, %v819_v3  ;;  %1015 = vmatpush.bf16.msra.mxu3 %v12915_v4  ;;  %s14106_s29 = scalar_lea.vmem %s18062_s28, %s14093_s26  ;;  %v12904_v20 = vld [vmem:[%s18060_s8 + $0x20] sm:$0xff]  ;;  %v12903_v22 = vld [vmem:[%s18060_s8 + $0x18] sm:$0xff]  ;;  %v12902_v28 = vld [vmem:[%s18060_s8 + $0x10] sm:$0xff]  ;;  %s18069_s26 = sld [smem:[#allocation26_spill]] }
  0x3b   : > { %v12912_v21 = vld [vmem:[%s18060_s8 + $0x60] sm:$0xff]  ;;  %v12911_v23 = vld [vmem:[%s18060_s8 + $0x58] sm:$0xff]  ;;  %v12910_v29 = vld [vmem:[%s18060_s8 + $0x50] sm:$0xff]  ;;  %s18070_s10 = sld [smem:[#allocation30_spill]]  ;;  %s18078_s2 = sshll.u32 %s14996_s0, 4 }
  0x3c   : > { %v828_v9 = vsel %vm826_vm0, %v820_v5, 0  ;;  %v831_v10 = vsel %vm826_vm0, %v821_v6, 0  ;;  %s791_s24 = scalar_lea.vmem %s18063_s25, %s18013_s6  ;;  %v12901_v30 = vld [vmem:[%s18060_s8 + $0x8] sm:$0xff]  ;;  %v12900_v32 = vld [vmem:[%s18060_s8] sm:$0xff]  ;;  %s18068_s25 = sld [smem:[#allocation28_spill]] }
  0x3d   : > { %840 = vmatpush.bf16.msra.mxu0 %v828_v9  ;;  %854 = vmatpush.bf16.msra.mxu1 %v831_v10  ;;  %v813_v11 = vld [vmem:[%s791_s24] sm:$0xff]  ;;  %v814_v12 = vld [vmem:[%s791_s24 + $0x8] sm:$0xff]  ;;  %v12923_v16 = vld [vmem:[%s18064_s23 + $0x38] sm:$0xff]  ;;  %s18065_s24 = sld [smem:[#allocation29_spill]]  ;;  %s18019_s6 = smov 64  }
  0x3e   : > { %v815_v14 = vpack.c.bf16 %v814_v12, %v813_v11  ;;  %1002 = vmatpush.bf16.msra.mxu2 %v12906_v7  ;;  %1016 = vmatpush.bf16.msra.mxu3 %v12914_v8  ;;  %v12931_v17 = vld [vmem:[%s18064_s23 + $0x78] sm:$0xff]  ;;  %v12922_v18 = vld [vmem:[%s18064_s23 + $0x30] sm:$0xff]  ;;  %v12921_v24 = vld [vmem:[%s18064_s23 + $0x28] sm:$0xff]  ;;  %s18071_s11 = sld [smem:[#allocation31_spill]]  ;;  %s16842_s3 = scalar_lea.vmem [#allocation5], %s18078_s2 }
  0x3f   : > { %v12930_v19 = vld [vmem:[%s18064_s23 + $0x70] sm:$0xff]  ;;  %v12929_v25 = vld [vmem:[%s18064_s23 + $0x68] sm:$0xff]  ;;  %v12920_v26 = vld [vmem:[%s18064_s23 + $0x20] sm:$0xff]  ;;  %18073 = sst [smem:[#allocation19_spill]] %s15003_s27 }
  0x40   : > { %9116 = vmatmul.msk.bf16.vlgmr.msra.gmra.mxu0 %vm822_vm1, %v815_v14  ;;  %9117 = vmatmul.msk.bf16.vlgmr.msra.gmra.mxu1 %vm822_vm1, %v815_v14  ;;  %v12928_v27 = vld [vmem:[%s18064_s23 + $0x60] sm:$0xff]  ;;  %v12909_v31 = vld [vmem:[%s18060_s8 + $0x48] sm:$0xff]  ;;  %v12919_v42 = vld [vmem:[%s18064_s23 + $0x18] sm:$0xff]  ;;  %s18074_s12 = sld [smem:[#allocation32_spill]] }
  0x41   : > { %1163 = vmatpush.bf16.msrb.mxu0 %v12923_v16  ;;  %1177 = vmatpush.bf16.msrb.mxu1 %v12931_v17  ;;  %v12908_v33 = vld [vmem:[%s18060_s8 + $0x40] sm:$0xff]  ;;  %v12927_v43 = vld [vmem:[%s18064_s23 + $0x58] sm:$0xff]  ;;  %v12918_v46 = vld [vmem:[%s18064_s23 + $0x10] sm:$0xff]  ;;  %s18075_s15 = sld [smem:[#allocation35_spill]] }
  0x42   : > { %1003 = vmatpush.bf16.msra.mxu2 %v12905_v13  ;;  %1017 = vmatpush.bf16.msra.mxu3 %v12913_v15  ;;  %v12926_v47 = vld [vmem:[%s18064_s23 + $0x50] sm:$0xff]  ;;  %v12917_v50 = vld [vmem:[%s18064_s23 + $0x8] sm:$0xff]  ;;  %v12916_v54 = vld [vmem:[%s18064_s23] sm:$0xff]  ;;  %s18076_s13 = sld [smem:[#allocation33_spill]] }
  0x43   : > { %v12939_v34 = vld [vmem:[%s18065_s24 + $0x38] sm:$0xff]  ;;  %v12938_v36 = vld [vmem:[%s18065_s24 + $0x30] sm:$0xff]  ;;  %v12937_v38 = vld [vmem:[%s18065_s24 + $0x28] sm:$0xff]  ;;  %s18077_s14 = sld [smem:[#allocation34_spill]] }
  0x44   : > { %v12947_v35 = vld [vmem:[%s18065_s24 + $0x78] sm:$0xff]  ;;  %v12946_v37 = vld [vmem:[%s18065_s24 + $0x70] sm:$0xff]  ;;  %v12945_v39 = vld [vmem:[%s18065_s24 + $0x68] sm:$0xff]  ;;  %s18082_s30 = sld [smem:[#allocation37_spill]] }
  0x45   : > { %1164 = vmatpush.bf16.msrb.mxu0 %v12922_v18  ;;  %1178 = vmatpush.bf16.msrb.mxu1 %v12930_v19  ;;  %v12936_v40 = vld [vmem:[%s18065_s24 + $0x20] sm:$0xff]  ;;  %v12935_v44 = vld [vmem:[%s18065_s24 + $0x18] sm:$0xff]  ;;  %v12934_v48 = vld [vmem:[%s18065_s24 + $0x10] sm:$0xff]  ;;  %s18083_s21 = sld [smem:[#allocation13_spill]] }
  0x46   : > { %1004 = vmatpush.bf16.msra.mxu2 %v12904_v20  ;;  %1018 = vmatpush.bf16.msra.mxu3 %v12912_v21  ;;  %v12944_v41 = vld [vmem:[%s18065_s24 + $0x60] sm:$0xff]  ;;  %v12943_v45 = vld [vmem:[%s18065_s24 + $0x58] sm:$0xff]  ;;  %v12942_v49 = vld [vmem:[%s18065_s24 + $0x50] sm:$0xff]  ;;  %s18086_s9 = sld [smem:[#allocation39_spill]] }
  0x47   : > { %v12925_v51 = vld [vmem:[%s18064_s23 + $0x48] sm:$0xff]  ;;  %v12924_v55 = vld [vmem:[%s18064_s23 + $0x40] sm:$0xff]  ;;  %v807_v62 = vld [vmem:[%s18066_s5 + $0x10] sm:$0xff] }
  0x48   : > { %v12933_v52 = vld [vmem:[%s18065_s24 + $0x8] sm:$0xff]  ;;  %v12932_v56 = vld [vmem:[%s18065_s24] sm:$0xff]  ;;  %v808_v63 = vld [vmem:[%s18066_s5 + $0x18] sm:$0xff] }
  0x49   : > { %1165 = vmatpush.bf16.msrb.mxu0 %v12921_v24  ;;  %1179 = vmatpush.bf16.msrb.mxu1 %v12929_v25  ;;  %v12941_v53 = vld [vmem:[%s18065_s24 + $0x48] sm:$0xff]  ;;  %v12940_v57 = vld [vmem:[%s18065_s24 + $0x40] sm:$0xff]  ;;  %v803_v4 = vld [vmem:[%s18067_s4 + $0x10] sm:$0xff] }
  0x4a   : > { %1005 = vmatpush.bf16.msra.mxu2 %v12903_v22  ;;  %1019 = vmatpush.bf16.msra.mxu3 %v12911_v23  ;;  %v805_v60 = vld [vmem:[%s18066_s5] sm:$0xff]  ;;  %v806_v61 = vld [vmem:[%s18066_s5 + $0x8] sm:$0xff]  ;;  %v804_v6 = vld [vmem:[%s18067_s4 + $0x18] sm:$0xff]  ;;  %s18072_s5 = smov 64  }
  0x4b   : > { %v801_v0 = vld [vmem:[%s18067_s4] sm:$0xff]  ;;  %v802_v3 = vld [vmem:[%s18067_s4 + $0x8] sm:$0xff]  ;;  %v12971_v16 = vld [vmem:[%s18064_s23 + $0xb8] sm:$0xff]  ;;  %s13624_s2 = sshll.u32 %s18083_s21, 4 }
  0x4c   : > { %v12979_v17 = vld [vmem:[%s18064_s23 + $0xf8] sm:$0xff]  ;;  %v12970_v18 = vld [vmem:[%s18064_s23 + $0xb0] sm:$0xff]  ;;  %v12969_v20 = vld [vmem:[%s18064_s23 + $0xa8] sm:$0xff]  ;;  %s8956_s28 = scalar_lea.hbm %s18086_s9, %s13624_s2 }
  0x4d   : > { %1166 = vmatpush.bf16.msrb.mxu0 %v12920_v26  ;;  %1180 = vmatpush.bf16.msrb.mxu1 %v12928_v27  ;;  %v12978_v19 = vld [vmem:[%s18064_s23 + $0xf0] sm:$0xff]  ;;  %v12977_v21 = vld [vmem:[%s18064_s23 + $0xe8] sm:$0xff]  ;;  %v12968_v22 = vld [vmem:[%s18064_s23 + $0xa0] sm:$0xff] }
  0x4e   : > { %1006 = vmatpush.bf16.msra.mxu2 %v12902_v28  ;;  %1020 = vmatpush.bf16.msra.mxu3 %v12910_v29  ;;  %v12976_v23 = vld [vmem:[%s18064_s23 + $0xe0] sm:$0xff]  ;;  %v12967_v26 = vld [vmem:[%s18064_s23 + $0x98] sm:$0xff]  ;;  %v12966_v28 = vld [vmem:[%s18064_s23 + $0x90] sm:$0xff] }
  0x4f   : > { %v12975_v27 = vld [vmem:[%s18064_s23 + $0xd8] sm:$0xff]  ;;  %v12974_v29 = vld [vmem:[%s18064_s23 + $0xd0] sm:$0xff] }
  0x51   : > { %1167 = vmatpush.bf16.msrb.mxu0 %v12919_v42  ;;  %1181 = vmatpush.bf16.msrb.mxu1 %v12927_v43  ;;  %v12999_v42 = vld [vmem:[%s18060_s8 + $0x118] sm:$0xff] }
  0x52   : > { %1007 = vmatpush.bf16.msra.mxu2 %v12901_v30  ;;  %1021 = vmatpush.bf16.msra.mxu3 %v12909_v31  ;;  %v12965_v30 = vld [vmem:[%s18064_s23 + $0x88] sm:$0xff]  ;;  %v13007_v43 = vld [vmem:[%s18060_s8 + $0x158] sm:$0xff] }
  0x53   : > { %v12973_v31 = vld [vmem:[%s18064_s23 + $0xc8] sm:$0xff] }
  0x55   : > { %1168 = vmatpush.bf16.msrb.mxu0 %v12918_v46  ;;  %1182 = vmatpush.bf16.msrb.mxu1 %v12926_v47  ;;  %v12997_v46 = vld [vmem:[%s18060_s8 + $0x108] sm:$0xff] }
  0x56   : > { %1008 = vmatpush.bf16.msra.mxu2 %v12900_v32  ;;  %1022 = vmatpush.bf16.msra.mxu3 %v12908_v33  ;;  %v12964_v32 = vld [vmem:[%s18064_s23 + $0x80] sm:$0xff]  ;;  %v13005_v47 = vld [vmem:[%s18060_s8 + $0x148] sm:$0xff] }
  0x57   : > { %v12972_v33 = vld [vmem:[%s18064_s23 + $0xc0] sm:$0xff] }
  0x59   : > { %1169 = vmatpush.bf16.msrb.mxu0 %v12917_v50  ;;  %1183 = vmatpush.bf16.msrb.mxu1 %v12925_v51  ;;  %v13035_v50 = vld [vmem:[%s18065_s24 + $0x138] sm:$0xff] }
  0x5a   : > { %1325 = vmatpush.bf16.msrb.mxu2 %v12939_v34  ;;  %1339 = vmatpush.bf16.msrb.mxu3 %v12947_v35  ;;  %v13003_v34 = vld [vmem:[%s18060_s8 + $0x138] sm:$0xff] }
  0x5b   : > { %v13011_v35 = vld [vmem:[%s18060_s8 + $0x178] sm:$0xff] }
  0x5c   : > { %v13043_v51 = vld [vmem:[%s18065_s24 + $0x178] sm:$0xff] }
  0x5d   : > { %1170 = vmatpush.bf16.msrb.mxu0 %v12916_v54  ;;  %1184 = vmatpush.bf16.msrb.mxu1 %v12924_v55  ;;  %v13033_v54 = vld [vmem:[%s18065_s24 + $0x128] sm:$0xff] }
  0x5e   : > { %1326 = vmatpush.bf16.msrb.mxu2 %v12938_v36  ;;  %1340 = vmatpush.bf16.msrb.mxu3 %v12946_v37  ;;  %v13002_v36 = vld [vmem:[%s18060_s8 + $0x130] sm:$0xff]  ;;  %v13041_v55 = vld [vmem:[%s18065_s24 + $0x168] sm:$0xff] }
  0x5f   : > { %v13010_v37 = vld [vmem:[%s18060_s8 + $0x170] sm:$0xff] }
  0x62   : > { %1327 = vmatpush.bf16.msrb.mxu2 %v12937_v38  ;;  %1341 = vmatpush.bf16.msrb.mxu3 %v12945_v39  ;;  %v13001_v38 = vld [vmem:[%s18060_s8 + $0x128] sm:$0xff] }
  0x63   : > { %v13009_v39 = vld [vmem:[%s18060_s8 + $0x168] sm:$0xff] }
  0x66   : > { %1328 = vmatpush.bf16.msrb.mxu2 %v12936_v40  ;;  %1342 = vmatpush.bf16.msrb.mxu3 %v12944_v41  ;;  %v13000_v40 = vld [vmem:[%s18060_s8 + $0x120] sm:$0xff] }
  0x67   : > { %v13008_v41 = vld [vmem:[%s18060_s8 + $0x160] sm:$0xff] }
  0x6a   : > { %1329 = vmatpush.bf16.msrb.mxu2 %v12935_v44  ;;  %1343 = vmatpush.bf16.msrb.mxu3 %v12943_v45  ;;  %v12998_v44 = vld [vmem:[%s18060_s8 + $0x110] sm:$0xff] }
  0x6b   : > { %v13006_v45 = vld [vmem:[%s18060_s8 + $0x150] sm:$0xff] }
  0x6e   : > { %1330 = vmatpush.bf16.msrb.mxu2 %v12934_v48  ;;  %1344 = vmatpush.bf16.msrb.mxu3 %v12942_v49  ;;  %v12996_v48 = vld [vmem:[%s18060_s8 + $0x100] sm:$0xff] }
  0x6f   : > { %v13004_v49 = vld [vmem:[%s18060_s8 + $0x140] sm:$0xff] }
  0x72   : > { %1331 = vmatpush.bf16.msrb.mxu2 %v12933_v52  ;;  %1345 = vmatpush.bf16.msrb.mxu3 %v12941_v53  ;;  %v13034_v52 = vld [vmem:[%s18065_s24 + $0x130] sm:$0xff] }
  0x73   : > { %v13042_v53 = vld [vmem:[%s18065_s24 + $0x170] sm:$0xff] }
  0x76   : > { %1332 = vmatpush.bf16.msrb.mxu2 %v12932_v56  ;;  %1346 = vmatpush.bf16.msrb.mxu3 %v12940_v57  ;;  %v13032_v56 = vld [vmem:[%s18065_s24 + $0x120] sm:$0xff] }
  0x77   : > { %v13040_v57 = vld [vmem:[%s18065_s24 + $0x160] sm:$0xff] }
  0xbd   : > { %v842_v58 = vpop.f32.mrf.mxu0  ;;  %v856_v59 = vpop.f32.mrf.mxu1 }
  0xbe   : > { %v14262_v1 = vadd.f32 %v842_v58, %v805_v60  ;;  %v14264_v2 = vadd.f32 %v856_v59, %v806_v61  ;;  %v13031_v58 = vld [vmem:[%s18065_s24 + $0x118] sm:$0xff]  ;;  %v13030_v60 = vld [vmem:[%s18065_s24 + $0x110] sm:$0xff] }
  0xbf   : > { %v13039_v59 = vld [vmem:[%s18065_s24 + $0x158] sm:$0xff]  ;;  %v13038_v61 = vld [vmem:[%s18065_s24 + $0x150] sm:$0xff] }
  0xc0   : > { %v861_v10 = vadd.f32 %v14262_v1, %v801_v0  ;;  %v862_v11 = vadd.f32 %v14264_v2, %v802_v3  ;;  %v13028_v0 = vld [vmem:[%s18065_s24 + $0x100] sm:$0xff] }
  0xc1   : > { %v13036_v3 = vld [vmem:[%s18065_s24 + $0x140] sm:$0xff] }
  0xc5   : > { %v844_v5 = vpop.f32.mrf.mxu0  ;;  %v858_v7 = vpop.f32.mrf.mxu1 }
  0xc6   : > { %v14275_v8 = vadd.f32 %v844_v5, %v807_v62  ;;  %v14277_v9 = vadd.f32 %v858_v7, %v808_v63  ;;  %v13029_v62 = vld [vmem:[%s18065_s24 + $0x108] sm:$0xff]  ;;  %v13075_v5 = vld [vmem:[%s18064_s23 + $0x1f8] sm:$0xff]  ;;  %v13074_v7 = vld [vmem:[%s18064_s23 + $0x1f0] sm:$0xff] }
  0xc7   : > { %v13037_v63 = vld [vmem:[%s18065_s24 + $0x148] sm:$0xff] }
  0xc8   : > { %v863_v12 = vadd.f32 %v14275_v8, %v803_v4  ;;  %v864_v13 = vadd.f32 %v14277_v9, %v804_v6  ;;  %v14317_v24 = vpack.c.bf16 %v14275_v8, %v14262_v1  ;;  %v14321_v25 = vpack.c.bf16 %v14277_v9, %v14264_v2  ;;  %v13067_v4 = vld [vmem:[%s18064_s23 + $0x1b8] sm:$0xff]  ;;  %v13066_v6 = vld [vmem:[%s18064_s23 + $0x1b0] sm:$0xff] }
  0xca   : > { %v14283_v14 = vpack.c.bf16 %v863_v12, %v861_v10  ;;  %v14285_v15 = vpack.c.bf16 %v864_v13, %v862_v11  ;;  %v13065_v10 = vld [vmem:[%s18064_s23 + $0x1a8] sm:$0xff]  ;;  %v13064_v12 = vld [vmem:[%s18064_s23 + $0x1a0] sm:$0xff] }
  0xcb   : > { %v13073_v11 = vld [vmem:[%s18064_s23 + $0x1e8] sm:$0xff]  ;;  %v13072_v13 = vld [vmem:[%s18064_s23 + $0x1e0] sm:$0xff] }
  0xcc   : > { %1009 = vmatmul.bf16.vlgmr.msra.gmra.mxu2 %v14283_v14  ;;  %1023 = vmatmul.bf16.vlgmr.msra.gmra.mxu3 %v14285_v15 }
  0xcd   : > { %1171 = vmatmul.bf16.vlgmr.msrb.gmra.mxu0 %v14283_v14  ;;  %1185 = vmatmul.bf16.vlgmr.msrb.gmra.mxu1 %v14285_v15 }
  0xce   : > { %1770 = vmatpush.bf16.msra.mxu2 %v12971_v16  ;;  %1784 = vmatpush.bf16.msra.mxu3 %v12979_v17  ;;  %v13063_v16 = vld [vmem:[%s18064_s23 + $0x198] sm:$0xff] }
  0xcf   : > { %v13071_v17 = vld [vmem:[%s18064_s23 + $0x1d8] sm:$0xff] }
  0xd2   : > { %1771 = vmatpush.bf16.msra.mxu2 %v12970_v18  ;;  %1785 = vmatpush.bf16.msra.mxu3 %v12978_v19  ;;  %v13062_v18 = vld [vmem:[%s18064_s23 + $0x190] sm:$0xff] }
  0xd3   : > { %v13070_v19 = vld [vmem:[%s18064_s23 + $0x1d0] sm:$0xff] }
  0xd6   : > { %1772 = vmatpush.bf16.msra.mxu2 %v12969_v20  ;;  %1786 = vmatpush.bf16.msra.mxu3 %v12977_v21  ;;  %v13061_v20 = vld [vmem:[%s18064_s23 + $0x188] sm:$0xff] }
  0xd7   : > { %v13069_v21 = vld [vmem:[%s18064_s23 + $0x1c8] sm:$0xff] }
  0xda   : > { %1773 = vmatpush.bf16.msra.mxu2 %v12968_v22  ;;  %1787 = vmatpush.bf16.msra.mxu3 %v12976_v23  ;;  %v13060_v22 = vld [vmem:[%s18064_s23 + $0x180] sm:$0xff] }
  0xdb   : > { %v13068_v23 = vld [vmem:[%s18064_s23 + $0x1c0] sm:$0xff] }
  0xdc   : > { %1333 = vmatmul.bf16.vlgmr.msrb.gmra.mxu2 %v14317_v24  ;;  %1347 = vmatmul.bf16.vlgmr.msrb.gmra.mxu3 %v14321_v25 }
  0xde   : > { %1774 = vmatpush.bf16.msra.mxu2 %v12967_v26  ;;  %1788 = vmatpush.bf16.msra.mxu3 %v12975_v27  ;;  %v13677_v26 = vld [vmem:[%s18068_s25] ss:$0 sm:$0xff] }
  0xe2   : > { %1775 = vmatpush.bf16.msra.mxu2 %v12966_v28  ;;  %1789 = vmatpush.bf16.msra.mxu3 %v12974_v29 }
  0xe6   : > { %1776 = vmatpush.bf16.msra.mxu2 %v12965_v30  ;;  %1790 = vmatpush.bf16.msra.mxu3 %v12973_v31 }
  0xea   : > { %1777 = vmatpush.bf16.msra.mxu2 %v12964_v32  ;;  %1791 = vmatpush.bf16.msra.mxu3 %v12972_v33  ;;  %v13678_v33 = vld [vmem:[%s18069_s26] ss:$0 sm:$0xff] }
  0xed   : > { %1778 = vmatmul.bf16.vlgmr.msra.gmra.mxu2 %v14283_v14  ;;  %1792 = vmatmul.bf16.vlgmr.msra.gmra.mxu3 %v14285_v15 }
  0xee   : > { %2221 = vmatpush.bf16.msrb.mxu2 %v13003_v34  ;;  %2235 = vmatpush.bf16.msrb.mxu3 %v13011_v35 }
  0xf2   : > { %2222 = vmatpush.bf16.msrb.mxu2 %v13002_v36  ;;  %2236 = vmatpush.bf16.msrb.mxu3 %v13010_v37 }
  0xf6   : > { %2223 = vmatpush.bf16.msrb.mxu2 %v13001_v38  ;;  %2237 = vmatpush.bf16.msrb.mxu3 %v13009_v39 }
  0xfa   : > { %2224 = vmatpush.bf16.msrb.mxu2 %v13000_v40  ;;  %2238 = vmatpush.bf16.msrb.mxu3 %v13008_v41 }
  0xfe   : > { %2225 = vmatpush.bf16.msrb.mxu2 %v12999_v42  ;;  %2239 = vmatpush.bf16.msrb.mxu3 %v13007_v43 }
 0x102   : > { %2226 = vmatpush.bf16.msrb.mxu2 %v12998_v44  ;;  %2240 = vmatpush.bf16.msrb.mxu3 %v13006_v45 }
 0x106   : > { %2227 = vmatpush.bf16.msrb.mxu2 %v12997_v46  ;;  %2241 = vmatpush.bf16.msrb.mxu3 %v13005_v47 }
 0x10a   : > { %2228 = vmatpush.bf16.msrb.mxu2 %v12996_v48  ;;  %2242 = vmatpush.bf16.msrb.mxu3 %v13004_v49  ;;  %v12955_v49 = vld [vmem:[%s18060_s8 + $0xb8] sm:$0xff] }
 0x10d   : > { %2229 = vmatmul.bf16.vlgmr.msrb.gmra.mxu2 %v14283_v14  ;;  %2243 = vmatmul.bf16.vlgmr.msrb.gmra.mxu3 %v14285_v15 }
 0x10e   : > { %2549 = vmatpush.bf16.msra.mxu2 %v13035_v50  ;;  %2563 = vmatpush.bf16.msra.mxu3 %v13043_v51 }
 0x112   : > { %2550 = vmatpush.bf16.msra.mxu2 %v13034_v52  ;;  %2564 = vmatpush.bf16.msra.mxu3 %v13042_v53  ;;  %v13679_v53 = vld [vmem:[%s18070_s10] ss:$0 sm:$0xff] }
 0x116   : > { %2551 = vmatpush.bf16.msra.mxu2 %v13033_v54  ;;  %2565 = vmatpush.bf16.msra.mxu3 %v13041_v55 }
 0x11a   : > { %2552 = vmatpush.bf16.msra.mxu2 %v13032_v56  ;;  %2566 = vmatpush.bf16.msra.mxu3 %v13040_v57  ;;  %v12954_v57 = vld [vmem:[%s18060_s8 + $0xb0] sm:$0xff] }
 0x11e   : > { %2553 = vmatpush.bf16.msra.mxu2 %v13031_v58  ;;  %2567 = vmatpush.bf16.msra.mxu3 %v13039_v59 }
 0x122   : > { %2554 = vmatpush.bf16.msra.mxu2 %v13030_v60  ;;  %2568 = vmatpush.bf16.msra.mxu3 %v13038_v61  ;;  %v12953_v61 = vld [vmem:[%s18060_s8 + $0xa8] sm:$0xff] }
 0x126   : > { %2555 = vmatpush.bf16.msra.mxu2 %v13029_v62  ;;  %2569 = vmatpush.bf16.msra.mxu3 %v13037_v63 }
 0x12a   : > { %2556 = vmatpush.bf16.msra.mxu2 %v13028_v0  ;;  %2570 = vmatpush.bf16.msra.mxu3 %v13036_v3  ;;  %v12952_v0 = vld [vmem:[%s18060_s8 + $0xa0] sm:$0xff] }
 0x12d   : > { %2557 = vmatmul.bf16.vlgmr.msra.gmra.mxu2 %v14317_v24  ;;  %2571 = vmatmul.bf16.vlgmr.msra.gmra.mxu3 %v14321_v25 }
 0x12e   : > { %2991 = vmatpush.bf16.msrb.mxu2 %v13067_v4  ;;  %3005 = vmatpush.bf16.msrb.mxu3 %v13075_v5 }
 0x132   : > { %2992 = vmatpush.bf16.msrb.mxu2 %v13066_v6  ;;  %3006 = vmatpush.bf16.msrb.mxu3 %v13074_v7  ;;  %v12951_v7 = vld [vmem:[%s18060_s8 + $0x98] sm:$0xff] }
 0x136   : > { %2993 = vmatpush.bf16.msrb.mxu2 %v13065_v10  ;;  %3007 = vmatpush.bf16.msrb.mxu3 %v13073_v11 }
 0x13a   : > { %2994 = vmatpush.bf16.msrb.mxu2 %v13064_v12  ;;  %3008 = vmatpush.bf16.msrb.mxu3 %v13072_v13  ;;  %v12950_v13 = vld [vmem:[%s18060_s8 + $0x90] sm:$0xff] }
 0x13e   : > { %2995 = vmatpush.bf16.msrb.mxu2 %v13063_v16  ;;  %3009 = vmatpush.bf16.msrb.mxu3 %v13071_v17  ;;  %v12949_v17 = vld [vmem:[%s18060_s8 + $0x88] sm:$0xff] }
 0x142   : > { %2996 = vmatpush.bf16.msrb.mxu2 %v13062_v18  ;;  %3010 = vmatpush.bf16.msrb.mxu3 %v13070_v19  ;;  %v12948_v19 = vld [vmem:[%s18060_s8 + $0x80] sm:$0xff] }
 0x146   : > { %2997 = vmatpush.bf16.msrb.mxu2 %v13061_v20  ;;  %3011 = vmatpush.bf16.msrb.mxu3 %v13069_v21  ;;  %v12987_v20 = vld [vmem:[%s18065_s24 + $0xb8] sm:$0xff]  ;;  %v12986_v21 = vld [vmem:[%s18065_s24 + $0xb0] sm:$0xff] }
 0x14a   : > { %2998 = vmatpush.bf16.msrb.mxu2 %v13060_v22  ;;  %3012 = vmatpush.bf16.msrb.mxu3 %v13068_v23  ;;  %v1172_v27 = vpop.f32.mrf.mxu0  ;;  %v1186_v28 = vpop.f32.mrf.mxu1  ;;  %v12985_v23 = vld [vmem:[%s18065_s24 + $0xa8] sm:$0xff] }
 0x14b   : > { %v1173_v29 = vadd.f32 %v13677_v26, %v1172_v27  ;;  %v13680_v27 = vld [vmem:[%s18068_s25 + $0x1] ss:$0 sm:$0xff] }
 0x14d   : > { %2999 = vmatmul.bf16.vlgmr.msrb.gmra.mxu2 %v14283_v14  ;;  %3013 = vmatmul.bf16.vlgmr.msrb.gmra.mxu3 %v14285_v15  ;;  %v1187_v32 = vadd.f32 %v1186_v28, %v1173_v29  ;;  %v12984_v29 = vld [vmem:[%s18065_s24 + $0xa0] sm:$0xff] }
 0x14f   : > { %v1010_v30 = vpop.f32.mrf.mxu2  ;;  %v1024_v31 = vpop.f32.mrf.mxu3  ;;  %v1191_v37 = vpack.c.bf16 %v1187_v32, %v1187_v32 }
 0x150   : > { %v1011_v38 = vadd.f32 %v13678_v33, %v1010_v30 }
 0x151   : > { %v1362_v44 = vunpack.c.l.b16 %v1191_v37  ;;  %v12982_v37 = vld [vmem:[%s18065_s24 + $0x90] sm:$0xff] }
 0x152   : > { %v1174_v34 = vpop.f32.mrf.mxu0  ;;  %v1188_v36 = vpop.f32.mrf.mxu1  ;;  %v1025_v45 = vadd.f32 %v1024_v31, %v1011_v38 }
 0x153   : > { %v1175_v35 = vadd.f32 %v13677_v26, %v1174_v34 }
 0x154   : > { %v1029_v51 = vpack.c.bf16 %v1025_v45, %v1025_v45 }
 0x155   : > { %v1189_v39 = vadd.f32 %v1188_v36, %v1175_v35  ;;  %v14558_v35 = vld [vmem:[%s18069_s26 + $0x2] ss:$0 sm:$0xff] }
 0x156   : > { %v1357_v58 = vunpack.c.l.b16 %v1029_v51  ;;  %v14581_v51 = vld [vmem:[%s18070_s10 + $0x2] ss:$0 sm:$0xff] }
 0x157   : > { %v1192_v40 = vpack.c.bf16 %v1189_v39, %v1189_v39  ;;  %v1012_v41 = vpop.f32.mrf.mxu2  ;;  %v1026_v42 = vpop.f32.mrf.mxu3 }
 0x158   : > { %v1013_v43 = vadd.f32 %v13678_v33, %v1012_v41  ;;  %v12983_v33 = vld [vmem:[%s18065_s24 + $0x98] sm:$0xff] }
 0x159   : > { %v1363_v46 = vunpack.c.l.b16 %v1192_v40 }
 0x15a   : > { %v1027_v47 = vadd.f32 %v1026_v42, %v1013_v43 }
 0x15b   : > { %v1364_v48 = vpack.c.b16 %v1363_v46, %v1362_v44  ;;  %v12981_v44 = vld [vmem:[%s18065_s24 + $0x88] sm:$0xff] }
 0x15c   : > { %v1030_v50 = vpack.c.bf16 %v1027_v47, %v1027_v47  ;;  %v12980_v47 = vld [vmem:[%s18065_s24 + $0x80] sm:$0xff] }
 0x15d   : > { %v1370_v52 = vsel %vm1365_vm2, %v1364_v48, 0 }
 0x15e   : > { %1379 = vmatpush.bf16.xpose.msra.mxu0 %v1370_v52  ;;  %v1358_v54 = vunpack.c.l.b16 %v1030_v50 }
 0x15f   : > { %v1334_v55 = vpop.f32.mrf.mxu2  ;;  %v1348_v56 = vpop.f32.mrf.mxu3 }
 0x160   : > { %v1335_v59 = vadd.f32 %v13679_v53, %v1334_v55  ;;  %v1359_v60 = vpack.c.b16 %v1358_v54, %v1357_v58  ;;  %v13683_v58 = vld [vmem:[%s18068_s25 + $0x3] ss:$0 sm:$0xff] }
 0x162   : > { %v1349_v62 = vadd.f32 %v1348_v56, %v1335_v59 }
 0x164   : > { %v1353_v5 = vpack.c.bf16 %v1349_v62, %v1349_v62 }
 0x165   : > { %9310 = vmatmul.msk.bf16.vlgmr.msra.gmra.mxu0 %vm1365_vm2, %v1359_v60 }
 0x166   : > { %1606 = vmatpush.bf16.msrb.mxu0 %v12955_v49  ;;  %v1446_v11 = vunpack.c.l.b16 %v1353_v5 }
 0x167   : > { %v1336_v63 = vpop.f32.mrf.mxu2  ;;  %v1350_v4 = vpop.f32.mrf.mxu3 }
 0x168   : > { %v1337_v3 = vadd.f32 %v13679_v53, %v1336_v63 }
 0x16a   : > { %1607 = vmatpush.bf16.msrb.mxu0 %v12954_v57  ;;  %v1351_v6 = vadd.f32 %v1350_v4, %v1337_v3 }
 0x16c   : > { %v1354_v10 = vpack.c.bf16 %v1351_v6, %v1351_v6 }
 0x16e   : > { %1608 = vmatpush.bf16.msrb.mxu0 %v12953_v61  ;;  %v1447_v12 = vunpack.c.l.b16 %v1354_v10 }
 0x170   : > { %v1448_v16 = vpack.c.b16 %v1447_v12, %v1446_v11  ;;  %v1779_v18 = vpop.f32.mrf.mxu2  ;;  %v1793_v22 = vpop.f32.mrf.mxu3 }
 0x171   : > { %v1780_v30 = vadd.f32 %v13680_v27, %v1779_v18 }
 0x172   : > { %1609 = vmatpush.bf16.msrb.mxu0 %v12952_v0  ;;  %1460 = vmatpush.bf16.msra.mxu1 %v1448_v16 }
 0x173   : > { %v1794_v34 = vadd.f32 %v1793_v22, %v1780_v30 }
 0x175   : > { %v1798_v39 = vpack.c.bf16 %v1794_v34, %v1794_v34  ;;  %v12963_v34 = vld [vmem:[%s18060_s8 + $0xf8] sm:$0xff] }
 0x176   : > { %1610 = vmatpush.bf16.msrb.mxu0 %v12951_v7  ;;  %1620 = vmatpush.bf16.msrb.mxu1 %v12963_v34  ;;  %v13017_v34 = vld [vmem:[%s18064_s23 + $0x128] sm:$0xff] }
 0x177   : > { %v1971_v45 = vunpack.c.l.b16 %v1798_v39  ;;  %v12959_v39 = vld [vmem:[%s18060_s8 + $0xd8] sm:$0xff] }
 0x178   : > { %v1781_v26 = vpop.f32.mrf.mxu2  ;;  %v1795_v31 = vpop.f32.mrf.mxu3 }
 0x179   : > { %v1782_v28 = vadd.f32 %v13680_v27, %v1781_v26 }
 0x17a   : > { %1611 = vmatpush.bf16.msrb.mxu0 %v12950_v13  ;;  %v14595_v13 = vld [vmem:[%s14106_s29] ss:$0 sm:$0xff] }
 0x17b   : > { %v1796_v32 = vadd.f32 %v1795_v31, %v1782_v28 }
 0x17d   : > { %v1799_v36 = vpack.c.bf16 %v1796_v32, %v1796_v32 }
 0x17e   : > { %1612 = vmatpush.bf16.msrb.mxu0 %v12949_v17 }
 0x17f   : > { %v1972_v42 = vunpack.c.l.b16 %v1799_v36  ;;  %v12962_v36 = vld [vmem:[%s18060_s8 + $0xf0] sm:$0xff] }
 0x180   : > { %1621 = vmatpush.bf16.msrb.mxu1 %v12962_v36  ;;  %v13016_v36 = vld [vmem:[%s18064_s23 + $0x120] sm:$0xff] }
 0x181   : > { %v1973_v46 = vpack.c.b16 %v1972_v42, %v1971_v45 }
 0x182   : > { %1613 = vmatpush.bf16.msrb.mxu0 %v12948_v19 }
 0x183   : > { %v1978_v48 = vsel %vm1365_vm2, %v1973_v46, 0 }
 0x185   : > { %1614 = vmatmul.bf16.vlgmr.msrb.gmra.mxu0 %v14283_v14 }
 0x186   : > { %1934 = vmatpush.bf16.msra.mxu0 %v12987_v20 }
 0x18a   : > { %1935 = vmatpush.bf16.msra.mxu0 %v12986_v21 }
 0x18e   : > { %1936 = vmatpush.bf16.msra.mxu0 %v12985_v23 }
 0x190   : > { %v2230_v38 = vpop.f32.mrf.mxu2  ;;  %v2244_v41 = vpop.f32.mrf.mxu3 }
 0x191   : > { %v2231_v40 = vadd.f32 %v14558_v35, %v2230_v38  ;;  %v12960_v38 = vld [vmem:[%s18060_s8 + $0xe0] sm:$0xff] }
 0x192   : > { %1937 = vmatpush.bf16.msra.mxu0 %v12984_v29 }
 0x193   : > { %v14564_v43 = vadd.f32 %v2244_v41, %v2231_v40  ;;  %v12958_v40 = vld [vmem:[%s18060_s8 + $0xd0] sm:$0xff]  ;;  %v12957_v41 = vld [vmem:[%s18060_s8 + $0xc8] sm:$0xff] }
 0x196   : > { %1938 = vmatpush.bf16.msra.mxu0 %v12983_v33 }
 0x198   : > { %v14574_v49 = vpop.f32.mrf.mxu2  ;;  %v14576_v50 = vpop.f32.mrf.mxu3 }
 0x19a   : > { %1939 = vmatpush.bf16.msra.mxu0 %v12982_v37  ;;  %v12961_v37 = vld [vmem:[%s18060_s8 + $0xe8] sm:$0xff] }
 0x19b   : > { %1622 = vmatpush.bf16.msrb.mxu1 %v12961_v37 }
 0x19e   : > { %1940 = vmatpush.bf16.msra.mxu0 %v12981_v44  ;;  %v12956_v44 = vld [vmem:[%s18060_s8 + $0xc0] sm:$0xff] }
 0x19f   : > { %1623 = vmatpush.bf16.msrb.mxu1 %v12960_v38 }
 0x1a2   : > { %1941 = vmatpush.bf16.msra.mxu0 %v12980_v47 }
 0x1a3   : > { %1624 = vmatpush.bf16.msrb.mxu1 %v12959_v39  ;;  %v13015_v39 = vld [vmem:[%s18064_s23 + $0x118] sm:$0xff] }
 0x1a5   : > { %1942 = vmatmul.bf16.vlgmr.msra.gmra.mxu0 %v14317_v24 }
 0x1a6   : > { %1987 = vmatpush.bf16.xpose.msrb.mxu0 %v1978_v48 }
 0x1a7   : > { %1625 = vmatpush.bf16.msrb.mxu1 %v12958_v40  ;;  %v13014_v40 = vld [vmem:[%s18064_s23 + $0x110] sm:$0xff] }
 0x1ab   : > { %1626 = vmatpush.bf16.msrb.mxu1 %v12957_v41 }
 0x1af   : > { %1627 = vmatpush.bf16.msrb.mxu1 %v12956_v44 }
 0x1b0   : > { %v2558_v52 = vpop.f32.mrf.mxu2  ;;  %v2572_v54 = vpop.f32.mrf.mxu3 }
 0x1b1   : > { %v2559_v53 = vadd.f32 %v14581_v51, %v2558_v52 }
 0x1b3   : > { %v14584_v55 = vadd.f32 %v2572_v54, %v2559_v53 }
 0x1b8   : > { %v14586_v56 = vpop.f32.mrf.mxu2  ;;  %v14588_v57 = vpop.f32.mrf.mxu3 }
 0x1d0   : > { %v3000_v59 = vpop.f32.mrf.mxu2  ;;  %v3014_v60 = vpop.f32.mrf.mxu3 }
 0x1d1   : > { %v3001_v61 = vadd.f32 %v13683_v58, %v3000_v59 }
 0x1d3   : > { %v3015_v62 = vadd.f32 %v3014_v60, %v3001_v61 }
 0x1d5   : > { %v3019_v4 = vpack.c.bf16 %v3015_v62, %v3015_v62 }
 0x1d7   : > { %v3192_v7 = vunpack.c.l.b16 %v3019_v4 }
 0x1d8   : > { %v3002_v63 = vpop.f32.mrf.mxu2  ;;  %v3016_v3 = vpop.f32.mrf.mxu3 }
 0x1d9   : > { %v3003_v0 = vadd.f32 %v13683_v58, %v3002_v63 }
 0x1db   : > { %v3017_v5 = vadd.f32 %v3016_v3, %v3003_v0 }
 0x1dd   : > { %v3020_v6 = vpack.c.bf16 %v3017_v5, %v3017_v5 }
 0x1df   : > { %v3193_v10 = vunpack.c.l.b16 %v3020_v6 }
 0x1e1   : > { %v3194_v11 = vpack.c.b16 %v3193_v10, %v3192_v7 }
 0x1e2   : > { %v1381_v16 = vpop.f32.mrf.mxu0 }
 0x1e3   : > { %v3199_v12 = vsel %vm1365_vm2, %v3194_v11, 0  ;;  %v1382_v17 = vadd.f32 %v14595_v13, %v1381_v16 }
 0x1e4   : > { %3208 = vmatpush.bf16.xpose.msra.mxu2 %v3199_v12 }
 0x1e5   : > { %v1387_v18 = vsel %vm1386_vm3, %v1382_v17, -inf }
 0x1e6   : > { %1388 = vmax.xlane.f32.xlu0 %v1387_v18 }
 0x1ea   : > { %v1383_v19 = vpop.f32.mrf.mxu0 }
 0x1eb   : > { %v1384_v20 = vadd.f32 %v14595_v13, %v1383_v19 }
 0x1ed   : > { %v1390_v21 = vsel %vm1386_vm3, %v1384_v20, -inf }
 0x1ee   : > { %1391 = vmax.xlane.f32.xlu0 %v1390_v21  ;;  %v12995_v21 = vld [vmem:[%s18065_s24 + $0xf8] sm:$0xff] }
 0x202   : > { %v1615_v41 = vpop.f32.mrf.mxu0 }
 0x259   : > { %v1389_v22 = vpop.xlane.xlu0 %1388 }
 0x25a   : > { %v1393_v23 = vsub.f32 %v1382_v17, %v1389_v22 }
 0x25c   : > { %v1395_v26 = vmul.f32 1.442695, %v1393_v23  ;;  %v12994_v23 = vld [vmem:[%s18065_s24 + $0xf0] sm:$0xff] }
 0x25e   : > { %13702 = vpow2.f32 %v1395_v26  ;;  %v12993_v26 = vld [vmem:[%s18065_s24 + $0xe8] sm:$0xff] }
 0x261   : > { %v1392_v27 = vpop.xlane.xlu0 %1391 }
 0x262   : > { %v1394_v28 = vsub.f32 %v1384_v20, %v1392_v27  ;;  %v12992_v27 = vld [vmem:[%s18065_s24 + $0xe0] sm:$0xff] }
 0x264   : > { %v13703_v29 = vpop.eup %13702  ;;  %v1397_v30 = vmul.f32 1.442695, %v1394_v28  ;;  %v12991_v28 = vld [vmem:[%s18065_s24 + $0xd8] sm:$0xff] }
 0x265   : > { %v1399_v31 = vsel %vm1386_vm3, %v13703_v29, 0.0 }
 0x266   : > { %13704 = vpow2.f32 %v1397_v30  ;;  %1400 = vadd.xlane.f32.xlu1 %v1399_v31  ;;  %v12989_v30 = vld [vmem:[%s18065_s24 + $0xc8] sm:$0xff]  ;;  %v12988_v31 = vld [vmem:[%s18065_s24 + $0xc0] sm:$0xff] }
 0x26c   : > { %v13705_v32 = vpop.eup %13704 }
 0x26d   : > { %v1402_v33 = vsel %vm1386_vm3, %v13705_v32, 0.0 }
 0x26e   : > { %1403 = vadd.xlane.f32.xlu1 %v1402_v33  ;;  %v13018_v33 = vld [vmem:[%s18064_s23 + $0x130] sm:$0xff] }
 0x2d9   : > { %v1401_v42 = vpop.xlane.xlu1 %1400 }
 0x2da   : > { %13706 = vrcp.f32 %v1401_v42  ;;  %v1416_v53 = vand.u32 2147483648, %v1401_v42  ;;  %vm1410_vm5 = vweird.f32 %v1401_v42  ;;  %v1414_v58 = vand.u32 2147483647, %v1401_v42 }
 0x2dc   : > { %v1417_v62 = vor.u32 1.1754944e-38, %v1416_v53  ;;  %vm1415_vm7 = vcmp.eq.f32.partialorder %v1414_v58, 8.507059e+37 }
 0x2e0   : > { %v13707_v45 = vpop.eup %13706 }
 0x2e1   : > { %v1406_v46 = vmul.f32 %v13707_v45, %v1401_v42  ;;  %v1404_v47 = vpop.xlane.xlu1 %1403  ;;  %vm1411_vm4 = vweird.f32 %v13707_v45 }
 0x2e2   : > { %13708 = vrcp.f32 %v1404_v47  ;;  %vm1412_vm6 = vmor %vm1410_vm5, %vm1411_vm4  ;;  %v1430_v3 = vand.u32 2147483648, %v1404_v47  ;;  %v1428_v5 = vand.u32 2147483647, %v1404_v47  ;;  %vm1424_vm9 = vweird.f32 %v1404_v47 }
 0x2e3   : > { %v1407_v48 = vsub.f32 1.0, %v1406_v46  ;;  %v13012_v46 = vld [vmem:[%s18064_s23 + $0x100] sm:$0xff] }
 0x2e4   : > { %v1431_v10 = vor.u32 1.1754944e-38, %v1430_v3  ;;  %vm1429_vm11 = vcmp.eq.f32.partialorder %v1428_v5, 8.507059e+37 }
 0x2e5   : > { %v1408_v52 = vmul.f32 %v13707_v45, %v1407_v48 }
 0x2e7   : > { %v1409_v54 = vadd.f32 %v13707_v45, %v1408_v52  ;;  %v1617_v52 = vpop.f32.mrf.mxu0 }
 0x2e8   : > { %v13709_v59 = vpop.eup %13708 }
 0x2e9   : > { %v1413_v60 = vsel %vm1412_vm6, %v13707_v45, %v1409_v54  ;;  %v1420_v61 = vmul.f32 %v13709_v59, %v1404_v47  ;;  %vm1425_vm8 = vweird.f32 %v13709_v59  ;;  %v13013_v45 = vld [vmem:[%s18064_s23 + $0x108] sm:$0xff]  ;;  %v13684_v47 = vld [vmem:[%s18069_s26 + $0x1] ss:$0 sm:$0xff] }
 0x2ea   : > { %v1418_v0 = vsel %vm1415_vm7, %v1417_v62, %v1413_v60  ;;  %vm1426_vm10 = vmor %vm1424_vm9, %vm1425_vm8  ;;  %v1616_v53 = vadd.f32 %v13684_v47, %v1615_v41  ;;  %v1618_v58 = vadd.f32 %v13684_v47, %v1617_v52  ;;  %v13025_v47 = vld [vmem:[%s18064_s23 + $0x168] sm:$0xff]  ;;  %v13023_v52 = vld [vmem:[%s18064_s23 + $0x158] sm:$0xff] }
 0x2eb   : > { %v1421_v63 = vsub.f32 1.0, %v1420_v61  ;;  %v14627_v6 = vmul.f32 %v13703_v29, %v1418_v0  ;;  %v12990_v29 = vld [vmem:[%s18065_s24 + $0xd0] sm:$0xff] }
 0x2ed   : > { %v1422_v4 = vmul.f32 %v13709_v59, %v1421_v63  ;;  %v1437_v16 = vpack.c.bf16 %v14627_v6, %v14627_v6 }
 0x2ef   : > { %v1423_v7 = vadd.f32 %v13709_v59, %v1422_v4  ;;  %v1441_v19 = vunpack.c.l.b16 %v1437_v16  ;;  %v1943_v62 = vpop.f32.mrf.mxu0  ;;  %v13685_v4 = vld [vmem:[%s18070_s10 + $0x1] ss:$0 sm:$0xff] }
 0x2f1   : > { %v1427_v11 = vsel %vm1426_vm10, %v13709_v59, %v1423_v7 }
 0x2f2   : > { %v1432_v12 = vsel %vm1429_vm11, %v1431_v10, %v1427_v11  ;;  %v1944_v10 = vadd.f32 %v13685_v4, %v1943_v62 }
 0x2f3   : > { %v14631_v17 = vmul.f32 %v13705_v32, %v1432_v12  ;;  %v13019_v32 = vld [vmem:[%s18064_s23 + $0x138] sm:$0xff] }
 0x2f4   : > { %2385 = vmatpush.bf16.msra.mxu0 %v13019_v32 }
 0x2f5   : > { %v1438_v18 = vpack.c.bf16 %v14631_v17, %v14631_v17 }
 0x2f7   : > { %v1442_v20 = vunpack.c.l.b16 %v1438_v18  ;;  %v1945_v11 = vpop.f32.mrf.mxu0 }
 0x2f8   : > { %2386 = vmatpush.bf16.msra.mxu0 %v13018_v33  ;;  %v1946_v16 = vadd.f32 %v13685_v4, %v1945_v11 }
 0x2f9   : > { %v1443_v22 = vpack.c.b16 %v1442_v20, %v1441_v19 }
 0x2fb   : > { %9311 = vmatmul.msk.bf16.vlgmr.msra.gmra.mxu1 %vm1386_vm3, %v1443_v22 }
 0x2fc   : > { %1948 = vmatpush.bf16.msra.mxu1 %v12995_v21  ;;  %2387 = vmatpush.bf16.msra.mxu0 %v13017_v34 }
 0x300   : > { %1949 = vmatpush.bf16.msra.mxu1 %v12994_v23  ;;  %2388 = vmatpush.bf16.msra.mxu0 %v13016_v36 }
 0x304   : > { %1950 = vmatpush.bf16.msra.mxu1 %v12993_v26  ;;  %2389 = vmatpush.bf16.msra.mxu0 %v13015_v39 }
 0x308   : > { %1951 = vmatpush.bf16.msra.mxu1 %v12992_v27  ;;  %2390 = vmatpush.bf16.msra.mxu0 %v13014_v40 }
 0x30b   : > { %1628 = vmatmul.bf16.vlgmr.msrb.gmra.mxu1 %v14285_v15 }
 0x30c   : > { %1952 = vmatpush.bf16.msra.mxu1 %v12991_v28  ;;  %2391 = vmatpush.bf16.msra.mxu0 %v13013_v45  ;;  %v13027_v45 = vld [vmem:[%s18064_s23 + $0x178] sm:$0xff] }
 0x310   : > { %1953 = vmatpush.bf16.msra.mxu1 %v12990_v29  ;;  %2392 = vmatpush.bf16.msra.mxu0 %v13012_v46  ;;  %v13026_v46 = vld [vmem:[%s18064_s23 + $0x170] sm:$0xff] }
 0x314   : > { %1954 = vmatpush.bf16.msra.mxu1 %v12989_v30 }
 0x318   : > { %1955 = vmatpush.bf16.msra.mxu1 %v12988_v31 }
 0x31b   : > { %1956 = vmatmul.bf16.vlgmr.msra.gmra.mxu1 %v14321_v25 }
 0x378   : > { %v1462_v37 = vpop.f32.mrf.mxu1 }
 0x379   : > { %v1467_v38 = vpack.c.bf16 %v1462_v37, %v1462_v37 }
 0x37b   : > { %1470 = vst.msk [vmem:[#allocation2] sm:$0xf] %vm1469_vm12, %v1467_v38 }
 0x380   : > { %v1464_v42 = vpop.f32.mrf.mxu1 }
 0x381   : > { %v1468_v44 = vpack.c.bf16 %v1464_v42, %v1464_v42 }
 0x383   : > { %1471 = vst.msk [vmem:[#allocation2 + $0x8] sm:$0xf] %vm1469_vm12, %v1468_v44 }
 0x388   : > { %v1629_v48 = vpop.f32.mrf.mxu1 }
 0x389   : > { %v1630_v54 = vadd.f32 %v1629_v48, %v1616_v53  ;;  %v13024_v48 = vld [vmem:[%s18064_s23 + $0x160] sm:$0xff]  ;;  %v13022_v53 = vld [vmem:[%s18064_s23 + $0x150] sm:$0xff] }
 0x38b   : > { %v1634_v60 = vpack.c.bf16 %v1630_v54, %v1630_v54  ;;  %v13021_v54 = vld [vmem:[%s18064_s23 + $0x148] sm:$0xff] }
 0x38d   : > { %v1966_v0 = vunpack.c.l.b16 %v1634_v60 }
 0x390   : > { %v1631_v59 = vpop.f32.mrf.mxu1 }
 0x391   : > { %v1632_v61 = vadd.f32 %v1631_v59, %v1618_v58  ;;  %v13020_v58 = vld [vmem:[%s18064_s23 + $0x140] sm:$0xff] }
 0x393   : > { %v1635_v63 = vpack.c.bf16 %v1632_v61, %v1632_v61 }
 0x395   : > { %v1967_v3 = vunpack.c.l.b16 %v1635_v63 }
 0x397   : > { %v1968_v5 = vpack.c.b16 %v1967_v3, %v1966_v0 }
 0x398   : > { %v1957_v7 = vpop.f32.mrf.mxu1 }
 0x399   : > { %9603 = vmatmul.msk.bf16.vlgmr.msrb.gmra.mxu0 %vm1365_vm2, %v1968_v5  ;;  %v1958_v12 = vadd.f32 %v1957_v7, %v1944_v10 }
 0x39b   : > { %v1962_v19 = vpack.c.bf16 %v1958_v12, %v1958_v12  ;;  %v2561_v12 = vadd.f32 %v14581_v51, %v14586_v56 }
 0x39d   : > { %v2053_v22 = vunpack.c.l.b16 %v1962_v19 }
 0x3a0   : > { %v1959_v18 = vpop.f32.mrf.mxu1 }
 0x3a1   : > { %v1960_v20 = vadd.f32 %v1959_v18, %v1946_v16 }
 0x3a3   : > { %v1963_v21 = vpack.c.bf16 %v1960_v20, %v1960_v20 }
 0x3a5   : > { %v2054_v23 = vunpack.c.l.b16 %v1963_v21 }
 0x3a7   : > { %v2055_v26 = vpack.c.b16 %v2054_v23, %v2053_v22  ;;  %v2575_v23 = vadd.f32 %v14588_v57, %v2561_v12  ;;  %v13046_v12 = vld [vmem:[%s18060_s8 + $0x190] sm:$0xff] }
 0x3a9   : > { %2067 = vmatpush.bf16.msrb.mxu1 %v2055_v26  ;;  %2393 = vmatmul.bf16.vlgmr.msra.gmra.mxu0 %v14283_v14 }
 0x3ad   : > { %2399 = vmatpush.bf16.msra.mxu1 %v13027_v45 }
 0x3b1   : > { %2400 = vmatpush.bf16.msra.mxu1 %v13026_v46 }
 0x3b5   : > { %2401 = vmatpush.bf16.msra.mxu1 %v13025_v47 }
 0x3b9   : > { %2402 = vmatpush.bf16.msra.mxu1 %v13024_v48  ;;  %v2233_v48 = vadd.f32 %v14558_v35, %v14574_v49 }
 0x3bd   : > { %2403 = vmatpush.bf16.msra.mxu1 %v13023_v52 }
 0x3c1   : > { %2404 = vmatpush.bf16.msra.mxu1 %v13022_v53 }
 0x3c5   : > { %2405 = vmatpush.bf16.msra.mxu1 %v13021_v54 }
 0x3c9   : > { %2406 = vmatpush.bf16.msra.mxu1 %v13020_v58 }
 0x416   : > { %v1989_v27 = vpop.f32.mrf.mxu0 }
 0x417   : > { %v1990_v28 = vadd.f32 %v14595_v13, %v1989_v27 }
 0x419   : > { %v1994_v29 = vsel %vm1386_vm3, %v1990_v28, -inf }
 0x41a   : > { %1995 = vmax.xlane.f32.xlu2 %v1994_v29 }
 0x41e   : > { %v1991_v30 = vpop.f32.mrf.mxu0 }
 0x41f   : > { %v1992_v31 = vadd.f32 %v14595_v13, %v1991_v30  ;;  %v2578_v30 = vpack.c.bf16 %v2575_v23, %v2575_v23  ;;  %v13079_v23 = vld [vmem:[%s18065_s24 + $0x198] sm:$0xff] }
 0x421   : > { %v1997_v32 = vsel %vm1386_vm3, %v1992_v31, -inf }
 0x422   : > { %1998 = vmax.xlane.f32.xlu2 %v1997_v32  ;;  %v2577_v32 = vpack.c.bf16 %v14584_v55, %v14584_v55  ;;  %v13686_v55 = vld [vmem:[%s18068_s25 + $0x2] ss:$0 sm:$0xff] }
 0x48d   : > { %v1996_v33 = vpop.xlane.xlu2 %1995 }
 0x48e   : > { %v2000_v34 = vsub.f32 %v1990_v28, %v1996_v33  ;;  %v2669_v33 = vunpack.c.l.b16 %v2578_v30 }
 0x490   : > { %v2002_v36 = vmul.f32 1.442695, %v2000_v34 }
 0x492   : > { %13710 = vpow2.f32 %v2002_v36 }
 0x495   : > { %v1999_v37 = vpop.xlane.xlu2 %1998 }
 0x496   : > { %v2001_v38 = vsub.f32 %v1992_v31, %v1999_v37  ;;  %v2668_v37 = vunpack.c.l.b16 %v2577_v32 }
 0x498   : > { %v13711_v39 = vpop.eup %13710  ;;  %v2004_v40 = vmul.f32 1.442695, %v2001_v38 }
 0x499   : > { %v2006_v41 = vsel %vm1386_vm3, %v13711_v39, 0.0 }
 0x49a   : > { %13712 = vpow2.f32 %v2004_v40  ;;  %2007 = vadd.xlane.f32.xlu0 %v2006_v41 }
 0x4a0   : > { %v13713_v42 = vpop.eup %13712 }
 0x4a1   : > { %v2009_v44 = vsel %vm1386_vm3, %v13713_v42, 0.0 }
 0x4a2   : > { %2010 = vadd.xlane.f32.xlu1 %v2009_v44 }
 0x50d   : > { %v2008_v59 = vpop.xlane.xlu0 %2007 }
 0x50e   : > { %13714 = vrcp.f32 %v2008_v59  ;;  %v2023_v3 = vand.u32 2147483648, %v2008_v59  ;;  %vm2017_vm14 = vweird.f32 %v2008_v59  ;;  %v2021_v5 = vand.u32 2147483647, %v2008_v59 }
 0x510   : > { %v2024_v16 = vor.u32 1.1754944e-38, %v2023_v3  ;;  %vm2022_vm0 = vcmp.eq.f32.partialorder %v2021_v5, 8.507059e+37  ;;  %v13051_v3 = vld [vmem:[%s18060_s8 + $0x1b8] sm:$0xff] }
 0x514   : > { %v13715_v60 = vpop.eup %13714 }
 0x515   : > { %v2013_v61 = vmul.f32 %v13715_v60, %v2008_v59  ;;  %v2011_v62 = vpop.xlane.xlu1 %2010  ;;  %vm2018_vm13 = vweird.f32 %v13715_v60  ;;  %v2247_v59 = vadd.f32 %v14576_v50, %v2233_v48  ;;  %v13050_v50 = vld [vmem:[%s18060_s8 + $0x1b0] sm:$0xff]  ;;  %v13056_v48 = vld [vmem:[%s18060_s8 + $0x1e0] sm:$0xff] }
 0x516   : > { %13716 = vrcp.f32 %v2011_v62  ;;  %vm2019_vm15 = vmor %vm2017_vm14, %vm2018_vm13  ;;  %v2037_v20 = vand.u32 2147483648, %v2011_v62  ;;  %v2035_v22 = vand.u32 2147483647, %v2011_v62  ;;  %vm2031_vm5 = vweird.f32 %v2011_v62 }
 0x517   : > { %v2014_v63 = vsub.f32 1.0, %v2013_v61 }
 0x518   : > { %v2038_v28 = vor.u32 1.1754944e-38, %v2037_v20  ;;  %vm2036_vm7 = vcmp.eq.f32.partialorder %v2035_v22, 8.507059e+37  ;;  %v13082_v20 = vld [vmem:[%s18065_s24 + $0x1b0] sm:$0xff]  ;;  %v13080_v22 = vld [vmem:[%s18065_s24 + $0x1a0] sm:$0xff] }
 0x519   : > { %v2015_v0 = vmul.f32 %v13715_v60, %v2014_v63  ;;  %v2250_v63 = vpack.c.bf16 %v2247_v59, %v2247_v59  ;;  %v13052_v59 = vld [vmem:[%s18060_s8 + $0x1c0] sm:$0xff] }
 0x51b   : > { %v2016_v4 = vadd.f32 %v13715_v60, %v2015_v0  ;;  %v2582_v49 = vunpack.c.l.b16 %v2250_v63 }
 0x51c   : > { %v13717_v7 = vpop.eup %13716 }
 0x51d   : > { %v2020_v10 = vsel %vm2019_vm15, %v13715_v60, %v2016_v4  ;;  %v2027_v11 = vmul.f32 %v13717_v7, %v2011_v62  ;;  %vm2032_vm4 = vweird.f32 %v13717_v7  ;;  %v2249_v4 = vpack.c.bf16 %v14564_v43, %v14564_v43  ;;  %v13048_v43 = vld [vmem:[%s18060_s8 + $0x1a0] sm:$0xff] }
 0x51e   : > { %v2025_v19 = vsel %vm2022_vm0, %v2024_v16, %v2020_v10  ;;  %vm2033_vm6 = vmor %vm2031_vm5, %vm2032_vm4  ;;  %v13049_v10 = vld [vmem:[%s18060_s8 + $0x1a8] sm:$0xff]  ;;  %vm2084_vm4 = vcmask 1043968  }
 0x51f   : > { %v2028_v18 = vsub.f32 1.0, %v2027_v11  ;;  %v14729_v26 = vmul.f32 %v13711_v39, %v2025_v19  ;;  %v2670_v39 = vpack.c.b16 %v2669_v33, %v2668_v37  ;;  %v2581_v5 = vunpack.c.l.b16 %v2249_v4  ;;  %v13047_v11 = vld [vmem:[%s18060_s8 + $0x198] sm:$0xff]  ;;  %v13045_v16 = vld [vmem:[%s18060_s8 + $0x188] sm:$0xff] }
 0x520   : > { %v13083_v19 = vld [vmem:[%s18065_s24 + $0x1b8] sm:$0xff] }
 0x521   : > { %v2029_v21 = vmul.f32 %v13717_v7, %v2028_v18  ;;  %v2044_v56 = vpack.c.bf16 %v14729_v26, %v14729_v26  ;;  %v13044_v18 = vld [vmem:[%s18060_s8 + $0x180] sm:$0xff] }
 0x523   : > { %v2030_v27 = vadd.f32 %v13717_v7, %v2029_v21  ;;  %v2048_v34 = vunpack.c.l.b16 %v2044_v56  ;;  %v13081_v21 = vld [vmem:[%s18065_s24 + $0x1a8] sm:$0xff] }
 0x525   : > { %v2034_v29 = vsel %vm2033_vm6, %v13717_v7, %v2030_v27  ;;  %v2583_v7 = vpack.c.b16 %v2582_v49, %v2581_v5  ;;  %v13077_v27 = vld [vmem:[%s18065_s24 + $0x188] sm:$0xff] }
 0x526   : > { %v2039_v51 = vsel %vm2036_vm7, %v2038_v28, %v2034_v29  ;;  %v13076_v28 = vld [vmem:[%s18065_s24 + $0x180] sm:$0xff] }
 0x527   : > { %v14733_v31 = vmul.f32 %v13713_v42, %v2039_v51  ;;  %v2394_v42 = vpop.f32.mrf.mxu0 }
 0x528   : > { %v2395_v45 = vadd.f32 %v13686_v55, %v2394_v42 }
 0x529   : > { %v2045_v57 = vpack.c.bf16 %v14733_v31, %v14733_v31 }
 0x52b   : > { %v2049_v36 = vunpack.c.l.b16 %v2045_v57 }
 0x52d   : > { %v2050_v38 = vpack.c.b16 %v2049_v36, %v2048_v34 }
 0x52f   : > { %9604 = vmatmul.msk.bf16.vlgmr.msrb.gmra.mxu1 %vm1386_vm3, %v2050_v38  ;;  %v2396_v46 = vpop.f32.mrf.mxu0 }
 0x530   : > { %2682 = vmatpush.bf16.msrb.mxu1 %v2670_v39  ;;  %v2397_v52 = vadd.f32 %v13686_v55, %v2396_v46  ;;  %v13058_v46 = vld [vmem:[%s18060_s8 + $0x1f0] sm:$0xff] }
 0x53f   : > { %2407 = vmatmul.bf16.vlgmr.msra.gmra.mxu1 %v14285_v15 }
 0x5ac   : > { %v14741_v40 = vpop.f32.mrf.mxu1 }
 0x5b4   : > { %v14743_v41 = vpop.f32.mrf.mxu1 }
 0x5bc   : > { %v2408_v44 = vpop.f32.mrf.mxu1 }
 0x5bd   : > { %v2409_v47 = vadd.f32 %v2408_v44, %v2395_v45  ;;  %v13059_v45 = vld [vmem:[%s18060_s8 + $0x1f8] sm:$0xff] }
 0x5be   : > { %2841 = vmatpush.bf16.msra.mxu1 %v13059_v45 }
 0x5bf   : > { %v2413_v54 = vpack.c.bf16 %v2409_v47, %v2409_v47  ;;  %v13057_v47 = vld [vmem:[%s18060_s8 + $0x1e8] sm:$0xff] }
 0x5c1   : > { %v2586_v61 = vunpack.c.l.b16 %v2413_v54  ;;  %v13053_v54 = vld [vmem:[%s18060_s8 + $0x1c8] sm:$0xff] }
 0x5c2   : > { %2842 = vmatpush.bf16.msra.mxu1 %v13058_v46 }
 0x5c4   : > { %v2410_v53 = vpop.f32.mrf.mxu1 }
 0x5c5   : > { %v2411_v58 = vadd.f32 %v2410_v53, %v2397_v52  ;;  %v13055_v52 = vld [vmem:[%s18060_s8 + $0x1d8] sm:$0xff]  ;;  %v13054_v53 = vld [vmem:[%s18060_s8 + $0x1d0] sm:$0xff] }
 0x5c6   : > { %2843 = vmatpush.bf16.msra.mxu1 %v13057_v47 }
 0x5c7   : > { %v2414_v60 = vpack.c.bf16 %v2411_v58, %v2411_v58 }
 0x5c9   : > { %v2587_v62 = vunpack.c.l.b16 %v2414_v60 }
 0x5ca   : > { %2844 = vmatpush.bf16.msra.mxu1 %v13056_v48 }
 0x5cb   : > { %v2588_v0 = vpack.c.b16 %v2587_v62, %v2586_v61 }
 0x5cd   : > { %v2593_v35 = vsel %vm1365_vm2, %v2588_v0, 0 }
 0x5ce   : > { %2602 = vmatpush.bf16.xpose.msrb.mxu0 %v2593_v35  ;;  %2845 = vmatpush.bf16.msra.mxu1 %v13055_v52 }
 0x5d2   : > { %2846 = vmatpush.bf16.msra.mxu1 %v13054_v53 }
 0x5d5   : > { %9896 = vmatmul.msk.bf16.vlgmr.msrb.gmra.mxu0 %vm1365_vm2, %v2583_v7 }
 0x5d6   : > { %2827 = vmatpush.bf16.msra.mxu0 %v13051_v3  ;;  %2847 = vmatpush.bf16.msra.mxu1 %v13053_v54 }
 0x5da   : > { %2828 = vmatpush.bf16.msra.mxu0 %v13050_v50  ;;  %2848 = vmatpush.bf16.msra.mxu1 %v13052_v59 }
 0x5de   : > { %2829 = vmatpush.bf16.msra.mxu0 %v13049_v10 }
 0x5e2   : > { %2830 = vmatpush.bf16.msra.mxu0 %v13048_v43  ;;  %v2042_v43 = vadd.f32 %v14729_v26, %v14627_v6 }
 0x5e6   : > { %2831 = vmatpush.bf16.msra.mxu0 %v13047_v11 }
 0x5ea   : > { %2832 = vmatpush.bf16.msra.mxu0 %v13046_v12 }
 0x5ee   : > { %2833 = vmatpush.bf16.msra.mxu0 %v13045_v16 }
 0x5f2   : > { %2834 = vmatpush.bf16.msra.mxu0 %v13044_v18 }
 0x5f5   : > { %2835 = vmatmul.bf16.vlgmr.msra.gmra.mxu0 %v14283_v14  ;;  %v13078_v14 = vld [vmem:[%s18065_s24 + $0x190] sm:$0xff] }
 0x5f6   : > { %3155 = vmatpush.bf16.msrb.mxu0 %v13083_v19 }
 0x5fa   : > { %3156 = vmatpush.bf16.msrb.mxu0 %v13082_v20 }
 0x5fe   : > { %3157 = vmatpush.bf16.msrb.mxu0 %v13081_v21 }
 0x602   : > { %3158 = vmatpush.bf16.msrb.mxu0 %v13080_v22 }
 0x606   : > { %3159 = vmatpush.bf16.msrb.mxu0 %v13079_v23 }
 0x60a   : > { %3160 = vmatpush.bf16.msrb.mxu0 %v13078_v14 }
 0x60e   : > { %3161 = vmatpush.bf16.msrb.mxu0 %v13077_v27  ;;  %v2043_v27 = vadd.f32 %v14733_v31, %v14631_v17  ;;  %v13089_v17 = vld [vmem:[%s18065_s24 + $0x1e8] sm:$0xff]  ;;  %v13088_v31 = vld [vmem:[%s18065_s24 + $0x1e0] sm:$0xff] }
 0x612   : > { %3162 = vmatpush.bf16.msrb.mxu0 %v13076_v28 }
 0x615   : > { %3163 = vmatmul.bf16.vlgmr.msrb.gmra.mxu0 %v14317_v24 }
 0x652   : > { %v2604_v29 = vpop.f32.mrf.mxu0 }
 0x653   : > { %v2605_v30 = vadd.f32 %v14595_v13, %v2604_v29 }
 0x655   : > { %v2609_v51 = vsel %vm1386_vm3, %v2605_v30, -inf }
 0x656   : > { %2610 = vmax.xlane.f32.xlu2 %v2609_v51 }
 0x65a   : > { %v2606_v56 = vpop.f32.mrf.mxu0 }
 0x65b   : > { %v2607_v32 = vadd.f32 %v14595_v13, %v2606_v56  ;;  %v13091_v56 = vld [vmem:[%s18065_s24 + $0x1f8] sm:$0xff] }
 0x65d   : > { %v2612_v57 = vsel %vm1386_vm3, %v2607_v32, -inf }
 0x65e   : > { %2613 = vmax.xlane.f32.xlu0 %v2612_v57  ;;  %v13090_v57 = vld [vmem:[%s18065_s24 + $0x1f0] sm:$0xff] }
 0x6c9   : > { %v2611_v33 = vpop.xlane.xlu2 %2610 }
 0x6ca   : > { %v2615_v34 = vsub.f32 %v2605_v30, %v2611_v33  ;;  %v13087_v33 = vld [vmem:[%s18065_s24 + $0x1d8] sm:$0xff] }
 0x6cc   : > { %v2617_v36 = vmul.f32 1.442695, %v2615_v34  ;;  %v13086_v34 = vld [vmem:[%s18065_s24 + $0x1d0] sm:$0xff] }
 0x6ce   : > { %13718 = vpow2.f32 %v2617_v36  ;;  %v13085_v36 = vld [vmem:[%s18065_s24 + $0x1c8] sm:$0xff] }
 0x6d1   : > { %v2614_v37 = vpop.xlane.xlu0 %2613 }
 0x6d2   : > { %v2616_v38 = vsub.f32 %v2607_v32, %v2614_v37  ;;  %v13084_v37 = vld [vmem:[%s18065_s24 + $0x1c0] sm:$0xff] }
 0x6d4   : > { %v13719_v39 = vpop.eup %13718  ;;  %v2619_v24 = vmul.f32 1.442695, %v2616_v38 }
 0x6d5   : > { %v2621_v42 = vsel %vm1386_vm3, %v13719_v39, 0.0 }
 0x6d6   : > { %13720 = vpow2.f32 %v2619_v24  ;;  %2622 = vadd.xlane.f32.xlu1 %v2621_v42 }
 0x6dc   : > { %v13721_v55 = vpop.eup %13720 }
 0x6dd   : > { %v2624_v44 = vsel %vm1386_vm3, %v13721_v55, 0.0 }
 0x6de   : > { %2625 = vadd.xlane.f32.xlu2 %v2624_v44 }
 0x749   : > { %v2623_v58 = vpop.xlane.xlu1 %2622 }
 0x74a   : > { %13722 = vrcp.f32 %v2623_v58  ;;  %v2638_v0 = vand.u32 2147483648, %v2623_v58  ;;  %v2636_v4 = vand.u32 2147483647, %v2623_v58  ;;  %vm2632_vm9 = vweird.f32 %v2623_v58 }
 0x74c   : > { %v2639_v50 = vor.u32 1.1754944e-38, %v2638_v0  ;;  %vm2637_vm11 = vcmp.eq.f32.partialorder %v2636_v4, 8.507059e+37 }
 0x750   : > { %v13723_v60 = vpop.eup %13722 }
 0x751   : > { %v2628_v61 = vmul.f32 %v13723_v60, %v2623_v58  ;;  %v2626_v62 = vpop.xlane.xlu2 %2625  ;;  %vm2633_vm8 = vweird.f32 %v13723_v60 }
 0x752   : > { %13724 = vrcp.f32 %v2626_v62  ;;  %vm2634_vm10 = vmor %vm2632_vm9, %vm2633_vm8  ;;  %v2652_v16 = vand.u32 2147483648, %v2626_v62  ;;  %v2650_v20 = vand.u32 2147483647, %v2626_v62  ;;  %vm2646_vm14 = vweird.f32 %v2626_v62 }
 0x753   : > { %v2629_v63 = vsub.f32 1.0, %v2628_v61  ;;  %v13688_v61 = vld [vmem:[%s18070_s10 + $0x3] ss:$0 sm:$0xff] }
 0x754   : > { %v2653_v22 = vor.u32 1.1754944e-38, %v2652_v16  ;;  %vm2651_vm0 = vcmp.eq.f32.partialorder %v2650_v20, 8.507059e+37 }
 0x755   : > { %v2630_v3 = vmul.f32 %v13723_v60, %v2629_v63 }
 0x757   : > { %v2631_v35 = vadd.f32 %v13723_v60, %v2630_v3 }
 0x758   : > { %v13725_v49 = vpop.eup %13724 }
 0x759   : > { %v2635_v5 = vsel %vm2634_vm10, %v13723_v60, %v2631_v35  ;;  %v2642_v7 = vmul.f32 %v13725_v49, %v2626_v62  ;;  %vm2647_vm13 = vweird.f32 %v13725_v49 }
 0x75a   : > { %v2640_v10 = vsel %vm2637_vm11, %v2639_v50, %v2635_v5  ;;  %vm2648_vm15 = vmor %vm2646_vm14, %vm2647_vm13 }
 0x75b   : > { %v2655_v11 = vmul.f32 %v13719_v39, %v2640_v10  ;;  %v2643_v12 = vsub.f32 1.0, %v2642_v7  ;;  %v2836_v39 = vpop.f32.mrf.mxu0 }
 0x75d   : > { %v14837_v18 = vadd.f32 %v2655_v11, %v2042_v43  ;;  %v2644_v19 = vmul.f32 %v13725_v49, %v2643_v12  ;;  %v2659_v28 = vpack.c.bf16 %v2655_v11, %v2655_v11 }
 0x75f   : > { %v2645_v21 = vadd.f32 %v13725_v49, %v2644_v19  ;;  %v2663_v30 = vunpack.c.l.b16 %v2659_v28 }
 0x761   : > { %v2649_v23 = vsel %vm2648_vm15, %v13725_v49, %v2645_v21 }
 0x762   : > { %v2654_v14 = vsel %vm2651_vm0, %v2653_v22, %v2649_v23  ;;  %v2074_v23 = vpack.c.bf16 %v14741_v40, %v14741_v40 }
 0x763   : > { %v2656_v6 = vmul.f32 %v13721_v55, %v2654_v14  ;;  %v13687_v55 = vld [vmem:[%s18069_s26 + $0x3] ss:$0 sm:$0xff]  ;;  %v2838_v45 = vpop.f32.mrf.mxu0 }
 0x764   : > { %v2837_v46 = vadd.f32 %v13687_v55, %v2836_v39  ;;  %v2839_v48 = vadd.f32 %v13687_v55, %v2838_v45  ;;  %v10243_v39 = vld [vmem:[%s18071_s11 + $0x58] sm:$0xf0] }
 0x765   : > { %v14841_v26 = vadd.f32 %v2656_v6, %v2043_v27  ;;  %v2660_v29 = vpack.c.bf16 %v2656_v6, %v2656_v6  ;;  %v10257_v6 = vld [vmem:[%s18071_s11 + $0x70] sm:$0xf] }
 0x767   : > { %v2664_v51 = vunpack.c.l.b16 %v2660_v29  ;;  %v13108_v29 = vld [vmem:[%s18071_s11 + $0x74] sm:$0xf] }
 0x769   : > { %v2665_v32 = vpack.c.b16 %v2664_v51, %v2663_v30  ;;  %v10259_v30 = vld [vmem:[%s18071_s11 + $0x78] sm:$0xf0]  ;;  %v10249_v51 = vld [vmem:[%s18071_s11 + $0x60] sm:$0xf] }
 0x76b   : > { %9897 = vmatmul.msk.bf16.vlgmr.msrb.gmra.mxu1 %vm1386_vm3, %v2665_v32  ;;  %v3164_v54 = vpop.f32.mrf.mxu0  ;;  %v10262_v32 = vor.u32 %v13108_v29, %v10259_v30 }
 0x76c   : > { %3169 = vmatpush.bf16.msrb.mxu1 %v13091_v56  ;;  %v3165_v0 = vadd.f32 %v13688_v61, %v3164_v54  ;;  %v13107_v56 = vld [vmem:[%s18071_s11 + $0x64] sm:$0xf0] }
 0x76d   : > { %3545 = vmatpush.bf16.msra.mxu0 %v10262_v32 }
 0x770   : > { %3170 = vmatpush.bf16.msrb.mxu1 %v13090_v57  ;;  %v13106_v57 = vld [vmem:[%s18071_s11 + $0x64] sm:$0xf] }
 0x773   : > { %v3166_v3 = vpop.f32.mrf.mxu0 }
 0x774   : > { %3171 = vmatpush.bf16.msrb.mxu1 %v13089_v17  ;;  %v3167_v35 = vadd.f32 %v13688_v61, %v3166_v3  ;;  %v10251_v17 = vld [vmem:[%s18071_s11 + $0x68] sm:$0xf0]  ;;  %v10225_v61 = vld [vmem:[%s18071_s11 + $0x30] sm:$0xf]  ;;  %v10227_v3 = vld [vmem:[%s18071_s11 + $0x38] sm:$0xf0] }
 0x778   : > { %3172 = vmatpush.bf16.msrb.mxu1 %v13088_v31 }
 0x77b   : > { %2849 = vmatmul.bf16.vlgmr.msra.gmra.mxu1 %v14285_v15 }
 0x77c   : > { %3173 = vmatpush.bf16.msrb.mxu1 %v13087_v33  ;;  %v10250_v33 = vor.u32 %v13107_v56, %v10249_v51 }
 0x780   : > { %3174 = vmatpush.bf16.msrb.mxu1 %v13086_v34 }
 0x784   : > { %3175 = vmatpush.bf16.msrb.mxu1 %v13085_v36  ;;  %v10254_v36 = vor.u32 %v13106_v57, %v10251_v17 }
 0x786   : > { %3546 = vmatpush.bf16.msra.mxu0 %v10254_v36 }
 0x788   : > { %3176 = vmatpush.bf16.msrb.mxu1 %v13084_v37  ;;  %v10241_v37 = vld [vmem:[%s18071_s11 + $0x50] sm:$0xf] }
 0x78b   : > { %3177 = vmatmul.bf16.vlgmr.msrb.gmra.mxu1 %v14321_v25 }
 0x7e8   : > { %v2684_v38 = vpop.f32.mrf.mxu1 }
 0x7e9   : > { %v2689_v15 = vpack.c.bf16 %v2684_v38, %v2684_v38  ;;  %v13105_v38 = vld [vmem:[%s18071_s11 + $0x54] sm:$0xf0] }
 0x7eb   : > { %2691 = vst.msk [vmem:[#allocation2 + $0x4] sm:$0xf] %vm1469_vm12, %v2689_v15  ;;  %v13104_v15 = vld [vmem:[%s18071_s11 + $0x54] sm:$0xf] }
 0x7ec   : > { %v10246_v45 = vor.u32 %v13104_v15, %v10243_v39 }
 0x7ee   : > { %3547 = vmatpush.bf16.msra.mxu0 %v10246_v45 }
 0x7f0   : > { %v2686_v24 = vpop.f32.mrf.mxu1 }
 0x7f1   : > { %v2690_v42 = vpack.c.bf16 %v2686_v24, %v2686_v24 }
 0x7f3   : > { %2692 = vst.msk [vmem:[#allocation2 + $0xc] sm:$0xf] %vm1469_vm12, %v2690_v42 }
 0x7f8   : > { %v2850_v44 = vpop.f32.mrf.mxu1 }
 0x7f9   : > { %v2851_v47 = vadd.f32 %v2850_v44, %v2837_v46  ;;  %v10242_v44 = vor.u32 %v13105_v38, %v10241_v37  ;;  %v10233_v46 = vld [vmem:[%s18071_s11 + $0x40] sm:$0xf] }
 0x7fb   : > { %v2855_v25 = vpack.c.bf16 %v2851_v47, %v2851_v47  ;;  %v13103_v47 = vld [vmem:[%s18071_s11 + $0x44] sm:$0xf0] }
 0x7fd   : > { %v3187_v59 = vunpack.c.l.b16 %v2855_v25  ;;  %v10234_v25 = vor.u32 %v13103_v47, %v10233_v46 }
 0x800   : > { %v2852_v52 = vpop.f32.mrf.mxu1 }
 0x801   : > { %v2853_v53 = vadd.f32 %v2852_v52, %v2839_v48  ;;  %v13102_v48 = vld [vmem:[%s18071_s11 + $0x44] sm:$0xf]  ;;  %v10235_v52 = vld [vmem:[%s18071_s11 + $0x48] sm:$0xf0] }
 0x803   : > { %v2856_v58 = vpack.c.bf16 %v2853_v53, %v2853_v53  ;;  %v10238_v53 = vor.u32 %v13102_v48, %v10235_v52 }
 0x805   : > { %v3188_v60 = vunpack.c.l.b16 %v2856_v58  ;;  %3548 = vmatpush.bf16.msra.mxu0 %v10238_v53 }
 0x807   : > { %v3189_v62 = vpack.c.b16 %v3188_v60, %v3187_v59  ;;  %v2075_v60 = vpack.c.bf16 %v14743_v41, %v14743_v41 }
 0x808   : > { %v3178_v63 = vpop.f32.mrf.mxu1 }
 0x809   : > { %10189 = vmatmul.msk.bf16.vlgmr.msra.gmra.mxu2 %vm1365_vm2, %v3189_v62  ;;  %v3179_v4 = vadd.f32 %v3178_v63, %v3165_v0  ;;  %v13101_v62 = vld [vmem:[%s18071_s11 + $0x34] sm:$0xf0]  ;;  %v13100_v63 = vld [vmem:[%s18071_s11 + $0x34] sm:$0xf] }
 0x80a   : > { %v10226_v0 = vor.u32 %v13101_v62, %v10225_v61  ;;  %v10230_v41 = vor.u32 %v13100_v63, %v10227_v3  ;;  %v13125_v3 = vld [vmem:[%s18071_s11 + $0xf4] sm:$0xf0] }
 0x80b   : > { %v3183_v50 = vpack.c.bf16 %v3179_v4, %v3179_v4  ;;  %v10217_v4 = vld [vmem:[%s18071_s11 + $0x20] sm:$0xf] }
 0x80c   : > { %3549 = vmatpush.bf16.msra.mxu0 %v10230_v41  ;;  %v10323_v41 = vld [vmem:[%s18071_s11 + $0xf8] sm:$0xf0] }
 0x80d   : > { %v3274_v10 = vunpack.c.l.b16 %v3183_v50 }
 0x810   : > { %v3180_v49 = vpop.f32.mrf.mxu1 }
 0x811   : > { %v3181_v5 = vadd.f32 %v3180_v49, %v3167_v35  ;;  %v13099_v35 = vld [vmem:[%s18071_s11 + $0x24] sm:$0xf0]  ;;  %v13098_v49 = vld [vmem:[%s18071_s11 + $0x24] sm:$0xf] }
 0x812   : > { %v10218_v50 = vor.u32 %v13099_v35, %v10217_v4  ;;  %v10313_v4 = vld [vmem:[%s18071_s11 + $0xe0] sm:$0xf]  ;;  %v13123_v35 = vld [vmem:[%s18071_s11 + $0xe4] sm:$0xf0] }
 0x813   : > { %v3184_v7 = vpack.c.bf16 %v3181_v5, %v3181_v5  ;;  %v10219_v5 = vld [vmem:[%s18071_s11 + $0x28] sm:$0xf0] }
 0x815   : > { %v3275_v43 = vunpack.c.l.b16 %v3184_v7  ;;  %v10222_v7 = vor.u32 %v13098_v49, %v10219_v5  ;;  %v10315_v5 = vld [vmem:[%s18071_s11 + $0xe8] sm:$0xf0] }
 0x817   : > { %v3276_v11 = vpack.c.b16 %v3275_v43, %v3274_v10  ;;  %3550 = vmatpush.bf16.msra.mxu0 %v10222_v7  ;;  %v10209_v10 = vld [vmem:[%s18071_s11 + $0x10] sm:$0xf]  ;;  %v13097_v43 = vld [vmem:[%s18071_s11 + $0x14] sm:$0xf0]  ;;  %v10314_v7 = vor.u32 %v13123_v35, %v10313_v4 }
 0x819   : > { %3288 = vmatpush.bf16.msra.mxu3 %v3276_v11  ;;  %v13096_v11 = vld [vmem:[%s18071_s11 + $0x14] sm:$0xf] }
 0x88c   : > { %v3210_v12 = vpop.f32.mrf.mxu2 }
 0x88d   : > { %v3211_v16 = vadd.f32 %v14595_v13, %v3210_v12  ;;  %v10210_v12 = vor.u32 %v13097_v43, %v10209_v10 }
 0x88f   : > { %v3215_v19 = vsel %vm1386_vm3, %v3211_v16, -inf }
 0x890   : > { %3216 = vmax.xlane.f32.xlu0 %v3215_v19 }
 0x894   : > { %v3212_v20 = vpop.f32.mrf.mxu2 }
 0x895   : > { %v3213_v21 = vadd.f32 %v14595_v13, %v3212_v20  ;;  %v13109_v13 = vld [vmem:[%s18071_s11 + $0x74] sm:$0xf0]  ;;  %v10201_v20 = vld [vmem:[%s18071_s11] sm:$0xf] }
 0x896   : > { %v10258_v40 = vor.u32 %v13109_v13, %v10257_v6 }
 0x897   : > { %v3218_v22 = vsel %vm1386_vm3, %v3213_v21, -inf }
 0x898   : > { %3219 = vmax.xlane.f32.xlu1 %v3218_v22  ;;  %3517 = vmatpush.bf16.msrb.mxu2 %v10258_v40  ;;  %v13094_v22 = vld [vmem:[%s18071_s11 + $0x4] sm:$0xf] }
 0x89c   : > { %3518 = vmatpush.bf16.msrb.mxu2 %v10250_v33 }
 0x8a0   : > { %3519 = vmatpush.bf16.msrb.mxu2 %v10242_v44 }
 0x8a4   : > { %3520 = vmatpush.bf16.msrb.mxu2 %v10234_v25 }
 0x8a8   : > { %3521 = vmatpush.bf16.msrb.mxu2 %v10226_v0  ;;  %v10321_v0 = vld [vmem:[%s18071_s11 + $0xf0] sm:$0xf] }
 0x8ac   : > { %3522 = vmatpush.bf16.msrb.mxu2 %v10218_v50  ;;  %v13122_v50 = vld [vmem:[%s18071_s11 + $0xe4] sm:$0xf] }
 0x8ad   : > { %v10318_v10 = vor.u32 %v13122_v50, %v10315_v5 }
 0x8b0   : > { %3523 = vmatpush.bf16.msrb.mxu2 %v10210_v12 }
 0x8b1   : > { %2078 = vrot.lane.b32.xlu1 %v2074_v23, %s18019_s6  ;;  %s18080_s6 = sld [smem:[#allocation36_spill]] }
 0x8b7   : > { %s18081_s22 = smov %s18080_s6 }
 0x903   : > { %v3217_v14 = vpop.xlane.xlu0 %3216 }
 0x904   : > { %v3221_v27 = vsub.f32 %v3211_v16, %v3217_v14  ;;  %v10211_v16 = vld [vmem:[%s18071_s11 + $0x18] sm:$0xf0]  ;;  %v10203_v14 = vld [vmem:[%s18071_s11 + $0x8] sm:$0xf0] }
 0x905   : > { %v10214_v19 = vor.u32 %v13096_v11, %v10211_v16 }
 0x906   : > { %v3223_v28 = vmul.f32 1.442695, %v3221_v27  ;;  %v10206_v27 = vor.u32 %v13094_v22, %v10203_v14  ;;  %v10297_v14 = vld [vmem:[%s18071_s11 + $0xc0] sm:$0xf] }
 0x907   : > { %3551 = vmatpush.bf16.msra.mxu0 %v10214_v19  ;;  %v10305_v19 = vld [vmem:[%s18071_s11 + $0xd0] sm:$0xf] }
 0x908   : > { %13726 = vpow2.f32 %v3223_v28 }
 0x90b   : > { %v3220_v31 = vpop.xlane.xlu1 %3219  ;;  %3552 = vmatpush.bf16.msra.mxu0 %v10206_v27  ;;  %v13119_v27 = vld [vmem:[%s18071_s11 + $0xc4] sm:$0xf0] }
 0x90c   : > { %v3222_v34 = vsub.f32 %v3213_v21, %v3220_v31  ;;  %v13095_v21 = vld [vmem:[%s18071_s11 + $0x4] sm:$0xf0] }
 0x90d   : > { %v10202_v23 = vor.u32 %v13095_v21, %v10201_v20  ;;  %v13121_v20 = vld [vmem:[%s18071_s11 + $0xd4] sm:$0xf0]  ;;  %v13120_v21 = vld [vmem:[%s18071_s11 + $0xd4] sm:$0xf] }
 0x90e   : > { %v14922_v24 = vpop.eup %13726  ;;  %v3225_v42 = vmul.f32 1.442695, %v3222_v34  ;;  %v10306_v22 = vor.u32 %v13121_v20, %v10305_v19 }
 0x90f   : > { %v3227_v55 = vsel %vm1386_vm3, %v14922_v24, 0.0  ;;  %3524 = vmatpush.bf16.msrb.mxu2 %v10202_v23  ;;  %v10307_v23 = vld [vmem:[%s18071_s11 + $0xd8] sm:$0xf0] }
 0x910   : > { %13728 = vpow2.f32 %v3225_v42  ;;  %3228 = vadd.xlane.f32.xlu2 %v3227_v55 }
 0x916   : > { %v14938_v54 = vpop.eup %13728 }
 0x917   : > { %v3230_v58 = vsel %vm1386_vm3, %v14938_v54, 0.0 }
 0x918   : > { %3231 = vadd.xlane.f32.xlu0 %v3230_v58 }
 0x923   : > { %v2079_v59 = vpop.permute.xlu1 %2078 }
 0x924   : > { %2085 = vst.msk [vmem:[#allocation2] sm:$0xf] %vm2084_vm4, %v2079_v59 }
 0x928   : > { %2080 = vrot.lane.b32.xlu2 %v2075_v60, %s18072_s5 }
 0x92b   : > { %v10193_v36 = vld [vmem:[#allocation2] sm:$0xf] }
 0x983   : > { %v3229_v28 = vpop.xlane.xlu2 %3228 }
 0x984   : > { %13730 = vrcp.f32 %v3229_v28  ;;  %v3244_v51 = vand.u32 2147483648, %v3229_v28  ;;  %v3242_v32 = vand.u32 2147483647, %v3229_v28  ;;  %vm3238_vm6 = vweird.f32 %v3229_v28 }
 0x986   : > { %v3245_v31 = vor.u32 1.1754944e-38, %v3244_v51  ;;  %vm3243_vm8 = vcmp.eq.f32.partialorder %v3242_v32, 8.507059e+37  ;;  %v13117_v51 = vld [vmem:[%s18071_s11 + $0xb4] sm:$0xf0]  ;;  %v10291_v32 = vld [vmem:[%s18071_s11 + $0xb8] sm:$0xf0] }
 0x98a   : > { %v13731_v6 = vpop.eup %13730 }
 0x98b   : > { %v3234_v13 = vmul.f32 %v13731_v6, %v3229_v28  ;;  %v3232_v29 = vpop.xlane.xlu0 %3231  ;;  %v2081_v40 = vpop.permute.xlu2 %2080  ;;  %vm3239_vm5 = vweird.f32 %v13731_v6  ;;  %v10310_v28 = vor.u32 %v13120_v21, %v10307_v23 }
 0x98c   : > { %13732 = vrcp.f32 %v3232_v29  ;;  %2086 = vst.msk [vmem:[#allocation2 + $0x8] sm:$0xf] %vm2084_vm4, %v2081_v40  ;;  %vm3240_vm7 = vmor %vm3238_vm6, %vm3239_vm5  ;;  %v3258_v55 = vand.u32 2147483648, %v3232_v29  ;;  %v3256_v46 = vand.u32 2147483647, %v3232_v29  ;;  %vm3252_vm10 = vweird.f32 %v3232_v29 }
 0x98d   : > { %v3235_v30 = vsub.f32 1.0, %v3234_v13  ;;  %v10299_v13 = vld [vmem:[%s18071_s11 + $0xc8] sm:$0xf0] }
 0x98e   : > { %v3259_v52 = vor.u32 1.1754944e-38, %v3258_v55  ;;  %vm3257_vm13 = vcmp.eq.f32.partialorder %v3256_v46, 8.507059e+37  ;;  %v13111_v46 = vld [vmem:[%s18071_s11 + $0x84] sm:$0xf0] }
 0x98f   : > { %v3236_v56 = vmul.f32 %v13731_v6, %v3235_v30  ;;  %v10289_v30 = vld [vmem:[%s18071_s11 + $0xb0] sm:$0xf] }
 0x991   : > { %v3237_v57 = vadd.f32 %v13731_v6, %v3236_v56  ;;  %v13116_v56 = vld [vmem:[%s18071_s11 + $0xb4] sm:$0xf] }
 0x992   : > { %v13733_v17 = vpop.eup %13732 }
 0x993   : > { %v3241_v33 = vsel %vm3240_vm7, %v13731_v6, %v3237_v57  ;;  %v3248_v34 = vmul.f32 %v13733_v17, %v3232_v29  ;;  %v13093_v37 = vld [vmem:[#allocation2 + $0x4] sm:$0xf0]  ;;  %vm3253_vm9 = vweird.f32 %v13733_v17  ;;  %v13118_v6 = vld [vmem:[%s18071_s11 + $0xc4] sm:$0xf]  ;;  %v10298_v29 = vor.u32 %v13119_v27, %v10297_v14 }
 0x994   : > { %v3246_v38 = vsel %vm3243_vm8, %v3245_v31, %v3241_v33  ;;  %v10194_v15 = vor.u32 %v13093_v37, %v10193_v36  ;;  %vm3254_vm11 = vmor %vm3252_vm10, %vm3253_vm9  ;;  %v10302_v40 = vor.u32 %v13118_v6, %v10299_v13  ;;  %v10290_v57 = vor.u32 %v13117_v51, %v10289_v30  ;;  %v10281_v31 = vld [vmem:[%s18071_s11 + $0xa0] sm:$0xf]  ;;  %v13115_v33 = vld [vmem:[%s18071_s11 + $0xa4] sm:$0xf0] }
 0x995   : > { %v3261_v39 = vmul.f32 %v14922_v24, %v3246_v38  ;;  %v3249_v42 = vsub.f32 1.0, %v3248_v34  ;;  %v13114_v34 = vld [vmem:[%s18071_s11 + $0xa4] sm:$0xf]  ;;  %v10283_v36 = vld [vmem:[%s18071_s11 + $0xa8] sm:$0xf0]  ;;  %v10282_v37 = vor.u32 %v13115_v33, %v10281_v31  ;;  %v13899_v27 = vmov 256.0  }
 0x996   : > { %3525 = vmatmul.bf16.vlgmr.msrb.gmra.mxu2 %v10194_v15  ;;  %3553 = vmatmul.bf16.vlgmr.msra.gmra.mxu0 %v10194_v15  ;;  %v10286_v38 = vor.u32 %v13114_v34, %v10283_v36  ;;  %v10273_v15 = vld [vmem:[%s18071_s11 + $0x90] sm:$0xf]  ;;  %13734 = vrcp.f32 %v13899_v27  ;;  %v10441_v6 = vld [vmem:[%s18075_s15 + $0xe0] sm:$0xf]  ;;  %v10443_v30 = vld [vmem:[%s18075_s15 + $0xf0] sm:$0xf0] }
 0x997   : > { %v3263_v44 = vadd.f32 %v3261_v39, %v14837_v18  ;;  %v3250_v45 = vmul.f32 %v13733_v17, %v3249_v42  ;;  %v3265_v53 = vpack.c.bf16 %v3261_v39, %v3261_v39  ;;  %v13113_v39 = vld [vmem:[%s18071_s11 + $0x94] sm:$0xf0]  ;;  %v13112_v42 = vld [vmem:[%s18071_s11 + $0x94] sm:$0xf]  ;;  %v13156_v13 = vld [vmem:[%s18075_s15 + $0xec] sm:$0xf0] }
 0x998   : > { %v10274_v55 = vor.u32 %v13113_v39, %v10273_v15  ;;  %v13152_v33 = vld [vmem:[%s18075_s15 + $0xcc] sm:$0xf0]  ;;  %v10553_v34 = vld [vmem:[%s18075_s15 + $0x1c0] sm:$0xf]  ;;  %v13150_v15 = vld [vmem:[%s18075_s15 + $0xc4] sm:$0xf] }
 0x999   : > { %v4750_v47 = vmul.f32 0.25, %v3263_v44  ;;  %v3251_v48 = vadd.f32 %v13733_v17, %v3250_v45  ;;  %v3269_v61 = vunpack.c.l.b16 %v3265_v53  ;;  %v10275_v44 = vld [vmem:[%s18071_s11 + $0x98] sm:$0xf0]  ;;  %v10265_v45 = vld [vmem:[%s18071_s11 + $0x80] sm:$0xf] }
 0x99a   : > { %v13184_v36 = vld [vmem:[%s18075_s15 + $0x1cc] sm:$0xf0]  ;;  %v10427_v39 = vld [vmem:[%s18075_s15 + $0xd0] sm:$0xf0] }
 0x99b   : > { %v3255_v25 = vsel %vm3254_vm11, %v13733_v17, %v3251_v48  ;;  %4752 = vst.msk [vmem:[%s15003_s27] sm:$0xff] %vm1386_vm3, %v4750_v47  ;;  %v10294_v17 = vor.u32 %v13116_v56, %v10291_v32  ;;  %v10278_v47 = vor.u32 %v13112_v42, %v10275_v44  ;;  %v13110_v48 = vld [vmem:[%s18071_s11 + $0x84] sm:$0xf]  ;;  %v10430_v44 = vor.u32 %v13150_v15, %v10427_v39  ;;  %v10363_v39 = vld [vmem:[%s18075_s15 + $0x50] sm:$0xf0] }
 0x99c   : > { %v3260_v24 = vsel %vm3257_vm13, %v3259_v52, %v3255_v25  ;;  %v10267_v52 = vld [vmem:[%s18071_s11 + $0x88] sm:$0xf0]  ;;  %v10266_v25 = vor.u32 %v13111_v46, %v10265_v45  ;;  %v13186_v32 = vld [vmem:[%s18075_s15 + $0x1e4] sm:$0xf]  ;;  %v10555_v45 = vld [vmem:[%s18075_s15 + $0x1d0] sm:$0xf0] }
 0x99d   : > { %v3262_v18 = vmul.f32 %v14938_v54, %v3260_v24  ;;  %v10322_v54 = vor.u32 %v13125_v3, %v10321_v0  ;;  %v10270_v24 = vor.u32 %v13110_v48, %v10267_v52  ;;  %v13182_v42 = vld [vmem:[%s18075_s15 + $0x1c4] sm:$0xf] }
 0x99e   : > { %v10558_v46 = vor.u32 %v13182_v42, %v10555_v45  ;;  %v13134_v15 = vld [vmem:[%s18075_s15 + $0x44] sm:$0xf]  ;;  %v10491_v45 = vld [vmem:[%s18075_s15 + $0x150] sm:$0xf0] }
 0x99f   : > { %v3264_v58 = vadd.f32 %v3262_v18, %v14841_v26  ;;  %v3266_v59 = vpack.c.bf16 %v3262_v18, %v3262_v18  ;;  %v13124_v26 = vld [vmem:[%s18071_s11 + $0xf4] sm:$0xf]  ;;  %3531 = vmatpush.bf16.msrb.mxu3 %v10322_v54 }
 0x9a0   : > { %v10326_v49 = vor.u32 %v13124_v26, %v10323_v41 }
 0x9a1   : > { %v4751_v60 = vmul.f32 0.25, %v3264_v58  ;;  %v3270_v62 = vunpack.c.l.b16 %v3266_v59 }
 0x9a2   : > { %3559 = vmatpush.bf16.msra.mxu1 %v10326_v49 }
 0x9a3   : > { %v3271_v63 = vpack.c.b16 %v3270_v62, %v3269_v61  ;;  %4753 = vst.msk [vmem:[%s15003_s27 + $0x8] sm:$0xff] %vm1386_vm3, %v4751_v60  ;;  %3532 = vmatpush.bf16.msrb.mxu3 %v10314_v7  ;;  %v3341_v61 = vld [vmem:[%s18074_s12] sm:$0x3]  ;;  %s13822_s27 = scalar_lea.hbm %s18086_s9, 32 }
 0x9a4   : > { %v3343_v26 = vperm.slane %v3341_v61, 0 }
 0x9a5   : > { %10190 = vmatmul.msk.bf16.vlgmr.msra.gmra.mxu3 %vm1386_vm3, %v3271_v63  ;;  %v3344_v63 = vperm.slane %v3341_v61, 1 }
 0x9a6   : > { %3560 = vmatpush.bf16.msra.mxu1 %v10318_v10 }
 0x9a7   : > { %3533 = vmatpush.bf16.msrb.mxu3 %v10306_v22 }
 0x9aa   : > { %3561 = vmatpush.bf16.msra.mxu1 %v10310_v28 }
 0x9ab   : > { %3534 = vmatpush.bf16.msrb.mxu3 %v10298_v29  ;;  %v13188_v29 = vld [vmem:[%s18075_s15 + $0x1ec] sm:$0xf0] }
 0x9ae   : > { %3562 = vmatpush.bf16.msra.mxu1 %v10302_v40  ;;  %v13154_v40 = vld [vmem:[%s18075_s15 + $0xe4] sm:$0xf] }
 0x9af   : > { %3535 = vmatpush.bf16.msrb.mxu3 %v10290_v57  ;;  %v10446_v56 = vor.u32 %v13154_v40, %v10443_v30  ;;  %v10571_v57 = vld [vmem:[%s18075_s15 + $0x1f0] sm:$0xf0]  ;;  %v13172_v40 = vld [vmem:[%s18075_s15 + $0x16c] sm:$0xf0]  ;;  %v13138_v30 = vld [vmem:[%s18075_s15 + $0x64] sm:$0xf] }
 0x9b0   : > { %v10574_v31 = vor.u32 %v13186_v32, %v10571_v57  ;;  %v13170_v57 = vld [vmem:[%s18075_s15 + $0x164] sm:$0xf] }
 0x9b1   : > { %4078 = vmatpush.bf16.msrb.mxu0 %v10446_v56 }
 0x9b2   : > { %3563 = vmatpush.bf16.msra.mxu1 %v10294_v17  ;;  %v10425_v17 = vld [vmem:[%s18075_s15 + $0xc0] sm:$0xf] }
 0x9b3   : > { %3536 = vmatpush.bf16.msrb.mxu3 %v10282_v37  ;;  %v10426_v37 = vor.u32 %v13152_v33, %v10425_v17  ;;  %v10507_v17 = vld [vmem:[%s18075_s15 + $0x170] sm:$0xf0]  ;;  %v10361_v33 = vld [vmem:[%s18075_s15 + $0x40] sm:$0xf] }
 0x9b5   : > { %4079 = vmatpush.bf16.msrb.mxu0 %v10430_v44  ;;  %v13166_v44 = vld [vmem:[%s18075_s15 + $0x144] sm:$0xf] }
 0x9b6   : > { %3564 = vmatpush.bf16.msra.mxu1 %v10286_v38  ;;  %v10554_v38 = vor.u32 %v13184_v36, %v10553_v34  ;;  %v13136_v34 = vld [vmem:[%s18075_s15 + $0x4c] sm:$0xf0]  ;;  %v10489_v36 = vld [vmem:[%s18075_s15 + $0x140] sm:$0xf] }
 0x9b7   : > { %3537 = vmatpush.bf16.msrb.mxu3 %v10274_v55 }
 0x9ba   : > { %3565 = vmatpush.bf16.msra.mxu1 %v10278_v47 }
 0x9bb   : > { %3538 = vmatpush.bf16.msrb.mxu3 %v10266_v25 }
 0x9be   : > { %3566 = vmatpush.bf16.msra.mxu1 %v10270_v24 }
 0x9c2   : > { %4092 = vmatpush.bf16.msrb.mxu1 %v10574_v31  ;;  %v10510_v31 = vor.u32 %v13170_v57, %v10507_v17  ;;  %v13183_v57 = vld [vmem:[%s18075_s15 + $0x1cc] sm:$0xf]  ;;  %v10563_v17 = vld [vmem:[%s18075_s15 + $0x1d8] sm:$0xf0] }
 0x9c6   : > { %4093 = vmatpush.bf16.msrb.mxu1 %v10558_v46  ;;  %v10494_v46 = vor.u32 %v13166_v44, %v10491_v45 }
 0xa13   : > { %v3554_v62 = vpop.f32.mrf.mxu0 }
 0xa14   : > { %v3555_v54 = vadd.f32 %v3554_v62, %v3344_v63 }
 0xa19   : > { %v3526_v0 = vpop.f32.mrf.mxu2 }
 0xa1a   : > { %v3527_v41 = vadd.f32 %v3526_v0, %v3343_v26 }
 0xa1b   : > { %v3556_v50 = vpop.f32.mrf.mxu0 }
 0xa21   : > { %v3528_v10 = vpop.f32.mrf.mxu2 }
 0xa28   : > { %v3290_v43 = vpop.f32.mrf.mxu3 }
 0xa29   : > { %v3295_v11 = vpack.c.bf16 %v3290_v43, %v3290_v43 }
 0xa2b   : > { %3299 = vrot.lane.b32.xlu0 %v3295_v11, %s18072_s5  ;;  %v3557_v11 = vadd.f32 %v3556_v50, %v3344_v63  ;;  %v13146_v50 = vld [vmem:[%s18075_s15 + $0xa4] sm:$0xf] }
 0xa30   : > { %v3292_v12 = vpop.f32.mrf.mxu3 }
 0xa31   : > { %v3296_v16 = vpack.c.bf16 %v3292_v12, %v3292_v12 }
 0xa33   : > { %3301 = vrot.lane.b32.xlu2 %v3296_v16, %s18072_s5  ;;  %v3529_v16 = vadd.f32 %v3528_v10, %v3343_v26 }
 0xa8d   : > { %v3302_v53 = vpop.permute.xlu2 %3301 }
 0xa8e   : > { %3306 = vst.msk [vmem:[#allocation2 + $0xc] sm:$0xf] %vm2084_vm4, %v3302_v53 }
 0xa95   : > { %v10195_v59 = vld [vmem:[#allocation2 + $0x8] sm:$0xf0] }
 0xa9d   : > { %v3300_v18 = vpop.permute.xlu0 %3299 }
 0xa9e   : > { %3305 = vst.msk [vmem:[#allocation2 + $0x4] sm:$0xf] %vm2084_vm4, %v3300_v18 }
 0xaa5   : > { %v13092_v58 = vld [vmem:[#allocation2 + $0x4] sm:$0xf] }
 0xaa6   : > { %v10198_v60 = vor.u32 %v13092_v58, %v10195_v59 }
 0xaa8   : > { %3539 = vmatmul.bf16.vlgmr.msrb.gmra.mxu3 %v10198_v60  ;;  %3567 = vmatmul.bf16.vlgmr.msra.gmra.mxu1 %v10198_v60 }
 0xb25   : > { %v3568_v3 = vpop.f32.mrf.mxu1 }
 0xb26   : > { %v3569_v4 = vadd.f32 %v3568_v3, %v3555_v54  ;;  %v10409_v54 = vld [vmem:[%s18075_s15 + $0xa0] sm:$0xf] }
 0xb28   : > { %v3574_v5 = vadd.f32 %v3569_v4, %v14264_v2  ;;  %v13735_v2 = vpop.eup %13734  ;;  %v10537_v4 = vld [vmem:[%s18075_s15 + $0x1a0] sm:$0xf] }
 0xb29   : > { %v3586_v28 = vmul.f32 256.0, %v13735_v2  ;;  %vm3590_vm14 = vweird.f32 %v13735_v2 }
 0xb2b   : > { %v3540_v35 = vpop.f32.mrf.mxu3 }
 0xb2c   : > { %v3541_v49 = vadd.f32 %v3540_v35, %v3527_v41  ;;  %v13148_v41 = vld [vmem:[%s18075_s15 + $0xac] sm:$0xf0] }
 0xb2d   : > { %v3570_v43 = vpop.f32.mrf.mxu1  ;;  %v10410_v35 = vor.u32 %v13148_v41, %v10409_v54  ;;  %v10329_v41 = vld [vmem:[%s18075_s15] sm:$0xf] }
 0xb2e   : > { %v3573_v7 = vadd.f32 %v3541_v49, %v14262_v1  ;;  %v3571_v19 = vadd.f32 %v3570_v43, %v3557_v11  ;;  %v3587_v1 = vsub.f32 1.0, %v3586_v28  ;;  %v13180_v49 = vld [vmem:[%s18075_s15 + $0x1ac] sm:$0xf0]  ;;  %v13178_v43 = vld [vmem:[%s18075_s15 + $0x1a4] sm:$0xf] }
 0xb2f   : > { %v10539_v11 = vld [vmem:[%s18075_s15 + $0x1b0] sm:$0xf0]  ;;  %v13174_v28 = vld [vmem:[%s18075_s15 + $0x184] sm:$0xf] }
 0xb30   : > { %v3579_v12 = vadd.f32 %v3574_v5, %v3573_v7  ;;  %v3576_v23 = vadd.f32 %v3571_v19, %v14277_v9  ;;  %v10442_v9 = vor.u32 %v13156_v13, %v10441_v6  ;;  %v3588_v55 = vmul.f32 %v13735_v2, %v3587_v1  ;;  %v13144_v19 = vld [vmem:[%s18075_s15 + $0x8c] sm:$0xf0]  ;;  %v10523_v1 = vld [vmem:[%s18075_s15 + $0x190] sm:$0xf0]  ;;  %v10377_v13 = vld [vmem:[%s18075_s15 + $0x60] sm:$0xf] }
 0xb31   : > { %v10526_v6 = vor.u32 %v13174_v28, %v10523_v1  ;;  %v13187_v28 = vld [vmem:[%s18075_s15 + $0x1ec] sm:$0xf] }
 0xb32   : > { %3580 = vadd.xlane.f32.xlu1 %v3579_v12  ;;  %4050 = vmatpush.bf16.msra.mxu2 %v10442_v9  ;;  %v3589_v47 = vadd.f32 %v13735_v2, %v3588_v55  ;;  %v10542_v12 = vor.u32 %v13178_v43, %v10539_v11  ;;  %v10505_v9 = vld [vmem:[%s18075_s15 + $0x160] sm:$0xf]  ;;  %v10366_v55 = vor.u32 %v13134_v15, %v10363_v39  ;;  %v13158_v11 = vld [vmem:[%s18075_s15 + $0x104] sm:$0xf]  ;;  %v13181_v15 = vld [vmem:[%s18075_s15 + $0x1b4] sm:$0xf0] }
 0xb33   : > { %v3542_v20 = vpop.f32.mrf.mxu3  ;;  %v10506_v56 = vor.u32 %v13172_v40, %v10505_v9  ;;  %v10561_v40 = vld [vmem:[%s18075_s15 + $0x1c8] sm:$0xf]  ;;  %v13147_v39 = vld [vmem:[%s18075_s15 + $0xac] sm:$0xf] }
 0xb34   : > { %v3543_v21 = vadd.f32 %v3542_v20, %v3529_v16  ;;  %v15167_v48 = vsel %vm3590_vm14, %v13735_v2, %v3589_v47  ;;  %v10393_v16 = vld [vmem:[%s18075_s15 + $0x80] sm:$0xf]  ;;  %4094 = vmatpush.bf16.msrb.mxu1 %v10542_v12  ;;  %v10459_v12 = vld [vmem:[%s18075_s15 + $0x110] sm:$0xf0] }
 0xb35   : > { %v10521_v20 = vld [vmem:[%s18075_s15 + $0x180] sm:$0xf] }
 0xb36   : > { %v3575_v22 = vadd.f32 %v3543_v21, %v14275_v8  ;;  %v10569_v8 = vld [vmem:[%s18075_s15 + $0x1e0] sm:$0xf]  ;;  %4051 = vmatpush.bf16.msra.mxu2 %v10426_v37  ;;  %v10394_v21 = vor.u32 %v13144_v19, %v10393_v16  ;;  %v10362_v37 = vor.u32 %v13136_v34, %v10361_v33  ;;  %v10449_v16 = vld [vmem:[%s18075_s15 + $0xe8] sm:$0xf]  ;;  %v10462_v19 = vor.u32 %v13158_v11, %v10459_v12  ;;  %v13139_v11 = vld [vmem:[%s18075_s15 + $0x6c] sm:$0xf] }
 0xb37   : > { %v10570_v51 = vor.u32 %v13188_v29, %v10569_v8  ;;  %v13140_v8 = vld [vmem:[%s18075_s15 + $0x6c] sm:$0xf0]  ;;  %v10345_v47 = vld [vmem:[%s18075_s15 + $0x20] sm:$0xf]  ;;  %v10566_v33 = vor.u32 %v13183_v57, %v10563_v17  ;;  %v10417_v34 = vld [vmem:[%s18075_s15 + $0xa8] sm:$0xf] }
 0xb38   : > { %v3582_v14 = vadd.f32 %v3576_v23, %v3575_v22  ;;  %4095 = vmatpush.bf16.msrb.mxu1 %v10526_v6  ;;  %v10378_v29 = vor.u32 %v13140_v8, %v10377_v13  ;;  %v10579_v6 = vld [vmem:[%s18075_s15 + $0x1f8] sm:$0xf0]  ;;  %v10433_v13 = vld [vmem:[%s18075_s15 + $0xc8] sm:$0xf]  ;;  %v13153_v8 = vld [vmem:[%s18075_s15 + $0xd4] sm:$0xf0] }
 0xb39   : > { %4064 = vmatpush.bf16.msra.mxu3 %v10570_v51  ;;  %v10379_v51 = vld [vmem:[%s18075_s15 + $0x70] sm:$0xf0]  ;;  %v10582_v9 = vor.u32 %v13187_v28, %v10579_v6  ;;  %v10387_v12 = vld [vmem:[%s18075_s15 + $0x78] sm:$0xf0]  ;;  %v10497_v28 = vld [vmem:[%s18075_s15 + $0x148] sm:$0xf] }
 0xb3a   : > { %3583 = vadd.xlane.f32.xlu0 %v3582_v14  ;;  %4052 = vmatpush.bf16.msra.mxu2 %v10410_v35  ;;  %v10395_v14 = vld [vmem:[%s18075_s15 + $0x90] sm:$0xf0]  ;;  %v10382_v32 = vor.u32 %v13138_v30, %v10379_v51  ;;  %v10457_v35 = vld [vmem:[%s18075_s15 + $0x100] sm:$0xf]  ;;  %v13185_v30 = vld [vmem:[%s18075_s15 + $0x1d4] sm:$0xf0] }
 0xb3b   : > { %v13151_v51 = vld [vmem:[%s18075_s15 + $0xcc] sm:$0xf]  ;;  %v13133_v17 = vld [vmem:[%s18075_s15 + $0x34] sm:$0xf0] }
 0xb3c   : > { %4096 = vmatpush.bf16.msrb.mxu1 %v10510_v31  ;;  %v13135_v6 = vld [vmem:[%s18075_s15 + $0x4c] sm:$0xf] }
 0xb3d   : > { %4065 = vmatpush.bf16.msra.mxu3 %v10554_v38  ;;  %v13168_v38 = vld [vmem:[%s18075_s15 + $0x14c] sm:$0xf0] }
 0xb3e   : > { %4053 = vmatpush.bf16.msra.mxu2 %v10394_v21  ;;  %v10490_v42 = vor.u32 %v13168_v38, %v10489_v36  ;;  %v10577_v21 = vld [vmem:[%s18075_s15 + $0x1e8] sm:$0xf]  ;;  %v13149_v36 = vld [vmem:[%s18075_s15 + $0xb4] sm:$0xf0] }
 0xb3f   : > { %v10418_v38 = vor.u32 %v13149_v36, %v10417_v34  ;;  %v13131_v36 = vld [vmem:[%s18075_s15 + $0x2c] sm:$0xf] }
 0xb40   : > { %4097 = vmatpush.bf16.msrb.mxu1 %v10494_v46  ;;  %v13179_v46 = vld [vmem:[%s18075_s15 + $0x1ac] sm:$0xf] }
 0xb42   : > { %4054 = vmatpush.bf16.msra.mxu2 %v10378_v29  ;;  %v10434_v29 = vor.u32 %v13153_v8, %v10433_v13  ;;  %v10371_v13 = vld [vmem:[%s18075_s15 + $0x58] sm:$0xf0]  ;;  %v13167_v8 = vld [vmem:[%s18075_s15 + $0x14c] sm:$0xf] }
 0xb43   : > { %v10374_v57 = vor.u32 %v13135_v6, %v10371_v13  ;;  %v10705_v6 = vld [vmem:[%s17989_s17 + $0xf0] sm:$0xf]  ;;  %v13221_v13 = vld [vmem:[%s17989_s17 + $0xf4] sm:$0xf0] }
 0xb46   : > { %4055 = vmatpush.bf16.msra.mxu2 %v10362_v37  ;;  %v10545_v37 = vld [vmem:[%s18075_s15 + $0x1a8] sm:$0xf] }
 0xb47   : > { %v10546_v44 = vor.u32 %v13181_v15, %v10545_v37  ;;  %v10355_v37 = vld [vmem:[%s18075_s15 + $0x38] sm:$0xf0]  ;;  %v13163_v15 = vld [vmem:[%s18075_s15 + $0x12c] sm:$0xf] }
 0xba5   : > { %v3581_v52 = vpop.xlane.xlu1 %3580 }
 0xba6   : > { %v3592_v25 = vmul.f32 %v15167_v48, %v3581_v52  ;;  %v13132_v52 = vld [vmem:[%s18075_s15 + $0x2c] sm:$0xf0] }
 0xba8   : > { %v15170_v24 = vsub.f32 %v3573_v7, %v3592_v25  ;;  %v15172_v53 = vsub.f32 %v3574_v5, %v3592_v25  ;;  %v10411_v5 = vld [vmem:[%s18075_s15 + $0xb0] sm:$0xf0]  ;;  %v10538_v7 = vor.u32 %v13180_v49, %v10537_v4  ;;  %v10473_v25 = vld [vmem:[%s18075_s15 + $0x120] sm:$0xf]  ;;  %v13128_v4 = vld [vmem:[%s18075_s15 + $0xc] sm:$0xf0] }
 0xba9   : > { %v10414_v10 = vor.u32 %v13146_v50, %v10411_v5  ;;  %v10330_v49 = vor.u32 %v13128_v4, %v10329_v41  ;;  %v13160_v50 = vld [vmem:[%s18075_s15 + $0x10c] sm:$0xf0]  ;;  %v13126_v5 = vld [vmem:[%s18075_s15 + $0x4] sm:$0xf]  ;;  %v10531_v4 = vld [vmem:[%s18075_s15 + $0x198] sm:$0xf0] }
 0xbaa   : > { %v3598_v18 = vmul.f32 %v15170_v24, %v15170_v24  ;;  %v3599_v58 = vmul.f32 %v15172_v53, %v15172_v53  ;;  %4066 = vmatpush.bf16.msra.mxu3 %v10538_v7  ;;  %v10331_v7 = vld [vmem:[%s18075_s15 + $0x10] sm:$0xf0] }
 0xbab   : > { %4080 = vmatpush.bf16.msrb.mxu0 %v10414_v10  ;;  %v10458_v10 = vor.u32 %v13160_v50, %v10457_v35  ;;  %v10334_v43 = vor.u32 %v13126_v5, %v10331_v7  ;;  %v10385_v50 = vld [vmem:[%s18075_s15 + $0x68] sm:$0xf]  ;;  %v13141_v5 = vld [vmem:[%s18075_s15 + $0x74] sm:$0xf0] }
 0xbac   : > { %v3602_v59 = vadd.f32 %v3599_v58, %v3598_v18  ;;  %v10346_v18 = vor.u32 %v13132_v52, %v10345_v47  ;;  %v13164_v58 = vld [vmem:[%s18075_s15 + $0x12c] sm:$0xf0]  ;;  %v10547_v47 = vld [vmem:[%s18075_s15 + $0x1b8] sm:$0xf0]  ;;  %v10401_v52 = vld [vmem:[%s18075_s15 + $0x88] sm:$0xf] }
 0xbad   : > { %v3584_v60 = vpop.xlane.xlu0 %3583  ;;  %v10513_v7 = vld [vmem:[%s18075_s15 + $0x168] sm:$0xf] }
 0xbae   : > { %v3593_v61 = vmul.f32 %v15167_v48, %v3584_v60  ;;  %3603 = vadd.xlane.f32.xlu2 %v3602_v59  ;;  %v13130_v59 = vld [vmem:[%s18075_s15 + $0x24] sm:$0xf]  ;;  %v10347_v60 = vld [vmem:[%s18075_s15 + $0x30] sm:$0xf0]  ;;  %4056 = vmatpush.bf16.msra.mxu2 %v10346_v18  ;;  %v10550_v18 = vor.u32 %v13179_v46, %v10547_v47  ;;  %v10358_v47 = vor.u32 %v13131_v36, %v10355_v37  ;;  %v10633_v37 = vld [vmem:[%s17989_s17 + $0x60] sm:$0xf] }
 0xbb0   : > { %v15179_v62 = vsub.f32 %v3575_v22, %v3593_v61  ;;  %v15181_v63 = vsub.f32 %v3576_v23, %v3593_v61  ;;  %v13176_v22 = vld [vmem:[%s18075_s15 + $0x18c] sm:$0xf0]  ;;  %v13142_v23 = vld [vmem:[%s18075_s15 + $0x84] sm:$0xf]  ;;  %v10474_v61 = vor.u32 %v13164_v58, %v10473_v25  ;;  %v13145_v58 = vld [vmem:[%s18075_s15 + $0x94] sm:$0xf0] }
 0xbb1   : > { %v10522_v27 = vor.u32 %v13176_v22, %v10521_v20  ;;  %v10398_v2 = vor.u32 %v13142_v23, %v10395_v14  ;;  %v13157_v20 = vld [vmem:[%s18075_s15 + $0xf4] sm:$0xf0] }
 0xbb2   : > { %v3600_v0 = vmul.f32 %v15179_v62, %v15179_v62  ;;  %v3601_v3 = vmul.f32 %v15181_v63, %v15181_v63  ;;  %4057 = vmatpush.bf16.msra.mxu2 %v10330_v49  ;;  %v13189_v22 = vld [vmem:[%s18075_s15 + $0x1f4] sm:$0xf0]  ;;  %v10450_v23 = vor.u32 %v13157_v20, %v10449_v16  ;;  %v10390_v20 = vor.u32 %v13139_v11, %v10387_v12 }
 0xbb3   : > { %4067 = vmatpush.bf16.msra.mxu3 %v10522_v27  ;;  %4081 = vmatpush.bf16.msrb.mxu0 %v10398_v2  ;;  %v10578_v14 = vor.u32 %v13189_v22, %v10577_v21  ;;  %v13155_v27 = vld [vmem:[%s18075_s15 + $0xec] sm:$0xf]  ;;  %v10451_v2 = vld [vmem:[%s18075_s15 + $0xf8] sm:$0xf0] }
 0xbb4   : > { %v3605_v26 = vadd.f32 %v3601_v3, %v3600_v0  ;;  %v10350_v0 = vor.u32 %v13130_v59, %v10347_v60  ;;  %v13162_v3 = vld [vmem:[%s18075_s15 + $0x124] sm:$0xf]  ;;  %v10454_v1 = vor.u32 %v13155_v27, %v10451_v2  ;;  %v10529_v59 = vld [vmem:[%s18075_s15 + $0x188] sm:$0xf]  ;;  %v13177_v60 = vld [vmem:[%s18075_s15 + $0x194] sm:$0xf0] }
 0xbb5   : > { %v10530_v41 = vor.u32 %v13177_v60, %v10529_v59  ;;  %v13171_v21 = vld [vmem:[%s18075_s15 + $0x16c] sm:$0xf]  ;;  %v10515_v22 = vld [vmem:[%s18075_s15 + $0x178] sm:$0xf0]  ;;  %v13137_v2 = vld [vmem:[%s18075_s15 + $0x54] sm:$0xf0] }
 0xbb6   : > { %3606 = vadd.xlane.f32.xlu1 %v3605_v26  ;;  %v10475_v26 = vld [vmem:[%s18075_s15 + $0x130] sm:$0xf0]  ;;  %4106 = vmatpush.bf16.msrb.mxu2 %v10450_v23  ;;  %v10369_v23 = vld [vmem:[%s18075_s15 + $0x48] sm:$0xf]  ;;  %v10518_v27 = vor.u32 %v13171_v21, %v10515_v22  ;;  %v10339_v59 = vld [vmem:[%s18075_s15 + $0x18] sm:$0xf0] }
 0xbb7   : > { %4068 = vmatpush.bf16.msra.mxu3 %v10506_v56  ;;  %4082 = vmatpush.bf16.msrb.mxu0 %v10382_v32  ;;  %v10478_v54 = vor.u32 %v13162_v3, %v10475_v26  ;;  %v10562_v56 = vor.u32 %v13185_v30, %v10561_v40  ;;  %v10435_v32 = vld [vmem:[%s18075_s15 + $0xd8] sm:$0xf0]  ;;  %v13175_v3 = vld [vmem:[%s18075_s15 + $0x18c] sm:$0xf]  ;;  %v10370_v40 = vor.u32 %v13137_v2, %v10369_v23 }
 0xbb8   : > { %v10438_v31 = vor.u32 %v13151_v51, %v10435_v32  ;;  %v10534_v49 = vor.u32 %v13175_v3, %v10531_v4  ;;  %v10499_v51 = vld [vmem:[%s18075_s15 + $0x158] sm:$0xf0] }
 0xbb9   : > { %4098 = vmatpush.bf16.msrb.mxu1 %v10478_v54  ;;  %v10402_v54 = vor.u32 %v13145_v58, %v10401_v52  ;;  %v10502_v34 = vor.u32 %v13167_v8, %v10499_v51  ;;  %v10465_v52 = vld [vmem:[%s18075_s15 + $0x108] sm:$0xf]  ;;  %v13127_v58 = vld [vmem:[%s18075_s15 + $0xc] sm:$0xf]  ;;  %v10641_v8 = vld [vmem:[%s17989_s17 + $0x70] sm:$0xf] }
 0xbba   : > { %4107 = vmatpush.bf16.msrb.mxu2 %v10434_v29  ;;  %v13253_v51 = vld [vmem:[%s17989_s17 + $0x1f4] sm:$0xf0] }
 0xbbb   : > { %4069 = vmatpush.bf16.msra.mxu3 %v10490_v42  ;;  %4083 = vmatpush.bf16.msrb.mxu0 %v10366_v55  ;;  %v10419_v42 = vld [vmem:[%s18075_s15 + $0xb8] sm:$0xf0] }
 0xbbc   : > { %v10422_v45 = vor.u32 %v13147_v39, %v10419_v42  ;;  %v10483_v39 = vld [vmem:[%s18075_s15 + $0x138] sm:$0xf0] }
 0xbbd   : > { %4099 = vmatpush.bf16.msrb.mxu1 %v10462_v19 }
 0xbbe   : > { %4108 = vmatpush.bf16.msrb.mxu2 %v10418_v38 }
 0xbbf   : > { %4070 = vmatpush.bf16.msra.mxu3 %v10474_v61  ;;  %4084 = vmatpush.bf16.msrb.mxu0 %v10350_v0  ;;  %v13143_v61 = vld [vmem:[%s18075_s15 + $0x8c] sm:$0xf]  ;;  %v10403_v0 = vld [vmem:[%s18075_s15 + $0x98] sm:$0xf0] }
 0xbc0   : > { %v10406_v35 = vor.u32 %v13143_v61, %v10403_v0  ;;  %v13159_v61 = vld [vmem:[%s18075_s15 + $0x10c] sm:$0xf]  ;;  %v10467_v0 = vld [vmem:[%s18075_s15 + $0x118] sm:$0xf0] }
 0xbc1   : > { %4148 = vmatpush.bf16.msra.mxu1 %v10582_v9 }
 0xbc2   : > { %4109 = vmatpush.bf16.msrb.mxu2 %v10402_v54 }
 0xbc3   : > { %4071 = vmatpush.bf16.msra.mxu3 %v10458_v10  ;;  %4085 = vmatpush.bf16.msrb.mxu0 %v10334_v43  ;;  %v10386_v10 = vor.u32 %v13141_v5, %v10385_v50  ;;  %v13173_v43 = vld [vmem:[%s18075_s15 + $0x174] sm:$0xf0]  ;;  %v10470_v50 = vor.u32 %v13159_v61, %v10467_v0  ;;  %v10817_v61 = vld [vmem:[%s17989_s17 + $0x1d0] sm:$0xf] }
 0xbc4   : > { %v10514_v19 = vor.u32 %v13173_v43, %v10513_v7  ;;  %v3577_v43 = vld [vmem:[%s18076_s13] sm:$0x3]  ;;  %v13249_v0 = vld [vmem:[%s17989_s17 + $0x1d4] sm:$0xf0] }
 0xbc5   : > { %4149 = vmatpush.bf16.msra.mxu1 %v10566_v33  ;;  %v13165_v33 = vld [vmem:[%s18075_s15 + $0x134] sm:$0xf0] }
 0xbc6   : > { %4110 = vmatpush.bf16.msrb.mxu2 %v10386_v10 }
 0xbc7   : > { %4120 = vmatpush.bf16.msrb.mxu3 %v10578_v14  ;;  %4134 = vmatpush.bf16.msra.mxu0 %v10454_v1  ;;  %v13169_v1 = vld [vmem:[%s18075_s15 + $0x154] sm:$0xf0] }
 0xbc8   : > { %v10498_v30 = vor.u32 %v13169_v1, %v10497_v28 }
 0xbc9   : > { %4150 = vmatpush.bf16.msra.mxu1 %v10550_v18  ;;  %v10486_v18 = vor.u32 %v13163_v15, %v10483_v39  ;;  %v10825_v39 = vld [vmem:[%s17989_s17 + $0x1e0] sm:$0xf] }
 0xbca   : > { %4111 = vmatpush.bf16.msrb.mxu2 %v10370_v40 }
 0xbcb   : > { %4121 = vmatpush.bf16.msrb.mxu3 %v10562_v56  ;;  %4135 = vmatpush.bf16.msra.mxu0 %v10438_v31  ;;  %v10353_v56 = vld [vmem:[%s18075_s15 + $0x28] sm:$0xf] }
 0xbcc   : > { %v10481_v31 = vld [vmem:[%s18075_s15 + $0x128] sm:$0xf]  ;;  %v10354_v42 = vor.u32 %v13133_v17, %v10353_v56  ;;  %v10769_v56 = vld [vmem:[%s17989_s17 + $0x170] sm:$0xf] }
 0xbcd   : > { %4151 = vmatpush.bf16.msra.mxu1 %v10534_v49  ;;  %v10342_v49 = vor.u32 %v13127_v58, %v10339_v59  ;;  %v13201_v58 = vld [vmem:[%s17989_s17 + $0x54] sm:$0xf0] }
 0xbce   : > { %4112 = vmatpush.bf16.msrb.mxu2 %v10354_v42 }
 0xbcf   : > { %4122 = vmatpush.bf16.msrb.mxu3 %v10546_v44  ;;  %4136 = vmatpush.bf16.msra.mxu0 %v10422_v45  ;;  %v10337_v44 = vld [vmem:[%s18075_s15 + $0x8] sm:$0xf]  ;;  %v13129_v45 = vld [vmem:[%s18075_s15 + $0x14] sm:$0xf0] }
 0xbd0   : > { %v10338_v54 = vor.u32 %v13129_v45, %v10337_v44  ;;  %v10761_v44 = vld [vmem:[%s17989_s17 + $0x160] sm:$0xf]  ;;  %v13235_v45 = vld [vmem:[%s17989_s17 + $0x164] sm:$0xf0] }
 0xbd1   : > { %4152 = vmatpush.bf16.msra.mxu1 %v10518_v27 }
 0xbd2   : > { %4113 = vmatpush.bf16.msrb.mxu2 %v10338_v54  ;;  %v10681_v54 = vld [vmem:[%s17989_s17 + $0xc0] sm:$0xf] }
 0xbd3   : > { %4123 = vmatpush.bf16.msrb.mxu3 %v10530_v41  ;;  %4137 = vmatpush.bf16.msra.mxu0 %v10406_v35 }
 0xbd5   : > { %4153 = vmatpush.bf16.msra.mxu1 %v10502_v34  ;;  %v13219_v34 = vld [vmem:[%s17989_s17 + $0xe4] sm:$0xf0] }
 0xbd7   : > { %4124 = vmatpush.bf16.msrb.mxu3 %v10514_v19  ;;  %4138 = vmatpush.bf16.msra.mxu0 %v10390_v20  ;;  %v3637_v19 = vperm.slane %v3577_v43, 0  ;;  %v3638_v20 = vperm.slane %v3577_v43, 1  ;;  %v13213_v43 = vld [vmem:[%s17989_s17 + $0xb4] sm:$0xf0] }
 0xbd9   : > { %4154 = vmatpush.bf16.msra.mxu1 %v10486_v18  ;;  %v10625_v18 = vld [vmem:[%s17989_s17 + $0x50] sm:$0xf] }
 0xbdb   : > { %4125 = vmatpush.bf16.msrb.mxu3 %v10498_v30  ;;  %4139 = vmatpush.bf16.msra.mxu0 %v10374_v57 }
 0xbdd   : > { %4155 = vmatpush.bf16.msra.mxu1 %v10470_v50  ;;  %v10818_v50 = vor.u32 %v13249_v0, %v10817_v61  ;;  %v13216_v61 = vld [vmem:[%s17989_s17 + $0xd4] sm:$0xf]  ;;  %v10691_v0 = vld [vmem:[%s17989_s17 + $0xd8] sm:$0xf0] }
 0xbdf   : > { %4140 = vmatpush.bf16.msra.mxu0 %v10358_v47  ;;  %v10689_v47 = vld [vmem:[%s17989_s17 + $0xd0] sm:$0xf] }
 0xbe3   : > { %4141 = vmatpush.bf16.msra.mxu0 %v10342_v49  ;;  %v13199_v49 = vld [vmem:[%s17989_s17 + $0x44] sm:$0xf0] }
 0xc21   : > { %v3604_v55 = vpop.xlane.xlu2 %3603 }
 0xc22   : > { %v3608_v25 = vmul.f32 %v3604_v55, %v15167_v48  ;;  %v10482_v55 = vor.u32 %v13165_v33, %v10481_v31  ;;  %v10706_v31 = vor.u32 %v13221_v13, %v10705_v6  ;;  %v10697_v33 = vld [vmem:[%s17989_s17 + $0xe0] sm:$0xf]  ;;  %v13247_v13 = vld [vmem:[%s17989_s17 + $0x1c4] sm:$0xf0] }
 0xc24   : > { %v15425_v26 = vadd.f32 1e-05, %v3608_v25  ;;  %v13161_v25 = vld [vmem:[%s18075_s15 + $0x114] sm:$0xf0]  ;;  %4126 = vmatpush.bf16.msrb.mxu3 %v10482_v55  ;;  %v13251_v55 = vld [vmem:[%s17989_s17 + $0x1e4] sm:$0xf0] }
 0xc25   : > { %v10466_v41 = vor.u32 %v13161_v25, %v10465_v52  ;;  %v13217_v25 = vld [vmem:[%s17989_s17 + $0xd4] sm:$0xf0]  ;;  %v10826_v59 = vor.u32 %v13251_v55, %v10825_v39  ;;  %v13191_v55 = vld [vmem:[%s17989_s17 + $0x4] sm:$0xf0] }
 0xc26   : > { %13736 = vrsqrt.f32 %v15425_v26  ;;  %vm3618_vm0 = vweird.f32 %v15425_v26 }
 0xc28   : > { %4127 = vmatpush.bf16.msrb.mxu3 %v10466_v41  ;;  %v10626_v41 = vor.u32 %v13201_v58, %v10625_v18  ;;  %v10793_v18 = vld [vmem:[%s17989_s17 + $0x1a0] sm:$0xf]  ;;  %v13243_v58 = vld [vmem:[%s17989_s17 + $0x1a4] sm:$0xf0] }
 0xc29   : > { %v3607_v16 = vpop.xlane.xlu1 %3606 }
 0xc2a   : > { %v3609_v14 = vmul.f32 %v3607_v16, %v15167_v48 }
 0xc2c   : > { %v13737_v9 = vpop.eup %13736  ;;  %v15477_v29 = vadd.f32 1e-05, %v3609_v14 }
 0xc2d   : > { %v3613_v32 = vmul.f32 %v13737_v9, %v15425_v26  ;;  %vm3619_vm15 = vweird.f32 %v13737_v9  ;;  %v3578_v26 = vld [vmem:[%s18077_s14] sm:$0x3] }
 0xc2e   : > { %13738 = vrsqrt.f32 %v15477_v29  ;;  %vm3620_vm5 = vmor %vm3618_vm0, %vm3619_vm15  ;;  %vm3628_vm7 = vweird.f32 %v15477_v29  ;;  %v3646_v23 = vperm.slane %v3578_v26, 0  ;;  %v3647_v14 = vperm.slane %v3578_v26, 1  ;;  %v10665_v26 = vld [vmem:[%s17989_s17 + $0xa0] sm:$0xf] }
 0xc2f   : > { %v3614_v38 = vmul.f32 %v13737_v9, %v3613_v32  ;;  %v13237_v32 = vld [vmem:[%s17989_s17 + $0x174] sm:$0xf0] }
 0xc30   : > { %v10770_v42 = vor.u32 %v13237_v32, %v10769_v56  ;;  %v10593_v56 = vld [vmem:[%s17989_s17 + $0x10] sm:$0xf]  ;;  %v13193_v32 = vld [vmem:[%s17989_s17 + $0x14] sm:$0xf0] }
 0xc31   : > { %v3615_v46 = vmul.f32 0.5, %v3614_v38  ;;  %v13203_v38 = vld [vmem:[%s17989_s17 + $0x64] sm:$0xf0] }
 0xc32   : > { %v10634_v52 = vor.u32 %v13203_v38, %v10633_v37  ;;  %v13218_v38 = vld [vmem:[%s17989_s17 + $0xe4] sm:$0xf] }
 0xc33   : > { %v3616_v60 = vsub.f32 1.5, %v3615_v46  ;;  %v10698_v46 = vor.u32 %v13219_v34, %v10697_v33  ;;  %v10801_v34 = vld [vmem:[%s17989_s17 + $0x1b0] sm:$0xf] }
 0xc34   : > { %v13739_v3 = vpop.eup %13738 }
 0xc35   : > { %v3617_v4 = vmul.f32 %v13737_v9, %v3616_v60  ;;  %v3623_v35 = vmul.f32 %v13739_v3, %v15477_v29  ;;  %vm3629_vm6 = vweird.f32 %v13739_v3  ;;  %v10762_v60 = vor.u32 %v13235_v45, %v10761_v44  ;;  %v10745_v44 = vld [vmem:[%s17989_s17 + $0x140] sm:$0xf] }
 0xc36   : > { %vm3630_vm8 = vmor %vm3628_vm7, %vm3629_vm6 }
 0xc37   : > { %v3624_v5 = vmul.f32 %v13739_v3, %v3623_v35  ;;  %v3621_v7 = vsel %vm3620_vm5, %v13737_v9, %v3617_v4  ;;  %v13215_v4 = vld [vmem:[%s17989_s17 + $0xc4] sm:$0xf0]  ;;  %v10617_v35 = vld [vmem:[%s17989_s17 + $0x40] sm:$0xf] }
 0xc38   : > { %v3632_v12 = vmul.f32 %v3621_v7, %v15170_v24  ;;  %v3633_v16 = vmul.f32 %v3621_v7, %v15172_v53  ;;  %v10673_v7 = vld [vmem:[%s17989_s17 + $0xb0] sm:$0xf] }
 0xc39   : > { %v3625_v10 = vmul.f32 0.5, %v3624_v5  ;;  %v10682_v5 = vor.u32 %v13215_v4, %v10681_v54  ;;  %v10737_v54 = vld [vmem:[%s17989_s17 + $0x130] sm:$0xf] }
 0xc3a   : > { %v3641_v24 = vmul.f32 %v3637_v19, %v3632_v12  ;;  %v3642_v28 = vmul.f32 %v3638_v20, %v3633_v16  ;;  %v13197_v12 = vld [vmem:[%s17989_s17 + $0x34] sm:$0xf0]  ;;  %v10674_v16 = vor.u32 %v13213_v43, %v10673_v7  ;;  %v13214_v43 = vld [vmem:[%s17989_s17 + $0xc4] sm:$0xf] }
 0xc3b   : > { %v3626_v11 = vsub.f32 1.5, %v3625_v10  ;;  %v10618_v10 = vor.u32 %v13199_v49, %v10617_v35  ;;  %v13202_v35 = vld [vmem:[%s17989_s17 + $0x64] sm:$0xf]  ;;  %v10635_v49 = vld [vmem:[%s17989_s17 + $0x68] sm:$0xf0] }
 0xc3c   : > { %v15560_v9 = vadd.f32 %v3646_v23, %v3641_v24  ;;  %v15564_v40 = vadd.f32 %v3647_v14, %v3642_v28  ;;  %v10649_v28 = vld [vmem:[%s17989_s17 + $0x80] sm:$0xf]  ;;  %v13241_v7 = vld [vmem:[%s17989_s17 + $0x194] sm:$0xf0] }
 0xc3d   : > { %v3627_v21 = vmul.f32 %v13739_v3, %v3626_v11  ;;  %v10609_v11 = vld [vmem:[%s17989_s17 + $0x30] sm:$0xf] }
 0xc3f   : > { %v3631_v22 = vsel %vm3630_vm8, %v13739_v3, %v3627_v21  ;;  %v10690_v3 = vor.u32 %v13217_v25, %v10689_v47  ;;  %v10601_v21 = vld [vmem:[%s17989_s17 + $0x20] sm:$0xf]  ;;  %v13204_v47 = vld [vmem:[%s17989_s17 + $0x74] sm:$0xf]  ;;  %v10643_v25 = vld [vmem:[%s17989_s17 + $0x78] sm:$0xf0] }
 0xc40   : > { %v3634_v27 = vmul.f32 %v3631_v22, %v15179_v62  ;;  %v3635_v2 = vmul.f32 %v3631_v22, %v15181_v63  ;;  %v13205_v62 = vld [vmem:[%s17989_s17 + $0x74] sm:$0xf0]  ;;  %v10833_v63 = vld [vmem:[%s17989_s17 + $0x1f0] sm:$0xf]  ;;  %v13195_v22 = vld [vmem:[%s17989_s17 + $0x24] sm:$0xf0] }
 0xc41   : > { %v10642_v36 = vor.u32 %v13205_v62, %v10641_v8  ;;  %v10834_v15 = vor.u32 %v13253_v51, %v10833_v63  ;;  %v13220_v8 = vld [vmem:[%s17989_s17 + $0xf4] sm:$0xf]  ;;  %v10707_v62 = vld [vmem:[%s17989_s17 + $0xf8] sm:$0xf0] }
 0xc42   : > { %v3643_v53 = vmul.f32 %v3637_v19, %v3634_v27  ;;  %v3644_v1 = vmul.f32 %v3638_v20, %v3635_v2  ;;  %v10610_v19 = vor.u32 %v13197_v12, %v10609_v11  ;;  %v13211_v20 = vld [vmem:[%s17989_s17 + $0xa4] sm:$0xf0]  ;;  %v10657_v27 = vld [vmem:[%s17989_s17 + $0x90] sm:$0xf]  ;;  %v13209_v2 = vld [vmem:[%s17989_s17 + $0x94] sm:$0xf0]  ;;  %v10710_v51 = vor.u32 %v13220_v8, %v10707_v62 }
 0xc43   : > { %v10658_v24 = vor.u32 %v13209_v2, %v10657_v27  ;;  %v10683_v11 = vld [vmem:[%s17989_s17 + $0xc8] sm:$0xf0]  ;;  %v13212_v2 = vld [vmem:[%s17989_s17 + $0xb4] sm:$0xf]  ;;  %v13225_v8 = vld [vmem:[%s17989_s17 + $0x114] sm:$0xf0] }
 0xc44   : > { %v15562_v29 = vadd.f32 %v3646_v23, %v3643_v53  ;;  %v15566_v30 = vadd.f32 %v3647_v14, %v3644_v1  ;;  %v10666_v23 = vor.u32 %v13211_v20, %v10665_v26  ;;  %v10602_v14 = vor.u32 %v13195_v22, %v10601_v21  ;;  %v13207_v53 = vld [vmem:[%s17989_s17 + $0x84] sm:$0xf0]  ;;  %v10809_v1 = vld [vmem:[%s17989_s17 + $0x1c0] sm:$0xf]  ;;  %v13200_v20 = vld [vmem:[%s17989_s17 + $0x54] sm:$0xf] }
 0xc45   : > { %v10650_v6 = vor.u32 %v13207_v53, %v10649_v28  ;;  %v10810_v63 = vor.u32 %v13247_v13, %v10809_v1  ;;  %v10686_v12 = vor.u32 %v13214_v43, %v10683_v11  ;;  %v13227_v26 = vld [vmem:[%s17989_s17 + $0x124] sm:$0xf0]  ;;  %v10627_v21 = vld [vmem:[%s17989_s17 + $0x58] sm:$0xf0]  ;;  %v13252_v53 = vld [vmem:[%s17989_s17 + $0x1f4] sm:$0xf] }
 0xc46   : > { %v3654_v57 = vpack.c.bf16 %v15562_v29, %v15560_v9  ;;  %v3655_v17 = vpack.c.bf16 %v15566_v30, %v15564_v40  ;;  %v10630_v22 = vor.u32 %v13200_v20, %v10627_v21  ;;  %v10835_v1 = vld [vmem:[%s17989_s17 + $0x1f8] sm:$0xf0]  ;;  %v13198_v62 = vld [vmem:[%s17989_s17 + $0x44] sm:$0xf]  ;;  %v13232_v11 = vld [vmem:[%s17989_s17 + $0x154] sm:$0xf] }
 0xc47   : > { %v10838_v13 = vor.u32 %v13252_v53, %v10835_v1  ;;  %v10595_v43 = vld [vmem:[%s17989_s17 + $0x18] sm:$0xf0]  ;;  %v10747_v53 = vld [vmem:[%s17989_s17 + $0x148] sm:$0xf0] }
 0xc48   : > { %4058 = vmatmul.bf16.vlgmr.msra.gmra.mxu2 %v3654_v57  ;;  %4072 = vmatmul.bf16.vlgmr.msra.gmra.mxu3 %v3655_v17  ;;  %v10803_v20 = vld [vmem:[%s17989_s17 + $0x1b8] sm:$0xf0] }
 0xc49   : > { %4086 = vmatmul.bf16.vlgmr.msrb.gmra.mxu0 %v3654_v57  ;;  %4100 = vmatmul.bf16.vlgmr.msrb.gmra.mxu1 %v3655_v17 }
 0xc4a   : > { %4578 = vmatpush.bf16.msra.mxu3 %v10706_v31  ;;  %4564 = vmatpush.bf16.msra.mxu2 %v10642_v36  ;;  %v13233_v31 = vld [vmem:[%s17989_s17 + $0x154] sm:$0xf0] }
 0xc4b   : > { %4606 = vmatpush.bf16.msrb.mxu1 %v10834_v15  ;;  %4592 = vmatpush.bf16.msrb.mxu0 %v10770_v42  ;;  %v13245_v36 = vld [vmem:[%s17989_s17 + $0x1b4] sm:$0xf0]  ;;  %v10699_v15 = vld [vmem:[%s17989_s17 + $0xe8] sm:$0xf0]  ;;  %v10585_v42 = vld [vmem:[%s17989_s17] sm:$0xf] }
 0xc4c   : > { %v10802_v37 = vor.u32 %v13245_v36, %v10801_v34  ;;  %v10702_v39 = vor.u32 %v13218_v38, %v10699_v15  ;;  %v10586_v45 = vor.u32 %v13191_v55, %v10585_v42  ;;  %v10713_v34 = vld [vmem:[%s17989_s17 + $0x100] sm:$0xf]  ;;  %v13223_v36 = vld [vmem:[%s17989_s17 + $0x104] sm:$0xf0]  ;;  %v13196_v15 = vld [vmem:[%s17989_s17 + $0x34] sm:$0xf] }
 0xc4d   : > { %v10714_v38 = vor.u32 %v13223_v36, %v10713_v34  ;;  %v13236_v55 = vld [vmem:[%s17989_s17 + $0x174] sm:$0xf]  ;;  %v13226_v34 = vld [vmem:[%s17989_s17 + $0x124] sm:$0xf] }
 0xc4e   : > { %4579 = vmatpush.bf16.msra.mxu3 %v10698_v46  ;;  %4565 = vmatpush.bf16.msra.mxu2 %v10634_v52  ;;  %v13231_v46 = vld [vmem:[%s17989_s17 + $0x144] sm:$0xf0] }
 0xc4f   : > { %4607 = vmatpush.bf16.msrb.mxu1 %v10826_v59  ;;  %4593 = vmatpush.bf16.msrb.mxu0 %v10762_v60  ;;  %v10746_v52 = vor.u32 %v13231_v46, %v10745_v44  ;;  %v10646_v59 = vor.u32 %v13204_v47, %v10643_v25  ;;  %v10794_v60 = vor.u32 %v13243_v58, %v10793_v18  ;;  %v10771_v44 = vld [vmem:[%s17989_s17 + $0x178] sm:$0xf0]  ;;  %v13208_v46 = vld [vmem:[%s17989_s17 + $0x94] sm:$0xf] }
 0xc50   : > { %v10659_v47 = vld [vmem:[%s17989_s17 + $0x98] sm:$0xf0] }
 0xc51   : > { %v10662_v25 = vor.u32 %v13208_v46, %v10659_v47  ;;  %v10819_v18 = vld [vmem:[%s17989_s17 + $0x1d8] sm:$0xf0]  ;;  %v13224_v47 = vld [vmem:[%s17989_s17 + $0x114] sm:$0xf] }
 0xc52   : > { %4580 = vmatpush.bf16.msra.mxu3 %v10690_v3  ;;  %4566 = vmatpush.bf16.msra.mxu2 %v10626_v41  ;;  %v10694_v3 = vor.u32 %v13216_v61, %v10691_v0  ;;  %v13229_v41 = vld [vmem:[%s17989_s17 + $0x134] sm:$0xf0]  ;;  %v13234_v61 = vld [vmem:[%s17989_s17 + $0x164] sm:$0xf] }
 0xc53   : > { %4608 = vmatpush.bf16.msrb.mxu1 %v10818_v50  ;;  %v10738_v4 = vor.u32 %v13229_v41, %v10737_v54  ;;  %v10638_v50 = vor.u32 %v13202_v35, %v10635_v49  ;;  %v13206_v41 = vld [vmem:[%s17989_s17 + $0x84] sm:$0xf]  ;;  %v15869_v49 = vld [vmem:[%s17988_s16] sm:$0xf] }
 0xc54   : > { %v13246_v35 = vld [vmem:[%s17989_s17 + $0x1c4] sm:$0xf]  ;;  %v3723_v21 = vperm.slane %v15869_v49, 1 }
 0xc56   : > { %4581 = vmatpush.bf16.msra.mxu3 %v10682_v5  ;;  %4567 = vmatpush.bf16.msra.mxu2 %v10618_v10  ;;  %v10785_v5 = vld [vmem:[%s17989_s17 + $0x190] sm:$0xf] }
 0xc57   : > { %4609 = vmatpush.bf16.msrb.mxu1 %v10810_v63  ;;  %v10786_v10 = vor.u32 %v13241_v7, %v10785_v5  ;;  %v10619_v63 = vld [vmem:[%s17989_s17 + $0x48] sm:$0xf0] }
 0xc58   : > { %4114 = vmatmul.bf16.vlgmr.msrb.gmra.mxu2 %v3654_v57  ;;  %4128 = vmatmul.bf16.vlgmr.msrb.gmra.mxu3 %v3655_v17  ;;  %v10811_v5 = vld [vmem:[%s17989_s17 + $0x1c8] sm:$0xf0] }
 0xc59   : > { %4142 = vmatmul.bf16.vlgmr.msra.gmra.mxu0 %v3654_v57  ;;  %4156 = vmatmul.bf16.vlgmr.msra.gmra.mxu1 %v3655_v17  ;;  %v10753_v57 = vld [vmem:[%s17989_s17 + $0x150] sm:$0xf]  ;;  %v10594_v17 = vor.u32 %v13193_v32, %v10593_v56  ;;  %v10622_v56 = vor.u32 %v13198_v62, %v10619_v63  ;;  %v13210_v32 = vld [vmem:[%s17989_s17 + $0xa4] sm:$0xf]  ;;  %v10814_v7 = vor.u32 %v13246_v35, %v10811_v5  ;;  %v3722_v63 = vperm.slane %v15869_v49, 0 }
 0xc5a   : > { %4582 = vmatpush.bf16.msra.mxu3 %v10674_v16  ;;  %4568 = vmatpush.bf16.msra.mxu2 %v10610_v19  ;;  %v10754_v33 = vor.u32 %v13233_v31, %v10753_v57  ;;  %v10729_v16 = vld [vmem:[%s17989_s17 + $0x120] sm:$0xf]  ;;  %v10667_v57 = vld [vmem:[%s17989_s17 + $0xa8] sm:$0xf0]  ;;  %v3725_v5 = vperm.slane %v15869_v49, 3 }
 0xc5b   : > { %4610 = vmatpush.bf16.msrb.mxu1 %v10802_v37  ;;  %v10730_v19 = vor.u32 %v13227_v26, %v10729_v16  ;;  %v10670_v31 = vor.u32 %v13210_v32, %v10667_v57  ;;  %v10755_v16 = vld [vmem:[%s17989_s17 + $0x158] sm:$0xf0]  ;;  %v13228_v32 = vld [vmem:[%s17989_s17 + $0x134] sm:$0xf] }
 0xc5c   : > { %4594 = vmatpush.bf16.msrb.mxu0 %v10754_v33  ;;  %v10827_v33 = vld [vmem:[%s17989_s17 + $0x1e8] sm:$0xf0]  ;;  %v10758_v26 = vor.u32 %v13232_v11, %v10755_v16  ;;  %v10739_v57 = vld [vmem:[%s17989_s17 + $0x138] sm:$0xf0] }
 0xc5e   : > { %4583 = vmatpush.bf16.msra.mxu3 %v10666_v23  ;;  %4569 = vmatpush.bf16.msra.mxu2 %v10602_v14  ;;  %v10777_v23 = vld [vmem:[%s17989_s17 + $0x180] sm:$0xf]  ;;  %v13239_v14 = vld [vmem:[%s17989_s17 + $0x184] sm:$0xf0] }
 0xc5f   : > { %4611 = vmatpush.bf16.msrb.mxu1 %v10794_v60  ;;  %v10778_v27 = vor.u32 %v13239_v14, %v10777_v23  ;;  %v10603_v60 = vld [vmem:[%s17989_s17 + $0x28] sm:$0xf0] }
 0xc60   : > { %4595 = vmatpush.bf16.msrb.mxu0 %v10746_v52  ;;  %v13248_v52 = vld [vmem:[%s17989_s17 + $0x1d4] sm:$0xf] }
 0xc61   : > { %v10822_v58 = vor.u32 %v13248_v52, %v10819_v18  ;;  %v10723_v52 = vld [vmem:[%s17989_s17 + $0x118] sm:$0xf0] }
 0xc62   : > { %4584 = vmatpush.bf16.msra.mxu3 %v10658_v24  ;;  %4570 = vmatpush.bf16.msra.mxu2 %v10594_v17  ;;  %v10675_v24 = vld [vmem:[%s17989_s17 + $0xb8] sm:$0xf0]  ;;  %v13250_v17 = vld [vmem:[%s17989_s17 + $0x1e4] sm:$0xf] }
 0xc63   : > { %4612 = vmatpush.bf16.msrb.mxu1 %v10786_v10  ;;  %v10678_v28 = vor.u32 %v13212_v2, %v10675_v24  ;;  %v10830_v37 = vor.u32 %v13250_v17, %v10827_v33  ;;  %v13192_v10 = vld [vmem:[%s17989_s17 + $0x14] sm:$0xf]  ;;  %v10587_v2 = vld [vmem:[%s17989_s17 + $0x8] sm:$0xf0]  ;;  %v13230_v24 = vld [vmem:[%s17989_s17 + $0x144] sm:$0xf]  ;;  %v10742_v17 = vor.u32 %v13228_v32, %v10739_v57 }
 0xc64   : > { %4596 = vmatpush.bf16.msrb.mxu0 %v10738_v4  ;;  %v10651_v4 = vld [vmem:[%s17989_s17 + $0x88] sm:$0xf0]  ;;  %v10750_v1 = vor.u32 %v13230_v24, %v10747_v53  ;;  %v10787_v33 = vld [vmem:[%s17989_s17 + $0x198] sm:$0xf0] }
 0xc66   : > { %4585 = vmatpush.bf16.msra.mxu3 %v10650_v6  ;;  %4571 = vmatpush.bf16.msra.mxu2 %v10586_v45  ;;  %v10721_v6 = vld [vmem:[%s17989_s17 + $0x110] sm:$0xf]  ;;  %v10774_v45 = vor.u32 %v13236_v55, %v10771_v44 }
 0xc67   : > { %4613 = vmatpush.bf16.msrb.mxu1 %v10778_v27  ;;  %v13190_v27 = vld [vmem:[%s17989_s17 + $0x4] sm:$0xf] }
 0xc68   : > { %4597 = vmatpush.bf16.msrb.mxu0 %v10730_v19  ;;  %v13244_v19 = vld [vmem:[%s17989_s17 + $0x1b4] sm:$0xf] }
 0xc69   : > { %v10806_v14 = vor.u32 %v13244_v19, %v10803_v20 }
 0xc6a   : > { %4634 = vmatpush.bf16.msrb.mxu3 %v10710_v51  ;;  %4620 = vmatpush.bf16.msrb.mxu2 %v10646_v59  ;;  %v10722_v51 = vor.u32 %v13225_v8, %v10721_v6  ;;  %v13194_v59 = vld [vmem:[%s17989_s17 + $0x24] sm:$0xf] }
 0xc6b   : > { %4662 = vmatpush.bf16.msra.mxu1 %v10838_v13  ;;  %v10606_v0 = vor.u32 %v13194_v59, %v10603_v60  ;;  %v13242_v6 = vld [vmem:[%s17989_s17 + $0x1a4] sm:$0xf]  ;;  %v10795_v13 = vld [vmem:[%s17989_s17 + $0x1a8] sm:$0xf0] }
 0xc6c   : > { %4598 = vmatpush.bf16.msrb.mxu0 %v10722_v51  ;;  %v10798_v8 = vor.u32 %v13242_v6, %v10795_v13 }
 0xc6e   : > { %4635 = vmatpush.bf16.msrb.mxu3 %v10702_v39  ;;  %4621 = vmatpush.bf16.msrb.mxu2 %v10638_v50  ;;  %v10611_v39 = vld [vmem:[%s17989_s17 + $0x38] sm:$0xf0]  ;;  %v10654_v50 = vor.u32 %v13206_v41, %v10651_v4 }
 0xc6f   : > { %v10614_v42 = vor.u32 %v13196_v15, %v10611_v39  ;;  %4663 = vmatpush.bf16.msra.mxu1 %v10830_v37  ;;  %v10731_v37 = vld [vmem:[%s17989_s17 + $0x128] sm:$0xf0]  ;;  %v13238_v39 = vld [vmem:[%s17989_s17 + $0x184] sm:$0xf] }
 0xc70   : > { %4599 = vmatpush.bf16.msrb.mxu0 %v10714_v38 }
 0xc72   : > { %4636 = vmatpush.bf16.msrb.mxu3 %v10694_v3  ;;  %4622 = vmatpush.bf16.msrb.mxu2 %v10630_v22  ;;  %v10763_v3 = vld [vmem:[%s17989_s17 + $0x168] sm:$0xf0] }
 0xc73   : > { %4664 = vmatpush.bf16.msra.mxu1 %v10822_v58  ;;  %v10766_v54 = vor.u32 %v13234_v61, %v10763_v3 }
 0xc74   : > { %4648 = vmatpush.bf16.msra.mxu0 %v10774_v45  ;;  %v10734_v45 = vor.u32 %v13226_v34, %v10731_v37 }
 0xc76   : > { %4637 = vmatpush.bf16.msrb.mxu3 %v10686_v12  ;;  %4623 = vmatpush.bf16.msrb.mxu2 %v10622_v56  ;;  %v10598_v12 = vor.u32 %v13192_v10, %v10595_v43  ;;  %v10715_v10 = vld [vmem:[%s17989_s17 + $0x108] sm:$0xf0] }
 0xc77   : > { %4665 = vmatpush.bf16.msra.mxu1 %v10814_v7  ;;  %v13222_v7 = vld [vmem:[%s17989_s17 + $0x104] sm:$0xf] }
 0xc78   : > { %4649 = vmatpush.bf16.msra.mxu0 %v10766_v54 }
 0xc7a   : > { %4638 = vmatpush.bf16.msrb.mxu3 %v10678_v28  ;;  %4624 = vmatpush.bf16.msrb.mxu2 %v10614_v42  ;;  %v10590_v28 = vor.u32 %v13190_v27, %v10587_v2  ;;  %v10779_v42 = vld [vmem:[%s17989_s17 + $0x188] sm:$0xf0] }
 0xc7b   : > { %4666 = vmatpush.bf16.msra.mxu1 %v10806_v14  ;;  %v10782_v18 = vor.u32 %v13238_v39, %v10779_v42 }
 0xc7c   : > { %4650 = vmatpush.bf16.msra.mxu0 %v10758_v26 }
 0xc7e   : > { %4639 = vmatpush.bf16.msrb.mxu3 %v10670_v31  ;;  %4625 = vmatpush.bf16.msrb.mxu2 %v10606_v0  ;;  %v13240_v31 = vld [vmem:[%s17989_s17 + $0x194] sm:$0xf]  ;;  %v10726_v0 = vor.u32 %v13224_v47, %v10723_v52 }
 0xc7f   : > { %4667 = vmatpush.bf16.msra.mxu1 %v10798_v8  ;;  %v10790_v36 = vor.u32 %v13240_v31, %v10787_v33  ;;  %v4238_v33 = vld [vmem:[%s17990_s18] sm:$0x3] }
 0xc80   : > { %4651 = vmatpush.bf16.msra.mxu0 %v10750_v1  ;;  %v4240_v37 = vperm.slane %v4238_v33, 0  ;;  %v4241_v42 = vperm.slane %v4238_v33, 1  ;;  %v13255_v33 = vld [vmem:[%s18060_s8 + $0x208] sm:$0xff] }
 0xc82   : > { %4640 = vmatpush.bf16.msrb.mxu3 %v10662_v25  ;;  %4626 = vmatpush.bf16.msrb.mxu2 %v10598_v12  ;;  %v10718_v12 = vor.u32 %v13222_v7, %v10715_v10 }
 0xc83   : > { %4668 = vmatpush.bf16.msra.mxu1 %v10790_v36 }
 0xc84   : > { %4652 = vmatpush.bf16.msra.mxu0 %v10742_v17 }
 0xc86   : > { %4641 = vmatpush.bf16.msrb.mxu3 %v10654_v50  ;;  %4627 = vmatpush.bf16.msrb.mxu2 %v10590_v28 }
 0xc87   : > { %4669 = vmatpush.bf16.msra.mxu1 %v10782_v18 }
 0xc88   : > { %4653 = vmatpush.bf16.msra.mxu0 %v10734_v45 }
 0xc8c   : > { %4654 = vmatpush.bf16.msra.mxu0 %v10726_v0 }
 0xc90   : > { %4655 = vmatpush.bf16.msra.mxu0 %v10718_v12 }
 0xcc6   : > { %v4087_v22 = vpop.f32.mrf.mxu0  ;;  %v4101_v23 = vpop.f32.mrf.mxu1 }
 0xcc7   : > { %v4088_v62 = vadd.f32 %v4087_v22, %v3723_v21 }
 0xcc9   : > { %v4102_v55 = vadd.f32 %v4101_v23, %v4088_v62 }
 0xccb   : > { %v4059_v51 = vpop.f32.mrf.mxu2  ;;  %v4073_v56 = vpop.f32.mrf.mxu3  ;;  %v4163_v58 = vmax.f32 %v4102_v55, 0.0 }
 0xccc   : > { %v4060_v46 = vadd.f32 %v4059_v51, %v3722_v63 }
 0xcce   : > { %v4089_v38 = vpop.f32.mrf.mxu0  ;;  %v4103_v15 = vpop.f32.mrf.mxu1  ;;  %v4074_v3 = vadd.f32 %v4073_v56, %v4060_v46 }
 0xccf   : > { %v4090_v44 = vadd.f32 %v4089_v38, %v3723_v21  ;;  %v3724_v21 = vperm.slane %v15869_v49, 2 }
 0xcd0   : > { %v4162_v43 = vmax.f32 %v4074_v3, 0.0 }
 0xcd1   : > { %v4104_v25 = vadd.f32 %v4103_v15, %v4090_v44 }
 0xcd3   : > { %v4167_v59 = vmax.f32 %v4104_v25, 0.0  ;;  %v4061_v60 = vpop.f32.mrf.mxu2  ;;  %v4075_v61 = vpop.f32.mrf.mxu3 }
 0xcd4   : > { %v4062_v54 = vadd.f32 %v4061_v60, %v3722_v63 }
 0xcd5   : > { %v4171_v41 = vpack.c.bf16 %v4167_v59, %v4163_v58 }
 0xcd6   : > { %v4076_v4 = vadd.f32 %v4075_v61, %v4062_v54  ;;  %v4143_v35 = vpop.f32.mrf.mxu0  ;;  %v4157_v50 = vpop.f32.mrf.mxu1 }
 0xcd7   : > { %4586 = vmatmul.bf16.vlgmr.msra.gmra.mxu3 %v4171_v41  ;;  %v4144_v26 = vadd.f32 %v4143_v35, %v3725_v5 }
 0xcd8   : > { %v4166_v11 = vmax.f32 %v4076_v4, 0.0 }
 0xcd9   : > { %v4158_v23 = vadd.f32 %v4157_v50, %v4144_v26 }
 0xcda   : > { %v4170_v16 = vpack.c.bf16 %v4166_v11, %v4162_v43 }
 0xcdb   : > { %v4115_v19 = vpop.f32.mrf.mxu2  ;;  %v4129_v20 = vpop.f32.mrf.mxu3  ;;  %v4165_v28 = vmax.f32 %v4158_v23, 0.0  ;;  %v13258_v23 = vld [vmem:[%s18060_s8 + $0x220] sm:$0xff] }
 0xcdc   : > { %4572 = vmatmul.bf16.vlgmr.msra.gmra.mxu2 %v4170_v16  ;;  %v4116_v27 = vadd.f32 %v4115_v19, %v3724_v21 }
 0xcde   : > { %v4145_v22 = vpop.f32.mrf.mxu0  ;;  %v4159_v2 = vpop.f32.mrf.mxu1  ;;  %v4130_v6 = vadd.f32 %v4129_v20, %v4116_v27  ;;  %v13257_v27 = vld [vmem:[%s18060_s8 + $0x218] sm:$0xff] }
 0xcdf   : > { %v4146_v14 = vadd.f32 %v4145_v22, %v3725_v5  ;;  %v13267_v22 = vld [vmem:[%s18060_s8 + $0x268] sm:$0xff] }
 0xce0   : > { %v4164_v51 = vmax.f32 %v4130_v6, 0.0 }
 0xce1   : > { %v4160_v24 = vadd.f32 %v4159_v2, %v4146_v14  ;;  %v13266_v14 = vld [vmem:[%s18060_s8 + $0x260] sm:$0xff]  ;;  %v13265_v2 = vld [vmem:[%s18060_s8 + $0x258] sm:$0xff] }
 0xce3   : > { %v4169_v53 = vmax.f32 %v4160_v24, 0.0  ;;  %v4117_v1 = vpop.f32.mrf.mxu2  ;;  %v4131_v62 = vpop.f32.mrf.mxu3 }
 0xce4   : > { %v4118_v13 = vadd.f32 %v4117_v1, %v3724_v21  ;;  %v13260_v21 = vld [vmem:[%s18060_s8 + $0x230] sm:$0xff] }
 0xce5   : > { %v4173_v8 = vpack.c.bf16 %v4169_v53, %v4165_v28 }
 0xce6   : > { %v4132_v63 = vadd.f32 %v4131_v62, %v4118_v13 }
 0xce7   : > { %4614 = vmatmul.bf16.vlgmr.msrb.gmra.mxu1 %v4173_v8  ;;  %4642 = vmatmul.bf16.vlgmr.msrb.gmra.mxu3 %v4171_v41 }
 0xce8   : > { %v4168_v56 = vmax.f32 %v4132_v63, 0.0 }
 0xcea   : > { %v4172_v49 = vpack.c.bf16 %v4168_v56, %v4164_v51 }
 0xcec   : > { %4600 = vmatmul.bf16.vlgmr.msrb.gmra.mxu0 %v4172_v49  ;;  %4628 = vmatmul.bf16.vlgmr.msrb.gmra.mxu2 %v4170_v16 }
 0xcf7   : > { %4670 = vmatmul.bf16.vlgmr.msra.gmra.mxu1 %v4173_v8 }
 0xcfc   : > { %4656 = vmatmul.bf16.vlgmr.msra.gmra.mxu0 %v4172_v49 }
 0xd5a   : > { %v4587_v57 = vpop.f32.mrf.mxu3 }
 0xd5f   : > { %v4573_v32 = vpop.f32.mrf.mxu2 }
 0xd60   : > { %v4574_v39 = vadd.f32 %v4573_v32, %v4240_v37 }
 0xd62   : > { %v4589_v36 = vpop.f32.mrf.mxu3  ;;  %v4588_v44 = vadd.f32 %v4587_v57, %v4574_v39  ;;  %v13293_v39 = vld [vmem:[%s18065_s24 + $0x238] sm:$0xff] }
 0xd64   : > { %v4615_v17 = vpop.f32.mrf.mxu1 }
 0xd67   : > { %v4575_v31 = vpop.f32.mrf.mxu2 }
 0xd68   : > { %v4576_v52 = vadd.f32 %v4575_v31, %v4240_v37  ;;  %v13264_v31 = vld [vmem:[%s18060_s8 + $0x250] sm:$0xff]  ;;  %v13285_v37 = vld [vmem:[%s18064_s23 + $0x278] sm:$0xff] }
 0xd69   : > { %v4601_v34 = vpop.f32.mrf.mxu0  ;;  %5074 = vmatpush.bf16.msrb.mxu1 %v13285_v37 }
 0xd6a   : > { %v4643_v46 = vpop.f32.mrf.mxu3  ;;  %v4602_v47 = vadd.f32 %v4601_v34, %v4588_v44  ;;  %v4590_v0 = vadd.f32 %v4589_v36, %v4576_v52  ;;  %v13263_v34 = vld [vmem:[%s18060_s8 + $0x248] sm:$0xff]  ;;  %v13277_v36 = vld [vmem:[%s18064_s23 + $0x238] sm:$0xff]  ;;  %v13284_v44 = vld [vmem:[%s18064_s23 + $0x270] sm:$0xff] }
 0xd6b   : > { %5060 = vmatpush.bf16.msrb.mxu0 %v13277_v36  ;;  %v13283_v52 = vld [vmem:[%s18064_s23 + $0x268] sm:$0xff] }
 0xd6c   : > { %v4617_v38 = vpop.f32.mrf.mxu1  ;;  %v4616_v60 = vadd.f32 %v4615_v17, %v4602_v47  ;;  %v13256_v17 = vld [vmem:[%s18060_s8 + $0x210] sm:$0xff]  ;;  %v13275_v47 = vld [vmem:[%s18064_s23 + $0x228] sm:$0xff] }
 0xd6d   : > { %5075 = vmatpush.bf16.msrb.mxu1 %v13284_v44 }
 0xd6e   : > { %v4676_v4 = vadd.f32 %v4616_v60, %v15560_v9  ;;  %v13261_v9 = vld [vmem:[%s18060_s8 + $0x238] sm:$0xff]  ;;  %v13290_v60 = vld [vmem:[%s18065_s24 + $0x220] sm:$0xff] }
 0xd6f   : > { %v4629_v15 = vpop.f32.mrf.mxu2  ;;  %4896 = vmatpush.bf16.msra.mxu2 %v13261_v9 }
 0xd70   : > { %v4630_v45 = vadd.f32 %v4629_v15, %v4241_v42  ;;  %v13262_v15 = vld [vmem:[%s18060_s8 + $0x240] sm:$0xff] }
 0xd71   : > { %v4603_v55 = vpop.f32.mrf.mxu0  ;;  %5076 = vmatpush.bf16.msrb.mxu1 %v13283_v52  ;;  %v13796_v52 = vld [vmem:[%s18067_s4] sm:$0xff] }
 0xd72   : > { %v4644_v18 = vadd.f32 %v4643_v46, %v4630_v45  ;;  %v4604_v41 = vadd.f32 %v4603_v55, %v4590_v0  ;;  %v4645_v50 = vpop.f32.mrf.mxu3  ;;  %v13276_v55 = vld [vmem:[%s18064_s23 + $0x230] sm:$0xff]  ;;  %v13273_v0 = vld [vmem:[%s18064_s23 + $0x218] sm:$0xff] }
 0xd73   : > { %4897 = vmatpush.bf16.msra.mxu2 %v13260_v21  ;;  %5061 = vmatpush.bf16.msrb.mxu0 %v13276_v55  ;;  %v13292_v45 = vld [vmem:[%s18065_s24 + $0x230] sm:$0xff]  ;;  %v13294_v21 = vld [vmem:[%s18065_s24 + $0x240] sm:$0xff] }
 0xd74   : > { %v4671_v25 = vpop.f32.mrf.mxu1  ;;  %v4618_v43 = vadd.f32 %v4617_v38, %v4604_v41  ;;  %v13254_v38 = vld [vmem:[%s18060_s8 + $0x200] sm:$0xff]  ;;  %v13300_v46 = vld [vmem:[%s18065_s24 + $0x270] sm:$0xff]  ;;  %v13297_v41 = vld [vmem:[%s18065_s24 + $0x258] sm:$0xff] }
 0xd76   : > { %v4678_v26 = vadd.f32 %v4618_v43, %v15562_v29  ;;  %v13268_v29 = vld [vmem:[%s18060_s8 + $0x270] sm:$0xff]  ;;  %v13271_v43 = vld [vmem:[%s18064_s23 + $0x208] sm:$0xff] }
 0xd77   : > { %v4631_v58 = vpop.f32.mrf.mxu2  ;;  %5062 = vmatpush.bf16.msrb.mxu0 %v13275_v47 }
 0xd78   : > { %v4632_v3 = vadd.f32 %v4631_v58, %v4241_v42  ;;  %v13301_v42 = vld [vmem:[%s18065_s24 + $0x278] sm:$0xff]  ;;  %v13274_v58 = vld [vmem:[%s18064_s23 + $0x220] sm:$0xff] }
 0xd79   : > { %v4657_v59 = vpop.f32.mrf.mxu0 }
 0xd7a   : > { %v4658_v61 = vadd.f32 %v4657_v59, %v4644_v18  ;;  %v4646_v5 = vadd.f32 %v4645_v50, %v4632_v3  ;;  %v13299_v18 = vld [vmem:[%s18065_s24 + $0x268] sm:$0xff]  ;;  %v13282_v59 = vld [vmem:[%s18064_s23 + $0x260] sm:$0xff]  ;;  %v13281_v3 = vld [vmem:[%s18064_s23 + $0x258] sm:$0xff] }
 0xd7b   : > { %5063 = vmatpush.bf16.msrb.mxu0 %v13274_v58  ;;  %5077 = vmatpush.bf16.msrb.mxu1 %v13282_v59  ;;  %v13799_v59 = vld [vmem:[%s18067_s4 + $0x18] sm:$0xff] }
 0xd7c   : > { %v4672_v54 = vadd.f32 %v4671_v25, %v4658_v61  ;;  %v4673_v12 = vpop.f32.mrf.mxu1  ;;  %v13291_v25 = vld [vmem:[%s18065_s24 + $0x228] sm:$0xff]  ;;  %v13298_v61 = vld [vmem:[%s18065_s24 + $0x260] sm:$0xff] }
 0xd7e   : > { %v4677_v35 = vadd.f32 %v4672_v54, %v15564_v40  ;;  %v13269_v40 = vld [vmem:[%s18060_s8 + $0x278] sm:$0xff] }
 0xd7f   : > { %4910 = vmatpush.bf16.msra.mxu3 %v13269_v40  ;;  %5064 = vmatpush.bf16.msrb.mxu0 %v13273_v0  ;;  %v13289_v54 = vld [vmem:[%s18065_s24 + $0x218] sm:$0xff]  ;;  %v13286_v40 = vld [vmem:[%s18065_s24 + $0x200] sm:$0xff] }
 0xd80   : > { %v4682_v7 = vadd.f32 %v4677_v35, %v4676_v4  ;;  %5078 = vmatpush.bf16.msrb.mxu1 %v13281_v3  ;;  %v13325_v3 = vld [vmem:[%s18064_s23 + $0x2b8] sm:$0xff] }
 0xd81   : > { %v4659_v10 = vpop.f32.mrf.mxu0 }
 0xd82   : > { %v4660_v11 = vadd.f32 %v4659_v10, %v4646_v5  ;;  %4683 = vadd.xlane.f32.xlu0 %v4682_v7  ;;  %v13288_v5 = vld [vmem:[%s18065_s24 + $0x210] sm:$0xff] }
 0xd83   : > { %4911 = vmatpush.bf16.msra.mxu3 %v13268_v29  ;;  %v13296_v7 = vld [vmem:[%s18065_s24 + $0x250] sm:$0xff] }
 0xd84   : > { %v4674_v16 = vadd.f32 %v4673_v12, %v4660_v11  ;;  %v13279_v11 = vld [vmem:[%s18064_s23 + $0x248] sm:$0xff] }
 0xd86   : > { %v4679_v19 = vadd.f32 %v4674_v16, %v15566_v30  ;;  %v13259_v30 = vld [vmem:[%s18060_s8 + $0x228] sm:$0xff] }
 0xd87   : > { %4898 = vmatpush.bf16.msra.mxu2 %v13259_v30  ;;  %4912 = vmatpush.bf16.msra.mxu3 %v13267_v22  ;;  %v13287_v16 = vld [vmem:[%s18065_s24 + $0x208] sm:$0xff] }
 0xd88   : > { %v4685_v20 = vadd.f32 %v4679_v19, %v4678_v26 }
 0xd8a   : > { %4686 = vadd.xlane.f32.xlu2 %v4685_v20  ;;  %v13278_v20 = vld [vmem:[%s18064_s23 + $0x240] sm:$0xff] }
 0xd8b   : > { %4899 = vmatpush.bf16.msra.mxu2 %v13258_v23  ;;  %4913 = vmatpush.bf16.msra.mxu3 %v13266_v14 }
 0xd8f   : > { %4900 = vmatpush.bf16.msra.mxu2 %v13257_v27  ;;  %4914 = vmatpush.bf16.msra.mxu3 %v13265_v2 }
 0xd93   : > { %4901 = vmatpush.bf16.msra.mxu2 %v13256_v17  ;;  %4915 = vmatpush.bf16.msra.mxu3 %v13264_v31  ;;  %v4681_v31 = vld [vmem:[%s17992_s20] sm:$0x3] }
 0xd94   : > { %v4742_v36 = vperm.slane %v4681_v31, 0  ;;  %v4743_v37 = vperm.slane %v4681_v31, 1 }
 0xd97   : > { %4902 = vmatpush.bf16.msra.mxu2 %v13255_v33  ;;  %4916 = vmatpush.bf16.msra.mxu3 %v13263_v34 }
 0xd9b   : > { %4903 = vmatpush.bf16.msra.mxu2 %v13254_v38  ;;  %4917 = vmatpush.bf16.msra.mxu3 %v13262_v15 }
 0xd9f   : > { %5224 = vmatpush.bf16.msrb.mxu2 %v13293_v39  ;;  %5238 = vmatpush.bf16.msrb.mxu3 %v13301_v42 }
 0xda3   : > { %5225 = vmatpush.bf16.msrb.mxu2 %v13292_v45  ;;  %5239 = vmatpush.bf16.msrb.mxu3 %v13300_v46 }
 0xda7   : > { %5226 = vmatpush.bf16.msrb.mxu2 %v13291_v25  ;;  %5240 = vmatpush.bf16.msrb.mxu3 %v13299_v18  ;;  %v13798_v18 = vld [vmem:[%s18067_s4 + $0x10] sm:$0xff] }
 0xdab   : > { %5227 = vmatpush.bf16.msrb.mxu2 %v13290_v60  ;;  %5241 = vmatpush.bf16.msrb.mxu3 %v13298_v61 }
 0xdaf   : > { %5228 = vmatpush.bf16.msrb.mxu2 %v13289_v54  ;;  %5242 = vmatpush.bf16.msrb.mxu3 %v13297_v41  ;;  %v13333_v54 = vld [vmem:[%s18064_s23 + $0x2f8] sm:$0xff]  ;;  %v13324_v41 = vld [vmem:[%s18064_s23 + $0x2b0] sm:$0xff] }
 0xdb3   : > { %5229 = vmatpush.bf16.msrb.mxu2 %v13288_v5  ;;  %5243 = vmatpush.bf16.msrb.mxu3 %v13296_v7  ;;  %v13322_v5 = vld [vmem:[%s18064_s23 + $0x2a0] sm:$0xff] }
 0xdb4   : > { %v13330_v7 = vld [vmem:[%s18064_s23 + $0x2e0] sm:$0xff] }
 0xdb7   : > { %5230 = vmatpush.bf16.msrb.mxu2 %v13287_v16  ;;  %v13320_v16 = vld [vmem:[%s18064_s23 + $0x290] sm:$0xff] }
 0xdbb   : > { %5231 = vmatpush.bf16.msrb.mxu2 %v13286_v40  ;;  %v13326_v40 = vld [vmem:[%s18064_s23 + $0x2c0] sm:$0xff] }
 0xdf5   : > { %v4684_v24 = vpop.xlane.xlu0 %4683 }
 0xdf6   : > { %v4688_v28 = vmul.f32 %v4684_v24, %v15167_v48 }
 0xdf8   : > { %v15988_v53 = vsub.f32 %v4676_v4, %v4688_v28  ;;  %v15990_v1 = vsub.f32 %v4677_v35, %v4688_v28  ;;  %v13272_v4 = vld [vmem:[%s18064_s23 + $0x210] sm:$0xff] }
 0xdf9   : > { %v13280_v35 = vld [vmem:[%s18064_s23 + $0x250] sm:$0xff]  ;;  %5065 = vmatpush.bf16.msrb.mxu0 %v13272_v4 }
 0xdfa   : > { %v4694_v6 = vmul.f32 %v15988_v53, %v15988_v53  ;;  %v4695_v13 = vmul.f32 %v15990_v1, %v15990_v1  ;;  %5079 = vmatpush.bf16.msrb.mxu1 %v13280_v35  ;;  %v13332_v4 = vld [vmem:[%s18064_s23 + $0x2f0] sm:$0xff]  ;;  %v13323_v35 = vld [vmem:[%s18064_s23 + $0x2a8] sm:$0xff] }
 0xdfc   : > { %v4698_v8 = vadd.f32 %v4695_v13, %v4694_v6  ;;  %v4680_v13 = vld [vmem:[%s17991_s19] sm:$0x3] }
 0xdfd   : > { %v4687_v62 = vpop.xlane.xlu2 %4686  ;;  %5066 = vmatpush.bf16.msrb.mxu0 %v13271_v43 }
 0xdfe   : > { %v4689_v63 = vmul.f32 %v4687_v62, %v15167_v48  ;;  %4699 = vadd.xlane.f32.xlu1 %v4698_v8  ;;  %5080 = vmatpush.bf16.msrb.mxu1 %v13279_v11  ;;  %v13321_v11 = vld [vmem:[%s18064_s23 + $0x298] sm:$0xff] }
 0xe00   : > { %v15997_v51 = vsub.f32 %v4678_v26, %v4689_v63  ;;  %v15999_v56 = vsub.f32 %v4679_v19, %v4689_v63  ;;  %v13295_v26 = vld [vmem:[%s18065_s24 + $0x248] sm:$0xff]  ;;  %v13270_v19 = vld [vmem:[%s18064_s23 + $0x200] sm:$0xff] }
 0xe01   : > { %5244 = vmatpush.bf16.msrb.mxu3 %v13295_v26  ;;  %5067 = vmatpush.bf16.msrb.mxu0 %v13270_v19  ;;  %v13328_v26 = vld [vmem:[%s18064_s23 + $0x2d0] sm:$0xff]  ;;  %v13319_v19 = vld [vmem:[%s18064_s23 + $0x288] sm:$0xff] }
 0xe02   : > { %v4696_v49 = vmul.f32 %v15997_v51, %v15997_v51  ;;  %v4697_v32 = vmul.f32 %v15999_v56, %v15999_v56  ;;  %5081 = vmatpush.bf16.msrb.mxu1 %v13278_v20  ;;  %v13327_v20 = vld [vmem:[%s18064_s23 + $0x2c8] sm:$0xff] }
 0xe04   : > { %v4701_v57 = vadd.f32 %v4697_v32, %v4696_v49  ;;  %v4733_v49 = vperm.slane %v4680_v13, 0  ;;  %v4734_v32 = vperm.slane %v4680_v13, 1 }
 0xe05   : > { %5245 = vmatpush.bf16.msrb.mxu3 %v13294_v21  ;;  %v13689_v21 = vld [vmem:[%s18068_s25 + $0x4] ss:$0 sm:$0xff] }
 0xe06   : > { %4702 = vadd.xlane.f32.xlu0 %v4701_v57 }
 0xe71   : > { %v4700_v50 = vpop.xlane.xlu1 %4699 }
 0xe72   : > { %v4704_v10 = vmul.f32 %v4700_v50, %v15167_v48  ;;  %v13331_v50 = vld [vmem:[%s18064_s23 + $0x2e8] sm:$0xff] }
 0xe74   : > { %v4706_v12 = vadd.f32 1e-05, %v4704_v10 }
 0xe76   : > { %13740 = vrsqrt.f32 %v4706_v12  ;;  %vm4714_vm10 = vweird.f32 %v4706_v12 }
 0xe79   : > { %v4703_v9 = vpop.xlane.xlu0 %4702 }
 0xe7a   : > { %v4705_v29 = vmul.f32 %v4703_v9, %v15167_v48  ;;  %v13318_v9 = vld [vmem:[%s18064_s23 + $0x280] sm:$0xff] }
 0xe7c   : > { %v13741_v30 = vpop.eup %13740  ;;  %v4707_v22 = vadd.f32 1e-05, %v4705_v29 }
 0xe7d   : > { %v4709_v23 = vmul.f32 %v13741_v30, %v4706_v12  ;;  %vm4715_vm9 = vweird.f32 %v13741_v30  ;;  %v13329_v12 = vld [vmem:[%s18064_s23 + $0x2d8] sm:$0xff] }
 0xe7e   : > { %13742 = vrsqrt.f32 %v4707_v22  ;;  %vm4716_vm11 = vmor %vm4714_vm10, %vm4715_vm9  ;;  %vm4724_vm14 = vweird.f32 %v4707_v22 }
 0xe7f   : > { %v4710_v14 = vmul.f32 %v13741_v30, %v4709_v23 }
 0xe81   : > { %v4711_v27 = vmul.f32 0.5, %v4710_v14 }
 0xe83   : > { %v4712_v2 = vsub.f32 1.5, %v4711_v27 }
 0xe84   : > { %v13743_v24 = vpop.eup %13742 }
 0xe85   : > { %v4713_v28 = vmul.f32 %v13741_v30, %v4712_v2  ;;  %v4719_v6 = vmul.f32 %v13743_v24, %v4707_v22  ;;  %vm4725_vm13 = vweird.f32 %v13743_v24  ;;  %v13690_v2 = vld [vmem:[%s18069_s26 + $0x4] ss:$0 sm:$0xff] }
 0xe86   : > { %vm4726_vm15 = vmor %vm4724_vm14, %vm4725_vm13 }
 0xe87   : > { %v4717_v8 = vsel %vm4716_vm11, %v13741_v30, %v4713_v28  ;;  %v4720_v62 = vmul.f32 %v13743_v24, %v4719_v6 }
 0xe88   : > { %v4728_v57 = vmul.f32 %v4717_v8, %v15988_v53  ;;  %v4729_v17 = vmul.f32 %v4717_v8, %v15990_v1 }
 0xe89   : > { %v4721_v63 = vmul.f32 0.5, %v4720_v62 }
 0xe8a   : > { %v4737_v38 = vmul.f32 %v4733_v49, %v4728_v57  ;;  %v4738_v15 = vmul.f32 %v4734_v32, %v4729_v17 }
 0xe8b   : > { %v4722_v33 = vsub.f32 1.5, %v4721_v63 }
 0xe8c   : > { %v16131_v55 = vadd.f32 %v4742_v36, %v4737_v38  ;;  %v16133_v1 = vadd.f32 %v4743_v37, %v4738_v15 }
 0xe8d   : > { %v4723_v34 = vmul.f32 %v13743_v24, %v4722_v33 }
 0xe8e   : > { %v4754_v25 = vadd.f32 %v13796_v52, %v16131_v55  ;;  %v13308_v52 = vld [vmem:[%s18060_s8 + $0x2b0] sm:$0xff] }
 0xe8f   : > { %v4727_v39 = vsel %vm4726_vm15, %v13743_v24, %v4723_v34 }
 0xe90   : > { %v4730_v42 = vmul.f32 %v4727_v39, %v15997_v51  ;;  %v4731_v53 = vmul.f32 %v4727_v39, %v15999_v56  ;;  %v13797_v51 = vld [vmem:[%s18067_s4 + $0x8] sm:$0xff] }
 0xe91   : > { %v4755_v56 = vadd.f32 %v13797_v51, %v16133_v1 }
 0xe92   : > { %v4739_v44 = vmul.f32 %v4733_v49, %v4730_v42  ;;  %v4740_v45 = vmul.f32 %v4734_v32, %v4731_v53  ;;  %v13691_v42 = vld [vmem:[%s18070_s10 + $0x4] ss:$0 sm:$0xff] }
 0xe94   : > { %v16135_v46 = vadd.f32 %v4742_v36, %v4739_v44  ;;  %v16137_v47 = vadd.f32 %v4743_v37, %v4740_v45  ;;  %v13309_v37 = vld [vmem:[%s18060_s8 + $0x2b8] sm:$0xff] }
 0xe96   : > { %v4756_v58 = vadd.f32 %v13798_v18, %v16135_v46  ;;  %v4757_v60 = vadd.f32 %v13799_v59, %v16137_v47  ;;  %v16189_v10 = vpack.c.bf16 %v16135_v46, %v16131_v55  ;;  %v16193_v43 = vpack.c.bf16 %v16137_v47, %v16133_v1  ;;  %v13307_v18 = vld [vmem:[%s18060_s8 + $0x2a8] sm:$0xff] }
 0xe98   : > { %v16155_v61 = vpack.c.bf16 %v4756_v58, %v4754_v25  ;;  %v16157_v0 = vpack.c.bf16 %v4757_v60, %v4755_v56 }
 0xe9a   : > { %4904 = vmatmul.bf16.vlgmr.msra.gmra.mxu2 %v16155_v61  ;;  %4918 = vmatmul.bf16.vlgmr.msra.gmra.mxu3 %v16157_v0 }
 0xe9b   : > { %5068 = vmatmul.bf16.vlgmr.msrb.gmra.mxu0 %v16155_v61  ;;  %5082 = vmatmul.bf16.vlgmr.msrb.gmra.mxu1 %v16157_v0 }
 0xe9c   : > { %5666 = vmatpush.bf16.msra.mxu2 %v13325_v3  ;;  %5680 = vmatpush.bf16.msra.mxu3 %v13333_v54  ;;  %v13306_v3 = vld [vmem:[%s18060_s8 + $0x2a0] sm:$0xff] }
 0xea0   : > { %5667 = vmatpush.bf16.msra.mxu2 %v13324_v41  ;;  %5681 = vmatpush.bf16.msra.mxu3 %v13332_v4 }
 0xea4   : > { %5668 = vmatpush.bf16.msra.mxu2 %v13323_v35  ;;  %5682 = vmatpush.bf16.msra.mxu3 %v13331_v50  ;;  %v13305_v35 = vld [vmem:[%s18060_s8 + $0x298] sm:$0xff] }
 0xea8   : > { %5669 = vmatpush.bf16.msra.mxu2 %v13322_v5  ;;  %5683 = vmatpush.bf16.msra.mxu3 %v13330_v7 }
 0xeaa   : > { %5232 = vmatmul.bf16.vlgmr.msrb.gmra.mxu2 %v16189_v10  ;;  %5246 = vmatmul.bf16.vlgmr.msrb.gmra.mxu3 %v16193_v43 }
 0xeac   : > { %5670 = vmatpush.bf16.msra.mxu2 %v13321_v11  ;;  %5684 = vmatpush.bf16.msra.mxu3 %v13329_v12  ;;  %v13692_v11 = vld [vmem:[%s18068_s25 + $0x5] ss:$0 sm:$0xff]  ;;  %v13304_v12 = vld [vmem:[%s18060_s8 + $0x290] sm:$0xff] }
 0xeb0   : > { %5671 = vmatpush.bf16.msra.mxu2 %v13320_v16  ;;  %5685 = vmatpush.bf16.msra.mxu3 %v13328_v26 }
 0xeb4   : > { %5672 = vmatpush.bf16.msra.mxu2 %v13319_v19  ;;  %5686 = vmatpush.bf16.msra.mxu3 %v13327_v20 }
 0xeb8   : > { %5673 = vmatpush.bf16.msra.mxu2 %v13318_v9  ;;  %5687 = vmatpush.bf16.msra.mxu3 %v13326_v40  ;;  %v13303_v9 = vld [vmem:[%s18060_s8 + $0x288] sm:$0xff] }
 0xebb   : > { %5674 = vmatmul.bf16.vlgmr.msra.gmra.mxu2 %v16155_v61  ;;  %5688 = vmatmul.bf16.vlgmr.msra.gmra.mxu3 %v16157_v0 }
 0xf18   : > { %v5069_v29 = vpop.f32.mrf.mxu0  ;;  %v5083_v30 = vpop.f32.mrf.mxu1 }
 0xf19   : > { %v5070_v22 = vadd.f32 %v13689_v21, %v5069_v29 }
 0xf1b   : > { %v5084_v27 = vadd.f32 %v5083_v30, %v5070_v22  ;;  %v13341_v30 = vld [vmem:[%s18065_s24 + $0x2b8] sm:$0xff] }
 0xf1d   : > { %v4905_v23 = vpop.f32.mrf.mxu2  ;;  %v4919_v14 = vpop.f32.mrf.mxu3  ;;  %v5088_v13 = vpack.c.bf16 %v5084_v27, %v5084_v27 }
 0xf1e   : > { %v4906_v8 = vadd.f32 %v13690_v2, %v4905_v23 }
 0xf1f   : > { %v5261_v17 = vunpack.c.l.b16 %v5088_v13  ;;  %v13339_v13 = vld [vmem:[%s18065_s24 + $0x2a8] sm:$0xff] }
 0xf20   : > { %v5071_v24 = vpop.f32.mrf.mxu0  ;;  %v5085_v6 = vpop.f32.mrf.mxu1  ;;  %v4920_v31 = vadd.f32 %v4919_v14, %v4906_v8 }
 0xf21   : > { %v5072_v28 = vadd.f32 %v13689_v21, %v5071_v24  ;;  %v13302_v21 = vld [vmem:[%s18060_s8 + $0x280] sm:$0xff] }
 0xf22   : > { %v4924_v15 = vpack.c.bf16 %v4920_v31, %v4920_v31  ;;  %v13373_v31 = vld [vmem:[%s18064_s23 + $0x338] sm:$0xff] }
 0xf23   : > { %v5086_v62 = vadd.f32 %v5085_v6, %v5072_v28 }
 0xf24   : > { %v5256_v25 = vunpack.c.l.b16 %v4924_v15  ;;  %v13367_v15 = vld [vmem:[%s18064_s23 + $0x308] sm:$0xff] }
 0xf25   : > { %v5089_v63 = vpack.c.bf16 %v5086_v62, %v5086_v62  ;;  %v4907_v49 = vpop.f32.mrf.mxu2  ;;  %v4921_v32 = vpop.f32.mrf.mxu3 }
 0xf26   : > { %v4908_v57 = vadd.f32 %v13690_v2, %v4907_v49  ;;  %v13340_v2 = vld [vmem:[%s18065_s24 + $0x2b0] sm:$0xff]  ;;  %v13337_v49 = vld [vmem:[%s18065_s24 + $0x298] sm:$0xff] }
 0xf27   : > { %v5262_v33 = vunpack.c.l.b16 %v5089_v63  ;;  %v13338_v63 = vld [vmem:[%s18065_s24 + $0x2a0] sm:$0xff] }
 0xf28   : > { %v4922_v34 = vadd.f32 %v4921_v32, %v4908_v57  ;;  %v13336_v32 = vld [vmem:[%s18065_s24 + $0x290] sm:$0xff]  ;;  %v13335_v57 = vld [vmem:[%s18065_s24 + $0x288] sm:$0xff] }
 0xf29   : > { %v5263_v36 = vpack.c.b16 %v5262_v33, %v5261_v17  ;;  %v13334_v17 = vld [vmem:[%s18065_s24 + $0x280] sm:$0xff]  ;;  %v13372_v33 = vld [vmem:[%s18064_s23 + $0x330] sm:$0xff] }
 0xf2a   : > { %v4925_v38 = vpack.c.bf16 %v4922_v34, %v4922_v34  ;;  %v13371_v34 = vld [vmem:[%s18064_s23 + $0x328] sm:$0xff] }
 0xf2b   : > { %v5268_v39 = vsel %vm1365_vm2, %v5263_v36, 0  ;;  %v13370_v36 = vld [vmem:[%s18064_s23 + $0x320] sm:$0xff] }
 0xf2c   : > { %5277 = vmatpush.bf16.xpose.msra.mxu0 %v5268_v39  ;;  %v5257_v53 = vunpack.c.l.b16 %v4925_v38  ;;  %v13368_v38 = vld [vmem:[%s18064_s23 + $0x310] sm:$0xff]  ;;  %v13366_v39 = vld [vmem:[%s18064_s23 + $0x300] sm:$0xff] }
 0xf2d   : > { %v5233_v44 = vpop.f32.mrf.mxu2  ;;  %v5247_v45 = vpop.f32.mrf.mxu3 }
 0xf2e   : > { %v5234_v51 = vadd.f32 %v13691_v42, %v5233_v44  ;;  %v5258_v56 = vpack.c.b16 %v5257_v53, %v5256_v25  ;;  %v16314_v53 = vld [vmem:[%s14106_s29] ss:$0 sm:$0xff] }
 0xf30   : > { %v5248_v58 = vadd.f32 %v5247_v45, %v5234_v51 }
 0xf32   : > { %v5252_v41 = vpack.c.bf16 %v5248_v58, %v5248_v58 }
 0xf33   : > { %11130 = vmatmul.msk.bf16.vlgmr.msra.gmra.mxu0 %vm1365_vm2, %v5258_v56 }
 0xf34   : > { %5502 = vmatpush.bf16.msrb.mxu0 %v13309_v37  ;;  %v5343_v5 = vunpack.c.l.b16 %v5252_v41  ;;  %v13369_v37 = vld [vmem:[%s18064_s23 + $0x318] sm:$0xff] }
 0xf35   : > { %v5235_v59 = vpop.f32.mrf.mxu2  ;;  %v5249_v60 = vpop.f32.mrf.mxu3 }
 0xf36   : > { %v5236_v54 = vadd.f32 %v13691_v42, %v5235_v59 }
 0xf38   : > { %5503 = vmatpush.bf16.msrb.mxu0 %v13308_v52  ;;  %v5250_v4 = vadd.f32 %v5249_v60, %v5236_v54 }
 0xf3a   : > { %v5253_v50 = vpack.c.bf16 %v5250_v4, %v5250_v4 }
 0xf3c   : > { %5504 = vmatpush.bf16.msrb.mxu0 %v13307_v18  ;;  %v5344_v7 = vunpack.c.l.b16 %v5253_v50  ;;  %v13317_v50 = vld [vmem:[%s18060_s8 + $0x2f8] sm:$0xff] }
 0xf3e   : > { %v5345_v16 = vpack.c.b16 %v5344_v7, %v5343_v5  ;;  %v5675_v26 = vpop.f32.mrf.mxu2  ;;  %v5689_v19 = vpop.f32.mrf.mxu3  ;;  %v13316_v5 = vld [vmem:[%s18060_s8 + $0x2f0] sm:$0xff]  ;;  %v13315_v7 = vld [vmem:[%s18060_s8 + $0x2e8] sm:$0xff] }
 0xf3f   : > { %v5676_v20 = vadd.f32 %v13692_v11, %v5675_v26  ;;  %v13311_v26 = vld [vmem:[%s18060_s8 + $0x2c8] sm:$0xff] }
 0xf40   : > { %5505 = vmatpush.bf16.msrb.mxu0 %v13306_v3  ;;  %5357 = vmatpush.bf16.msra.mxu1 %v5345_v16  ;;  %v13312_v16 = vld [vmem:[%s18060_s8 + $0x2d0] sm:$0xff] }
 0xf41   : > { %v5690_v40 = vadd.f32 %v5689_v19, %v5676_v20  ;;  %v13310_v19 = vld [vmem:[%s18060_s8 + $0x2c0] sm:$0xff] }
 0xf43   : > { %v5694_v14 = vpack.c.bf16 %v5690_v40, %v5690_v40 }
 0xf44   : > { %5506 = vmatpush.bf16.msrb.mxu0 %v13305_v35  ;;  %5516 = vmatpush.bf16.msrb.mxu1 %v13317_v50  ;;  %v13356_v50 = vld [vmem:[%s18060_s8 + $0x330] sm:$0xff] }
 0xf45   : > { %v5867_v28 = vunpack.c.l.b16 %v5694_v14 }
 0xf46   : > { %v5677_v29 = vpop.f32.mrf.mxu2  ;;  %v5691_v23 = vpop.f32.mrf.mxu3 }
 0xf47   : > { %v5678_v22 = vadd.f32 %v13692_v11, %v5677_v29  ;;  %v13314_v11 = vld [vmem:[%s18060_s8 + $0x2e0] sm:$0xff] }
 0xf48   : > { %5507 = vmatpush.bf16.msrb.mxu0 %v13304_v12  ;;  %5517 = vmatpush.bf16.msrb.mxu1 %v13316_v5  ;;  %v13313_v12 = vld [vmem:[%s18060_s8 + $0x2d8] sm:$0xff]  ;;  %v13355_v5 = vld [vmem:[%s18060_s8 + $0x328] sm:$0xff] }
 0xf49   : > { %v5692_v27 = vadd.f32 %v5691_v23, %v5678_v22 }
 0xf4b   : > { %v5695_v24 = vpack.c.bf16 %v5692_v27, %v5692_v27 }
 0xf4c   : > { %5508 = vmatpush.bf16.msrb.mxu0 %v13303_v9  ;;  %5518 = vmatpush.bf16.msrb.mxu1 %v13315_v7  ;;  %v13354_v7 = vld [vmem:[%s18060_s8 + $0x320] sm:$0xff] }
 0xf4d   : > { %v5868_v6 = vunpack.c.l.b16 %v5695_v24 }
 0xf4f   : > { %v5869_v8 = vpack.c.b16 %v5868_v6, %v5867_v28 }
 0xf50   : > { %5509 = vmatpush.bf16.msrb.mxu0 %v13302_v21  ;;  %5519 = vmatpush.bf16.msrb.mxu1 %v13314_v11  ;;  %v13353_v11 = vld [vmem:[%s18060_s8 + $0x318] sm:$0xff] }
 0xf51   : > { %v5874_v62 = vsel %vm1365_vm2, %v5869_v8, 0 }
 0xf52   : > { %5883 = vmatpush.bf16.xpose.msrb.mxu2 %v5874_v62 }
 0xf53   : > { %5510 = vmatmul.bf16.vlgmr.msrb.gmra.mxu0 %v16155_v61 }
 0xf54   : > { %5830 = vmatpush.bf16.msra.mxu0 %v13341_v30  ;;  %5520 = vmatpush.bf16.msrb.mxu1 %v13313_v12  ;;  %v13352_v12 = vld [vmem:[%s18060_s8 + $0x310] sm:$0xff] }
 0xf58   : > { %5831 = vmatpush.bf16.msra.mxu0 %v13340_v2  ;;  %5521 = vmatpush.bf16.msrb.mxu1 %v13312_v16  ;;  %v13351_v16 = vld [vmem:[%s18060_s8 + $0x308] sm:$0xff] }
 0xf5c   : > { %5832 = vmatpush.bf16.msra.mxu0 %v13339_v13  ;;  %5522 = vmatpush.bf16.msrb.mxu1 %v13311_v26  ;;  %v13350_v26 = vld [vmem:[%s18060_s8 + $0x300] sm:$0xff] }
 0xf60   : > { %5833 = vmatpush.bf16.msra.mxu0 %v13338_v63  ;;  %5523 = vmatpush.bf16.msrb.mxu1 %v13310_v19 }
 0xf64   : > { %5834 = vmatpush.bf16.msra.mxu0 %v13337_v49 }
 0xf68   : > { %5835 = vmatpush.bf16.msra.mxu0 %v13336_v32 }
 0xf6c   : > { %5836 = vmatpush.bf16.msra.mxu0 %v13335_v57 }
 0xf70   : > { %5837 = vmatpush.bf16.msra.mxu0 %v13334_v17 }
 0xf73   : > { %5838 = vmatmul.bf16.vlgmr.msra.gmra.mxu0 %v16189_v10 }
 0xf74   : > { %6280 = vmatpush.bf16.msrb.mxu0 %v13373_v31 }
 0xf78   : > { %6281 = vmatpush.bf16.msrb.mxu0 %v13372_v33 }
 0xf7c   : > { %6282 = vmatpush.bf16.msrb.mxu0 %v13371_v34 }
 0xf80   : > { %6283 = vmatpush.bf16.msrb.mxu0 %v13370_v36 }
 0xf84   : > { %6284 = vmatpush.bf16.msrb.mxu0 %v13369_v37 }
 0xf88   : > { %6285 = vmatpush.bf16.msrb.mxu0 %v13368_v38 }
 0xf8c   : > { %6286 = vmatpush.bf16.msrb.mxu0 %v13367_v15  ;;  %v13349_v15 = vld [vmem:[%s18065_s24 + $0x2f8] sm:$0xff] }
 0xf90   : > { %6287 = vmatpush.bf16.msrb.mxu0 %v13366_v39 }
 0xf93   : > { %6288 = vmatmul.bf16.vlgmr.msrb.gmra.mxu0 %v16155_v61 }
 0xfb0   : > { %v5279_v42 = vpop.f32.mrf.mxu0 }
 0xfb1   : > { %v5280_v44 = vadd.f32 %v16314_v53, %v5279_v42  ;;  %v13348_v42 = vld [vmem:[%s18065_s24 + $0x2f0] sm:$0xff] }
 0xfb3   : > { %v5284_v45 = vsel %vm1386_vm3, %v5280_v44, -inf }
 0xfb4   : > { %5285 = vmax.xlane.f32.xlu2 %v5284_v45  ;;  %v13346_v45 = vld [vmem:[%s18065_s24 + $0x2e0] sm:$0xff] }
 0xfb8   : > { %v5281_v52 = vpop.f32.mrf.mxu0 }
 0xfb9   : > { %v5282_v25 = vadd.f32 %v16314_v53, %v5281_v52  ;;  %v13345_v52 = vld [vmem:[%s18065_s24 + $0x2d8] sm:$0xff] }
 0xfbb   : > { %v5287_v51 = vsel %vm1386_vm3, %v5282_v25, -inf }
 0xfbc   : > { %5288 = vmax.xlane.f32.xlu1 %v5287_v51  ;;  %v13343_v51 = vld [vmem:[%s18065_s24 + $0x2c8] sm:$0xff] }
0x1027   : > { %v5286_v56 = vpop.xlane.xlu2 %5285 }
0x1028   : > { %v5290_v18 = vsub.f32 %v5280_v44, %v5286_v56  ;;  %v13347_v44 = vld [vmem:[%s18065_s24 + $0x2e8] sm:$0xff]  ;;  %v13342_v56 = vld [vmem:[%s18065_s24 + $0x2c0] sm:$0xff] }
0x102a   : > { %v5292_v58 = vmul.f32 1.442695, %v5290_v18  ;;  %v13381_v18 = vld [vmem:[%s18064_s23 + $0x378] sm:$0xff] }
0x102c   : > { %13744 = vpow2.f32 %v5292_v58  ;;  %v13380_v58 = vld [vmem:[%s18064_s23 + $0x370] sm:$0xff] }
0x102f   : > { %v5289_v59 = vpop.xlane.xlu1 %5288 }
0x1030   : > { %v5291_v60 = vsub.f32 %v5282_v25, %v5289_v59  ;;  %v13344_v25 = vld [vmem:[%s18065_s24 + $0x2d0] sm:$0xff]  ;;  %v13379_v59 = vld [vmem:[%s18064_s23 + $0x368] sm:$0xff] }
0x1032   : > { %v13745_v3 = vpop.eup %13744  ;;  %v5294_v54 = vmul.f32 1.442695, %v5291_v60  ;;  %v13378_v60 = vld [vmem:[%s18064_s23 + $0x360] sm:$0xff] }
0x1033   : > { %v5296_v41 = vsel %vm1386_vm3, %v13745_v3, 0.0 }
0x1034   : > { %13746 = vpow2.f32 %v5294_v54  ;;  %5297 = vadd.xlane.f32.xlu0 %v5296_v41  ;;  %v13376_v54 = vld [vmem:[%s18064_s23 + $0x350] sm:$0xff]  ;;  %v13375_v41 = vld [vmem:[%s18064_s23 + $0x348] sm:$0xff] }
0x103a   : > { %v13747_v4 = vpop.eup %13746 }
0x103b   : > { %v5299_v35 = vsel %vm1386_vm3, %v13747_v4, 0.0 }
0x103c   : > { %5300 = vadd.xlane.f32.xlu2 %v5299_v35  ;;  %v13357_v35 = vld [vmem:[%s18060_s8 + $0x338] sm:$0xff] }
0x103d   : > { %6116 = vmatpush.bf16.msra.mxu2 %v13357_v35  ;;  %v13420_v35 = vld [vmem:[%s18064_s23 + $0x3b0] sm:$0xff] }
0x1041   : > { %6117 = vmatpush.bf16.msra.mxu2 %v13356_v50 }
0x1045   : > { %6118 = vmatpush.bf16.msra.mxu2 %v13355_v5 }
0x1049   : > { %6119 = vmatpush.bf16.msra.mxu2 %v13354_v7 }
0x104d   : > { %6120 = vmatpush.bf16.msra.mxu2 %v13353_v11  ;;  %v13419_v11 = vld [vmem:[%s18064_s23 + $0x3a8] sm:$0xff] }
0x1051   : > { %6121 = vmatpush.bf16.msra.mxu2 %v13352_v12 }
0x1055   : > { %6122 = vmatpush.bf16.msra.mxu2 %v13351_v16 }
0x1059   : > { %6123 = vmatpush.bf16.msra.mxu2 %v13350_v26 }
0x10a7   : > { %v5298_v20 = vpop.xlane.xlu0 %5297 }
0x10a8   : > { %13748 = vrcp.f32 %v5298_v20  ;;  %v5313_v22 = vand.u32 2147483648, %v5298_v20  ;;  %vm5307_vm5 = vweird.f32 %v5298_v20  ;;  %v5311_v14 = vand.u32 2147483647, %v5298_v20 }
0x10aa   : > { %v5314_v28 = vor.u32 1.1754944e-38, %v5313_v22  ;;  %vm5312_vm7 = vcmp.eq.f32.partialorder %v5311_v14, 8.507059e+37 }
0x10ae   : > { %v13749_v9 = vpop.eup %13748 }
0x10af   : > { %v5303_v40 = vmul.f32 %v13749_v9, %v5298_v20  ;;  %v5301_v21 = vpop.xlane.xlu2 %5300  ;;  %vm5308_vm0 = vweird.f32 %v13749_v9 }
0x10b0   : > { %13750 = vrcp.f32 %v5301_v21  ;;  %vm5309_vm6 = vmor %vm5307_vm5, %vm5308_vm0  ;;  %v5327_v8 = vand.u32 2147483648, %v5301_v21  ;;  %v5325_v63 = vand.u32 2147483647, %v5301_v21  ;;  %vm5321_vm9 = vweird.f32 %v5301_v21 }
0x10b1   : > { %v5304_v29 = vsub.f32 1.0, %v5303_v40 }
0x10b2   : > { %v5328_v57 = vor.u32 1.1754944e-38, %v5327_v8  ;;  %vm5326_vm11 = vcmp.eq.f32.partialorder %v5325_v63, 8.507059e+37  ;;  %v13389_v63 = vld [vmem:[%s18065_s24 + $0x338] sm:$0xff] }
0x10b3   : > { %v5305_v30 = vmul.f32 %v13749_v9, %v5304_v29  ;;  %v13693_v29 = vld [vmem:[%s18069_s26 + $0x5] ss:$0 sm:$0xff] }
0x10b5   : > { %v5306_v23 = vadd.f32 %v13749_v9, %v5305_v30 }
0x10b6   : > { %v13751_v27 = vpop.eup %13750 }
0x10b7   : > { %v5310_v2 = vsel %vm5309_vm6, %v13749_v9, %v5306_v23  ;;  %v5317_v24 = vmul.f32 %v13751_v27, %v5301_v21  ;;  %vm5322_vm8 = vweird.f32 %v13751_v27  ;;  %v5511_v9 = vpop.f32.mrf.mxu0 }
0x10b8   : > { %v5315_v13 = vsel %vm5312_vm7, %v5314_v28, %v5310_v2  ;;  %vm5323_vm10 = vmor %vm5321_vm9, %vm5322_vm8  ;;  %v5512_v23 = vadd.f32 %v13693_v29, %v5511_v9 }
0x10b9   : > { %v5318_v6 = vsub.f32 1.0, %v5317_v24  ;;  %v16346_v49 = vmul.f32 %v13745_v3, %v5315_v13  ;;  %v13377_v3 = vld [vmem:[%s18064_s23 + $0x358] sm:$0xff] }
0x10bb   : > { %v5319_v62 = vmul.f32 %v13751_v27, %v5318_v6  ;;  %v5334_v33 = vpack.c.bf16 %v16346_v49, %v16346_v49 }
0x10bd   : > { %v5320_v32 = vadd.f32 %v13751_v27, %v5319_v62  ;;  %v5338_v37 = vunpack.c.l.b16 %v5334_v33 }
0x10bf   : > { %v5324_v17 = vsel %vm5323_vm10, %v13751_v27, %v5320_v32  ;;  %v5513_v22 = vpop.f32.mrf.mxu0  ;;  %v13694_v32 = vld [vmem:[%s18070_s10 + $0x5] ss:$0 sm:$0xff] }
0x10c0   : > { %v5329_v31 = vsel %vm5326_vm11, %v5328_v57, %v5324_v17  ;;  %v5514_v27 = vadd.f32 %v13693_v29, %v5513_v22  ;;  %v13417_v29 = vld [vmem:[%s18064_s23 + $0x398] sm:$0xff] }
0x10c1   : > { %v16350_v34 = vmul.f32 %v13747_v4, %v5329_v31  ;;  %v13374_v4 = vld [vmem:[%s18064_s23 + $0x340] sm:$0xff]  ;;  %v13388_v31 = vld [vmem:[%s18065_s24 + $0x330] sm:$0xff] }
0x10c3   : > { %v5335_v36 = vpack.c.bf16 %v16350_v34, %v16350_v34 }
0x10c5   : > { %v5339_v38 = vunpack.c.l.b16 %v5335_v36 }
0x10c7   : > { %v5340_v39 = vpack.c.b16 %v5339_v38, %v5338_v37  ;;  %v5839_v6 = vpop.f32.mrf.mxu0  ;;  %v13387_v38 = vld [vmem:[%s18065_s24 + $0x328] sm:$0xff] }
0x10c8   : > { %v5840_v33 = vadd.f32 %v13694_v32, %v5839_v6 }
0x10c9   : > { %11131 = vmatmul.msk.bf16.vlgmr.msra.gmra.mxu1 %vm1386_vm3, %v5340_v39 }
0x10ca   : > { %5844 = vmatpush.bf16.msra.mxu1 %v13349_v15 }
0x10ce   : > { %5845 = vmatpush.bf16.msra.mxu1 %v13348_v42 }
0x10cf   : > { %v5841_v36 = vpop.f32.mrf.mxu0 }
0x10d0   : > { %v5842_v15 = vadd.f32 %v13694_v32, %v5841_v36 }
0x10d2   : > { %5846 = vmatpush.bf16.msra.mxu1 %v13347_v44 }
0x10d6   : > { %5847 = vmatpush.bf16.msra.mxu1 %v13346_v45  ;;  %v13386_v45 = vld [vmem:[%s18065_s24 + $0x320] sm:$0xff] }
0x10d9   : > { %5524 = vmatmul.bf16.vlgmr.msrb.gmra.mxu1 %v16157_v0 }
0x10da   : > { %5848 = vmatpush.bf16.msra.mxu1 %v13345_v52 }
0x10de   : > { %5849 = vmatpush.bf16.msra.mxu1 %v13344_v25 }
0x10e2   : > { %5850 = vmatpush.bf16.msra.mxu1 %v13343_v51 }
0x10e6   : > { %5851 = vmatpush.bf16.msra.mxu1 %v13342_v56  ;;  %v13385_v56 = vld [vmem:[%s18065_s24 + $0x318] sm:$0xff] }
0x10e9   : > { %5852 = vmatmul.bf16.vlgmr.msra.gmra.mxu1 %v16193_v43 }
0x10ea   : > { %6294 = vmatpush.bf16.msrb.mxu1 %v13381_v18 }
0x10ee   : > { %6295 = vmatpush.bf16.msrb.mxu1 %v13380_v58  ;;  %v13384_v58 = vld [vmem:[%s18065_s24 + $0x310] sm:$0xff] }
0x10f2   : > { %6296 = vmatpush.bf16.msrb.mxu1 %v13379_v59  ;;  %v13383_v59 = vld [vmem:[%s18065_s24 + $0x308] sm:$0xff] }
0x10f6   : > { %6297 = vmatpush.bf16.msrb.mxu1 %v13378_v60  ;;  %v6289_v60 = vpop.f32.mrf.mxu0 }
0x10fa   : > { %6298 = vmatpush.bf16.msrb.mxu1 %v13377_v3  ;;  %v13382_v3 = vld [vmem:[%s18065_s24 + $0x300] sm:$0xff] }
0x10fe   : > { %6299 = vmatpush.bf16.msrb.mxu1 %v13376_v54  ;;  %v13421_v54 = vld [vmem:[%s18064_s23 + $0x3b8] sm:$0xff]  ;;  %v6291_v5 = vpop.f32.mrf.mxu0 }
0x1102   : > { %6300 = vmatpush.bf16.msrb.mxu1 %v13375_v41  ;;  %v13695_v41 = vld [vmem:[%s18068_s25 + $0x6] ss:$0 sm:$0xff] }
0x1103   : > { %v6290_v50 = vadd.f32 %v13695_v41, %v6289_v60  ;;  %v6292_v12 = vadd.f32 %v13695_v41, %v6291_v5 }
0x1106   : > { %6301 = vmatpush.bf16.msrb.mxu1 %v13374_v4 }
0x1109   : > { %6302 = vmatmul.bf16.vlgmr.msrb.gmra.mxu1 %v16157_v0 }
0x1146   : > { %v5359_v19 = vpop.f32.mrf.mxu1 }
0x1147   : > { %v5364_v20 = vpack.c.bf16 %v5359_v19, %v5359_v19 }
0x1149   : > { %5366 = vst.msk [vmem:[#allocation2] sm:$0xf] %vm1469_vm12, %v5364_v20  ;;  %v13418_v20 = vld [vmem:[%s18064_s23 + $0x3a0] sm:$0xff] }
0x114e   : > { %v5361_v40 = vpop.f32.mrf.mxu1 }
0x114f   : > { %v5365_v21 = vpack.c.bf16 %v5361_v40, %v5361_v40 }
0x1151   : > { %5367 = vst.msk [vmem:[#allocation2 + $0x8] sm:$0xf] %vm1469_vm12, %v5365_v21 }
0x1156   : > { %v5525_v30 = vpop.f32.mrf.mxu1 }
0x1157   : > { %v5526_v14 = vadd.f32 %v5525_v30, %v5512_v23  ;;  %v13416_v23 = vld [vmem:[%s18064_s23 + $0x390] sm:$0xff] }
0x1159   : > { %v5530_v24 = vpack.c.bf16 %v5526_v14, %v5526_v14  ;;  %v13415_v14 = vld [vmem:[%s18064_s23 + $0x388] sm:$0xff] }
0x115b   : > { %v5862_v8 = vunpack.c.l.b16 %v5530_v24 }
0x115e   : > { %v5527_v2 = vpop.f32.mrf.mxu1 }
0x115f   : > { %v5528_v28 = vadd.f32 %v5527_v2, %v5514_v27  ;;  %v13414_v27 = vld [vmem:[%s18064_s23 + $0x380] sm:$0xff] }
0x1161   : > { %v5531_v13 = vpack.c.bf16 %v5528_v28, %v5528_v28 }
0x1163   : > { %v5863_v62 = vunpack.c.l.b16 %v5531_v13 }
0x1165   : > { %v5864_v57 = vpack.c.b16 %v5863_v62, %v5862_v8 }
0x1166   : > { %v5853_v17 = vpop.f32.mrf.mxu1 }
0x1167   : > { %11423 = vmatmul.msk.bf16.vlgmr.msrb.gmra.mxu2 %vm1365_vm2, %v5864_v57  ;;  %v5854_v37 = vadd.f32 %v5853_v17, %v5840_v33 }
0x1168   : > { %6444 = vmatpush.bf16.msrb.mxu2 %v13389_v63 }
0x1169   : > { %v5858_v42 = vpack.c.bf16 %v5854_v37, %v5854_v37 }
0x116b   : > { %v5949_v25 = vunpack.c.l.b16 %v5858_v42  ;;  %v13363_v42 = vld [vmem:[%s18060_s8 + $0x368] sm:$0xff] }
0x116c   : > { %6445 = vmatpush.bf16.msrb.mxu2 %v13388_v31 }
0x116e   : > { %v5855_v39 = vpop.f32.mrf.mxu1 }
0x116f   : > { %v5856_v44 = vadd.f32 %v5855_v39, %v5842_v15  ;;  %v13365_v15 = vld [vmem:[%s18060_s8 + $0x378] sm:$0xff]  ;;  %v13364_v39 = vld [vmem:[%s18060_s8 + $0x370] sm:$0xff] }
0x1170   : > { %6446 = vmatpush.bf16.msrb.mxu2 %v13387_v38 }
0x1171   : > { %v5859_v52 = vpack.c.bf16 %v5856_v44, %v5856_v44  ;;  %v13362_v44 = vld [vmem:[%s18060_s8 + $0x360] sm:$0xff] }
0x1173   : > { %v5950_v51 = vunpack.c.l.b16 %v5859_v52  ;;  %v13360_v52 = vld [vmem:[%s18060_s8 + $0x350] sm:$0xff] }
0x1174   : > { %6447 = vmatpush.bf16.msrb.mxu2 %v13386_v45  ;;  %v13361_v45 = vld [vmem:[%s18060_s8 + $0x358] sm:$0xff] }
0x1175   : > { %v5951_v18 = vpack.c.b16 %v5950_v51, %v5949_v25  ;;  %v13359_v25 = vld [vmem:[%s18060_s8 + $0x348] sm:$0xff] }
0x1177   : > { %5963 = vmatpush.bf16.msrb.mxu3 %v5951_v18  ;;  %6124 = vmatmul.bf16.vlgmr.msra.gmra.mxu2 %v16155_v61 }
0x1178   : > { %6448 = vmatpush.bf16.msrb.mxu2 %v13385_v56  ;;  %v13358_v56 = vld [vmem:[%s18060_s8 + $0x340] sm:$0xff] }
0x117b   : > { %6130 = vmatpush.bf16.msra.mxu3 %v13365_v15  ;;  %v13422_v15 = vld [vmem:[%s18064_s23 + $0x3c0] sm:$0xff] }
0x117c   : > { %6449 = vmatpush.bf16.msrb.mxu2 %v13384_v58 }
0x117f   : > { %6131 = vmatpush.bf16.msra.mxu3 %v13364_v39  ;;  %v13405_v39 = vld [vmem:[%s18060_s8 + $0x3b8] sm:$0xff] }
0x1180   : > { %6450 = vmatpush.bf16.msrb.mxu2 %v13383_v59 }
0x1183   : > { %6132 = vmatpush.bf16.msra.mxu3 %v13363_v42  ;;  %v13404_v42 = vld [vmem:[%s18060_s8 + $0x3b0] sm:$0xff] }
0x1184   : > { %6451 = vmatpush.bf16.msrb.mxu2 %v13382_v3 }
0x1186   : > { %v6303_v4 = vpop.f32.mrf.mxu1 }
0x1187   : > { %6452 = vmatmul.bf16.vlgmr.msrb.gmra.mxu2 %v16189_v10  ;;  %v6304_v7 = vadd.f32 %v6303_v4, %v6290_v50  ;;  %6133 = vmatpush.bf16.msra.mxu3 %v13362_v44  ;;  %v13403_v44 = vld [vmem:[%s18060_s8 + $0x3a8] sm:$0xff] }
0x1188   : > { %6886 = vmatpush.bf16.msra.mxu2 %v13421_v54 }
0x1189   : > { %v6308_v26 = vpack.c.bf16 %v6304_v7, %v6304_v7 }
0x118b   : > { %v6481_v40 = vunpack.c.l.b16 %v6308_v26  ;;  %6134 = vmatpush.bf16.msra.mxu3 %v13361_v45  ;;  %v13402_v45 = vld [vmem:[%s18060_s8 + $0x3a0] sm:$0xff] }
0x118c   : > { %6887 = vmatpush.bf16.msra.mxu2 %v13420_v35 }
0x118e   : > { %v6305_v16 = vpop.f32.mrf.mxu1 }
0x118f   : > { %v6306_v19 = vadd.f32 %v6305_v16, %v6292_v12  ;;  %6135 = vmatpush.bf16.msra.mxu3 %v13360_v52  ;;  %v13401_v52 = vld [vmem:[%s18060_s8 + $0x398] sm:$0xff] }
0x1190   : > { %6888 = vmatpush.bf16.msra.mxu2 %v13419_v11 }
0x1191   : > { %v6309_v9 = vpack.c.bf16 %v6306_v19, %v6306_v19 }
0x1193   : > { %v6482_v21 = vunpack.c.l.b16 %v6309_v9  ;;  %6136 = vmatpush.bf16.msra.mxu3 %v13359_v25  ;;  %v13400_v25 = vld [vmem:[%s18060_s8 + $0x390] sm:$0xff] }
0x1194   : > { %6889 = vmatpush.bf16.msra.mxu2 %v13418_v20 }
0x1195   : > { %v6483_v30 = vpack.c.b16 %v6482_v21, %v6481_v40 }
0x1197   : > { %v6488_v22 = vsel %vm1365_vm2, %v6483_v30, 0  ;;  %6137 = vmatpush.bf16.msra.mxu3 %v13358_v56 }
0x1198   : > { %6497 = vmatpush.bf16.xpose.msra.mxu0 %v6488_v22  ;;  %6890 = vmatpush.bf16.msra.mxu2 %v13417_v29 }
0x119c   : > { %6891 = vmatpush.bf16.msra.mxu2 %v13416_v23 }
0x11a0   : > { %6892 = vmatpush.bf16.msra.mxu2 %v13415_v14  ;;  %6722 = vmatpush.bf16.msrb.mxu0 %v13405_v39 }
0x11a4   : > { %6893 = vmatpush.bf16.msra.mxu2 %v13414_v27  ;;  %6723 = vmatpush.bf16.msrb.mxu0 %v13404_v42 }
0x11a7   : > { %6894 = vmatmul.bf16.vlgmr.msra.gmra.mxu2 %v16155_v61 }
0x11a8   : > { %6724 = vmatpush.bf16.msrb.mxu0 %v13403_v44 }
0x11ac   : > { %6725 = vmatpush.bf16.msrb.mxu0 %v13402_v45 }
0x11b0   : > { %6726 = vmatpush.bf16.msrb.mxu0 %v13401_v52 }
0x11b4   : > { %6727 = vmatpush.bf16.msrb.mxu0 %v13400_v25 }
0x11ea   : > { %v5885_v2 = vpop.f32.mrf.mxu2 }
0x11eb   : > { %v5886_v24 = vadd.f32 %v16314_v53, %v5885_v2  ;;  %v13397_v2 = vld [vmem:[%s18065_s24 + $0x378] sm:$0xff] }
0x11ed   : > { %v5890_v28 = vsel %vm1386_vm3, %v5886_v24, -inf }
0x11ee   : > { %5891 = vmax.xlane.f32.xlu1 %v5890_v28  ;;  %v13396_v28 = vld [vmem:[%s18065_s24 + $0x370] sm:$0xff] }
0x11f2   : > { %v5887_v6 = vpop.f32.mrf.mxu2 }
0x11f3   : > { %v5888_v13 = vadd.f32 %v16314_v53, %v5887_v6  ;;  %v13395_v6 = vld [vmem:[%s18065_s24 + $0x368] sm:$0xff] }
0x11f5   : > { %v5893_v8 = vsel %vm1386_vm3, %v5888_v13, -inf }
0x11f6   : > { %5894 = vmax.xlane.f32.xlu0 %v5893_v8  ;;  %v13393_v8 = vld [vmem:[%s18065_s24 + $0x358] sm:$0xff] }
0x1261   : > { %v5892_v62 = vpop.xlane.xlu1 %5891 }
0x1262   : > { %v5896_v63 = vsub.f32 %v5886_v24, %v5892_v62  ;;  %v13392_v62 = vld [vmem:[%s18065_s24 + $0x350] sm:$0xff] }
0x1264   : > { %v5898_v32 = vmul.f32 1.442695, %v5896_v63  ;;  %v13391_v63 = vld [vmem:[%s18065_s24 + $0x348] sm:$0xff] }
0x1266   : > { %13752 = vpow2.f32 %v5898_v32  ;;  %v13390_v32 = vld [vmem:[%s18065_s24 + $0x340] sm:$0xff] }
0x1269   : > { %v5895_v57 = vpop.xlane.xlu0 %5894 }
0x126a   : > { %v5897_v17 = vsub.f32 %v5888_v13, %v5895_v57  ;;  %v13394_v13 = vld [vmem:[%s18065_s24 + $0x360] sm:$0xff]  ;;  %v13429_v57 = vld [vmem:[%s18064_s23 + $0x3f8] sm:$0xff] }
0x126c   : > { %v13753_v31 = vpop.eup %13752  ;;  %v5900_v33 = vmul.f32 1.442695, %v5897_v17  ;;  %v13428_v17 = vld [vmem:[%s18064_s23 + $0x3f0] sm:$0xff] }
0x126d   : > { %v5902_v36 = vsel %vm1386_vm3, %v13753_v31, 0.0 }
0x126e   : > { %13754 = vpow2.f32 %v5900_v33  ;;  %5903 = vadd.xlane.f32.xlu2 %v5902_v36  ;;  %v13426_v33 = vld [vmem:[%s18064_s23 + $0x3e0] sm:$0xff]  ;;  %v13425_v36 = vld [vmem:[%s18064_s23 + $0x3d8] sm:$0xff] }
0x1274   : > { %v13755_v37 = vpop.eup %13754 }
0x1275   : > { %v5905_v38 = vsel %vm1386_vm3, %v13755_v37, 0.0 }
0x1276   : > { %5906 = vadd.xlane.f32.xlu1 %v5905_v38  ;;  %v13423_v38 = vld [vmem:[%s18064_s23 + $0x3c8] sm:$0xff] }
0x12e1   : > { %v5904_v51 = vpop.xlane.xlu2 %5903 }
0x12e2   : > { %13756 = vrcp.f32 %v5904_v51  ;;  %v5919_v54 = vand.u32 2147483648, %v5904_v51  ;;  %vm5913_vm14 = vweird.f32 %v5904_v51  ;;  %v5917_v4 = vand.u32 2147483647, %v5904_v51 }
0x12e4   : > { %v5920_v7 = vor.u32 1.1754944e-38, %v5919_v54  ;;  %vm5918_vm0 = vcmp.eq.f32.partialorder %v5917_v4, 8.507059e+37 }
0x12e8   : > { %v13757_v18 = vpop.eup %13756 }
0x12e9   : > { %v5909_v58 = vmul.f32 %v13757_v18, %v5904_v51  ;;  %v5907_v59 = vpop.xlane.xlu1 %5906  ;;  %vm5914_vm13 = vweird.f32 %v13757_v18  ;;  %v13399_v51 = vld [vmem:[%s18060_s8 + $0x388] sm:$0xff] }
0x12ea   : > { %13758 = vrcp.f32 %v5907_v59  ;;  %vm5915_vm15 = vmor %vm5913_vm14, %vm5914_vm13  ;;  %v5933_v16 = vand.u32 2147483648, %v5907_v59  ;;  %v5931_v19 = vand.u32 2147483647, %v5907_v59  ;;  %vm5927_vm6 = vweird.f32 %v5907_v59  ;;  %6728 = vmatpush.bf16.msrb.mxu0 %v13399_v51 }
0x12eb   : > { %v5910_v60 = vsub.f32 1.0, %v5909_v58  ;;  %v6125_v58 = vpop.f32.mrf.mxu2 }
0x12ec   : > { %v5934_v40 = vor.u32 1.1754944e-38, %v5933_v16  ;;  %vm5932_vm8 = vcmp.eq.f32.partialorder %v5931_v19, 8.507059e+37  ;;  %v13437_v19 = vld [vmem:[%s18065_s24 + $0x3b8] sm:$0xff] }
0x12ed   : > { %v5911_v3 = vmul.f32 %v13757_v18, %v5910_v60  ;;  %v13696_v60 = vld [vmem:[%s18069_s26 + $0x6] ss:$0 sm:$0xff] }
0x12ef   : > { %v5912_v41 = vadd.f32 %v13757_v18, %v5911_v3 }
0x12f0   : > { %v13759_v35 = vpop.eup %13758 }
0x12f1   : > { %v5916_v50 = vsel %vm5915_vm15, %v13757_v18, %v5912_v41  ;;  %v5923_v5 = vmul.f32 %v13759_v35, %v5907_v59  ;;  %vm5928_vm5 = vweird.f32 %v13759_v35  ;;  %v13398_v18 = vld [vmem:[%s18060_s8 + $0x380] sm:$0xff]  ;;  %v6126_v41 = vadd.f32 %v13696_v60, %v6125_v58 }
0x12f2   : > { %v5921_v12 = vsel %vm5918_vm0, %v5920_v7, %v5916_v50  ;;  %vm5929_vm7 = vmor %vm5927_vm6, %vm5928_vm5  ;;  %6729 = vmatpush.bf16.msrb.mxu0 %v13398_v18 }
0x12f3   : > { %v5924_v11 = vsub.f32 1.0, %v5923_v5  ;;  %v16524_v20 = vmul.f32 %v13753_v31, %v5921_v12  ;;  %v13427_v31 = vld [vmem:[%s18064_s23 + $0x3e8] sm:$0xff]  ;;  %v6127_v3 = vpop.f32.mrf.mxu2 }
0x12f5   : > { %v5925_v26 = vmul.f32 %v13759_v35, %v5924_v11  ;;  %v5940_v30 = vpack.c.bf16 %v16524_v20, %v16524_v20 }
0x12f7   : > { %v5926_v9 = vadd.f32 %v13759_v35, %v5925_v26  ;;  %v5944_v14 = vunpack.c.l.b16 %v5940_v30 }
0x12f9   : > { %v5930_v21 = vsel %vm5929_vm7, %v13759_v35, %v5926_v9  ;;  %v6128_v35 = vadd.f32 %v13696_v60, %v6127_v3  ;;  %v13697_v9 = vld [vmem:[%s18070_s10 + $0x6] ss:$0 sm:$0xff] }
0x12fa   : > { %v5935_v29 = vsel %vm5932_vm8, %v5934_v40, %v5930_v21 }
0x12fb   : > { %v16528_v22 = vmul.f32 %v13755_v37, %v5935_v29  ;;  %v13424_v37 = vld [vmem:[%s18064_s23 + $0x3d0] sm:$0xff]  ;;  %v6453_v11 = vpop.f32.mrf.mxu2 }
0x12fc   : > { %v13436_v29 = vld [vmem:[%s18065_s24 + $0x3b0] sm:$0xff]  ;;  %v6454_v30 = vadd.f32 %v13697_v9, %v6453_v11 }
0x12fd   : > { %v5941_v23 = vpack.c.bf16 %v16528_v22, %v16528_v22 }
0x12ff   : > { %v5945_v27 = vunpack.c.l.b16 %v5941_v23 }
0x1301   : > { %v5946_v24 = vpack.c.b16 %v5945_v27, %v5944_v14  ;;  %v13435_v27 = vld [vmem:[%s18065_s24 + $0x3a8] sm:$0xff] }
0x1303   : > { %11424 = vmatmul.msk.bf16.vlgmr.msrb.gmra.mxu3 %vm1386_vm3, %v5946_v24  ;;  %v6455_v23 = vpop.f32.mrf.mxu2 }
0x1304   : > { %6458 = vmatpush.bf16.msrb.mxu3 %v13397_v2  ;;  %v6456_v2 = vadd.f32 %v13697_v9, %v6455_v23  ;;  %v13409_v23 = vld [vmem:[%s18060_s8 + $0x3d8] sm:$0xff] }
0x1308   : > { %6459 = vmatpush.bf16.msrb.mxu3 %v13396_v28 }
0x130c   : > { %6460 = vmatpush.bf16.msrb.mxu3 %v13395_v6 }
0x1310   : > { %6461 = vmatpush.bf16.msrb.mxu3 %v13394_v13  ;;  %v13434_v13 = vld [vmem:[%s18065_s24 + $0x3a0] sm:$0xff] }
0x1313   : > { %6138 = vmatmul.bf16.vlgmr.msra.gmra.mxu3 %v16157_v0 }
0x1314   : > { %6462 = vmatpush.bf16.msrb.mxu3 %v13393_v8 }
0x1318   : > { %6463 = vmatpush.bf16.msrb.mxu3 %v13392_v62 }
0x131c   : > { %6464 = vmatpush.bf16.msrb.mxu3 %v13391_v63 }
0x1320   : > { %6465 = vmatpush.bf16.msrb.mxu3 %v13390_v32  ;;  %v13433_v32 = vld [vmem:[%s18065_s24 + $0x398] sm:$0xff] }
0x1323   : > { %6466 = vmatmul.bf16.vlgmr.msrb.gmra.mxu3 %v16193_v43 }
0x1324   : > { %6900 = vmatpush.bf16.msra.mxu3 %v13429_v57 }
0x1328   : > { %6901 = vmatpush.bf16.msra.mxu3 %v13428_v17  ;;  %v13432_v17 = vld [vmem:[%s18065_s24 + $0x390] sm:$0xff] }
0x132c   : > { %6902 = vmatpush.bf16.msra.mxu3 %v13427_v31  ;;  %v13431_v31 = vld [vmem:[%s18065_s24 + $0x388] sm:$0xff] }
0x1330   : > { %6903 = vmatpush.bf16.msra.mxu3 %v13426_v33  ;;  %v6895_v33 = vpop.f32.mrf.mxu2 }
0x1334   : > { %6904 = vmatpush.bf16.msra.mxu3 %v13425_v36  ;;  %v13430_v36 = vld [vmem:[%s18065_s24 + $0x380] sm:$0xff] }
0x1338   : > { %6905 = vmatpush.bf16.msra.mxu3 %v13424_v37 }
0x133c   : > { %6906 = vmatpush.bf16.msra.mxu3 %v13423_v38 }
0x1340   : > { %6907 = vmatpush.bf16.msra.mxu3 %v13422_v15  ;;  %v6897_v15 = vpop.f32.mrf.mxu2 }
0x1343   : > { %6908 = vmatmul.bf16.vlgmr.msra.gmra.mxu3 %v16157_v0 }
0x1386   : > { %v16605_v56 = vpop.f32.mrf.mxu3 }
0x138e   : > { %v16610_v59 = vpop.f32.mrf.mxu3 }
0x1396   : > { %v6139_v54 = vpop.f32.mrf.mxu3 }
0x1397   : > { %v6140_v4 = vadd.f32 %v6139_v54, %v6126_v41 }
0x1399   : > { %v6144_v5 = vpack.c.bf16 %v6140_v4, %v6140_v4 }
0x139b   : > { %v6476_v16 = vunpack.c.l.b16 %v6144_v5 }
0x139e   : > { %v6141_v50 = vpop.f32.mrf.mxu3 }
0x139f   : > { %v6142_v7 = vadd.f32 %v6141_v50, %v6128_v35 }
0x13a1   : > { %v6145_v12 = vpack.c.bf16 %v6142_v7, %v6142_v7 }
0x13a3   : > { %v6477_v26 = vunpack.c.l.b16 %v6145_v12 }
0x13a5   : > { %v6478_v40 = vpack.c.b16 %v6477_v26, %v6476_v16 }
0x13a6   : > { %v6467_v21 = vpop.f32.mrf.mxu3 }
0x13a7   : > { %11716 = vmatmul.msk.bf16.vlgmr.msra.gmra.mxu0 %vm1365_vm2, %v6478_v40  ;;  %v6468_v14 = vadd.f32 %v6467_v21, %v6454_v30  ;;  %v13412_v21 = vld [vmem:[%s18060_s8 + $0x3f0] sm:$0xff]  ;;  %v13410_v30 = vld [vmem:[%s18060_s8 + $0x3e0] sm:$0xff] }
0x13a8   : > { %7050 = vmatpush.bf16.msra.mxu0 %v13437_v19 }
0x13a9   : > { %v6472_v28 = vpack.c.bf16 %v6468_v14, %v6468_v14  ;;  %v13408_v14 = vld [vmem:[%s18060_s8 + $0x3d0] sm:$0xff] }
0x13ab   : > { %v6563_v62 = vunpack.c.l.b16 %v6472_v28 }
0x13ac   : > { %7051 = vmatpush.bf16.msra.mxu0 %v13436_v29  ;;  %v13411_v29 = vld [vmem:[%s18060_s8 + $0x3e8] sm:$0xff] }
0x13ae   : > { %v6469_v24 = vpop.f32.mrf.mxu3 }
0x13af   : > { %v6470_v6 = vadd.f32 %v6469_v24, %v6456_v2  ;;  %v13406_v24 = vld [vmem:[%s18060_s8 + $0x3c0] sm:$0xff] }
0x13b0   : > { %7052 = vmatpush.bf16.msra.mxu0 %v13435_v27  ;;  %v13407_v27 = vld [vmem:[%s18060_s8 + $0x3c8] sm:$0xff] }
0x13b1   : > { %v6473_v8 = vpack.c.bf16 %v6470_v6, %v6470_v6 }
0x13b3   : > { %v6564_v63 = vunpack.c.l.b16 %v6473_v8 }
0x13b4   : > { %7053 = vmatpush.bf16.msra.mxu0 %v13434_v13 }
0x13b5   : > { %v6565_v57 = vpack.c.b16 %v6564_v63, %v6563_v62 }
0x13b7   : > { %6577 = vmatpush.bf16.msra.mxu1 %v6565_v57  ;;  %6730 = vmatmul.bf16.vlgmr.msrb.gmra.mxu0 %v16155_v61  ;;  %v13698_v61 = vld [vmem:[%s18068_s25 + $0x7] ss:$0 sm:$0xff] }
0x13b8   : > { %7054 = vmatpush.bf16.msra.mxu0 %v13433_v32  ;;  %v6896_v38 = vadd.f32 %v13698_v61, %v6895_v33  ;;  %v6898_v42 = vadd.f32 %v13698_v61, %v6897_v15 }
0x13bc   : > { %7055 = vmatpush.bf16.msra.mxu0 %v13432_v17 }
0x13c0   : > { %7056 = vmatpush.bf16.msra.mxu0 %v13431_v31 }
0x13c4   : > { %7057 = vmatpush.bf16.msra.mxu0 %v13430_v36 }
0x13c6   : > { %v6909_v37 = vpop.f32.mrf.mxu3 }
0x13c7   : > { %7058 = vmatmul.bf16.vlgmr.msra.gmra.mxu0 %v16189_v10  ;;  %v6910_v39 = vadd.f32 %v6909_v37, %v6896_v38  ;;  %v5938_v37 = vadd.f32 %v16524_v20, %v16346_v49 }
0x13c9   : > { %v6914_v45 = vpack.c.bf16 %v6910_v39, %v6910_v39 }
0x13cb   : > { %v7087_v51 = vunpack.c.l.b16 %v6914_v45 }
0x13ce   : > { %v6911_v44 = vpop.f32.mrf.mxu3 }
0x13cf   : > { %v6912_v52 = vadd.f32 %v6911_v44, %v6898_v42 }
0x13d1   : > { %v6915_v25 = vpack.c.bf16 %v6912_v52, %v6912_v52 }
0x13d3   : > { %v7088_v18 = vunpack.c.l.b16 %v6915_v25 }
0x13d5   : > { %v7089_v58 = vpack.c.b16 %v7088_v18, %v7087_v51 }
0x13d7   : > { %v7094_v60 = vsel %vm1365_vm2, %v7089_v58, 0  ;;  %v5939_v58 = vadd.f32 %v16528_v22, %v16350_v34  ;;  %v13443_v34 = vld [vmem:[%s18065_s24 + $0x3e8] sm:$0xff]  ;;  %v13442_v22 = vld [vmem:[%s18065_s24 + $0x3e0] sm:$0xff] }
0x13d8   : > { %7103 = vmatpush.bf16.xpose.msrb.mxu2 %v7094_v60 }
0x1424   : > { %v6499_v3 = vpop.f32.mrf.mxu0 }
0x1425   : > { %v6500_v54 = vadd.f32 %v16314_v53, %v6499_v3 }
0x1427   : > { %v6504_v41 = vsel %vm1386_vm3, %v6500_v54, -inf }
0x1428   : > { %6505 = vmax.xlane.f32.xlu0 %v6504_v41 }
0x142c   : > { %v6501_v4 = vpop.f32.mrf.mxu0 }
0x142d   : > { %v6502_v10 = vadd.f32 %v16314_v53, %v6501_v4  ;;  %v13413_v53 = vld [vmem:[%s18060_s8 + $0x3f8] sm:$0xff]  ;;  %s8959_s8 = sshll.u32 %s8956_s28, 4  ;;  %s8960_s8 = int_to_ptr.hbm [resolvable:$true] %s8959_s8 }
0x142e   : > { %6736 = vmatpush.bf16.msrb.mxu1 %v13413_v53  ;;  %v13445_v4 = vld [vmem:[%s18065_s24 + $0x3f8] sm:$0xff] }
0x142f   : > { %v6507_v35 = vsel %vm1386_vm3, %v6502_v10, -inf }
0x1430   : > { %6508 = vmax.xlane.f32.xlu2 %v6507_v35  ;;  %v13444_v35 = vld [vmem:[%s18065_s24 + $0x3f0] sm:$0xff] }
0x1432   : > { %6737 = vmatpush.bf16.msrb.mxu1 %v13412_v21 }
0x1436   : > { %6738 = vmatpush.bf16.msrb.mxu1 %v13411_v29 }
0x143a   : > { %6739 = vmatpush.bf16.msrb.mxu1 %v13410_v30 }
0x143e   : > { %6740 = vmatpush.bf16.msrb.mxu1 %v13409_v23 }
0x1442   : > { %6741 = vmatpush.bf16.msrb.mxu1 %v13408_v14 }
0x1446   : > { %6742 = vmatpush.bf16.msrb.mxu1 %v13407_v27 }
0x144a   : > { %6743 = vmatpush.bf16.msrb.mxu1 %v13406_v24 }
0x149b   : > { %v6506_v50 = vpop.xlane.xlu0 %6505 }
0x149c   : > { %v6510_v5 = vsub.f32 %v6500_v54, %v6506_v50  ;;  %v13441_v50 = vld [vmem:[%s18065_s24 + $0x3d8] sm:$0xff] }
0x149e   : > { %v6512_v7 = vmul.f32 1.442695, %v6510_v5  ;;  %v13440_v5 = vld [vmem:[%s18065_s24 + $0x3d0] sm:$0xff] }
0x14a0   : > { %13760 = vpow2.f32 %v6512_v7  ;;  %v13439_v7 = vld [vmem:[%s18065_s24 + $0x3c8] sm:$0xff] }
0x14a3   : > { %v6509_v11 = vpop.xlane.xlu2 %6508 }
0x14a4   : > { %v6511_v12 = vsub.f32 %v6502_v10, %v6509_v11  ;;  %v13438_v11 = vld [vmem:[%s18065_s24 + $0x3c0] sm:$0xff] }
0x14a6   : > { %v13761_v16 = vpop.eup %13760  ;;  %v6514_v26 = vmul.f32 1.442695, %v6511_v12 }
0x14a7   : > { %v6516_v19 = vsel %vm1386_vm3, %v13761_v16, 0.0 }
0x14a8   : > { %13762 = vpow2.f32 %v6514_v26  ;;  %6517 = vadd.xlane.f32.xlu1 %v6516_v19 }
0x14ae   : > { %v13763_v9 = vpop.eup %13762 }
0x14af   : > { %v6519_v40 = vsel %vm1386_vm3, %v13763_v9, 0.0 }
0x14b0   : > { %6520 = vadd.xlane.f32.xlu0 %v6519_v40 }
0x151b   : > { %v6518_v2 = vpop.xlane.xlu1 %6517 }
0x151c   : > { %13764 = vrcp.f32 %v6518_v2  ;;  %v6533_v62 = vand.u32 2147483648, %v6518_v2  ;;  %v6531_v32 = vand.u32 2147483647, %v6518_v2  ;;  %vm6527_vm10 = vweird.f32 %v6518_v2 }
0x151e   : > { %v6534_v31 = vor.u32 1.1754944e-38, %v6533_v62  ;;  %vm6532_vm13 = vcmp.eq.f32.partialorder %v6531_v32, 8.507059e+37 }
0x1522   : > { %v13765_v28 = vpop.eup %13764 }
0x1523   : > { %v6523_v6 = vmul.f32 %v13765_v28, %v6518_v2  ;;  %v6521_v13 = vpop.xlane.xlu0 %6520  ;;  %vm6528_vm9 = vweird.f32 %v13765_v28 }
0x1524   : > { %13766 = vrcp.f32 %v6521_v13  ;;  %vm6529_vm11 = vmor %vm6527_vm10, %vm6528_vm9  ;;  %v6547_v39 = vand.u32 2147483648, %v6521_v13  ;;  %v6545_v45 = vand.u32 2147483647, %v6521_v13  ;;  %vm6541_vm15 = vweird.f32 %v6521_v13 }
0x1525   : > { %v6524_v8 = vsub.f32 1.0, %v6523_v6  ;;  %v13700_v6 = vld [vmem:[%s18070_s10 + $0x7] ss:$0 sm:$0xff]  ;;  %s8937_s10 = scalar_lea.sflag [#allocation4], %s14996_s0 }
0x1526   : > { %v6548_v25 = vor.u32 1.1754944e-38, %v6547_v39  ;;  %vm6546_vm5 = vcmp.eq.f32.partialorder %v6545_v45, 8.507059e+37  ;;  %v13801_v39 = vld [vmem:[%s14106_s29] ss:$0 sm:$0xff]  ;;  %s18079_s29 = sld [smem:[#allocation32_spill]] }
0x1527   : > { %v6525_v63 = vmul.f32 %v13765_v28, %v6524_v8 }
0x1529   : > { %v6526_v57 = vadd.f32 %v13765_v28, %v6525_v63 }
0x152a   : > { %v13767_v17 = vpop.eup %13766 }
0x152b   : > { %v6530_v33 = vsel %vm6529_vm11, %v13765_v28, %v6526_v57  ;;  %v6537_v36 = vmul.f32 %v13767_v17, %v6521_v13  ;;  %vm6542_vm14 = vweird.f32 %v13767_v17 }
0x152c   : > { %v6535_v61 = vsel %vm6532_vm13, %v6534_v31, %v6530_v33  ;;  %vm6543_vm0 = vmor %vm6541_vm15, %vm6542_vm14 }
0x152d   : > { %v6550_v38 = vmul.f32 %v13761_v16, %v6535_v61  ;;  %v6538_v15 = vsub.f32 1.0, %v6537_v36  ;;  %v6731_v16 = vpop.f32.mrf.mxu0 }
0x152f   : > { %v16681_v42 = vadd.f32 %v6550_v38, %v5938_v37  ;;  %v6539_v44 = vmul.f32 %v13767_v17, %v6538_v15  ;;  %v6554_v60 = vpack.c.bf16 %v6550_v38, %v6550_v38 }
0x1531   : > { %v6540_v52 = vadd.f32 %v13767_v17, %v6539_v44  ;;  %v6558_v54 = vunpack.c.l.b16 %v6554_v60 }
0x1533   : > { %v6544_v51 = vsel %vm6543_vm0, %v13767_v17, %v6540_v52 }
0x1534   : > { %v6549_v18 = vsel %vm6546_vm5, %v6548_v25, %v6544_v51 }
0x1535   : > { %v6551_v49 = vmul.f32 %v13763_v9, %v6549_v18  ;;  %v13699_v9 = vld [vmem:[%s18069_s26 + $0x7] ss:$0 sm:$0xff]  ;;  %v6733_v40 = vpop.f32.mrf.mxu0  ;;  %v5970_v18 = vpack.c.bf16 %v16605_v56, %v16605_v56  ;;  %v12112_v56 = vld [vmem:[%s18071_s11 + $0x178] sm:$0xf0] }
0x1536   : > { %v6732_v21 = vadd.f32 %v13699_v9, %v6731_v16  ;;  %v6734_v30 = vadd.f32 %v13699_v9, %v6733_v40  ;;  %v12102_v16 = vld [vmem:[%s18071_s11 + $0x160] sm:$0xf] }
0x1537   : > { %v16685_v20 = vadd.f32 %v6551_v49, %v5939_v58  ;;  %v6555_v3 = vpack.c.bf16 %v6551_v49, %v6551_v49  ;;  %v12110_v49 = vld [vmem:[%s18071_s11 + $0x170] sm:$0xf] }
0x1539   : > { %v6559_v41 = vunpack.c.l.b16 %v6555_v3  ;;  %v13463_v3 = vld [vmem:[%s18071_s11 + $0x174] sm:$0xf0] }
0x153b   : > { %v6560_v10 = vpack.c.b16 %v6559_v41, %v6558_v54  ;;  %v13462_v54 = vld [vmem:[%s18071_s11 + $0x174] sm:$0xf]  ;;  %v12111_v41 = vor.u32 %v13463_v3, %v12110_v49 }
0x153d   : > { %11717 = vmatmul.msk.bf16.vlgmr.msra.gmra.mxu1 %vm1386_vm3, %v6560_v10  ;;  %v7059_v27 = vpop.f32.mrf.mxu0  ;;  %v12115_v10 = vor.u32 %v13462_v54, %v12112_v56  ;;  %7414 = vmatpush.bf16.msra.mxu2 %v12111_v41 }
0x153e   : > { %7064 = vmatpush.bf16.msra.mxu1 %v13445_v4  ;;  %v7060_v62 = vadd.f32 %v13700_v6, %v7059_v27  ;;  %v13457_v27 = vld [vmem:[%s18071_s11 + $0x144] sm:$0xf0] }
0x153f   : > { %7442 = vmatpush.bf16.msrb.mxu0 %v12115_v10 }
0x1542   : > { %7065 = vmatpush.bf16.msra.mxu1 %v13444_v35 }
0x1545   : > { %v7061_v63 = vpop.f32.mrf.mxu0 }
0x1546   : > { %7066 = vmatpush.bf16.msra.mxu1 %v13443_v34  ;;  %v7062_v57 = vadd.f32 %v13700_v6, %v7061_v63 }
0x154a   : > { %7067 = vmatpush.bf16.msra.mxu1 %v13442_v22 }
0x154d   : > { %6744 = vmatmul.bf16.vlgmr.msrb.gmra.mxu1 %v16157_v0 }
0x154e   : > { %7068 = vmatpush.bf16.msra.mxu1 %v13441_v50 }
0x1552   : > { %7069 = vmatpush.bf16.msra.mxu1 %v13440_v5 }
0x1556   : > { %7070 = vmatpush.bf16.msra.mxu1 %v13439_v7 }
0x155a   : > { %7071 = vmatpush.bf16.msra.mxu1 %v13438_v11 }
0x155d   : > { %7072 = vmatmul.bf16.vlgmr.msra.gmra.mxu1 %v16193_v43 }
0x15ba   : > { %v6579_v12 = vpop.f32.mrf.mxu1 }
0x15bb   : > { %v6584_v0 = vpack.c.bf16 %v6579_v12, %v6579_v12  ;;  %v5971_v12 = vpack.c.bf16 %v16610_v59, %v16610_v59  ;;  %v12104_v59 = vld [vmem:[%s18071_s11 + $0x168] sm:$0xf0] }
0x15bd   : > { %6586 = vst.msk [vmem:[#allocation2 + $0x4] sm:$0xf] %vm1469_vm12, %v6584_v0 }
0x15c2   : > { %v6581_v26 = vpop.f32.mrf.mxu1 }
0x15c3   : > { %v6585_v19 = vpack.c.bf16 %v6581_v26, %v6581_v26  ;;  %v13461_v26 = vld [vmem:[%s18071_s11 + $0x164] sm:$0xf0] }
0x15c4   : > { %v12103_v9 = vor.u32 %v13461_v26, %v12102_v16 }
0x15c5   : > { %6587 = vst.msk [vmem:[#allocation2 + $0xc] sm:$0xf] %vm1469_vm12, %v6585_v19  ;;  %v13460_v19 = vld [vmem:[%s18071_s11 + $0x164] sm:$0xf] }
0x15c6   : > { %v12107_v40 = vor.u32 %v13460_v19, %v12104_v59  ;;  %7415 = vmatpush.bf16.msra.mxu2 %v12103_v9 }
0x15c8   : > { %7443 = vmatpush.bf16.msrb.mxu0 %v12107_v40 }
0x15ca   : > { %v6745_v53 = vpop.f32.mrf.mxu1 }
0x15cb   : > { %v6746_v29 = vadd.f32 %v6745_v53, %v6732_v21  ;;  %v12094_v53 = vld [vmem:[%s18071_s11 + $0x150] sm:$0xf]  ;;  %v13459_v21 = vld [vmem:[%s18071_s11 + $0x154] sm:$0xf0] }
0x15cd   : > { %v6750_v43 = vpack.c.bf16 %v6746_v29, %v6746_v29  ;;  %v13458_v29 = vld [vmem:[%s18071_s11 + $0x154] sm:$0xf] }
0x15cf   : > { %v7082_v24 = vunpack.c.l.b16 %v6750_v43 }
0x15d2   : > { %v6747_v23 = vpop.f32.mrf.mxu1 }
0x15d3   : > { %v6748_v14 = vadd.f32 %v6747_v23, %v6734_v30  ;;  %v12095_v30 = vor.u32 %v13459_v21, %v12094_v53  ;;  %v12096_v23 = vld [vmem:[%s18071_s11 + $0x158] sm:$0xf0] }
0x15d4   : > { %v12099_v43 = vor.u32 %v13458_v29, %v12096_v23 }
0x15d5   : > { %v6751_v2 = vpack.c.bf16 %v6748_v14, %v6748_v14  ;;  %7416 = vmatpush.bf16.msra.mxu2 %v12095_v30  ;;  %v12086_v14 = vld [vmem:[%s18071_s11 + $0x140] sm:$0xf] }
0x15d6   : > { %7444 = vmatpush.bf16.msrb.mxu0 %v12099_v43 }
0x15d7   : > { %v7083_v28 = vunpack.c.l.b16 %v6751_v2  ;;  %v13456_v2 = vld [vmem:[%s18071_s11 + $0x144] sm:$0xf] }
0x15d9   : > { %v7084_v13 = vpack.c.b16 %v7083_v28, %v7082_v24  ;;  %v12087_v24 = vor.u32 %v13457_v27, %v12086_v14  ;;  %v12088_v28 = vld [vmem:[%s18071_s11 + $0x148] sm:$0xf0] }
0x15da   : > { %v7073_v8 = vpop.f32.mrf.mxu1  ;;  %v12091_v6 = vor.u32 %v13456_v2, %v12088_v28 }
0x15db   : > { %12009 = vmatmul.msk.bf16.vlgmr.msrb.gmra.mxu2 %vm1365_vm2, %v7084_v13  ;;  %v7074_v32 = vadd.f32 %v7073_v8, %v7060_v62  ;;  %v12078_v13 = vld [vmem:[%s18071_s11 + $0x130] sm:$0xf]  ;;  %v13455_v8 = vld [vmem:[%s18071_s11 + $0x134] sm:$0xf0]  ;;  %v13454_v62 = vld [vmem:[%s18071_s11 + $0x134] sm:$0xf] }
0x15dc   : > { %7417 = vmatpush.bf16.msra.mxu2 %v12087_v24  ;;  %7445 = vmatpush.bf16.msrb.mxu0 %v12091_v6  ;;  %v12079_v63 = vor.u32 %v13455_v8, %v12078_v13 }
0x15dd   : > { %v7078_v31 = vpack.c.bf16 %v7074_v32, %v7074_v32  ;;  %v12080_v32 = vld [vmem:[%s18071_s11 + $0x138] sm:$0xf0] }
0x15df   : > { %v7169_v61 = vunpack.c.l.b16 %v7078_v31  ;;  %v13453_v31 = vld [vmem:[%s18071_s11 + $0x124] sm:$0xf0] }
0x15e0   : > { %7418 = vmatpush.bf16.msra.mxu2 %v12079_v63 }
0x15e2   : > { %v7075_v17 = vpop.f32.mrf.mxu1 }
0x15e3   : > { %v7076_v33 = vadd.f32 %v7075_v17, %v7062_v57  ;;  %v12083_v57 = vor.u32 %v13454_v62, %v12080_v32  ;;  %v12070_v17 = vld [vmem:[%s18071_s11 + $0x120] sm:$0xf] }
0x15e5   : > { %v7079_v36 = vpack.c.bf16 %v7076_v33, %v7076_v33  ;;  %7446 = vmatpush.bf16.msrb.mxu0 %v12083_v57  ;;  %v13452_v33 = vld [vmem:[%s18071_s11 + $0x124] sm:$0xf] }
0x15e7   : > { %v7170_v37 = vunpack.c.l.b16 %v7079_v36  ;;  %v12071_v36 = vor.u32 %v13453_v31, %v12070_v17  ;;  %v13479_v31 = vld [vmem:[%s18071_s11 + $0x1f4] sm:$0xf0] }
0x15e9   : > { %v7171_v38 = vpack.c.b16 %v7170_v37, %v7169_v61  ;;  %v12072_v61 = vld [vmem:[%s18071_s11 + $0x128] sm:$0xf0]  ;;  %7419 = vmatpush.bf16.msra.mxu2 %v12071_v36 }
0x15ea   : > { %v12075_v37 = vor.u32 %v13452_v33, %v12072_v61  ;;  %v13478_v33 = vld [vmem:[%s18071_s11 + $0x1f4] sm:$0xf]  ;;  %v12176_v61 = vld [vmem:[%s18071_s11 + $0x1f8] sm:$0xf0] }
0x15eb   : > { %7183 = vmatpush.bf16.msrb.mxu3 %v7171_v38  ;;  %v12062_v38 = vld [vmem:[%s18071_s11 + $0x110] sm:$0xf] }
0x15ec   : > { %7447 = vmatpush.bf16.msrb.mxu0 %v12075_v37  ;;  %v12166_v37 = vld [vmem:[%s18071_s11 + $0x1e0] sm:$0xf] }
0x165e   : > { %v7105_v15 = vpop.f32.mrf.mxu2 }
0x165f   : > { %v7106_v44 = vadd.f32 %v13801_v39, %v7105_v15  ;;  %v13451_v15 = vld [vmem:[%s18071_s11 + $0x114] sm:$0xf0] }
0x1661   : > { %v7110_v45 = vsel %vm1386_vm3, %v7106_v44, -inf }
0x1662   : > { %7111 = vmax.xlane.f32.xlu2 %v7110_v45  ;;  %v12064_v45 = vld [vmem:[%s18071_s11 + $0x118] sm:$0xf0] }
0x1666   : > { %v7107_v52 = vpop.f32.mrf.mxu2 }
0x1667   : > { %v7108_v25 = vadd.f32 %v13801_v39, %v7107_v52  ;;  %v13450_v39 = vld [vmem:[%s18071_s11 + $0x114] sm:$0xf] }
0x1668   : > { %v12067_v52 = vor.u32 %v13450_v39, %v12064_v45  ;;  %v13476_v39 = vld [vmem:[%s18071_s11 + $0x1e4] sm:$0xf] }
0x1669   : > { %v7113_v51 = vsel %vm1386_vm3, %v7108_v25, -inf }
0x166a   : > { %7114 = vmax.xlane.f32.xlu1 %v7113_v51  ;;  %7448 = vmatpush.bf16.msrb.mxu0 %v12067_v52  ;;  %v13449_v51 = vld [vmem:[%s18071_s11 + $0x104] sm:$0xf0] }
0x1683   : > { %5974 = vrot.lane.b32.xlu1 %v5970_v18, %s18072_s5  ;;  %v13448_v18 = vld [vmem:[%s18071_s11 + $0x104] sm:$0xf] }
0x16d5   : > { %v7112_v58 = vpop.xlane.xlu2 %7111 }
0x16d6   : > { %v7116_v60 = vsub.f32 %v7106_v44, %v7112_v58  ;;  %v12063_v44 = vor.u32 %v13451_v15, %v12062_v38  ;;  %v13477_v38 = vld [vmem:[%s18071_s11 + $0x1e4] sm:$0xf0]  ;;  %v12179_v15 = vor.u32 %v13478_v33, %v12176_v61 }
0x16d7   : > { %v12167_v45 = vor.u32 %v13477_v38, %v12166_v37 }
0x16d8   : > { %v7118_v4 = vmul.f32 1.442695, %v7116_v60  ;;  %7420 = vmatpush.bf16.msra.mxu2 %v12063_v44  ;;  %v12056_v60 = vld [vmem:[%s18071_s11 + $0x108] sm:$0xf0]  ;;  %7456 = vmatpush.bf16.msrb.mxu1 %v12179_v15 }
0x16d9   : > { %v12059_v49 = vor.u32 %v13448_v18, %v12056_v60  ;;  %v12168_v44 = vld [vmem:[%s18071_s11 + $0x1e8] sm:$0xf0]  ;;  %v13474_v18 = vld [vmem:[%s18071_s11 + $0x1d4] sm:$0xf] }
0x16da   : > { %13768 = vpow2.f32 %v7118_v4  ;;  %v12171_v52 = vor.u32 %v13476_v39, %v12168_v44 }
0x16db   : > { %7449 = vmatpush.bf16.msrb.mxu0 %v12059_v49 }
0x16dc   : > { %7457 = vmatpush.bf16.msrb.mxu1 %v12171_v52 }
0x16dd   : > { %v7115_v35 = vpop.xlane.xlu1 %7114 }
0x16de   : > { %v7117_v34 = vsub.f32 %v7108_v25, %v7115_v35  ;;  %v12054_v25 = vld [vmem:[%s18071_s11 + $0x100] sm:$0xf] }
0x16df   : > { %v12055_v58 = vor.u32 %v13449_v51, %v12054_v25  ;;  %v12158_v25 = vld [vmem:[%s18071_s11 + $0x1d0] sm:$0xf]  ;;  %v13475_v51 = vld [vmem:[%s18071_s11 + $0x1d4] sm:$0xf0] }
0x16e0   : > { %v16741_v22 = vpop.eup %13768  ;;  %v7120_v50 = vmul.f32 1.442695, %v7117_v34  ;;  %v12159_v60 = vor.u32 %v13475_v51, %v12158_v25 }
0x16e1   : > { %v7122_v5 = vsel %vm1386_vm3, %v16741_v22, 0.0  ;;  %7421 = vmatpush.bf16.msra.mxu2 %v12055_v58  ;;  %v12160_v58 = vld [vmem:[%s18071_s11 + $0x1d8] sm:$0xf0] }
0x16e2   : > { %13770 = vpow2.f32 %v7120_v50  ;;  %7123 = vadd.xlane.f32.xlu0 %v7122_v5  ;;  %v12163_v49 = vor.u32 %v13474_v18, %v12160_v58 }
0x16e4   : > { %7458 = vmatpush.bf16.msrb.mxu1 %v12163_v49 }
0x16e8   : > { %v16745_v7 = vpop.eup %13770 }
0x16e9   : > { %v7125_v11 = vsel %vm1386_vm3, %v16745_v7, 0.0 }
0x16ea   : > { %7126 = vadd.xlane.f32.xlu2 %v7125_v11 }
0x16f5   : > { %v5975_v0 = vpop.permute.xlu1 %5974 }
0x16f6   : > { %5980 = vst.msk [vmem:[#allocation2] sm:$0xf] %vm2084_vm4, %v5975_v0  ;;  %5976 = vrot.lane.b32.xlu0 %v5971_v12, %s18072_s5 }
0x16fd   : > { %v12046_v27 = vld [vmem:[#allocation2] sm:$0xf] }
0x1755   : > { %v7124_v3 = vpop.xlane.xlu0 %7123 }
0x1756   : > { %13772 = vrcp.f32 %v7124_v3  ;;  %v7139_v10 = vand.u32 2147483648, %v7124_v3  ;;  %v7137_v34 = vand.u32 2147483647, %v7124_v3  ;;  %vm7133_vm12 = vweird.f32 %v7124_v3 }
0x1758   : > { %v7140_v11 = vor.u32 1.1754944e-38, %v7139_v10  ;;  %vm7138_vm7 = vcmp.eq.f32.partialorder %v7137_v34, 8.507059e+37  ;;  %v13471_v34 = vld [vmem:[%s18071_s11 + $0x1b4] sm:$0xf0] }
0x175c   : > { %v13773_v54 = vpop.eup %13772 }
0x175d   : > { %v7129_v41 = vmul.f32 %v13773_v54, %v7124_v3  ;;  %v7127_v56 = vpop.xlane.xlu2 %7126  ;;  %vm7134_vm2 = vweird.f32 %v13773_v54  ;;  %v12150_v3 = vld [vmem:[%s18071_s11 + $0x1c0] sm:$0xf] }
0x175e   : > { %13774 = vrcp.f32 %v7127_v56  ;;  %vm7135_vm6 = vmor %vm7133_vm12, %vm7134_vm2  ;;  %v7153_v9 = vand.u32 2147483648, %v7127_v56  ;;  %v7151_v21 = vand.u32 2147483647, %v7127_v56  ;;  %vm7147_vm9 = vweird.f32 %v7127_v56 }
0x175f   : > { %v7130_v4 = vsub.f32 1.0, %v7129_v41  ;;  %v13472_v41 = vld [vmem:[%s18071_s11 + $0x1c4] sm:$0xf] }
0x1760   : > { %v7154_v23 = vor.u32 1.1754944e-38, %v7153_v9  ;;  %vm7152_vm11 = vcmp.eq.f32.partialorder %v7151_v21, 8.507059e+37  ;;  %v13467_v21 = vld [vmem:[%s18071_s11 + $0x194] sm:$0xf0] }
0x1761   : > { %v7131_v35 = vmul.f32 %v13773_v54, %v7130_v4 }
0x1763   : > { %v7132_v50 = vadd.f32 %v13773_v54, %v7131_v35  ;;  %v12142_v35 = vld [vmem:[%s18071_s11 + $0x1b0] sm:$0xf] }
0x1764   : > { %v13775_v5 = vpop.eup %13774 }
0x1765   : > { %v7136_v12 = vsel %vm7135_vm6, %v13773_v54, %v7132_v50  ;;  %v7143_v0 = vmul.f32 %v13775_v5, %v7127_v56  ;;  %vm7148_vm8 = vweird.f32 %v13775_v5  ;;  %v13473_v54 = vld [vmem:[%s18071_s11 + $0x1c4] sm:$0xf0]  ;;  %v12152_v56 = vld [vmem:[%s18071_s11 + $0x1c8] sm:$0xf0]  ;;  %v13470_v50 = vld [vmem:[%s18071_s11 + $0x1b4] sm:$0xf] }
0x1766   : > { %v7141_v16 = vsel %vm7138_vm7, %v7140_v11, %v7136_v12  ;;  %vm7149_vm10 = vmor %vm7147_vm9, %vm7148_vm8  ;;  %v12151_v4 = vor.u32 %v13473_v54, %v12150_v3  ;;  %v12155_v10 = vor.u32 %v13472_v41, %v12152_v56  ;;  %v12143_v11 = vor.u32 %v13471_v34, %v12142_v35  ;;  %v12489_v54 = vld [vmem:[%s18075_s15 + $0x3e0] sm:$0xf]  ;;  %v12363_v56 = vld [vmem:[%s18075_s15 + $0x2f0] sm:$0xf0] }
0x1767   : > { %v7156_v26 = vmul.f32 %v16741_v22, %v7141_v16  ;;  %v7144_v19 = vsub.f32 1.0, %v7143_v0  ;;  %v12134_v0 = vld [vmem:[%s18071_s11 + $0x1a0] sm:$0xf]  ;;  %v13469_v16 = vld [vmem:[%s18071_s11 + $0x1a4] sm:$0xf0]  ;;  %vm8816_vm9 = vcmask 23552  }
0x1768   : > { %v5977_v59 = vpop.permute.xlu0 %5976  ;;  %7459 = vmatpush.bf16.msrb.mxu1 %v12155_v10  ;;  %v12135_v9 = vor.u32 %v13469_v16, %v12134_v0  ;;  %v13540_v35 = vld [vmem:[%s18075_s15 + $0x3e4] sm:$0xf]  ;;  %v12491_v34 = vld [vmem:[%s18075_s15 + $0x3f0] sm:$0xf0]  ;;  %v13538_v0 = vld [vmem:[%s18075_s15 + $0x3cc] sm:$0xf0] }
0x1769   : > { %v7158_v40 = vadd.f32 %v7156_v26, %v16681_v42  ;;  %v7145_v53 = vmul.f32 %v13775_v5, %v7144_v19  ;;  %5981 = vst.msk [vmem:[#allocation2 + $0x8] sm:$0xf] %vm2084_vm4, %v5977_v59  ;;  %v7160_v22 = vpack.c.bf16 %v7156_v26, %v7156_v26  ;;  %v13468_v26 = vld [vmem:[%s18071_s11 + $0x1a4] sm:$0xf]  ;;  %v12136_v19 = vld [vmem:[%s18071_s11 + $0x1a8] sm:$0xf0] }
0x176a   : > { %v12139_v59 = vor.u32 %v13468_v26, %v12136_v19  ;;  %v13504_v19 = vld [vmem:[%s18075_s15 + $0x2c4] sm:$0xf] }
0x176b   : > { %v8648_v29 = vmul.f32 0.25, %v7158_v40  ;;  %v7146_v30 = vadd.f32 %v13775_v5, %v7145_v53  ;;  %v7164_v13 = vunpack.c.l.b16 %v7160_v22  ;;  %v12126_v53 = vld [vmem:[%s18071_s11 + $0x190] sm:$0xf]  ;;  %v13465_v22 = vld [vmem:[%s18071_s11 + $0x184] sm:$0xf0] }
0x176d   : > { %v7150_v43 = vsel %vm7149_vm10, %v13775_v5, %v7146_v30  ;;  %8650 = vst.msk [vmem:[%s16842_s3] sm:$0xff] %vm1386_vm3, %v8648_v29  ;;  %v12144_v5 = vld [vmem:[%s18071_s11 + $0x1b8] sm:$0xf0]  ;;  %v12127_v29 = vor.u32 %v13467_v21, %v12126_v53  ;;  %v13466_v30 = vld [vmem:[%s18071_s11 + $0x194] sm:$0xf] }
0x176e   : > { %v7155_v42 = vsel %vm7152_vm11, %v7154_v23, %v7150_v43  ;;  %v12147_v12 = vor.u32 %v13470_v50, %v12144_v5  ;;  %v12128_v23 = vld [vmem:[%s18071_s11 + $0x198] sm:$0xf0]  ;;  %v12118_v43 = vld [vmem:[%s18071_s11 + $0x180] sm:$0xf]  ;;  %v12494_v5 = vor.u32 %v13540_v35, %v12491_v34  ;;  %v12475_v53 = vld [vmem:[%s18075_s15 + $0x3d0] sm:$0xf0] }
0x176f   : > { %v7157_v14 = vmul.f32 %v16745_v7, %v7155_v42  ;;  %v12131_v42 = vor.u32 %v13466_v30, %v12128_v23  ;;  %v12345_v50 = vld [vmem:[%s18075_s15 + $0x2c0] sm:$0xf]  ;;  %v12427_v35 = vld [vmem:[%s18075_s15 + $0x370] sm:$0xf0] }
0x1770   : > { %v13447_v2 = vld [vmem:[#allocation2 + $0x4] sm:$0xf0]  ;;  %7460 = vmatpush.bf16.msrb.mxu1 %v12147_v12  ;;  %v12473_v12 = vld [vmem:[%s18075_s15 + $0x3c0] sm:$0xf] }
0x1771   : > { %v7159_v24 = vadd.f32 %v7157_v14, %v16685_v20  ;;  %v7161_v28 = vpack.c.bf16 %v7157_v14, %v7157_v14  ;;  %v12047_v6 = vor.u32 %v13447_v2, %v12046_v27  ;;  %v12174_v20 = vld [vmem:[%s18071_s11 + $0x1f0] sm:$0xf]  ;;  %v13464_v14 = vld [vmem:[%s18071_s11 + $0x184] sm:$0xf]  ;;  %v12120_v27 = vld [vmem:[%s18071_s11 + $0x188] sm:$0xf0]  ;;  %v12119_v2 = vor.u32 %v13465_v22, %v12118_v43 }
0x1772   : > { %v12175_v36 = vor.u32 %v13479_v31, %v12174_v20  ;;  %v12474_v26 = vor.u32 %v13538_v0, %v12473_v12  ;;  %v13522_v0 = vld [vmem:[%s18075_s15 + $0x34c] sm:$0xf0]  ;;  %s13816_s11 = sshra.s32 %s8960_s8, 4  ;;  %s13817_s11 = int_to_ptr.hbm [resolvable:$true] %s13816_s11 }
0x1773   : > { %v7165_v8 = vunpack.c.l.b16 %v7161_v28  ;;  %v8649_v62 = vmul.f32 0.25, %v7159_v24  ;;  %7422 = vmatmul.bf16.vlgmr.msra.gmra.mxu2 %v12047_v6  ;;  %7450 = vmatmul.bf16.vlgmr.msrb.gmra.mxu0 %v12047_v6  ;;  %v12123_v24 = vor.u32 %v13464_v14, %v12120_v27  ;;  %p13823_p0 = scmp.lt.s32.totalorder %s13817_s11, %s18086_s9 }
0x1774   : > { %7428 = vmatpush.bf16.msra.mxu3 %v12175_v36  ;;  %7461 = vmatpush.bf16.msrb.mxu1 %v12139_v59  ;;  %v13536_v59 = vld [vmem:[%s18075_s15 + $0x3c4] sm:$0xf] }
0x1775   : > { %v7166_v63 = vpack.c.b16 %v7165_v8, %v7164_v13  ;;  %8651 = vst.msk [vmem:[%s16842_s3 + $0x8] sm:$0xff] %vm1386_vm3, %v8649_v62  ;;  %v12043_v62 = vld [vmem:[%s18079_s29 + $0x2] sm:$0x3]  ;;  %v12478_v21 = vor.u32 %v13536_v59, %v12475_v53  ;;  %v13520_v59 = vld [vmem:[%s18075_s15 + $0x344] sm:$0xf] }
0x1777   : > { %12010 = vmatmul.msk.bf16.vlgmr.msrb.gmra.mxu3 %vm1386_vm3, %v7166_v63 }
0x1778   : > { %7429 = vmatpush.bf16.msra.mxu3 %v12167_v45  ;;  %7462 = vmatpush.bf16.msrb.mxu1 %v12131_v42 }
0x177c   : > { %7430 = vmatpush.bf16.msra.mxu3 %v12159_v60  ;;  %7463 = vmatpush.bf16.msrb.mxu1 %v12123_v24 }
0x1780   : > { %7431 = vmatpush.bf16.msra.mxu3 %v12151_v4  ;;  %7986 = vmatpush.bf16.msra.mxu1 %v12494_v5  ;;  %v13490_v5 = vld [vmem:[%s18075_s15 + $0x24c] sm:$0xf0] }
0x1784   : > { %7432 = vmatpush.bf16.msra.mxu3 %v12143_v11  ;;  %v13506_v11 = vld [vmem:[%s18075_s15 + $0x2cc] sm:$0xf0]  ;;  %7987 = vmatpush.bf16.msra.mxu1 %v12478_v21  ;;  %v12265_v21 = vld [vmem:[%s18075_s15 + $0x220] sm:$0xf] }
0x1785   : > { %v12346_v16 = vor.u32 %v13506_v11, %v12345_v50  ;;  %v12281_v50 = vld [vmem:[%s18075_s15 + $0x240] sm:$0xf] }
0x1786   : > { %v12409_v11 = vld [vmem:[%s18075_s15 + $0x340] sm:$0xf]  ;;  %v12282_v12 = vor.u32 %v13490_v5, %v12281_v50  ;;  %v12337_v5 = vld [vmem:[%s18075_s15 + $0x2a8] sm:$0xf] }
0x1788   : > { %7433 = vmatpush.bf16.msra.mxu3 %v12135_v9  ;;  %v12347_v9 = vld [vmem:[%s18075_s15 + $0x2d0] sm:$0xf0] }
0x178c   : > { %7434 = vmatpush.bf16.msra.mxu3 %v12127_v29 }
0x1790   : > { %7435 = vmatpush.bf16.msra.mxu3 %v12119_v2 }
0x17f0   : > { %v7451_v63 = vpop.f32.mrf.mxu0 }
0x17f8   : > { %v7453_v37 = vpop.f32.mrf.mxu0 }
0x17fa   : > { %v7185_v32 = vpop.f32.mrf.mxu3 }
0x17fb   : > { %v7190_v57 = vpack.c.bf16 %v7185_v32, %v7185_v32  ;;  %v7241_v32 = vperm.slane %v12043_v62, 1 }
0x17fd   : > { %7194 = vrot.lane.b32.xlu2 %v7190_v57, %s18072_s5  ;;  %v7423_v57 = vpop.f32.mrf.mxu2  ;;  %v7452_v20 = vadd.f32 %v7451_v63, %v7241_v32  ;;  %v7454_v45 = vadd.f32 %v7453_v37, %v7241_v32  ;;  %v13502_v63 = vld [vmem:[%s18075_s15 + $0x2ac] sm:$0xf0]  ;;  %v12457_v32 = vld [vmem:[%s18075_s15 + $0x3a0] sm:$0xf] }
0x1802   : > { %v7187_v7 = vpop.f32.mrf.mxu3 }
0x1803   : > { %v7191_v17 = vpack.c.bf16 %v7187_v7, %v7187_v7 }
0x1805   : > { %7196 = vrot.lane.b32.xlu0 %v7191_v17, %s18072_s5  ;;  %v7240_v17 = vperm.slane %v12043_v62, 0  ;;  %v7425_v39 = vpop.f32.mrf.mxu2  ;;  %v12329_v62 = vld [vmem:[%s18075_s15 + $0x2a0] sm:$0xf]  ;;  %s18084_s5 = sld [smem:[#allocation19_spill]] }
0x1807   : > { %v7424_v31 = vadd.f32 %v7423_v57, %v7240_v17  ;;  %v7426_v25 = vadd.f32 %v7425_v39, %v7240_v17  ;;  %v12330_v57 = vor.u32 %v13502_v63, %v12329_v62  ;;  %v13500_v17 = vld [vmem:[%s18075_s15 + $0x2a4] sm:$0xf]  ;;  %v12441_v39 = vld [vmem:[%s18075_s15 + $0x380] sm:$0xf] }
0x1808   : > { %v12249_v63 = vld [vmem:[%s18075_s15 + $0x200] sm:$0xf] }
0x180b   : > { %s8957_s4 = sshll.u32 %s18084_s5, 4  ;;  %s8958_s4 = int_to_ptr.vmem [resolvable:$true] %s8957_s4 }
0x1857   : > { %v7195_v40 = vpop.permute.xlu2 %7194 }
0x1858   : > { %7200 = vst.msk [vmem:[#allocation2 + $0x4] sm:$0xf] %vm2084_vm4, %v7195_v40  ;;  %v12350_v40 = vor.u32 %v13504_v19, %v12347_v9  ;;  %v12410_v19 = vor.u32 %v13522_v0, %v12409_v11  ;;  %v13503_v11 = vld [vmem:[%s18075_s15 + $0x2b4] sm:$0xf0] }
0x1859   : > { %v12338_v0 = vor.u32 %v13503_v11, %v12337_v5  ;;  %v13485_v11 = vld [vmem:[%s18075_s15 + $0x22c] sm:$0xf] }
0x185f   : > { %v13446_v6 = vld [vmem:[#allocation2 + $0x4] sm:$0xf] }
0x1877   : > { %v7197_v28 = vpop.permute.xlu0 %7196 }
0x1878   : > { %7201 = vst.msk [vmem:[#allocation2 + $0xc] sm:$0xf] %vm2084_vm4, %v7197_v28 }
0x187f   : > { %v12048_v13 = vld [vmem:[#allocation2 + $0x8] sm:$0xf0] }
0x1880   : > { %v12051_v8 = vor.u32 %v13446_v6, %v12048_v13 }
0x1882   : > { %7436 = vmatmul.bf16.vlgmr.msra.gmra.mxu3 %v12051_v8  ;;  %7464 = vmatmul.bf16.vlgmr.msrb.gmra.mxu1 %v12051_v8 }
0x18ff   : > { %v7465_v7 = vpop.f32.mrf.mxu1 }
0x1900   : > { %v7466_v33 = vadd.f32 %v7465_v7, %v7452_v20  ;;  %v13534_v7 = vld [vmem:[%s18075_s15 + $0x3ac] sm:$0xf0]  ;;  %v12331_v20 = vld [vmem:[%s18075_s15 + $0x2b0] sm:$0xf0] }
0x1902   : > { %v7471_v38 = vadd.f32 %v7466_v33, %v16133_v1  ;;  %v12361_v1 = vld [vmem:[%s18075_s15 + $0x2e0] sm:$0xf]  ;;  %v12334_v33 = vor.u32 %v13500_v17, %v12331_v20  ;;  %v13514_v17 = vld [vmem:[%s18075_s15 + $0x30c] sm:$0xf0]  ;;  %v13480_v20 = vld [vmem:[%s18075_s15 + $0x204] sm:$0xf] }
0x1905   : > { %v7437_v36 = vpop.f32.mrf.mxu3 }
0x1906   : > { %v7438_v61 = vadd.f32 %v7437_v36, %v7424_v31  ;;  %v12458_v31 = vor.u32 %v13534_v7, %v12457_v32  ;;  %v13532_v36 = vld [vmem:[%s18075_s15 + $0x3a4] sm:$0xf]  ;;  %v13482_v32 = vld [vmem:[%s18075_s15 + $0x20c] sm:$0xf0] }
0x1907   : > { %v7467_v44 = vpop.f32.mrf.mxu1  ;;  %v12250_v7 = vor.u32 %v13482_v32, %v12249_v63  ;;  %v13529_v63 = vld [vmem:[%s18075_s15 + $0x38c] sm:$0xf]  ;;  %v12451_v32 = vld [vmem:[%s18075_s15 + $0x398] sm:$0xf0] }
0x1908   : > { %v7470_v15 = vadd.f32 %v7438_v61, %v16131_v55  ;;  %v7468_v51 = vadd.f32 %v7467_v44, %v7454_v45  ;;  %v13510_v55 = vld [vmem:[%s18075_s15 + $0x2ec] sm:$0xf0]  ;;  %v12459_v61 = vld [vmem:[%s18075_s15 + $0x3b0] sm:$0xf0] }
0x1909   : > { %v12362_v41 = vor.u32 %v13510_v55, %v12361_v1  ;;  %v12462_v37 = vor.u32 %v13532_v36, %v12459_v61  ;;  %v13530_v45 = vld [vmem:[%s18075_s15 + $0x38c] sm:$0xf0]  ;;  %v12425_v55 = vld [vmem:[%s18075_s15 + $0x360] sm:$0xf]  ;;  %v13512_v61 = vld [vmem:[%s18075_s15 + $0x304] sm:$0xf] }
0x190a   : > { %v7478_v52 = vadd.f32 %v7471_v38, %v7470_v15  ;;  %v7473_v60 = vadd.f32 %v7468_v51, %v16137_v47  ;;  %v13542_v47 = vld [vmem:[%s18075_s15 + $0x3ec] sm:$0xf0]  ;;  %v12442_v51 = vor.u32 %v13530_v45, %v12441_v39  ;;  %v13511_v39 = vld [vmem:[%s18075_s15 + $0x2f4] sm:$0xf0] }
0x190b   : > { %v12490_v4 = vor.u32 %v13542_v47, %v12489_v54  ;;  %7944 = vmatpush.bf16.msrb.mxu2 %v12362_v41  ;;  %7988 = vmatpush.bf16.msra.mxu1 %v12462_v37  ;;  %v13494_v1 = vld [vmem:[%s18075_s15 + $0x26c] sm:$0xf0]  ;;  %v13492_v47 = vld [vmem:[%s18075_s15 + $0x264] sm:$0xf]  ;;  %v12379_v37 = vld [vmem:[%s18075_s15 + $0x310] sm:$0xf0] }
0x190c   : > { %7479 = vadd.xlane.f32.xlu1 %v7478_v52  ;;  %v13496_v52 = vld [vmem:[%s18075_s15 + $0x284] sm:$0xf]  ;;  %v13526_v41 = vld [vmem:[%s18075_s15 + $0x36c] sm:$0xf0]  ;;  %v13543_v45 = vld [vmem:[%s18075_s15 + $0x3f4] sm:$0xf0] }
0x190d   : > { %v7439_v18 = vpop.f32.mrf.mxu3  ;;  %7958 = vmatpush.bf16.msrb.mxu3 %v12490_v4 }
0x190e   : > { %v7440_v58 = vadd.f32 %v7439_v18, %v7426_v25  ;;  %v12315_v25 = vld [vmem:[%s18075_s15 + $0x290] sm:$0xf0] }
0x190f   : > { %7945 = vmatpush.bf16.msrb.mxu2 %v12346_v16  ;;  %v12318_v18 = vor.u32 %v13496_v52, %v12315_v25  ;;  %v13488_v16 = vld [vmem:[%s18075_s15 + $0x244] sm:$0xf] }
0x1910   : > { %v7472_v49 = vadd.f32 %v7440_v58, %v16135_v46  ;;  %v13508_v46 = vld [vmem:[%s18075_s15 + $0x2e4] sm:$0xf] }
0x1911   : > { %v12366_v10 = vor.u32 %v13508_v46, %v12363_v56  ;;  %7959 = vmatpush.bf16.msrb.mxu3 %v12474_v26  ;;  %v13528_v58 = vld [vmem:[%s18075_s15 + $0x384] sm:$0xf]  ;;  %v12299_v46 = vld [vmem:[%s18075_s15 + $0x270] sm:$0xf0]  ;;  %v12426_v56 = vor.u32 %v13526_v41, %v12425_v55  ;;  %v12481_v41 = vld [vmem:[%s18075_s15 + $0x3c8] sm:$0xf] }
0x1912   : > { %v7481_v3 = vadd.f32 %v7473_v60, %v7472_v49  ;;  %v12302_v4 = vor.u32 %v13492_v47, %v12299_v46  ;;  %v12283_v26 = vld [vmem:[%s18075_s15 + $0x250] sm:$0xf0]  ;;  %v13539_v47 = vld [vmem:[%s18075_s15 + $0x3d4] sm:$0xf0]  ;;  %v13505_v46 = vld [vmem:[%s18075_s15 + $0x2cc] sm:$0xf] }
0x1913   : > { %7972 = vmatpush.bf16.msra.mxu0 %v12366_v10  ;;  %7946 = vmatpush.bf16.msrb.mxu2 %v12330_v57  ;;  %v13524_v10 = vld [vmem:[%s18075_s15 + $0x364] sm:$0xf]  ;;  %v12286_v9 = vor.u32 %v13488_v16, %v12283_v26  ;;  %v12377_v57 = vld [vmem:[%s18075_s15 + $0x300] sm:$0xf]  ;;  %v13535_v16 = vld [vmem:[%s18075_s15 + $0x3b4] sm:$0xf0] }
0x1914   : > { %7482 = vadd.xlane.f32.xlu2 %v7481_v3  ;;  %v12297_v3 = vld [vmem:[%s18075_s15 + $0x260] sm:$0xf]  ;;  %v12430_v34 = vor.u32 %v13524_v10, %v12427_v35  ;;  %v13537_v10 = vld [vmem:[%s18075_s15 + $0x3cc] sm:$0xf]  ;;  %v12483_v35 = vld [vmem:[%s18075_s15 + $0x3d8] sm:$0xf0] }
0x1915   : > { %7960 = vmatpush.bf16.msrb.mxu3 %v12458_v31  ;;  %v12298_v54 = vor.u32 %v13494_v1, %v12297_v3  ;;  %v12251_v31 = vld [vmem:[%s18075_s15 + $0x210] sm:$0xf0]  ;;  %v12353_v3 = vld [vmem:[%s18075_s15 + $0x2c8] sm:$0xf]  ;;  %v13507_v1 = vld [vmem:[%s18075_s15 + $0x2d4] sm:$0xf0]  ;;  %v12486_v50 = vor.u32 %v13537_v10, %v12483_v35 }
0x1916   : > { %v12254_v36 = vor.u32 %v13480_v20, %v12251_v31  ;;  %v13501_v26 = vld [vmem:[%s18075_s15 + $0x2ac] sm:$0xf]  ;;  %v13495_v20 = vld [vmem:[%s18075_s15 + $0x274] sm:$0xf0]  ;;  %v12433_v31 = vld [vmem:[%s18075_s15 + $0x368] sm:$0xf] }
0x1917   : > { %7973 = vmatpush.bf16.msra.mxu0 %v12350_v40  ;;  %v12411_v40 = vld [vmem:[%s18075_s15 + $0x350] sm:$0xf0]  ;;  %v13487_v35 = vld [vmem:[%s18075_s15 + $0x234] sm:$0xf0] }
0x1918   : > { %v12414_v53 = vor.u32 %v13520_v59, %v12411_v40 }
0x1919   : > { %7961 = vmatpush.bf16.msrb.mxu3 %v12442_v51  ;;  %v13509_v51 = vld [vmem:[%s18075_s15 + $0x2ec] sm:$0xf] }
0x191b   : > { %7974 = vmatpush.bf16.msra.mxu0 %v12334_v33  ;;  %v12378_v33 = vor.u32 %v13514_v17, %v12377_v57  ;;  %v12305_v17 = vld [vmem:[%s18075_s15 + $0x268] sm:$0xf] }
0x191d   : > { %7962 = vmatpush.bf16.msrb.mxu3 %v12426_v56  ;;  %v12482_v56 = vor.u32 %v13539_v47, %v12481_v41 }
0x191f   : > { %7975 = vmatpush.bf16.msra.mxu0 %v12318_v18  ;;  %v12371_v18 = vld [vmem:[%s18075_s15 + $0x2f8] sm:$0xf0] }
0x1921   : > { %7963 = vmatpush.bf16.msrb.mxu3 %v12410_v19  ;;  %v12339_v19 = vld [vmem:[%s18075_s15 + $0x2b8] sm:$0xf0] }
0x1922   : > { %v12342_v40 = vor.u32 %v13501_v26, %v12339_v19  ;;  %v12403_v26 = vld [vmem:[%s18075_s15 + $0x338] sm:$0xf0] }
0x1923   : > { %7976 = vmatpush.bf16.msra.mxu0 %v12302_v4  ;;  %v12355_v4 = vld [vmem:[%s18075_s15 + $0x2d8] sm:$0xf0] }
0x1927   : > { %7977 = vmatpush.bf16.msra.mxu0 %v12286_v9 }
0x197f   : > { %v7480_v29 = vpop.xlane.xlu1 %7479 }
0x1980   : > { %v7484_v30 = vmul.f32 %v7480_v29, %v15167_v48  ;;  %v13486_v29 = vld [vmem:[%s18075_s15 + $0x22c] sm:$0xf0] }
0x1982   : > { %v17007_v23 = vsub.f32 %v7470_v15, %v7484_v30  ;;  %v17009_v43 = vsub.f32 %v7471_v38, %v7484_v30  ;;  %v12313_v38 = vld [vmem:[%s18075_s15 + $0x280] sm:$0xf]  ;;  %v13498_v15 = vld [vmem:[%s18075_s15 + $0x28c] sm:$0xf0] }
0x1983   : > { %v12314_v44 = vor.u32 %v13498_v15, %v12313_v38  ;;  %v12393_v30 = vld [vmem:[%s18075_s15 + $0x320] sm:$0xf]  ;;  %v12369_v38 = vld [vmem:[%s18075_s15 + $0x2e8] sm:$0xf]  ;;  %v12382_v15 = vor.u32 %v13512_v61, %v12379_v37  ;;  %v13493_v61 = vld [vmem:[%s18075_s15 + $0x26c] sm:$0xf] }
0x1984   : > { %v7490_v42 = vmul.f32 %v17007_v23, %v17007_v23  ;;  %v7491_v22 = vmul.f32 %v17009_v43, %v17009_v43  ;;  %v12370_v52 = vor.u32 %v13511_v39, %v12369_v38  ;;  %v12307_v37 = vld [vmem:[%s18075_s15 + $0x278] sm:$0xf0] }
0x1985   : > { %7947 = vmatpush.bf16.msrb.mxu2 %v12314_v44  ;;  %v12497_v44 = vld [vmem:[%s18075_s15 + $0x3e8] sm:$0xf]  ;;  %v12310_v39 = vor.u32 %v13493_v61, %v12307_v37  ;;  %v12181_v37 = vld [vmem:[%s18077_s14 + $0x2] sm:$0x3] }
0x1986   : > { %v7494_v14 = vadd.f32 %v7491_v22, %v7490_v42  ;;  %v12266_v42 = vor.u32 %v13486_v29, %v12265_v21  ;;  %v13518_v22 = vld [vmem:[%s18075_s15 + $0x32c] sm:$0xf0]  ;;  %v12498_v25 = vor.u32 %v13543_v45, %v12497_v44  ;;  %v12467_v21 = vld [vmem:[%s18075_s15 + $0x3b8] sm:$0xf0]  ;;  %v13525_v44 = vld [vmem:[%s18075_s15 + $0x36c] sm:$0xf] }
0x1987   : > { %v7483_v27 = vpop.xlane.xlu2 %7482  ;;  %v12435_v45 = vld [vmem:[%s18075_s15 + $0x378] sm:$0xf0] }
0x1988   : > { %v7485_v2 = vmul.f32 %v7483_v27, %v15167_v48  ;;  %7495 = vadd.xlane.f32.xlu0 %v7494_v14  ;;  %v13484_v14 = vld [vmem:[%s18075_s15 + $0x224] sm:$0xf]  ;;  %v12267_v27 = vld [vmem:[%s18075_s15 + $0x230] sm:$0xf0] }
0x1989   : > { %7948 = vmatpush.bf16.msrb.mxu2 %v12298_v54  ;;  %v12354_v54 = vor.u32 %v13507_v1, %v12353_v3  ;;  %v12291_v3 = vld [vmem:[%s18075_s15 + $0x258] sm:$0xf0]  ;;  %v13521_v1 = vld [vmem:[%s18075_s15 + $0x34c] sm:$0xf] }
0x198a   : > { %v17016_v24 = vsub.f32 %v7472_v49, %v7485_v2  ;;  %v17018_v28 = vsub.f32 %v7473_v60, %v7485_v2  ;;  %v12443_v60 = vld [vmem:[%s18075_s15 + $0x390] sm:$0xf0]  ;;  %v12394_v2 = vor.u32 %v13518_v22, %v12393_v30  ;;  %v13499_v22 = vld [vmem:[%s18075_s15 + $0x294] sm:$0xf0] }
0x198b   : > { %v12446_v49 = vor.u32 %v13528_v58, %v12443_v60  ;;  %v13541_v58 = vld [vmem:[%s18075_s15 + $0x3ec] sm:$0xf]  ;;  %v12374_v60 = vor.u32 %v13509_v51, %v12371_v18  ;;  %v12438_v51 = vor.u32 %v13525_v44, %v12435_v45  ;;  %v13491_v18 = vld [vmem:[%s18075_s15 + $0x254] sm:$0xf0]  ;;  %v7538_v45 = vperm.slane %v12181_v37, 0 }
0x198c   : > { %v7492_v6 = vmul.f32 %v17016_v24, %v17016_v24  ;;  %v7493_v13 = vmul.f32 %v17018_v28, %v17018_v28  ;;  %7964 = vmatpush.bf16.msrb.mxu3 %v12394_v2 }
0x198d   : > { %7989 = vmatpush.bf16.msra.mxu1 %v12446_v49  ;;  %7949 = vmatpush.bf16.msrb.mxu2 %v12282_v12  ;;  %v12499_v49 = vld [vmem:[%s18075_s15 + $0x3f8] sm:$0xf0]  ;;  %v12465_v12 = vld [vmem:[%s18075_s15 + $0x3a8] sm:$0xf] }
0x198e   : > { %v7497_v8 = vadd.f32 %v7493_v13, %v7492_v6  ;;  %v12270_v6 = vor.u32 %v13484_v14, %v12267_v27  ;;  %v13516_v13 = vld [vmem:[%s18075_s15 + $0x324] sm:$0xf]  ;;  %v12502_v55 = vor.u32 %v13541_v58, %v12499_v49  ;;  %v12466_v59 = vor.u32 %v13535_v16, %v12465_v12  ;;  %v12449_v14 = vld [vmem:[%s18075_s15 + $0x388] sm:$0xf]  ;;  %v13489_v49 = vld [vmem:[%s18075_s15 + $0x24c] sm:$0xf] }
0x198f   : > { %v12417_v58 = vld [vmem:[%s18075_s15 + $0x348] sm:$0xf]  ;;  %v12294_v10 = vor.u32 %v13489_v49, %v12291_v3  ;;  %v12275_v12 = vld [vmem:[%s18075_s15 + $0x238] sm:$0xf0]  ;;  %v13517_v16 = vld [vmem:[%s18075_s15 + $0x32c] sm:$0xf] }
0x1990   : > { %7498 = vadd.xlane.f32.xlu1 %v7497_v8  ;;  %v12395_v8 = vld [vmem:[%s18075_s15 + $0x330] sm:$0xf0]  ;;  %7978 = vmatpush.bf16.msra.mxu0 %v12270_v6  ;;  %v13531_v6 = vld [vmem:[%s18075_s15 + $0x394] sm:$0xf0] }
0x1991   : > { %7990 = vmatpush.bf16.msra.mxu1 %v12430_v34  ;;  %7950 = vmatpush.bf16.msrb.mxu2 %v12266_v42  ;;  %v12398_v62 = vor.u32 %v13516_v13, %v12395_v8  ;;  %v12358_v34 = vor.u32 %v13505_v46, %v12355_v4  ;;  %v12321_v42 = vld [vmem:[%s18075_s15 + $0x288] sm:$0xf]  ;;  %v13497_v13 = vld [vmem:[%s18075_s15 + $0x28c] sm:$0xf]  ;;  %v12450_v8 = vor.u32 %v13531_v6, %v12449_v14  ;;  %v12419_v46 = vld [vmem:[%s18075_s15 + $0x358] sm:$0xf0] }
0x1992   : > { %7965 = vmatpush.bf16.msrb.mxu3 %v12378_v33  ;;  %v12322_v2 = vor.u32 %v13499_v22, %v12321_v42  ;;  %v12306_v33 = vor.u32 %v13495_v20, %v12305_v17  ;;  %v12422_v5 = vor.u32 %v13521_v1, %v12419_v46  ;;  %v12406_v42 = vor.u32 %v13517_v16, %v12403_v26  ;;  %v13481_v22 = vld [vmem:[%s18075_s15 + $0x20c] sm:$0xf]  ;;  %v12259_v14 = vld [vmem:[%s18075_s15 + $0x218] sm:$0xf0]  ;;  %v12626_v1 = vld [vmem:[%s17989_s17 + $0x270] sm:$0xf] }
0x1993   : > { %v13513_v6 = vld [vmem:[%s18075_s15 + $0x30c] sm:$0xf]  ;;  %v13607_v46 = vld [vmem:[%s17989_s17 + $0x3f4] sm:$0xf0]  ;;  %v12810_v26 = vld [vmem:[%s17989_s17 + $0x3e0] sm:$0xf] }
0x1994   : > { %7979 = vmatpush.bf16.msra.mxu0 %v12254_v36  ;;  %v13527_v36 = vld [vmem:[%s18075_s15 + $0x374] sm:$0xf0] }
0x1995   : > { %7991 = vmatpush.bf16.msra.mxu1 %v12414_v53  ;;  %7951 = vmatpush.bf16.msrb.mxu2 %v12250_v7  ;;  %v13533_v53 = vld [vmem:[%s18075_s15 + $0x3ac] sm:$0xf]  ;;  %v12454_v7 = vor.u32 %v13529_v63, %v12451_v32 }
0x1996   : > { %8014 = vmatpush.bf16.msra.mxu3 %v12498_v25  ;;  %v12470_v30 = vor.u32 %v13533_v53, %v12467_v21  ;;  %v12278_v21 = vor.u32 %v13485_v11, %v12275_v12  ;;  %v12618_v12 = vld [vmem:[%s17989_s17 + $0x260] sm:$0xf] }
0x1998   : > { %8028 = vmatpush.bf16.msrb.mxu0 %v12374_v60  ;;  %v13523_v60 = vld [vmem:[%s18075_s15 + $0x354] sm:$0xf0] }
0x1999   : > { %7992 = vmatpush.bf16.msra.mxu1 %v12398_v62  ;;  %8000 = vmatpush.bf16.msra.mxu2 %v12370_v52  ;;  %v12323_v62 = vld [vmem:[%s18075_s15 + $0x298] sm:$0xf0]  ;;  %v12289_v52 = vld [vmem:[%s18075_s15 + $0x248] sm:$0xf]  ;;  %v12418_v47 = vor.u32 %v13523_v60, %v12417_v58 }
0x199a   : > { %8015 = vmatpush.bf16.msra.mxu3 %v12482_v56  ;;  %v12326_v57 = vor.u32 %v13497_v13, %v12323_v62  ;;  %v12290_v41 = vor.u32 %v13491_v18, %v12289_v52  ;;  %v12273_v56 = vld [vmem:[%s18075_s15 + $0x228] sm:$0xf]  ;;  %v12387_v13 = vld [vmem:[%s18075_s15 + $0x318] sm:$0xf0]  ;;  %v7539_v52 = vperm.slane %v12181_v37, 1 }
0x199b   : > { %v12274_v19 = vor.u32 %v13487_v35, %v12273_v56  ;;  %v12390_v17 = vor.u32 %v13513_v6, %v12387_v13  ;;  %v12754_v56 = vld [vmem:[%s17989_s17 + $0x370] sm:$0xf]  ;;  %v13603_v13 = vld [vmem:[%s17989_s17 + $0x3d4] sm:$0xf0] }
0x199c   : > { %8029 = vmatpush.bf16.msrb.mxu0 %v12358_v34  ;;  %v12401_v34 = vld [vmem:[%s18075_s15 + $0x328] sm:$0xf]  ;;  %v12802_v6 = vld [vmem:[%s17989_s17 + $0x3d0] sm:$0xf]  ;;  %v13551_v37 = vld [vmem:[%s17989_s17 + $0x234] sm:$0xf0] }
0x199d   : > { %7993 = vmatpush.bf16.msra.mxu1 %v12382_v15  ;;  %8001 = vmatpush.bf16.msra.mxu2 %v12354_v54  ;;  %v12434_v15 = vor.u32 %v13527_v36, %v12433_v31  ;;  %v12180_v31 = vld [vmem:[%s18076_s13 + $0x2] sm:$0x3]  ;;  %s13818_s13 = scalar_lea.hbm %s13817_s11, 16 }
0x199e   : > { %8016 = vmatpush.bf16.msra.mxu3 %v12466_v59  ;;  %v12257_v59 = vld [vmem:[%s18075_s15 + $0x208] sm:$0xf]  ;;  %p13819_p11 = scmp.ne.s32.totalorder %s13817_s11, %s13818_s13  ;;  %p13824_p1 = scmp.lt.s32.totalorder %s13822_s27, %s13818_s13 }
0x19a0   : > { %8030 = vmatpush.bf16.msrb.mxu0 %v12342_v40  ;;  %v13483_v40 = vld [vmem:[%s18075_s15 + $0x214] sm:$0xf0]  ;;  %p13820_p12 = pnand %p13819_p11, %p14072_p5  ;;  %p13825_p2 = por %p13824_p1, %p13823_p0 }
0x19a1   : > { %8042 = vmatpush.bf16.msrb.mxu1 %v12502_v55  ;;  %8002 = vmatpush.bf16.msra.mxu2 %v12338_v0  ;;  %v12258_v62 = vor.u32 %v13483_v40, %v12257_v59  ;;  %v12746_v59 = vld [vmem:[%s17989_s17 + $0x360] sm:$0xf]  ;;  %v13589_v40 = vld [vmem:[%s17989_s17 + $0x364] sm:$0xf0] }
0x19a2   : > { %8017 = vmatpush.bf16.msra.mxu3 %v12450_v8  ;;  %p13821_p13 = pneg %p13820_p12 }
0x19a4   : > { %8031 = vmatpush.bf16.msrb.mxu0 %v12326_v57  ;;  %p13826_p3 = pnand %p13825_p2, %p13821_p13 }
0x19a5   : > { %8043 = vmatpush.bf16.msrb.mxu1 %v12486_v50  ;;  %8003 = vmatpush.bf16.msra.mxu2 %v12322_v2  ;;  %v13519_v50 = vld [vmem:[%s18075_s15 + $0x334] sm:$0xf0] }
0x19a6   : > { %8018 = vmatpush.bf16.msra.mxu3 %v12434_v15 }
0x19a8   : > { %8032 = vmatpush.bf16.msrb.mxu0 %v12310_v39 }
0x19a9   : > { %8044 = vmatpush.bf16.msrb.mxu1 %v12470_v30  ;;  %8004 = vmatpush.bf16.msra.mxu2 %v12306_v33  ;;  %v13515_v30 = vld [vmem:[%s18075_s15 + $0x314] sm:$0xf0] }
0x19aa   : > { %8019 = vmatpush.bf16.msra.mxu3 %v12418_v47 }
0x19ac   : > { %8033 = vmatpush.bf16.msrb.mxu0 %v12294_v10 }
0x19ad   : > { %8045 = vmatpush.bf16.msrb.mxu1 %v12454_v7  ;;  %8005 = vmatpush.bf16.msra.mxu2 %v12290_v41  ;;  %v12262_v7 = vor.u32 %v13481_v22, %v12259_v14  ;;  %v13555_v22 = vld [vmem:[%s17989_s17 + $0x254] sm:$0xf0] }
0x19b0   : > { %8034 = vmatpush.bf16.msrb.mxu0 %v12278_v21  ;;  %v12674_v21 = vld [vmem:[%s17989_s17 + $0x2d0] sm:$0xf] }
0x19b1   : > { %8046 = vmatpush.bf16.msrb.mxu1 %v12438_v51  ;;  %8006 = vmatpush.bf16.msra.mxu2 %v12274_v19 }
0x19b4   : > { %8035 = vmatpush.bf16.msrb.mxu0 %v12262_v7  ;;  %v13553_v7 = vld [vmem:[%s17989_s17 + $0x244] sm:$0xf0] }
0x19b5   : > { %8047 = vmatpush.bf16.msrb.mxu1 %v12422_v5  ;;  %8007 = vmatpush.bf16.msra.mxu2 %v12258_v62  ;;  %v13573_v5 = vld [vmem:[%s17989_s17 + $0x2e4] sm:$0xf0]  ;;  %v12666_v62 = vld [vmem:[%s17989_s17 + $0x2c0] sm:$0xf] }
0x19b9   : > { %8048 = vmatpush.bf16.msrb.mxu1 %v12406_v42  ;;  %v12610_v42 = vld [vmem:[%s17989_s17 + $0x250] sm:$0xf] }
0x19bd   : > { %8049 = vmatpush.bf16.msrb.mxu1 %v12390_v17  ;;  %v12803_v17 = vor.u32 %v13603_v13, %v12802_v6  ;;  %v13570_v6 = vld [vmem:[%s17989_s17 + $0x2d4] sm:$0xf]  ;;  %v12676_v13 = vld [vmem:[%s17989_s17 + $0x2d8] sm:$0xf0] }
0x19fb   : > { %v7496_v9 = vpop.xlane.xlu0 %7495 }
0x19fc   : > { %v7500_v29 = vmul.f32 %v7496_v9, %v15167_v48  ;;  %v12402_v9 = vor.u32 %v13519_v50, %v12401_v34  ;;  %v12682_v50 = vld [vmem:[%s17989_s17 + $0x2e0] sm:$0xf] }
0x19fe   : > { %v17250_v27 = vadd.f32 1e-05, %v7500_v29  ;;  %v12385_v29 = vld [vmem:[%s18075_s15 + $0x308] sm:$0xf]  ;;  %8020 = vmatpush.bf16.msra.mxu3 %v12402_v9 }
0x19ff   : > { %v12386_v63 = vor.u32 %v13515_v30, %v12385_v29  ;;  %v13605_v9 = vld [vmem:[%s17989_s17 + $0x3e4] sm:$0xf0]  ;;  %v13571_v30 = vld [vmem:[%s17989_s17 + $0x2d4] sm:$0xf0] }
0x1a00   : > { %13776 = vrsqrt.f32 %v17250_v27  ;;  %vm7510_vm4 = vweird.f32 %v17250_v27  ;;  %v12811_v14 = vor.u32 %v13605_v9, %v12810_v26  ;;  %v13545_v9 = vld [vmem:[%s17989_s17 + $0x204] sm:$0xf0] }
0x1a02   : > { %8021 = vmatpush.bf16.msra.mxu3 %v12386_v63  ;;  %v12611_v63 = vor.u32 %v13555_v22, %v12610_v42  ;;  %v12778_v42 = vld [vmem:[%s17989_s17 + $0x3a0] sm:$0xf]  ;;  %v13597_v22 = vld [vmem:[%s17989_s17 + $0x3a4] sm:$0xf0] }
0x1a03   : > { %v7499_v38 = vpop.xlane.xlu1 %7498 }
0x1a04   : > { %v7501_v25 = vmul.f32 %v7499_v38, %v15167_v48  ;;  %v7529_v38 = vperm.slane %v12180_v31, 0 }
0x1a06   : > { %v13777_v55 = vpop.eup %13776  ;;  %v17314_v54 = vadd.f32 1e-05, %v7501_v25 }
0x1a07   : > { %v7505_v4 = vmul.f32 %v13777_v55, %v17250_v27  ;;  %vm7511_vm3 = vweird.f32 %v13777_v55  ;;  %v7530_v27 = vperm.slane %v12180_v31, 1  ;;  %v12658_v31 = vld [vmem:[%s17989_s17 + $0x2b0] sm:$0xf] }
0x1a08   : > { %13778 = vrsqrt.f32 %v17314_v54  ;;  %vm7512_vm13 = vmor %vm7510_vm4, %vm7511_vm3  ;;  %vm7520_vm15 = vweird.f32 %v17314_v54 }
0x1a09   : > { %v7506_v0 = vmul.f32 %v13777_v55, %v7505_v4  ;;  %v13591_v4 = vld [vmem:[%s17989_s17 + $0x374] sm:$0xf0] }
0x1a0a   : > { %v12755_v19 = vor.u32 %v13591_v4, %v12754_v56  ;;  %v12578_v56 = vld [vmem:[%s17989_s17 + $0x210] sm:$0xf]  ;;  %v13547_v4 = vld [vmem:[%s17989_s17 + $0x214] sm:$0xf0] }
0x1a0b   : > { %v7507_v53 = vmul.f32 0.5, %v7506_v0  ;;  %v13557_v0 = vld [vmem:[%s17989_s17 + $0x264] sm:$0xf0] }
0x1a0c   : > { %v12619_v29 = vor.u32 %v13557_v0, %v12618_v12  ;;  %v13572_v0 = vld [vmem:[%s17989_s17 + $0x2e4] sm:$0xf] }
0x1a0d   : > { %v7508_v2 = vsub.f32 1.5, %v7507_v53  ;;  %v12683_v53 = vor.u32 %v13573_v5, %v12682_v50  ;;  %v12786_v5 = vld [vmem:[%s17989_s17 + $0x3b0] sm:$0xf] }
0x1a0e   : > { %v13779_v8 = vpop.eup %13778 }
0x1a0f   : > { %v7509_v32 = vmul.f32 %v13777_v55, %v7508_v2  ;;  %v7515_v57 = vmul.f32 %v13779_v8, %v17314_v54  ;;  %vm7521_vm14 = vweird.f32 %v13779_v8  ;;  %v12747_v2 = vor.u32 %v13589_v40, %v12746_v59  ;;  %v12730_v59 = vld [vmem:[%s17989_s17 + $0x340] sm:$0xf] }
0x1a10   : > { %vm7522_vm0 = vmor %vm7520_vm15, %vm7521_vm14 }
0x1a11   : > { %v7516_v20 = vmul.f32 %v13779_v8, %v7515_v57  ;;  %v7513_v33 = vsel %vm7512_vm13, %v13777_v55, %v7509_v32  ;;  %v13569_v32 = vld [vmem:[%s17989_s17 + $0x2c4] sm:$0xf0]  ;;  %v12602_v57 = vld [vmem:[%s17989_s17 + $0x240] sm:$0xf] }
0x1a12   : > { %v7524_v15 = vmul.f32 %v7513_v33, %v17007_v23  ;;  %v7525_v39 = vmul.f32 %v7513_v33, %v17009_v43  ;;  %v12690_v23 = vld [vmem:[%s17989_s17 + $0x2f0] sm:$0xf]  ;;  %v13575_v43 = vld [vmem:[%s17989_s17 + $0x2f4] sm:$0xf0]  ;;  %v12603_v33 = vor.u32 %v13553_v7, %v12602_v57  ;;  %v13556_v57 = vld [vmem:[%s17989_s17 + $0x264] sm:$0xf] }
0x1a13   : > { %v7517_v36 = vmul.f32 0.5, %v7516_v20  ;;  %v12691_v34 = vor.u32 %v13575_v43, %v12690_v23  ;;  %v12667_v20 = vor.u32 %v13569_v32, %v12666_v62  ;;  %v13601_v43 = vld [vmem:[%s17989_s17 + $0x3c4] sm:$0xf0]  ;;  %v12722_v62 = vld [vmem:[%s17989_s17 + $0x330] sm:$0xf] }
0x1a14   : > { %v7533_v51 = vmul.f32 %v7529_v38, %v7524_v15  ;;  %v7534_v18 = vmul.f32 %v7530_v27, %v7525_v39  ;;  %v13565_v39 = vld [vmem:[%s17989_s17 + $0x2a4] sm:$0xf0]  ;;  %v12620_v7 = vld [vmem:[%s17989_s17 + $0x268] sm:$0xf0] }
0x1a15   : > { %v7518_v61 = vsub.f32 1.5, %v7517_v36  ;;  %v13567_v36 = vld [vmem:[%s17989_s17 + $0x2b4] sm:$0xf0] }
0x1a16   : > { %v17397_v55 = vadd.f32 %v7538_v45, %v7533_v51  ;;  %v17399_v54 = vadd.f32 %v7539_v52, %v7534_v18  ;;  %v12642_v51 = vld [vmem:[%s17989_s17 + $0x290] sm:$0xf]  ;;  %v13563_v18 = vld [vmem:[%s17989_s17 + $0x294] sm:$0xf0] }
0x1a17   : > { %v7519_v44 = vmul.f32 %v13779_v8, %v7518_v61  ;;  %v12594_v61 = vld [vmem:[%s17989_s17 + $0x230] sm:$0xf] }
0x1a18   : > { %v12595_v15 = vor.u32 %v13551_v37, %v12594_v61  ;;  %v12668_v61 = vld [vmem:[%s17989_s17 + $0x2c8] sm:$0xf0] }
0x1a19   : > { %v7523_v25 = vsel %vm7522_vm0, %v13779_v8, %v7519_v44  ;;  %v12675_v8 = vor.u32 %v13571_v30, %v12674_v21  ;;  %v12586_v44 = vld [vmem:[%s17989_s17 + $0x220] sm:$0xf]  ;;  %v13558_v21 = vld [vmem:[%s17989_s17 + $0x274] sm:$0xf]  ;;  %v12628_v30 = vld [vmem:[%s17989_s17 + $0x278] sm:$0xf0] }
0x1a1a   : > { %v7526_v58 = vmul.f32 %v7523_v25, %v17016_v24  ;;  %v7527_v60 = vmul.f32 %v7523_v25, %v17018_v28  ;;  %v13559_v24 = vld [vmem:[%s17989_s17 + $0x274] sm:$0xf0]  ;;  %v12818_v28 = vld [vmem:[%s17989_s17 + $0x3f0] sm:$0xf] }
0x1a1b   : > { %v12627_v11 = vor.u32 %v13559_v24, %v12626_v1  ;;  %v12819_v16 = vor.u32 %v13607_v46, %v12818_v28  ;;  %v13574_v1 = vld [vmem:[%s17989_s17 + $0x2f4] sm:$0xf]  ;;  %v12692_v24 = vld [vmem:[%s17989_s17 + $0x2f8] sm:$0xf0] }
0x1a1c   : > { %v7535_v49 = vmul.f32 %v7529_v38, %v7526_v58  ;;  %v7536_v3 = vmul.f32 %v7530_v27, %v7527_v60  ;;  %v12659_v38 = vor.u32 %v13567_v36, %v12658_v31  ;;  %v12650_v27 = vld [vmem:[%s17989_s17 + $0x2a0] sm:$0xf]  ;;  %v12643_v58 = vor.u32 %v13563_v18, %v12642_v51  ;;  %v13595_v31 = vld [vmem:[%s17989_s17 + $0x394] sm:$0xf0]  ;;  %v13568_v36 = vld [vmem:[%s17989_s17 + $0x2c4] sm:$0xf] }
0x1a1d   : > { %v12634_v60 = vld [vmem:[%s17989_s17 + $0x280] sm:$0xf]  ;;  %v12695_v46 = vor.u32 %v13574_v1, %v12692_v24  ;;  %v12671_v37 = vor.u32 %v13568_v36, %v12668_v61  ;;  %v13566_v18 = vld [vmem:[%s17989_s17 + $0x2b4] sm:$0xf]  ;;  %v13579_v1 = vld [vmem:[%s17989_s17 + $0x314] sm:$0xf0] }
0x1a1e   : > { %v17401_v41 = vadd.f32 %v7538_v45, %v7535_v49  ;;  %v17403_v47 = vadd.f32 %v7539_v52, %v7536_v3  ;;  %v13549_v45 = vld [vmem:[%s17989_s17 + $0x224] sm:$0xf0]  ;;  %v12651_v52 = vor.u32 %v13565_v39, %v12650_v27  ;;  %v12794_v3 = vld [vmem:[%s17989_s17 + $0x3c0] sm:$0xf]  ;;  %v13554_v39 = vld [vmem:[%s17989_s17 + $0x254] sm:$0xf] }
0x1a1f   : > { %v12587_v25 = vor.u32 %v13549_v45, %v12586_v44  ;;  %v13561_v49 = vld [vmem:[%s17989_s17 + $0x284] sm:$0xf0]  ;;  %v12795_v28 = vor.u32 %v13601_v43, %v12794_v3  ;;  %v12612_v44 = vld [vmem:[%s17989_s17 + $0x258] sm:$0xf0]  ;;  %v13552_v24 = vld [vmem:[%s17989_s17 + $0x244] sm:$0xf] }
0x1a20   : > { %v7546_v10 = vpack.c.bf16 %v17401_v41, %v17397_v55  ;;  %v7547_v35 = vpack.c.bf16 %v17403_v47, %v17399_v54  ;;  %v12635_v23 = vor.u32 %v13561_v49, %v12634_v60  ;;  %v13581_v27 = vld [vmem:[%s17989_s17 + $0x324] sm:$0xf0]  ;;  %v12615_v45 = vor.u32 %v13554_v39, %v12612_v44  ;;  %v13606_v49 = vld [vmem:[%s17989_s17 + $0x3f4] sm:$0xf]  ;;  %v12820_v3 = vld [vmem:[%s17989_s17 + $0x3f8] sm:$0xf0] }
0x1a21   : > { %v12823_v43 = vor.u32 %v13606_v49, %v12820_v3  ;;  %v12580_v36 = vld [vmem:[%s17989_s17 + $0x218] sm:$0xf0]  ;;  %v13586_v61 = vld [vmem:[%s17989_s17 + $0x354] sm:$0xf]  ;;  %v12732_v49 = vld [vmem:[%s17989_s17 + $0x348] sm:$0xf0] }
0x1a22   : > { %7952 = vmatmul.bf16.vlgmr.msrb.gmra.mxu2 %v7546_v10  ;;  %7966 = vmatmul.bf16.vlgmr.msrb.gmra.mxu3 %v7547_v35  ;;  %v12788_v39 = vld [vmem:[%s17989_s17 + $0x3b8] sm:$0xf0] }
0x1a23   : > { %7980 = vmatmul.bf16.vlgmr.msra.gmra.mxu0 %v7546_v10  ;;  %7994 = vmatmul.bf16.vlgmr.msra.gmra.mxu1 %v7547_v35 }
0x1a24   : > { %8474 = vmatpush.bf16.msrb.mxu3 %v12691_v34  ;;  %8460 = vmatpush.bf16.msrb.mxu2 %v12627_v11  ;;  %v13587_v34 = vld [vmem:[%s17989_s17 + $0x354] sm:$0xf0] }
0x1a25   : > { %8502 = vmatpush.bf16.msra.mxu1 %v12819_v16  ;;  %8488 = vmatpush.bf16.msra.mxu0 %v12755_v19  ;;  %v13599_v11 = vld [vmem:[%s17989_s17 + $0x3b4] sm:$0xf0]  ;;  %v12684_v16 = vld [vmem:[%s17989_s17 + $0x2e8] sm:$0xf0]  ;;  %v12570_v19 = vld [vmem:[%s17989_s17 + $0x200] sm:$0xf] }
0x1a26   : > { %v12787_v12 = vor.u32 %v13599_v11, %v12786_v5  ;;  %v12687_v26 = vor.u32 %v13572_v0, %v12684_v16  ;;  %v12571_v40 = vor.u32 %v13545_v9, %v12570_v19  ;;  %v12698_v5 = vld [vmem:[%s17989_s17 + $0x300] sm:$0xf]  ;;  %v13577_v11 = vld [vmem:[%s17989_s17 + $0x304] sm:$0xf0]  ;;  %v13550_v16 = vld [vmem:[%s17989_s17 + $0x234] sm:$0xf] }
0x1a27   : > { %v12699_v0 = vor.u32 %v13577_v11, %v12698_v5  ;;  %v13590_v9 = vld [vmem:[%s17989_s17 + $0x374] sm:$0xf]  ;;  %v13580_v5 = vld [vmem:[%s17989_s17 + $0x324] sm:$0xf] }
0x1a28   : > { %8475 = vmatpush.bf16.msrb.mxu3 %v12683_v53  ;;  %8461 = vmatpush.bf16.msrb.mxu2 %v12619_v29  ;;  %v13585_v53 = vld [vmem:[%s17989_s17 + $0x344] sm:$0xf0] }
0x1a29   : > { %8503 = vmatpush.bf16.msra.mxu1 %v12811_v14  ;;  %8489 = vmatpush.bf16.msra.mxu0 %v12747_v2  ;;  %v12731_v29 = vor.u32 %v13585_v53, %v12730_v59  ;;  %v12631_v14 = vor.u32 %v13558_v21, %v12628_v30  ;;  %v12779_v2 = vor.u32 %v13597_v22, %v12778_v42  ;;  %v12756_v59 = vld [vmem:[%s17989_s17 + $0x378] sm:$0xf0]  ;;  %v13562_v53 = vld [vmem:[%s17989_s17 + $0x294] sm:$0xf] }
0x1a2a   : > { %v12644_v21 = vld [vmem:[%s17989_s17 + $0x298] sm:$0xf0] }
0x1a2b   : > { %v12647_v30 = vor.u32 %v13562_v53, %v12644_v21  ;;  %v12804_v42 = vld [vmem:[%s17989_s17 + $0x3d8] sm:$0xf0]  ;;  %v13578_v21 = vld [vmem:[%s17989_s17 + $0x314] sm:$0xf] }
0x1a2c   : > { %8476 = vmatpush.bf16.msrb.mxu3 %v12675_v8  ;;  %8462 = vmatpush.bf16.msrb.mxu2 %v12611_v63  ;;  %v12679_v8 = vor.u32 %v13570_v6, %v12676_v13  ;;  %v13583_v63 = vld [vmem:[%s17989_s17 + $0x334] sm:$0xf0]  ;;  %v13588_v6 = vld [vmem:[%s17989_s17 + $0x364] sm:$0xf] }
0x1a2d   : > { %8504 = vmatpush.bf16.msra.mxu1 %v12803_v17  ;;  %v12723_v32 = vor.u32 %v13583_v63, %v12722_v62  ;;  %v12623_v17 = vor.u32 %v13556_v57, %v12620_v7  ;;  %v13560_v63 = vld [vmem:[%s17989_s17 + $0x284] sm:$0xf] }
0x1a2e   : > { %v13600_v57 = vld [vmem:[%s17989_s17 + $0x3c4] sm:$0xf] }
0x1a2f   : > { %v17706_v7 = vld [vmem:[%s17988_s16 + $0x4] sm:$0xf] }
0x1a30   : > { %8477 = vmatpush.bf16.msrb.mxu3 %v12667_v20  ;;  %8463 = vmatpush.bf16.msrb.mxu2 %v12603_v33  ;;  %v12770_v20 = vld [vmem:[%s17989_s17 + $0x390] sm:$0xf]  ;;  %v7617_v44 = vperm.slane %v17706_v7, 1 }
0x1a31   : > { %8505 = vmatpush.bf16.msra.mxu1 %v12795_v28  ;;  %v12771_v33 = vor.u32 %v13595_v31, %v12770_v20  ;;  %v12604_v28 = vld [vmem:[%s17989_s17 + $0x248] sm:$0xf0] }
0x1a32   : > { %8008 = vmatmul.bf16.vlgmr.msra.gmra.mxu2 %v7546_v10  ;;  %8022 = vmatmul.bf16.vlgmr.msra.gmra.mxu3 %v7547_v35  ;;  %v12796_v20 = vld [vmem:[%s17989_s17 + $0x3c8] sm:$0xf0] }
0x1a33   : > { %8036 = vmatmul.bf16.vlgmr.msrb.gmra.mxu0 %v7546_v10  ;;  %8050 = vmatmul.bf16.vlgmr.msrb.gmra.mxu1 %v7547_v35  ;;  %v12738_v10 = vld [vmem:[%s17989_s17 + $0x350] sm:$0xf]  ;;  %v12579_v35 = vor.u32 %v13547_v4, %v12578_v56  ;;  %v12607_v56 = vor.u32 %v13552_v24, %v12604_v28  ;;  %v13564_v4 = vld [vmem:[%s17989_s17 + $0x2a4] sm:$0xf]  ;;  %v12799_v31 = vor.u32 %v13600_v57, %v12796_v20  ;;  %v7616_v28 = vperm.slane %v17706_v7, 0 }
0x1a34   : > { %8478 = vmatpush.bf16.msrb.mxu3 %v12659_v38  ;;  %8464 = vmatpush.bf16.msrb.mxu2 %v12595_v15  ;;  %v12739_v50 = vor.u32 %v13587_v34, %v12738_v10  ;;  %v12714_v38 = vld [vmem:[%s17989_s17 + $0x320] sm:$0xf]  ;;  %v12652_v10 = vld [vmem:[%s17989_s17 + $0x2a8] sm:$0xf0]  ;;  %v7619_v20 = vperm.slane %v17706_v7, 3 }
0x1a35   : > { %8506 = vmatpush.bf16.msra.mxu1 %v12787_v12  ;;  %v12715_v15 = vor.u32 %v13581_v27, %v12714_v38  ;;  %v12655_v34 = vor.u32 %v13564_v4, %v12652_v10  ;;  %v12740_v38 = vld [vmem:[%s17989_s17 + $0x358] sm:$0xf0]  ;;  %v13582_v4 = vld [vmem:[%s17989_s17 + $0x334] sm:$0xf] }
0x1a36   : > { %8490 = vmatpush.bf16.msra.mxu0 %v12739_v50  ;;  %v12812_v50 = vld [vmem:[%s17989_s17 + $0x3e8] sm:$0xf0]  ;;  %v12743_v27 = vor.u32 %v13586_v61, %v12740_v38  ;;  %v12724_v10 = vld [vmem:[%s17989_s17 + $0x338] sm:$0xf0] }
0x1a38   : > { %8479 = vmatpush.bf16.msrb.mxu3 %v12651_v52  ;;  %8465 = vmatpush.bf16.msrb.mxu2 %v12587_v25  ;;  %v12762_v52 = vld [vmem:[%s17989_s17 + $0x380] sm:$0xf]  ;;  %v13593_v25 = vld [vmem:[%s17989_s17 + $0x384] sm:$0xf0] }
0x1a39   : > { %8507 = vmatpush.bf16.msra.mxu1 %v12779_v2  ;;  %v12763_v51 = vor.u32 %v13593_v25, %v12762_v52  ;;  %v12588_v2 = vld [vmem:[%s17989_s17 + $0x228] sm:$0xf0] }
0x1a3a   : > { %8491 = vmatpush.bf16.msra.mxu0 %v12731_v29  ;;  %v13602_v29 = vld [vmem:[%s17989_s17 + $0x3d4] sm:$0xf] }
0x1a3b   : > { %v12807_v22 = vor.u32 %v13602_v29, %v12804_v42  ;;  %v12708_v29 = vld [vmem:[%s17989_s17 + $0x318] sm:$0xf0] }
0x1a3c   : > { %8480 = vmatpush.bf16.msrb.mxu3 %v12643_v58  ;;  %8466 = vmatpush.bf16.msrb.mxu2 %v12579_v35  ;;  %v12660_v58 = vld [vmem:[%s17989_s17 + $0x2b8] sm:$0xf0]  ;;  %v13604_v35 = vld [vmem:[%s17989_s17 + $0x3e4] sm:$0xf] }
0x1a3d   : > { %8508 = vmatpush.bf16.msra.mxu1 %v12771_v33  ;;  %v12663_v60 = vor.u32 %v13566_v18, %v12660_v58  ;;  %v12815_v12 = vor.u32 %v13604_v35, %v12812_v50  ;;  %v13546_v33 = vld [vmem:[%s17989_s17 + $0x214] sm:$0xf]  ;;  %v12572_v18 = vld [vmem:[%s17989_s17 + $0x208] sm:$0xf0]  ;;  %v13584_v58 = vld [vmem:[%s17989_s17 + $0x344] sm:$0xf]  ;;  %v12727_v35 = vor.u32 %v13582_v4, %v12724_v10 }
0x1a3e   : > { %8492 = vmatpush.bf16.msra.mxu0 %v12723_v32  ;;  %v12636_v32 = vld [vmem:[%s17989_s17 + $0x288] sm:$0xf0]  ;;  %v12735_v3 = vor.u32 %v13584_v58, %v12732_v49  ;;  %v12772_v50 = vld [vmem:[%s17989_s17 + $0x398] sm:$0xf0] }
0x1a40   : > { %8481 = vmatpush.bf16.msrb.mxu3 %v12635_v23  ;;  %8467 = vmatpush.bf16.msrb.mxu2 %v12571_v40  ;;  %v12706_v23 = vld [vmem:[%s17989_s17 + $0x310] sm:$0xf]  ;;  %v12759_v40 = vor.u32 %v13590_v9, %v12756_v59 }
0x1a41   : > { %8509 = vmatpush.bf16.msra.mxu1 %v12763_v51  ;;  %v13544_v51 = vld [vmem:[%s17989_s17 + $0x204] sm:$0xf] }
0x1a42   : > { %8493 = vmatpush.bf16.msra.mxu0 %v12715_v15  ;;  %v13598_v15 = vld [vmem:[%s17989_s17 + $0x3b4] sm:$0xf] }
0x1a43   : > { %v12791_v25 = vor.u32 %v13598_v15, %v12788_v39 }
0x1a44   : > { %8530 = vmatpush.bf16.msra.mxu3 %v12695_v46  ;;  %8516 = vmatpush.bf16.msra.mxu2 %v12631_v14  ;;  %v12707_v46 = vor.u32 %v13579_v1, %v12706_v23  ;;  %v13548_v14 = vld [vmem:[%s17989_s17 + $0x224] sm:$0xf] }
0x1a45   : > { %8558 = vmatpush.bf16.msrb.mxu1 %v12823_v43  ;;  %v12591_v13 = vor.u32 %v13548_v14, %v12588_v2  ;;  %v13596_v23 = vld [vmem:[%s17989_s17 + $0x3a4] sm:$0xf]  ;;  %v12780_v43 = vld [vmem:[%s17989_s17 + $0x3a8] sm:$0xf0] }
0x1a46   : > { %8494 = vmatpush.bf16.msra.mxu0 %v12707_v46  ;;  %v12783_v1 = vor.u32 %v13596_v23, %v12780_v43 }
0x1a48   : > { %8531 = vmatpush.bf16.msra.mxu3 %v12687_v26  ;;  %8517 = vmatpush.bf16.msra.mxu2 %v12623_v17  ;;  %v12596_v26 = vld [vmem:[%s17989_s17 + $0x238] sm:$0xf0]  ;;  %v12639_v17 = vor.u32 %v13560_v63, %v12636_v32 }
0x1a49   : > { %v12599_v19 = vor.u32 %v13550_v16, %v12596_v26  ;;  %8559 = vmatpush.bf16.msrb.mxu1 %v12815_v12  ;;  %v12716_v12 = vld [vmem:[%s17989_s17 + $0x328] sm:$0xf0]  ;;  %v13592_v26 = vld [vmem:[%s17989_s17 + $0x384] sm:$0xf] }
0x1a4a   : > { %8495 = vmatpush.bf16.msra.mxu0 %v12699_v0 }
0x1a4c   : > { %8532 = vmatpush.bf16.msra.mxu3 %v12679_v8  ;;  %8518 = vmatpush.bf16.msra.mxu2 %v12615_v45  ;;  %v12748_v8 = vld [vmem:[%s17989_s17 + $0x368] sm:$0xf0] }
0x1a4d   : > { %8560 = vmatpush.bf16.msrb.mxu1 %v12807_v22  ;;  %v12751_v62 = vor.u32 %v13588_v6, %v12748_v8 }
0x1a4e   : > { %8544 = vmatpush.bf16.msrb.mxu0 %v12759_v40  ;;  %v12719_v40 = vor.u32 %v13580_v5, %v12716_v12 }
0x1a50   : > { %8533 = vmatpush.bf16.msra.mxu3 %v12671_v37  ;;  %8519 = vmatpush.bf16.msra.mxu2 %v12607_v56  ;;  %v12583_v37 = vor.u32 %v13546_v33, %v12580_v36  ;;  %v12700_v33 = vld [vmem:[%s17989_s17 + $0x308] sm:$0xf0] }
0x1a51   : > { %8561 = vmatpush.bf16.msrb.mxu1 %v12799_v31  ;;  %v13576_v31 = vld [vmem:[%s17989_s17 + $0x304] sm:$0xf] }
0x1a52   : > { %8545 = vmatpush.bf16.msrb.mxu0 %v12751_v62 }
0x1a54   : > { %8534 = vmatpush.bf16.msra.mxu3 %v12663_v60  ;;  %8520 = vmatpush.bf16.msra.mxu2 %v12599_v19  ;;  %v12575_v60 = vor.u32 %v13544_v51, %v12572_v18  ;;  %v12764_v19 = vld [vmem:[%s17989_s17 + $0x388] sm:$0xf0] }
0x1a55   : > { %8562 = vmatpush.bf16.msrb.mxu1 %v12791_v25  ;;  %v12767_v42 = vor.u32 %v13592_v26, %v12764_v19 }
0x1a56   : > { %8546 = vmatpush.bf16.msrb.mxu0 %v12743_v27 }
0x1a58   : > { %8535 = vmatpush.bf16.msra.mxu3 %v12655_v34  ;;  %8521 = vmatpush.bf16.msra.mxu2 %v12591_v13  ;;  %v13594_v34 = vld [vmem:[%s17989_s17 + $0x394] sm:$0xf]  ;;  %v12711_v13 = vor.u32 %v13578_v21, %v12708_v29 }
0x1a59   : > { %8563 = vmatpush.bf16.msrb.mxu1 %v12783_v1  ;;  %v12775_v11 = vor.u32 %v13594_v34, %v12772_v50  ;;  %v12567_v50 = vld [vmem:[%s17990_s18 + $0x2] sm:$0x3] }
0x1a5a   : > { %8547 = vmatpush.bf16.msrb.mxu0 %v12735_v3  ;;  %v8136_v12 = vperm.slane %v12567_v50, 0  ;;  %v8137_v19 = vperm.slane %v12567_v50, 1  ;;  %v13609_v50 = vld [vmem:[%s18081_s22 + $0x8] sm:$0xff] }
0x1a5c   : > { %8536 = vmatpush.bf16.msra.mxu3 %v12647_v30  ;;  %8522 = vmatpush.bf16.msra.mxu2 %v12583_v37  ;;  %v12703_v37 = vor.u32 %v13576_v31, %v12700_v33 }
0x1a5d   : > { %8564 = vmatpush.bf16.msrb.mxu1 %v12775_v11 }
0x1a5e   : > { %8548 = vmatpush.bf16.msrb.mxu0 %v12727_v35 }
0x1a60   : > { %8537 = vmatpush.bf16.msra.mxu3 %v12639_v17  ;;  %8523 = vmatpush.bf16.msra.mxu2 %v12575_v60 }
0x1a61   : > { %8565 = vmatpush.bf16.msrb.mxu1 %v12767_v42 }
0x1a62   : > { %8549 = vmatpush.bf16.msrb.mxu0 %v12719_v40 }
0x1a66   : > { %8550 = vmatpush.bf16.msrb.mxu0 %v12711_v13 }
0x1a6a   : > { %8551 = vmatpush.bf16.msrb.mxu0 %v12703_v37 }
0x1aa0   : > { %v7981_v45 = vpop.f32.mrf.mxu0  ;;  %v7995_v52 = vpop.f32.mrf.mxu1 }
0x1aa1   : > { %v7982_v24 = vadd.f32 %v7981_v45, %v7617_v44 }
0x1aa3   : > { %v7996_v9 = vadd.f32 %v7995_v52, %v7982_v24 }
0x1aa5   : > { %v7953_v46 = vpop.f32.mrf.mxu2  ;;  %v7967_v56 = vpop.f32.mrf.mxu3  ;;  %v8057_v22 = vmax.f32 %v7996_v9, 0.0 }
0x1aa6   : > { %v7954_v53 = vadd.f32 %v7953_v46, %v7616_v28 }
0x1aa8   : > { %v7983_v0 = vpop.f32.mrf.mxu0  ;;  %v7997_v16 = vpop.f32.mrf.mxu1  ;;  %v7968_v8 = vadd.f32 %v7967_v56, %v7954_v53 }
0x1aa9   : > { %v7984_v59 = vadd.f32 %v7983_v0, %v7617_v44  ;;  %v7618_v44 = vperm.slane %v17706_v7, 2 }
0x1aaa   : > { %v8056_v36 = vmax.f32 %v7968_v8, 0.0 }
0x1aab   : > { %v7998_v30 = vadd.f32 %v7997_v16, %v7984_v59 }
0x1aad   : > { %v8061_v14 = vmax.f32 %v7998_v30, 0.0  ;;  %v7955_v2 = vpop.f32.mrf.mxu2  ;;  %v7969_v6 = vpop.f32.mrf.mxu3 }
0x1aae   : > { %v7956_v62 = vadd.f32 %v7955_v2, %v7616_v28 }
0x1aaf   : > { %v8065_v63 = vpack.c.bf16 %v8061_v14, %v8057_v22 }
0x1ab0   : > { %v7970_v32 = vadd.f32 %v7969_v6, %v7956_v62  ;;  %v8037_v57 = vpop.f32.mrf.mxu0  ;;  %v8051_v17 = vpop.f32.mrf.mxu1 }
0x1ab1   : > { %8482 = vmatmul.bf16.vlgmr.msrb.gmra.mxu3 %v8065_v63  ;;  %v8038_v27 = vadd.f32 %v8037_v57, %v7619_v20 }
0x1ab2   : > { %v8060_v61 = vmax.f32 %v7970_v32, 0.0 }
0x1ab3   : > { %v8052_v52 = vadd.f32 %v8051_v17, %v8038_v27 }
0x1ab4   : > { %v8064_v38 = vpack.c.bf16 %v8060_v61, %v8056_v36 }
0x1ab5   : > { %v8009_v15 = vpop.f32.mrf.mxu2  ;;  %v8023_v39 = vpop.f32.mrf.mxu3  ;;  %v8059_v60 = vmax.f32 %v8052_v52, 0.0 }
0x1ab6   : > { %8468 = vmatmul.bf16.vlgmr.msrb.gmra.mxu2 %v8064_v38  ;;  %v8010_v51 = vadd.f32 %v8009_v15, %v7618_v44 }
0x1ab8   : > { %v8039_v45 = vpop.f32.mrf.mxu0  ;;  %v8053_v18 = vpop.f32.mrf.mxu1  ;;  %v8024_v23 = vadd.f32 %v8023_v39, %v8010_v51 }
0x1ab9   : > { %v8040_v25 = vadd.f32 %v8039_v45, %v7619_v20 }
0x1aba   : > { %v8058_v46 = vmax.f32 %v8024_v23, 0.0  ;;  %v13615_v23 = vld [vmem:[%s18080_s6 + $0x38] sm:$0xff] }
0x1abb   : > { %v8054_v58 = vadd.f32 %v8053_v18, %v8040_v25  ;;  %8786 = vmatpush.bf16.msrb.mxu2 %v13615_v23 }
0x1abd   : > { %v8063_v49 = vmax.f32 %v8054_v58, 0.0  ;;  %v8011_v3 = vpop.f32.mrf.mxu2  ;;  %v8025_v24 = vpop.f32.mrf.mxu3 }
0x1abe   : > { %v8012_v43 = vadd.f32 %v8011_v3, %v7618_v44 }
0x1abf   : > { %v8067_v1 = vpack.c.bf16 %v8063_v49, %v8059_v60 }
0x1ac0   : > { %v8026_v28 = vadd.f32 %v8025_v24, %v8012_v43  ;;  %v13623_v43 = vld [vmem:[%s18081_s22 + $0x78] sm:$0xff]  ;;  %v13622_v24 = vld [vmem:[%s18081_s22 + $0x70] sm:$0xff] }
0x1ac1   : > { %8510 = vmatmul.bf16.vlgmr.msra.gmra.mxu1 %v8067_v1  ;;  %8538 = vmatmul.bf16.vlgmr.msra.gmra.mxu3 %v8065_v63 }
0x1ac2   : > { %v8062_v56 = vmax.f32 %v8026_v28, 0.0  ;;  %8800 = vmatpush.bf16.msrb.mxu3 %v13623_v43  ;;  %v13613_v28 = vld [vmem:[%s18081_s22 + $0x28] sm:$0xff] }
0x1ac4   : > { %v8066_v7 = vpack.c.bf16 %v8062_v56, %v8058_v46  ;;  %v13621_v46 = vld [vmem:[%s18081_s22 + $0x68] sm:$0xff]  ;;  %v13612_v56 = vld [vmem:[%s18081_s22 + $0x20] sm:$0xff] }
0x1ac6   : > { %8496 = vmatmul.bf16.vlgmr.msra.gmra.mxu0 %v8066_v7  ;;  %8524 = vmatmul.bf16.vlgmr.msra.gmra.mxu2 %v8064_v38 }
0x1ac7   : > { %8801 = vmatpush.bf16.msrb.mxu3 %v13622_v24 }
0x1acb   : > { %8802 = vmatpush.bf16.msrb.mxu3 %v13621_v46 }
0x1ad1   : > { %8566 = vmatmul.bf16.vlgmr.msrb.gmra.mxu1 %v8067_v1  ;;  %v13614_v1 = vld [vmem:[%s18081_s22 + $0x30] sm:$0xff] }
0x1ad2   : > { %8787 = vmatpush.bf16.msrb.mxu2 %v13614_v1 }
0x1ad6   : > { %8552 = vmatmul.bf16.vlgmr.msrb.gmra.mxu0 %v8066_v7  ;;  %8788 = vmatpush.bf16.msrb.mxu2 %v13613_v28  ;;  %v13620_v7 = vld [vmem:[%s18081_s22 + $0x60] sm:$0xff] }
0x1ad7   : > { %8803 = vmatpush.bf16.msrb.mxu3 %v13620_v7 }
0x1ada   : > { %8789 = vmatpush.bf16.msrb.mxu2 %v13612_v56 }
0x1b34   : > { %v8483_v10 = vpop.f32.mrf.mxu3 }
0x1b39   : > { %v8469_v4 = vpop.f32.mrf.mxu2 }
0x1b3a   : > { %v8470_v26 = vadd.f32 %v8469_v4, %v8136_v12  ;;  %v13611_v4 = vld [vmem:[%s18081_s22 + $0x18] sm:$0xff] }
0x1b3b   : > { %8790 = vmatpush.bf16.msrb.mxu2 %v13611_v4 }
0x1b3c   : > { %v8485_v11 = vpop.f32.mrf.mxu3  ;;  %v8484_v59 = vadd.f32 %v8483_v10, %v8470_v26  ;;  %v13619_v10 = vld [vmem:[%s18081_s22 + $0x58] sm:$0xff]  ;;  %v13616_v26 = vld [vmem:[%s18081_s22 + $0x40] sm:$0xff] }
0x1b3d   : > { %8804 = vmatpush.bf16.msrb.mxu3 %v13619_v10 }
0x1b3e   : > { %v8511_v35 = vpop.f32.mrf.mxu1 }
0x1b41   : > { %v8471_v34 = vpop.f32.mrf.mxu2 }
0x1b42   : > { %v8472_v29 = vadd.f32 %v8471_v34, %v8136_v12  ;;  %v13618_v34 = vld [vmem:[%s18081_s22 + $0x50] sm:$0xff] }
0x1b43   : > { %v8497_v5 = vpop.f32.mrf.mxu0  ;;  %8805 = vmatpush.bf16.msrb.mxu3 %v13618_v34 }
0x1b44   : > { %v8539_v53 = vpop.f32.mrf.mxu3  ;;  %v8498_v21 = vadd.f32 %v8497_v5, %v8484_v59  ;;  %v8486_v13 = vadd.f32 %v8485_v11, %v8472_v29  ;;  %v13617_v5 = vld [vmem:[%s18081_s22 + $0x48] sm:$0xff] }
0x1b46   : > { %v8513_v0 = vpop.f32.mrf.mxu1  ;;  %v8512_v2 = vadd.f32 %v8511_v35, %v8498_v21  ;;  %v13610_v35 = vld [vmem:[%s18081_s22 + $0x10] sm:$0xff] }
0x1b47   : > { %8791 = vmatpush.bf16.msrb.mxu2 %v13610_v35  ;;  %8806 = vmatpush.bf16.msrb.mxu3 %v13617_v5 }
0x1b48   : > { %v8572_v32 = vadd.f32 %v8512_v2, %v17397_v55 }
0x1b49   : > { %v8525_v16 = vpop.f32.mrf.mxu2 }
0x1b4a   : > { %v8526_v40 = vadd.f32 %v8525_v16, %v8137_v19  ;;  %v13608_v16 = vld [vmem:[%s18081_s22] sm:$0xff] }
0x1b4b   : > { %v8499_v9 = vpop.f32.mrf.mxu0  ;;  %8792 = vmatpush.bf16.msrb.mxu2 %v13609_v50  ;;  %8807 = vmatpush.bf16.msrb.mxu3 %v13616_v26 }
0x1b4c   : > { %v8540_v42 = vadd.f32 %v8539_v53, %v8526_v40  ;;  %v8500_v63 = vadd.f32 %v8499_v9, %v8486_v13  ;;  %v8541_v17 = vpop.f32.mrf.mxu3 }
0x1b4e   : > { %v8567_v30 = vpop.f32.mrf.mxu1  ;;  %v8514_v36 = vadd.f32 %v8513_v0, %v8500_v63 }
0x1b4f   : > { %8793 = vmatpush.bf16.msrb.mxu2 %v13608_v16 }
0x1b50   : > { %v8574_v27 = vadd.f32 %v8514_v36, %v17401_v41 }
0x1b51   : > { %v8527_v22 = vpop.f32.mrf.mxu2 }
0x1b52   : > { %v8528_v8 = vadd.f32 %v8527_v22, %v8137_v19 }
0x1b53   : > { %v8553_v14 = vpop.f32.mrf.mxu0 }
0x1b54   : > { %v8554_v6 = vadd.f32 %v8553_v14, %v8540_v42  ;;  %v8542_v20 = vadd.f32 %v8541_v17, %v8528_v8 }
0x1b56   : > { %v8568_v62 = vadd.f32 %v8567_v30, %v8554_v6  ;;  %v8569_v37 = vpop.f32.mrf.mxu1  ;;  %v12824_v6 = vld [vmem:[%s17991_s19 + $0x2] sm:$0x3] }
0x1b57   : > { %v8631_v63 = vperm.slane %v12824_v6, 0 }
0x1b58   : > { %v8573_v57 = vadd.f32 %v8568_v62, %v17399_v54  ;;  %v12825_v62 = vld [vmem:[%s17992_s20 + $0x2] sm:$0x3] }
0x1b5a   : > { %v8580_v31 = vadd.f32 %v8573_v57, %v8572_v32 }
0x1b5b   : > { %v8555_v33 = vpop.f32.mrf.mxu0 }
0x1b5c   : > { %v8556_v61 = vadd.f32 %v8555_v33, %v8542_v20  ;;  %8581 = vadd.xlane.f32.xlu2 %v8580_v31  ;;  %v8640_v31 = vperm.slane %v12825_v62, 0  ;;  %v8641_v33 = vperm.slane %v12825_v62, 1 }
0x1b5e   : > { %v8570_v38 = vadd.f32 %v8569_v37, %v8556_v61 }
0x1b60   : > { %v8575_v15 = vadd.f32 %v8570_v38, %v17403_v47 }
0x1b62   : > { %v8583_v39 = vadd.f32 %v8575_v15, %v8574_v27 }
0x1b64   : > { %8584 = vadd.xlane.f32.xlu0 %v8583_v39 }
0x1bcf   : > { %v8582_v44 = vpop.xlane.xlu2 %8581 }
0x1bd0   : > { %v8586_v55 = vmul.f32 %v8582_v44, %v15167_v48 }
0x1bd2   : > { %v17795_v45 = vsub.f32 %v8572_v32, %v8586_v55  ;;  %v17797_v54 = vsub.f32 %v8573_v57, %v8586_v55  ;;  %v8632_v32 = vperm.slane %v12824_v6, 1 }
0x1bd4   : > { %v8592_v52 = vmul.f32 %v17795_v45, %v17795_v45  ;;  %v8593_v25 = vmul.f32 %v17797_v54, %v17797_v54 }
0x1bd6   : > { %v8596_v51 = vadd.f32 %v8593_v25, %v8592_v52 }
0x1bd7   : > { %v8585_v18 = vpop.xlane.xlu0 %8584 }
0x1bd8   : > { %v8587_v41 = vmul.f32 %v8585_v18, %v15167_v48  ;;  %8597 = vadd.xlane.f32.xlu1 %v8596_v51  ;;  %v13701_v51 = vld [vmem:[%s18082_s30] ss:$0 sm:$0xff] }
0x1bda   : > { %v17804_v47 = vsub.f32 %v8574_v27, %v8587_v41  ;;  %v17806_v58 = vsub.f32 %v8575_v15, %v8587_v41 }
0x1bdc   : > { %v8594_v60 = vmul.f32 %v17804_v47, %v17804_v47  ;;  %v8595_v49 = vmul.f32 %v17806_v58, %v17806_v58 }
0x1bde   : > { %v8599_v3 = vadd.f32 %v8595_v49, %v8594_v60 }
0x1be0   : > { %8600 = vadd.xlane.f32.xlu2 %v8599_v3 }
0x1c4b   : > { %v8598_v11 = vpop.xlane.xlu1 %8597 }
0x1c4c   : > { %v8602_v12 = vmul.f32 %v8598_v11, %v15167_v48 }
0x1c4e   : > { %v8604_v0 = vadd.f32 1e-05, %v8602_v12 }
0x1c50   : > { %13780 = vrsqrt.f32 %v8604_v0  ;;  %vm8612_vm2 = vweird.f32 %v8604_v0 }
0x1c53   : > { %v8601_v19 = vpop.xlane.xlu2 %8600 }
0x1c54   : > { %v8603_v9 = vmul.f32 %v8601_v19, %v15167_v48 }
0x1c56   : > { %v13781_v59 = vpop.eup %13780  ;;  %v8605_v40 = vadd.f32 1e-05, %v8603_v9 }
0x1c57   : > { %v8607_v53 = vmul.f32 %v13781_v59, %v8604_v0  ;;  %vm8613_vm5 = vweird.f32 %v13781_v59 }
0x1c58   : > { %13782 = vrsqrt.f32 %v8605_v40  ;;  %vm8614_vm12 = vmor %vm8612_vm2, %vm8613_vm5  ;;  %vm8622_vm7 = vweird.f32 %v8605_v40 }
0x1c59   : > { %v8608_v21 = vmul.f32 %v13781_v59, %v8607_v53 }
0x1c5b   : > { %v8609_v29 = vmul.f32 0.5, %v8608_v21 }
0x1c5d   : > { %v8610_v30 = vsub.f32 1.5, %v8609_v29 }
0x1c5e   : > { %v13783_v42 = vpop.eup %13782 }
0x1c5f   : > { %v8611_v22 = vmul.f32 %v13781_v59, %v8610_v30  ;;  %v8617_v14 = vmul.f32 %v13783_v42, %v8605_v40  ;;  %vm8623_vm6 = vweird.f32 %v13783_v42 }
0x1c60   : > { %vm8624_vm8 = vmor %vm8622_vm7, %vm8623_vm6 }
0x1c61   : > { %v8618_v2 = vmul.f32 %v13783_v42, %v8617_v14  ;;  %v8615_v13 = vsel %vm8614_vm12, %v13781_v59, %v8611_v22 }
0x1c62   : > { %v8626_v57 = vmul.f32 %v8615_v13, %v17795_v45  ;;  %v8627_v17 = vmul.f32 %v8615_v13, %v17797_v54 }
0x1c63   : > { %v8619_v48 = vmul.f32 0.5, %v8618_v2 }
0x1c64   : > { %v8635_v61 = vmul.f32 %v8631_v63, %v8626_v57  ;;  %v8636_v37 = vmul.f32 %v8632_v32, %v8627_v17 }
0x1c65   : > { %v8620_v8 = vsub.f32 1.5, %v8619_v48 }
0x1c66   : > { %v8644_v44 = vadd.f32 %v8640_v31, %v8635_v61  ;;  %v8645_v55 = vadd.f32 %v8641_v33, %v8636_v37 }
0x1c67   : > { %v8621_v20 = vmul.f32 %v13783_v42, %v8620_v8 }
0x1c69   : > { %v8625_v36 = vsel %vm8624_vm8, %v13783_v42, %v8621_v20 }
0x1c6a   : > { %v8628_v38 = vmul.f32 %v8625_v36, %v17804_v47  ;;  %v8629_v27 = vmul.f32 %v8625_v36, %v17806_v58 }
0x1c6c   : > { %v8637_v15 = vmul.f32 %v8631_v63, %v8628_v38  ;;  %v8638_v39 = vmul.f32 %v8632_v32, %v8629_v27 }
0x1c6e   : > { %v8646_v52 = vadd.f32 %v8640_v31, %v8637_v15  ;;  %v8647_v45 = vadd.f32 %v8641_v33, %v8638_v39 }
0x1c70   : > { %v8652_v25 = vpack.c.bf16 %v8646_v52, %v8644_v44  ;;  %v8653_v54 = vpack.c.bf16 %v8647_v45, %v8645_v55 }
0x1c72   : > { %8794 = vmatmul.bf16.vlgmr.msrb.gmra.mxu2 %v8652_v25  ;;  %8808 = vmatmul.bf16.vlgmr.msrb.gmra.mxu3 %v8653_v54 }
0x1cf5   : > { %v8795_v18 = vpop.f32.mrf.mxu2  ;;  %v8809_v41 = vpop.f32.mrf.mxu3 }
0x1cf6   : > { %v8796_v60 = vadd.f32 %v13701_v51, %v8795_v18 }
0x1cf8   : > { %v17875_v47 = vadd.f32 %v8809_v41, %v8796_v60 }
0x1cfa   : > { %v8814_v58 = vmul.f32 %v17875_v47, %v17875_v47 }
0x1cfc   : > { %8885 = vrot.lane.b32.xlu2 %v8814_v58, %s13900_s1  ;;  %8849 = vrot.lane.b32.xlu0 %v8814_v58, %s13901_s7  ;;  %v8817_v28 = vsel %vm8816_vm9, %v8814_v58, 0.0 }
0x1cfd   : > { %v8797_v49 = vpop.f32.mrf.mxu2  ;;  %v8811_v23 = vpop.f32.mrf.mxu3 }
0x1cfe   : > { %v8798_v3 = vadd.f32 %v13701_v51, %v8797_v49 }
0x1d00   : > { %v17879_v43 = vadd.f32 %v8811_v23, %v8798_v3 }
0x1d02   : > { %v8815_v1 = vmul.f32 %v17879_v43, %v17879_v43 }
0x1d04   : > { %8851 = vrot.lane.b32.xlu1 %v8815_v1, %s13901_s7  ;;  %8887 = vrot.lane.b32.xlu0 %v8815_v1, %s13900_s1  ;;  %v8820_v24 = vsel %vm8816_vm9, %v8815_v1, 0.0  ;;  %s18087_s1 = sld [smem:[#allocation40_spill]] }
0x1d0a   : > { %s8973_s7 = scalar_lea.hbm %s18087_s1, %s13624_s2 }
0x1d2e   : > { %8821 = vadd.xlane.f32.xlu0 %v8820_v24  ;;  %8818 = vadd.xlane.f32.xlu1 %v8817_v28 }
0x1d56   : > { %v8886_v46 = vpop.permute.xlu2 %8885 }
0x1d57   : > { %v8891_v56 = vsel %vm8816_vm9, %v8886_v46, 0.0 }
0x1d58   : > { %8892 = vadd.xlane.f32.xlu0 %v8891_v56 }
0x1d6e   : > { %v8850_v7 = vpop.permute.xlu0 %8849 }
0x1d6f   : > { %v8855_v4 = vsel %vm8816_vm9, %v8850_v7, 0.0 }
0x1d70   : > { %8856 = vadd.xlane.f32.xlu2 %v8855_v4 }
0x1d76   : > { %v8852_v10 = vpop.permute.xlu1 %8851  ;;  %v8888_v35 = vpop.permute.xlu0 %8887 }
0x1d77   : > { %v8894_v34 = vsel %vm8816_vm9, %v8888_v35, 0.0  ;;  %v8858_v50 = vsel %vm8816_vm9, %v8852_v10, 0.0 }
0x1d78   : > { %8895 = vadd.xlane.f32.xlu2 %v8894_v34  ;;  %8859 = vadd.xlane.f32.xlu1 %v8858_v50 }
0x1d79   : > { %13829 = shalt.err (!%p13826_p3)
}
0x1d7a   : > { %s13902_s5 = smov 128   ;;  %s13903_s2 = smov 8  }
0x1d7b   : > { %13626 = dma.vmem_to_hbm [thread:$0]  (%p14072_p5), %s8958_s4, 256, %s8960_s8, %s8937_s10, %s13902_s5, %s13902_s5, %s13903_s2  }
0x1d7c   : > { %s8974_s28 = sshll.u32 %s16842_s3, 4  ;;  %s8976_s6 = sshll.u32 %s8973_s7, 4  ;;  %s8975_s28 = int_to_ptr.vmem [resolvable:$true] %s8974_s28  ;;  %s8977_s6 = int_to_ptr.hbm [resolvable:$true] %s8976_s6 }
0x1d7d   : > { %s8942_s14 = scalar_lea.sflag [#allocation6], %s14996_s0  ;;  %s13844_s30 = sshra.s32 %s8977_s6, 4  ;;  %s13845_s30 = int_to_ptr.hbm [resolvable:$true] %s13844_s30 }
0x1d7e   : > { %s13846_s11 = scalar_lea.hbm %s13845_s30, 16  ;;  %s13850_s21 = scalar_lea.hbm %s18087_s1, 32 }
0x1d7f   : > { %p13847_p4 = scmp.ne.s32.totalorder %s13845_s30, %s13846_s11  ;;  %p13851_p9 = scmp.lt.s32.totalorder %s13845_s30, %s18087_s1 }
0x1d80   : > { %p13852_p10 = scmp.lt.s32.totalorder %s13850_s21, %s13846_s11 }
0x1d81   : > { %p13848_p7 = pnand %p13847_p4, %p14072_p5 }
0x1d82   : > { %p13853_p11 = por %p13852_p10, %p13851_p9 }
0x1d83   : > { %p13849_p8 = pneg %p13848_p7 }
0x1d85   : > { %p13854_p12 = pnand %p13853_p11, %p13849_p8 }
0x1d87   : > { %13857 = shalt.err (!%p13854_p12)
}
0x1d88   : > { %13627 = dma.vmem_to_hbm [thread:$0]  (%p14072_p5), %s8975_s28, 256, %s8977_s6, %s8942_s14, %s13902_s5, %s13902_s5, %s13903_s2   ;;  %vm8925_vm12 = vcmask 72704   ;;  %vm8928_vm6 = vcmask 97280  }
0x1d89   : > { %s18088_s10 = sld [smem:[#allocation18_spill]] }
0x1d8a   : > { %s18090_s3 = sld [smem:[#allocation38_spill]] }
0x1d8f   : > { %s18089_s4 = sshll.u32 %s18088_s10, 4 }
0x1d90   : > { %s799_s12 = scalar_lea.vmem %s18090_s3, %s18089_s4 }
0x1da1   : > { %v8822_v5 = vpop.xlane.xlu0 %8821  ;;  %v8819_v11 = vpop.xlane.xlu1 %8818 }
0x1da2   : > { %v8823_v0 = vmax.f32 %v8819_v11, 1e-24  ;;  %v17920_v26 = vmax.f32 %v8822_v5, 1e-24 }
0x1da4   : > { %13784 = vrsqrt.f32 %v8823_v0  ;;  %vm8831_vm3 = vweird.f32 %v8823_v0  ;;  %vm8841_vm8 = vweird.f32 %v17920_v26 }
0x1daa   : > { %v13785_v19 = vpop.eup %13784 }
0x1dab   : > { %v8826_v59 = vmul.f32 %v13785_v19, %v8823_v0  ;;  %vm8832_vm10 = vweird.f32 %v13785_v19 }
0x1dac   : > { %vm8833_vm13 = vmor %vm8831_vm3, %vm8832_vm10 }
0x1dad   : > { %v8827_v29 = vmul.f32 %v13785_v19, %v8826_v59 }
0x1daf   : > { %v8828_v22 = vmul.f32 0.5, %v8827_v29 }
0x1db1   : > { %v8829_v63 = vsub.f32 1.5, %v8828_v22 }
0x1db3   : > { %v8830_v31 = vmul.f32 %v13785_v19, %v8829_v63 }
0x1db5   : > { %v8834_v15 = vsel %vm8833_vm13, %v13785_v19, %v8830_v31 }
0x1db6   : > { %v8845_v51 = vmul.f32 %v8834_v15, %v17875_v47 }
0x1dcb   : > { %v8893_v12 = vpop.xlane.xlu0 %8892 }
0x1dcc   : > { %v8897_v16 = vmax.f32 %v8893_v12, 1e-24 }
0x1dce   : > { %13786 = vrsqrt.f32 %v8897_v16  ;;  %vm8905_vm14 = vweird.f32 %v8897_v16 }
0x1dcf   : > { %13788 = vrsqrt.f32 %v17920_v26 }
0x1dd4   : > { %v13787_v9 = vpop.eup %13786 }
0x1dd5   : > { %v8900_v40 = vmul.f32 %v13787_v9, %v8897_v16  ;;  %v17923_v42 = vpop.eup %13788  ;;  %vm8906_vm11 = vweird.f32 %v13787_v9 }
0x1dd6   : > { %v8836_v14 = vmul.f32 %v17923_v42, %v17920_v26  ;;  %vm8907_vm15 = vmor %vm8905_vm14, %vm8906_vm11  ;;  %vm8842_vm2 = vweird.f32 %v17923_v42 }
0x1dd7   : > { %v8901_v30 = vmul.f32 %v13787_v9, %v8900_v40  ;;  %vm8843_vm11 = vmor %vm8841_vm8, %vm8842_vm2 }
0x1dd8   : > { %v8837_v57 = vmul.f32 %v17923_v42, %v8836_v14 }
0x1dd9   : > { %v8902_v2 = vmul.f32 0.5, %v8901_v30 }
0x1dda   : > { %v8838_v36 = vmul.f32 0.5, %v8837_v57 }
0x1ddb   : > { %v8903_v17 = vsub.f32 1.5, %v8902_v2 }
0x1ddc   : > { %v8839_v55 = vsub.f32 1.5, %v8838_v36 }
0x1ddd   : > { %v8904_v61 = vmul.f32 %v13787_v9, %v8903_v17 }
0x1dde   : > { %v8840_v49 = vmul.f32 %v17923_v42, %v8839_v55 }
0x1ddf   : > { %v8908_v52 = vsel %vm8907_vm15, %v13787_v9, %v8904_v61 }
0x1de0   : > { %v8919_v60 = vmul.f32 %v8908_v52, %v17875_v47  ;;  %v8844_v7 = vsel %vm8843_vm11, %v17923_v42, %v8840_v49 }
0x1de3   : > { %v8857_v53 = vpop.xlane.xlu2 %8856 }
0x1de4   : > { %v8861_v21 = vmax.f32 %v8857_v53, 1e-24 }
0x1de6   : > { %13790 = vrsqrt.f32 %v8861_v21  ;;  %vm8869_vm0 = vweird.f32 %v8861_v21 }
0x1deb   : > { %v8896_v6 = vpop.xlane.xlu2 %8895  ;;  %v8860_v13 = vpop.xlane.xlu1 %8859 }
0x1dec   : > { %v13791_v48 = vpop.eup %13790  ;;  %v8898_v8 = vmax.f32 %v8896_v6, 1e-24  ;;  %v8862_v62 = vmax.f32 %v8860_v13, 1e-24 }
0x1ded   : > { %v8864_v32 = vmul.f32 %v13791_v48, %v8861_v21  ;;  %vm8870_vm4 = vweird.f32 %v13791_v48 }
0x1dee   : > { %13792 = vrsqrt.f32 %v8898_v8  ;;  %vm8871_vm5 = vmor %vm8869_vm0, %vm8870_vm4  ;;  %vm8915_vm3 = vweird.f32 %v8898_v8  ;;  %vm8879_vm13 = vweird.f32 %v8862_v62 }
0x1def   : > { %v8865_v20 = vmul.f32 %v13791_v48, %v8864_v32  ;;  %13794 = vrsqrt.f32 %v8862_v62 }
0x1df1   : > { %v8866_v33 = vmul.f32 0.5, %v8865_v20 }
0x1df3   : > { %v8867_v37 = vsub.f32 1.5, %v8866_v33 }
0x1df4   : > { %v13793_v38 = vpop.eup %13792 }
0x1df5   : > { %v13795_v27 = vpop.eup %13794  ;;  %v8868_v39 = vmul.f32 %v13791_v48, %v8867_v37  ;;  %v8910_v44 = vmul.f32 %v13793_v38, %v8898_v8  ;;  %vm8916_vm7 = vweird.f32 %v13793_v38 }
0x1df6   : > { %v8874_v45 = vmul.f32 %v13795_v27, %v8862_v62  ;;  %vm8880_vm10 = vweird.f32 %v13795_v27  ;;  %vm8917_vm4 = vmor %vm8915_vm3, %vm8916_vm7 }
0x1df7   : > { %v8872_v25 = vsel %vm8871_vm5, %v13791_v48, %v8868_v39  ;;  %v8911_v54 = vmul.f32 %v13793_v38, %v8910_v44  ;;  %vm8881_vm14 = vmor %vm8879_vm13, %vm8880_vm10 }
0x1df8   : > { %v8883_v18 = vmul.f32 %v8872_v25, %v17875_v47  ;;  %v8875_v41 = vmul.f32 %v13795_v27, %v8874_v45 }
0x1df9   : > { %v8912_v58 = vmul.f32 0.5, %v8911_v54 }
0x1dfa   : > { %v8921_v3 = vsel %vm8816_vm9, %v8845_v51, %v8883_v18  ;;  %v8876_v23 = vmul.f32 0.5, %v8875_v41 }
0x1dfb   : > { %v8923_v1 = vsel %vm822_vm1, %v8921_v3, %v8919_v60  ;;  %v8913_v24 = vsub.f32 1.5, %v8912_v58 }
0x1dfc   : > { %v8926_v28 = vsel %vm8925_vm12, %v8923_v1, %v17875_v47  ;;  %v8877_v46 = vsub.f32 1.5, %v8876_v23  ;;  %v8846_v47 = vmul.f32 %v8844_v7, %v17879_v43 }
0x1dfd   : > { %8929 = vst.msk [vmem:[%s799_s12] sm:$0xff] %vm8928_vm6, %v8926_v28  ;;  %v8914_v56 = vmul.f32 %v13793_v38, %v8913_v24 }
0x1dfe   : > { %v8878_v4 = vmul.f32 %v13795_v27, %v8877_v46 }
0x1dff   : > { %v8918_v10 = vsel %vm8917_vm4, %v13793_v38, %v8914_v56 }
0x1e00   : > { %v8920_v35 = vmul.f32 %v8918_v10, %v17879_v43  ;;  %v8882_v34 = vsel %vm8881_vm14, %v13795_v27, %v8878_v4 }
0x1e01   : > { %v8884_v50 = vmul.f32 %v8882_v34, %v17879_v43 }
0x1e03   : > { %v8922_v5 = vsel %vm8816_vm9, %v8846_v47, %v8884_v50 }
0x1e04   : > { %v8924_v11 = vsel %vm822_vm1, %v8922_v5, %v8920_v35 }
0x1e05   : > { %v8927_v12 = vsel %vm8925_vm12, %v8924_v11, %v17879_v43 }
0x1e06   : > { %8930 = vst.msk [vmem:[%s799_s12 + $0x8] sm:$0xff] %vm8928_vm6, %v8927_v12 }
0x1e07 PF: > { %s18091_s7 = sld [smem:[#allocation12_spill]] }
0x1e08   : > { %s18092_s5 = sld [smem:[#allocation9_spill]] }
0x1e0d   : > { %p13637_p5 = scmp.ge.s32.totalorder %s18091_s7, 2 }
0x1e0e   : > { %s8999_s28 = sand.u32 1, %s18092_s5  }
0x1e0f   : > { %p13631_p13 = pnand %p13637_p5, %p14076_p6  ;;  %s9000_s6 = scalar_lea.sflag [#allocation4], %s8999_s28 }
0x1e11   : > { %p13632_p0 = pneg %p13631_p13 }
0x1e13   : > { %13875 = dma.done.wait (%p13632_p0), %s9000_s6, 256  }
0x1e14   : > { %13877 = vsyncadd (%p13632_p0), %s9000_s6, 4294967040  ;;  %s9010_s14 = scalar_lea.sflag [#allocation6], %s8999_s28 }
0x1e15   : > { %13879 = dma.done.wait (%p13632_p0), %s9010_s14, 256  }
0x1e16   : > { %13881 = vsyncadd (%p13632_p0), %s9010_s14, 4294967040  ;;  %s18094_s30 = sld [smem:[#allocation14_spill]] }
0x1e17   : > { %s18095_s29 = sld [smem:[#allocation10_spill]] }
0x1e18   : > { %s18096_s2 = sld [smem:[#allocation11_spill]] }
0x1e19   : > { %s18097_s6 = sld [smem:[#allocation15_spill]] }
0x1e1c   : > { %p39_p1 = scmp.ge.s32.totalorder %s18094_s30, 4  }
0x1e1e   :  { %41 = sbr.rel (!%p39_p1) target bundleno = 27 (0x1b), region = 231 }
0x1e23   :  { %9016 = vsyncpa [#allocation4], 1 }
0x1e24   :  { %9018 = vsyncpa [#allocation4 + $0x1], 1 }
0x1e25   :  { %9019 = vsyncpa [#allocation6], 1 }
0x1e26   :  { %9021 = vsyncpa [#allocation6 + $0x1], 1 }

</bundles_post_ra>
